<compile_context>
chip_gen: v7x
topology: tpu7x:2x2x1
jax: 0.10.0
libtpu: 0.0.40
codegen_flags: <defaults>
</compile_context>

<pallas_src>
import functools

import jax
import jax.numpy as jnp
import numpy as np
from jax import lax
from jax.experimental import pallas as pl
from jax.experimental.pallas import tpu as pltpu

HIDDEN = 32            # hidden_nf
EDGE_FEAT = 2          # edge_feat_nf (1 computed distance + 1 external edge_attr)
N_LAYERS = 2
NORM_FACTOR = 100.0    # normalization_factor, aggregation_method='sum'
NORM_CONSTANT = 1.0
COORDS_RANGE = 15.0    # only used for tanh=True (not the default)
MAX_TILE_E = 512       # max edge rows per grid step (multiple of 8)


def _round_up(x, m):
    return ((x + m - 1) // m) * m


def _cdiv(a, b):
    return (a + b - 1) // b


# ----------------------------- Pallas kernels ------------------------------

def _gcl_fused_kernel(rc_ref, pk_ref, h_ref, nmask_ref,
                      w0hr_ref, w0hc_ref, w0ea_ref, b0_ref, w1_ref, b1_ref,
                      aw_ref, ab_ref,
                      nw0h_ref, nw0a_ref, nb0_ref, nw1_ref, nb1_ref,
                      hout_ref, pr_ref, pc_ref, acc_ref, *, norm_factor, fe):
    """One fused GCL layer for a (batch, edge-tile) grid step.

    First edge tile of a batch: pre-project h into edge-MLP space (pr/pc kept
    in VMEM scratch), zero the segment-sum accumulator.
    Every edge tile: one-hot MXU gather of the pre-projected node features,
    edge MLP, sigmoid attention (VPU+XLU), edge mask, segment-sum into scratch.
    Last edge tile: residual node MLP + node mask, single output write.
    """
    et = pl.program_id(1)

    @pl.when(et == 0)
    def _init():
        hb = h_ref[0]
        pr_ref[...] = (jnp.dot(hb, w0hr_ref[...], preferred_element_type=jnp.float32)
                       + b0_ref[...])                       # bias folded into pr
        pc_ref[...] = jnp.dot(hb, w0hc_ref[...], preferred_element_type=jnp.float32)
        acc_ref[...] = jnp.zeros_like(acc_ref)

    rc = rc_ref[0]                                          # (tile_e, 2) int32, batch-local
    pk = pk_ref[0]                                          # (tile_e, fe+4) float32
    tile_e = rc.shape[0]
    n_nodes = h_ref.shape[1]
    iota = lax.broadcasted_iota(jnp.int32, (tile_e, n_nodes), 1)
    sel_r = (rc[:, 0:1] == iota).astype(jnp.float32)        # (tile_e, N) one-hot
    sel_c = (rc[:, 1:2] == iota).astype(jnp.float32)

    # gather of pre-projected features (MXU); edge_attr uses zero-padded weight
    pre = (jnp.dot(sel_r, pr_ref[...], preferred_element_type=jnp.float32)
           + jnp.dot(sel_c, pc_ref[...], preferred_element_type=jnp.float32)
           + jnp.dot(pk, w0ea_ref[...], preferred_element_type=jnp.float32))
    m = jax.nn.silu(pre)
    m = jax.nn.silu(jnp.dot(m, w1_ref[...], preferred_element_type=jnp.float32)
                    + b1_ref[...])
    # attention head: VPU multiply + lane reduction instead of a 1-column matmul
    att = jax.nn.sigmoid(jnp.sum(m * aw_ref[...], axis=-1, keepdims=True) + ab_ref[...])
    emask = pk[:, fe:fe + 1]
    ef = m * (att * emask)                                  # padded tail edges have mask 0

    # segment-sum: sel_r^T @ ef -> (N, H), accumulated across edge tiles (MXU)
    acc_ref[...] += lax.dot_general(sel_r, ef, (((0,), (0,)), ((), ())),
                                    preferred_element_type=jnp.float32)

    @pl.when(et == pl.num_programs(1) - 1)
    def _node_phase():
        agg = acc_ref[...] * (1.0 / norm_factor)
        hv = h_ref[0]
        mm = jax.nn.silu(jnp.dot(hv, nw0h_ref[...], preferred_element_type=jnp.float32)
                         + jnp.dot(agg, nw0a_ref[...], preferred_element_type=jnp.float32)
                         + nb0_ref[...])
        out = hv + jnp.dot(mm, nw1_ref[...], preferred_element_type=jnp.float32) + nb1_ref[...]
        hout_ref[0] = out * nmask_ref[0]


def _equiv_fused_kernel(rc_ref, pk_ref, h_ref, x_ref, nmask_ref,
                        w0hr_ref, w0hc_ref, w0ea_ref, b0_ref, w1_ref, b1_ref,
                        wout_ref, xout_ref, pr_ref, pc_ref, acc_ref,
                        *, norm_factor, fe):
    """Fused EquivariantUpdate: coord MLP, coord_diff scaling, edge mask,
    coord segment-sum (VMEM accumulator) and final coord update (tanh=False)."""
    et = pl.program_id(1)

    @pl.when(et == 0)
    def _init():
        hb = h_ref[0]
        pr_ref[...] = (jnp.dot(hb, w0hr_ref[...], preferred_element_type=jnp.float32)
                       + b0_ref[...])
        pc_ref[...] = jnp.dot(hb, w0hc_ref[...], preferred_element_type=jnp.float32)
        acc_ref[...] = jnp.zeros_like(acc_ref)

    rc = rc_ref[0]
    pk = pk_ref[0]
    tile_e = rc.shape[0]
    n_nodes = h_ref.shape[1]
    iota = lax.broadcasted_iota(jnp.int32, (tile_e, n_nodes), 1)
    sel_r = (rc[:, 0:1] == iota).astype(jnp.float32)
    sel_c = (rc[:, 1:2] == iota).astype(jnp.float32)

    pre = (jnp.dot(sel_r, pr_ref[...], preferred_element_type=jnp.float32)
           + jnp.dot(sel_c, pc_ref[...], preferred_element_type=jnp.float32)
           + jnp.dot(pk, w0ea_ref[...], preferred_element_type=jnp.float32))
    m = jax.nn.silu(pre)
    m = jax.nn.silu(jnp.dot(m, w1_ref[...], preferred_element_type=jnp.float32)
                    + b1_ref[...])
    scal = jnp.sum(m * wout_ref[...], axis=-1, keepdims=True)   # Linear(H,1,bias=False)
    emask = pk[:, fe:fe + 1]
    cdiff = pk[:, fe + 1:fe + 4]
    # TODO(synk): tanh=True branch (coord_diff * tanh(mlp) * coords_range) not exercised
    #             by the default EquivariantBlock config (tanh=False).
    trans = cdiff * (scal * emask)                               # stays in VMEM

    acc_ref[...] += lax.dot_general(sel_r, trans, (((0,), (0,)), ((), ())),
                                    preferred_element_type=jnp.float32)

    @pl.when(et == pl.num_programs(1) - 1)
    def _coord_phase():
        xout_ref[0] = (x_ref[0] + acc_ref[...] * (1.0 / norm_factor)) * nmask_ref[0]


# ----------------------------- pallas_call wrappers -------------------------

def _gcl_layer_call(p, h_b, rc, packed, nmask, *, tile_e, norm_factor):
    B, N, H = h_b.shape
    PK = packed.shape[2]
    fe = PK - 4                                    # edge_attr width
    n_et = rc.shape[1] // tile_e
    edge_blk = lambda b, et: (b, et, 0)
    node_blk = lambda b, et: (b, 0, 0)
    rep2 = lambda b, et: (0, 0)
    ew0, nw0 = p['ew0'], p['nw0']
    w0ea_pad = jnp.zeros((PK, H), jnp.float32).at[:fe].set(ew0[2 * H:])
    kernel = functools.partial(_gcl_fused_kernel, norm_factor=norm_factor, fe=fe)
    return pl.pallas_call(
        kernel,
        out_shape=jax.ShapeDtypeStruct((B, N, H), jnp.float32),
        grid=(B, n_et),
        in_specs=[
            pl.BlockSpec((1, tile_e, 2), edge_blk),    # [row, col] (batch-local)
            pl.BlockSpec((1, tile_e, PK), edge_blk),   # [edge_attr, edge_mask, coord_diff]
            pl.BlockSpec((1, N, H), node_blk),         # h (resident across edge tiles)
            pl.BlockSpec((1, N, 1), node_blk),         # node_mask
            pl.BlockSpec((H, H), rep2),                # ew0[:H]   (h_row part)
            pl.BlockSpec((H, H), rep2),                # ew0[H:2H] (h_col part)
            pl.BlockSpec((PK, H), rep2),               # ew0[2H:]  zero-padded to packed lanes
            pl.BlockSpec((1, H), rep2),                # eb0
            pl.BlockSpec((H, H), rep2),                # ew1
            pl.BlockSpec((1, H), rep2),                # eb1
            pl.BlockSpec((1, H), rep2),                # attention weight (row vector)
            pl.BlockSpec((1, 1), rep2),                # attention bias
            pl.BlockSpec((H, H), rep2),                # nw0[:H]
            pl.BlockSpec((H, H), rep2),                # nw0[H:]
            pl.BlockSpec((1, H), rep2),                # nb0
            pl.BlockSpec((H, H), rep2),                # nw1
            pl.BlockSpec((1, H), rep2),                # nb1
        ],
        out_specs=pl.BlockSpec((1, N, H), node_blk),
        scratch_shapes=[pltpu.VMEM((N, H), jnp.float32),   # pr = h@W_r + b0
                        pltpu.VMEM((N, H), jnp.float32),   # pc = h@W_c
                        pltpu.VMEM((N, H), jnp.float32)],  # segment-sum accumulator
        compiler_params=pltpu.CompilerParams(
            dimension_semantics=("parallel", "arbitrary")),
        input_output_aliases={2: 0},                   # h updated in place
    )(rc, packed, h_b, nmask,
      ew0[:H], ew0[H:2 * H], w0ea_pad, p['eb0'], p['ew1'], p['eb1'],
      p['aw'].reshape(1, H), p['ab'],
      nw0[:H], nw0[H:], p['nb0'], p['nw1'], p['nb1'])


def _equiv_call(p, h_b, x_b, rc, packed, nmask, *, tile_e, norm_factor):
    B, N, H = h_b.shape
    PK = packed.shape[2]
    fe = PK - 4
    n_et = rc.shape[1] // tile_e
    edge_blk = lambda b, et: (b, et, 0)
    node_blk = lambda b, et: (b, 0, 0)
    rep2 = lambda b, et: (0, 0)
    cw0 = p['cw0']
    w0ea_pad = jnp.zeros((PK, H), jnp.float32).at[:fe].set(cw0[2 * H:])
    kernel = functools.partial(_equiv_fused_kernel, norm_factor=norm_factor, fe=fe)
    return pl.pallas_call(
        kernel,
        out_shape=jax.ShapeDtypeStruct((B, N, 3), jnp.float32),
        grid=(B, n_et),
        in_specs=[
            pl.BlockSpec((1, tile_e, 2), edge_blk),    # [row, col]
            pl.BlockSpec((1, tile_e, PK), edge_blk),   # [edge_attr, edge_mask, coord_diff]
            pl.BlockSpec((1, N, H), node_blk),         # h
            pl.BlockSpec((1, N, 3), node_blk),         # x
            pl.BlockSpec((1, N, 1), node_blk),         # node_mask
            pl.BlockSpec((H, H), rep2),                # cw0[:H]
            pl.BlockSpec((H, H), rep2),                # cw0[H:2H]
            pl.BlockSpec((PK, H), rep2),               # cw0[2H:] zero-padded
            pl.BlockSpec((1, H), rep2),                # cb0
            pl.BlockSpec((H, H), rep2),                # cw1
            pl.BlockSpec((1, H), rep2),                # cb1
            pl.BlockSpec((1, H), rep2),                # cwout (row vector)
        ],
        out_specs=pl.BlockSpec((1, N, 3), node_blk),
        scratch_shapes=[pltpu.VMEM((N, H), jnp.float32),
                        pltpu.VMEM((N, H), jnp.float32),
                        pltpu.VMEM((N, 3), jnp.float32)],
        compiler_params=pltpu.CompilerParams(
            dimension_semantics=("parallel", "arbitrary")),
        input_output_aliases={3: 0},                   # x updated in place
    )(rc, packed, h_b, x_b, nmask,
      cw0[:H], cw0[H:2 * H], w0ea_pad, p['cb0'], p['cw1'], p['cb1'],
      p['cwout'].reshape(1, H))


# ----------------------------- JAX glue ------------------------------------

def coord2diff_jax(x_frac, row, col, lattice, norm_constant):
    """Periodic-boundary distances; per-batch 3x3 lattice algebra (JAX glue)."""
    B = lattice.shape[0]
    xf = x_frac.reshape(B, -1, 3)
    N = xf.shape[1]
    E = row.shape[0] // B
    row_b = row.reshape(B, E) % N
    col_b = col.reshape(B, E) % N

    def per_batch(xfb, r, c, L):
        x_real = xfb @ L.T
        cd = x_real[r] - x_real[c]
        invL = jnp.linalg.inv(L)
        fd = cd @ invL.T
        fd = fd - jnp.round(fd)
        cd = fd @ L.T
        radial = jnp.sum(cd ** 2, axis=1, keepdims=True)
        norm = jnp.sqrt(radial + 1e-8)
        cd = cd / (norm + norm_constant)
        return radial, cd

    radial, cd = jax.vmap(per_batch)(xf, row_b, col_b, lattice)
    return radial.reshape(B * E, 1), cd.reshape(B * E, 3)


def _init_linear(key, fan_in, fan_out, scale=None):
    if scale is None:
        scale = 1.0 / np.sqrt(fan_in)
    kw, kb = jax.random.split(key)
    w = jax.random.uniform(kw, (fan_in, fan_out), jnp.float32, -scale, scale)
    b = jax.random.uniform(kb, (1, fan_out), jnp.float32, -scale, scale)
    return w, b


def init_params(key, hidden=HIDDEN, edge_feat=EDGE_FEAT, n_layers=N_LAYERS):
    params = {}
    in_edge = 2 * hidden + edge_feat
    for i in range(n_layers):
        key, k1, k2, k3, k4, k5 = jax.random.split(key, 6)
        ew0, eb0 = _init_linear(k1, in_edge, hidden)
        ew1, eb1 = _init_linear(k2, hidden, hidden)
        aw, ab = _init_linear(k3, hidden, 1)
        nw0, nb0 = _init_linear(k4, 2 * hidden, hidden)
        nw1, nb1 = _init_linear(k5, hidden, hidden)
        params[f'gcl_{i}'] = dict(ew0=ew0, eb0=eb0, ew1=ew1, eb1=eb1, aw=aw, ab=ab,
                                  nw0=nw0, nb0=nb0, nw1=nw1, nb1=nb1)
    key, k1, k2, k3 = jax.random.split(key, 4)
    cw0, cb0 = _init_linear(k1, in_edge, hidden)
    cw1, cb1 = _init_linear(k2, hidden, hidden)
    xav = 0.001 * np.sqrt(6.0 / (hidden + 1))   # xavier_uniform_(gain=0.001), no bias
    cwout = jax.random.uniform(k3, (hidden, 1), jnp.float32, -xav, xav)
    params['equiv'] = dict(cw0=cw0, cb0=cb0, cw1=cw1, cb1=cb1, cwout=cwout)
    return params


@jax.jit
def equivariant_block_forward(params, h, x, row, col, lattice,
                              edge_attr_ext, node_mask, edge_mask):
    B = lattice.shape[0]
    BN, H = h.shape
    N = BN // B
    BE = row.shape[0]
    E = BE // B

    distances, coord_diff = coord2diff_jax(x, row, col, lattice, NORM_CONSTANT)
    edge_attr = jnp.concatenate([distances, edge_attr_ext], axis=1)   # (BE, F_e)
    F_e = edge_attr.shape[1]
    PK = F_e + 4                      # [edge_attr | edge_mask | coord_diff(3)]

    # Balanced edge tiling: minimize tail padding instead of padding to a fixed
    # tile.  Padded edges carry row=col=0 and edge_mask=0 (contribute nothing).
    n_t = _cdiv(E, MAX_TILE_E)
    tile_e = _round_up(_cdiv(E, n_t), 8)
    E_pad = tile_e * n_t

    def to_batched_edges(a, feat):
        a = a.reshape(B, E, feat)
        if E_pad != E:
            a = jnp.pad(a, ((0, 0), (0, E_pad - E), (0, 0)))
        return a

    packed = to_batched_edges(
        jnp.concatenate([edge_attr, edge_mask, coord_diff], axis=1).astype(jnp.float32), PK)
    rc = to_batched_edges(
        jnp.stack([(row % N).astype(jnp.int32), (col % N).astype(jnp.int32)], axis=1), 2)

    h_b = h.reshape(B, N, H)
    x_b = x.reshape(B, N, 3)
    nmask = node_mask.reshape(B, N, 1)

    for i in range(N_LAYERS):
        h_b = _gcl_layer_call(params[f'gcl_{i}'], h_b, rc, packed, nmask,
                              tile_e=tile_e, norm_factor=NORM_FACTOR)

    x_b = _equiv_call(params['equiv'], h_b, x_b, rc, packed, nmask,
                      tile_e=tile_e, norm_factor=NORM_FACTOR)

    h_out = (h_b * nmask).reshape(BN, H)   # final node-mask multiply in EquivariantBlock
    x_out = x_b.reshape(BN, 3)
    return h_out, x_out


def reference_forward(params, h, x, row, col, lattice, edge_attr_ext, node_mask, edge_mask):
    """Pure-JAX reference mirroring the PyTorch module (no Pallas)."""
    distances, coord_diff = coord2diff_jax(x, row, col, lattice, NORM_CONSTANT)
    edge_attr = jnp.concatenate([distances, edge_attr_ext], axis=1)
    BN = h.shape[0]

    def segsum(data):
        return jnp.zeros((BN, data.shape[1]), data.dtype).at[row].add(data) / NORM_FACTOR

    for i in range(N_LAYERS):
        p = params[f'gcl_{i}']
        ein = jnp.concatenate([h[row], h[col], edge_attr], axis=1)
        m = jax.nn.silu(ein @ p['ew0'] + p['eb0'])
        m = jax.nn.silu(m @ p['ew1'] + p['eb1'])
        att = jax.nn.sigmoid(m @ p['aw'] + p['ab'])
        ef = m * att * edge_mask
        agg = segsum(ef)
        mm = jax.nn.silu(jnp.concatenate([h, agg], axis=1) @ p['nw0'] + p['nb0'])
        h = (h + (mm @ p['nw1'] + p['nb1'])) * node_mask
    pe = params['equiv']
    ein = jnp.concatenate([h[row], h[col], edge_attr], axis=1)
    m = jax.nn.silu(ein @ pe['cw0'] + pe['cb0'])
    m = jax.nn.silu(m @ pe['cw1'] + pe['cb1'])
    trans = coord_diff * (m @ pe['cwout']) * edge_mask
    x_new = (x + segsum(trans)) * node_mask
    h = h * node_mask
    return h, x_new


if __name__ == "__main__":
    key = jax.random.PRNGKey(0)
    B, N, H = 2, 24, HIDDEN      # E = 576 per batch -> exercises multi-tile path
    E = N * N
    BN, BE = B * N, B * E

    kp, kh, kx, kl, ke, knm = jax.random.split(key, 6)
    params = init_params(kp)

    h0 = jax.random.normal(kh, (BN, H), jnp.float32)
    x0 = jax.random.uniform(kx, (BN, 3), jnp.float32)                 # fractional coords
    lattice = 5.0 * jnp.eye(3, dtype=jnp.float32)[None] + \
        0.2 * jax.random.normal(kl, (B, 3, 3), jnp.float32)
    edge_attr_ext = jax.random.normal(ke, (BE, 1), jnp.float32)

    # fully-connected intra-batch edges with GLOBAL node indices, grouped by batch
    nodes = np.arange(N)
    rr, cc = np.meshgrid(nodes, nodes, indexing='ij')
    row = jnp.asarray(np.concatenate([rr.reshape(-1) + b * N for b in range(B)]).astype(np.int32))
    col = jnp.asarray(np.concatenate([cc.reshape(-1) + b * N for b in range(B)]).astype(np.int32))

    node_mask = (jax.random.uniform(knm, (BN, 1)) > 0.2).astype(jnp.float32)
    edge_mask = (node_mask[row, 0] * node_mask[col, 0]).reshape(BE, 1)

    h_out, x_out = equivariant_block_forward(params, h0, x0, row, col, lattice,
                                             edge_attr_ext, node_mask, edge_mask)
    jax.block_until_ready((h_out, x_out))

    h_ref, x_ref = reference_forward(params, h0, x0, row, col, lattice,
                                     edge_attr_ext, node_mask, edge_mask)
    np.testing.assert_allclose(np.asarray(h_out), np.asarray(h_ref), rtol=2e-3, atol=2e-3)
    np.testing.assert_allclose(np.asarray(x_out), np.asarray(x_ref), rtol=2e-3, atol=2e-3)
    print("KERNEL_OK")
</pallas_src>

<mosaic_0001>
module attributes {stable_mosaic.version = 11 : i64} {
  func.func @_gcl_fused_kernel(%arg0: i32, %arg1: i32, %arg2: memref<1x288x2xi32, #tpu.memory_space<vmem>>, %arg3: memref<1x288x6xf32, #tpu.memory_space<vmem>>, %arg4: memref<1x24x32xf32, #tpu.memory_space<vmem>>, %arg5: memref<1x24x1xf32, #tpu.memory_space<vmem>>, %arg6: memref<32x32xf32, #tpu.memory_space<vmem>>, %arg7: memref<32x32xf32, #tpu.memory_space<vmem>>, %arg8: memref<6x32xf32, #tpu.memory_space<vmem>>, %arg9: memref<1x32xf32, #tpu.memory_space<vmem>>, %arg10: memref<32x32xf32, #tpu.memory_space<vmem>>, %arg11: memref<1x32xf32, #tpu.memory_space<vmem>>, %arg12: memref<1x32xf32, #tpu.memory_space<vmem>>, %arg13: memref<1x1xf32, #tpu.memory_space<vmem>>, %arg14: memref<32x32xf32, #tpu.memory_space<vmem>>, %arg15: memref<32x32xf32, #tpu.memory_space<vmem>>, %arg16: memref<1x32xf32, #tpu.memory_space<vmem>>, %arg17: memref<32x32xf32, #tpu.memory_space<vmem>>, %arg18: memref<1x32xf32, #tpu.memory_space<vmem>>, %arg19: memref<1x24x32xf32, #tpu.memory_space<vmem>>, %arg20: memref<24x32xf32, #tpu.memory_space<vmem>>, %arg21: memref<24x32xf32, #tpu.memory_space<vmem>>, %arg22: memref<24x32xf32, #tpu.memory_space<vmem>>) attributes {dimension_semantics = [#tpu.dimension_semantics<parallel>, #tpu.dimension_semantics<arbitrary>], iteration_bounds = array<i64: 2, 2>, scalar_prefetch = 0 : i64, scratch_operands = 3 : i64, tpu.core_type = #tpu.core_type<tc>, window_params = [{transform_indices = @transform_0, window_bounds = array<i64: 1, 288, 2>}, {transform_indices = @transform_1, window_bounds = array<i64: 1, 288, 6>}, {transform_indices = @transform_2, window_bounds = array<i64: 1, 24, 32>}, {transform_indices = @transform_3, window_bounds = array<i64: 1, 24, 1>}, {pipeline_mode = #tpu.pipeline_mode<synchronous>, transform_indices = @transform_4, window_bounds = array<i64: 32, 32>}, {pipeline_mode = #tpu.pipeline_mode<synchronous>, transform_indices = @transform_5, window_bounds = array<i64: 32, 32>}, {pipeline_mode = #tpu.pipeline_mode<synchronous>, transform_indices = @transform_6, window_bounds = array<i64: 6, 32>}, {pipeline_mode = #tpu.pipeline_mode<synchronous>, transform_indices = @transform_7, window_bounds = array<i64: 1, 32>}, {pipeline_mode = #tpu.pipeline_mode<synchronous>, transform_indices = @transform_8, window_bounds = array<i64: 32, 32>}, {pipeline_mode = #tpu.pipeline_mode<synchronous>, transform_indices = @transform_9, window_bounds = array<i64: 1, 32>}, {pipeline_mode = #tpu.pipeline_mode<synchronous>, transform_indices = @transform_10, window_bounds = array<i64: 1, 32>}, {pipeline_mode = #tpu.pipeline_mode<synchronous>, transform_indices = @transform_11, window_bounds = array<i64: 1, 1>}, {pipeline_mode = #tpu.pipeline_mode<synchronous>, transform_indices = @transform_12, window_bounds = array<i64: 32, 32>}, {pipeline_mode = #tpu.pipeline_mode<synchronous>, transform_indices = @transform_13, window_bounds = array<i64: 32, 32>}, {pipeline_mode = #tpu.pipeline_mode<synchronous>, transform_indices = @transform_14, window_bounds = array<i64: 1, 32>}, {pipeline_mode = #tpu.pipeline_mode<synchronous>, transform_indices = @transform_15, window_bounds = array<i64: 32, 32>}, {pipeline_mode = #tpu.pipeline_mode<synchronous>, transform_indices = @transform_16, window_bounds = array<i64: 1, 32>}, {transform_indices = @transform_17, window_bounds = array<i64: 1, 24, 32>}]} {
    %c0_i32 = arith.constant 0 : i32
    %0 = arith.cmpi eq, %arg1, %c0_i32 : i32
    %1 = arith.extui %0 : i1 to i32
    %c0_i32_0 = arith.constant 0 : i32
    %2 = arith.cmpi ne, %1, %c0_i32_0 : i32
    scf.if %2 {
      %c0_33 = arith.constant 0 : index
      %c0_34 = arith.constant 0 : index
      %c0_35 = arith.constant 0 : index
      %67 = vector.load %arg4[%c0_33, %c0_34, %c0_35] : memref<1x24x32xf32, #tpu.memory_space<vmem>>, vector<1x24x32xf32>
      %68 = vector.shape_cast %67 : vector<1x24x32xf32> to vector<24x32xf32>
      %c0_36 = arith.constant 0 : index
      %c0_37 = arith.constant 0 : index
      %69 = vector.load %arg6[%c0_36, %c0_37] : memref<32x32xf32, #tpu.memory_space<vmem>>, vector<32x32xf32>
      %cst_38 = arith.constant dense<0.000000e+00> : vector<24x32xf32>
      %70 = tpu.matmul %68, %69, %cst_38 {dimension_numbers = #tpu.dot_dimension_numbers<[1], [0], [0], [1], [0, 0, 1, 1], [], []>} : vector<24x32xf32>, vector<32x32xf32>, vector<24x32xf32> -> vector<24x32xf32>
      %c0_39 = arith.constant 0 : index
      %c0_40 = arith.constant 0 : index
      %71 = vector.load %arg9[%c0_39, %c0_40] : memref<1x32xf32, #tpu.memory_space<vmem>>, vector<1x32xf32>
      %72 = vector.broadcast %71 : vector<1x32xf32> to vector<24x32xf32>
      %73 = arith.addf %70, %72 : vector<24x32xf32>
      %c0_41 = arith.constant 0 : index
      %c0_42 = arith.constant 0 : index
      %74 = vector.load %arg20[%c0_41, %c0_42] : memref<24x32xf32, #tpu.memory_space<vmem>>, vector<24x32xf32>
      tpu.vector_store %arg20[%c0_41, %c0_42], %73 {strides = array<i32>} : memref<24x32xf32, #tpu.memory_space<vmem>>, vector<24x32xf32>,
      %c0_43 = arith.constant 0 : index
      %c0_44 = arith.constant 0 : index
      %75 = vector.load %arg7[%c0_43, %c0_44] : memref<32x32xf32, #tpu.memory_space<vmem>>, vector<32x32xf32>
      %cst_45 = arith.constant dense<0.000000e+00> : vector<24x32xf32>
      %76 = tpu.matmul %68, %75, %cst_45 {dimension_numbers = #tpu.dot_dimension_numbers<[1], [0], [0], [1], [0, 0, 1, 1], [], []>} : vector<24x32xf32>, vector<32x32xf32>, vector<24x32xf32> -> vector<24x32xf32>
      %c0_46 = arith.constant 0 : index
      %c0_47 = arith.constant 0 : index
      %77 = vector.load %arg21[%c0_46, %c0_47] : memref<24x32xf32, #tpu.memory_space<vmem>>, vector<24x32xf32>
      tpu.vector_store %arg21[%c0_46, %c0_47], %76 {strides = array<i32>} : memref<24x32xf32, #tpu.memory_space<vmem>>, vector<24x32xf32>,
      %cst_48 = arith.constant 0.000000e+00 : f32
      %78 = vector.broadcast %cst_48 : f32 to vector<24x32xf32>
      %c0_49 = arith.constant 0 : index
      %c0_50 = arith.constant 0 : index
      %79 = vector.load %arg22[%c0_49, %c0_50] : memref<24x32xf32, #tpu.memory_space<vmem>>, vector<24x32xf32>
      tpu.vector_store %arg22[%c0_49, %c0_50], %78 {strides = array<i32>} : memref<24x32xf32, #tpu.memory_space<vmem>>, vector<24x32xf32>,
    } else {
    }
    %c0 = arith.constant 0 : index
    %c0_1 = arith.constant 0 : index
    %c0_2 = arith.constant 0 : index
    %3 = vector.load %arg2[%c0, %c0_1, %c0_2] : memref<1x288x2xi32, #tpu.memory_space<vmem>>, vector<1x288x2xi32>
    %4 = vector.shape_cast %3 : vector<1x288x2xi32> to vector<288x2xi32>
    %c0_3 = arith.constant 0 : index
    %c0_4 = arith.constant 0 : index
    %c0_5 = arith.constant 0 : index
    %5 = vector.load %arg3[%c0_3, %c0_4, %c0_5] : memref<1x288x6xf32, #tpu.memory_space<vmem>>, vector<1x288x6xf32>
    %6 = vector.shape_cast %5 : vector<1x288x6xf32> to vector<288x6xf32>
    %7 = tpu.iota {dimensions = array<i32: 1>} : vector<288x24xi32>
    %8 = vector.extract_strided_slice %4 {offsets = [0, 0], sizes = [288, 1], strides = [1, 1]} : vector<288x2xi32> to vector<288x1xi32>
    %9 = vector.broadcast %8 : vector<288x1xi32> to vector<288x24xi32>
    %10 = arith.cmpi eq, %9, %7 : vector<288x24xi32>
    %11 = arith.extui %10 : vector<288x24xi1> to vector<288x24xi32>
    %12 = arith.sitofp %11 : vector<288x24xi32> to vector<288x24xf32>
    %13 = vector.extract_strided_slice %4 {offsets = [0, 1], sizes = [288, 1], strides = [1, 1]} : vector<288x2xi32> to vector<288x1xi32>
    %14 = vector.broadcast %13 : vector<288x1xi32> to vector<288x24xi32>
    %15 = arith.cmpi eq, %14, %7 : vector<288x24xi32>
    %16 = arith.extui %15 : vector<288x24xi1> to vector<288x24xi32>
    %17 = arith.sitofp %16 : vector<288x24xi32> to vector<288x24xf32>
    %c0_6 = arith.constant 0 : index
    %c0_7 = arith.constant 0 : index
    %18 = vector.load %arg20[%c0_6, %c0_7] : memref<24x32xf32, #tpu.memory_space<vmem>>, vector<24x32xf32>
    %cst = arith.constant dense<0.000000e+00> : vector<288x32xf32>
    %19 = tpu.matmul %12, %18, %cst {dimension_numbers = #tpu.dot_dimension_numbers<[1], [0], [0], [1], [0, 0, 1, 1], [], []>} : vector<288x24xf32>, vector<24x32xf32>, vector<288x32xf32> -> vector<288x32xf32>
    %c0_8 = arith.constant 0 : index
    %c0_9 = arith.constant 0 : index
    %20 = vector.load %arg21[%c0_8, %c0_9] : memref<24x32xf32, #tpu.memory_space<vmem>>, vector<24x32xf32>
    %cst_10 = arith.constant dense<0.000000e+00> : vector<288x32xf32>
    %21 = tpu.matmul %17, %20, %cst_10 {dimension_numbers = #tpu.dot_dimension_numbers<[1], [0], [0], [1], [0, 0, 1, 1], [], []>} : vector<288x24xf32>, vector<24x32xf32>, vector<288x32xf32> -> vector<288x32xf32>
    %22 = arith.addf %19, %21 : vector<288x32xf32>
    %c0_11 = arith.constant 0 : index
    %c0_12 = arith.constant 0 : index
    %23 = vector.load %arg8[%c0_11, %c0_12] : memref<6x32xf32, #tpu.memory_space<vmem>>, vector<6x32xf32>
    %cst_13 = arith.constant dense<0.000000e+00> : vector<288x32xf32>
    %24 = tpu.matmul %6, %23, %cst_13 {dimension_numbers = #tpu.dot_dimension_numbers<[1], [0], [0], [1], [0, 0, 1, 1], [], []>} : vector<288x6xf32>, vector<6x32xf32>, vector<288x32xf32> -> vector<288x32xf32>
    %25 = arith.addf %22, %24 : vector<288x32xf32>
    %26 = arith.negf %25 : vector<288x32xf32>
    %27 = math.exp %26 : vector<288x32xf32>
    %cst_14 = arith.constant 1.000000e+00 : f32
    %28 = vector.broadcast %cst_14 : f32 to vector<288x32xf32>
    %29 = arith.addf %28, %27 : vector<288x32xf32>
    %30 = arith.divf %28, %29 : vector<288x32xf32>
    %31 = arith.mulf %25, %30 : vector<288x32xf32>
    %c0_15 = arith.constant 0 : index
    %c0_16 = arith.constant 0 : index
    %32 = vector.load %arg10[%c0_15, %c0_16] : memref<32x32xf32, #tpu.memory_space<vmem>>, vector<32x32xf32>
    %cst_17 = arith.constant dense<0.000000e+00> : vector<288x32xf32>
    %33 = tpu.matmul %31, %32, %cst_17 {dimension_numbers = #tpu.dot_dimension_numbers<[1], [0], [0], [1], [0, 0, 1, 1], [], []>} : vector<288x32xf32>, vector<32x32xf32>, vector<288x32xf32> -> vector<288x32xf32>
    %c0_18 = arith.constant 0 : index
    %c0_19 = arith.constant 0 : index
    %34 = vector.load %arg11[%c0_18, %c0_19] : memref<1x32xf32, #tpu.memory_space<vmem>>, vector<1x32xf32>
    %35 = vector.broadcast %34 : vector<1x32xf32> to vector<288x32xf32>
    %36 = arith.addf %33, %35 : vector<288x32xf32>
    %37 = arith.negf %36 : vector<288x32xf32>
    %38 = math.exp %37 : vector<288x32xf32>
    %cst_20 = arith.constant 1.000000e+00 : f32
    %39 = vector.broadcast %cst_20 : f32 to vector<288x32xf32>
    %40 = arith.addf %39, %38 : vector<288x32xf32>
    %41 = arith.divf %39, %40 : vector<288x32xf32>
    %42 = arith.mulf %36, %41 : vector<288x32xf32>
    %c0_21 = arith.constant 0 : index
    %c0_22 = arith.constant 0 : index
    %43 = vector.load %arg12[%c0_21, %c0_22] : memref<1x32xf32, #tpu.memory_space<vmem>>, vector<1x32xf32>
    %44 = vector.broadcast %43 : vector<1x32xf32> to vector<288x32xf32>
    %45 = arith.mulf %42, %44 : vector<288x32xf32>
    %cst_23 = arith.constant dense<0.000000e+00> : vector<288xf32>
    %46 = vector.multi_reduction <add>, %45, %cst_23 [1] : vector<288x32xf32> to vector<288xf32>
    %47 = vector.shape_cast %46 : vector<288xf32> to vector<288x1xf32>
    %c0_24 = arith.constant 0 : index
    %c0_25 = arith.constant 0 : index
    %48 = vector.load %arg13[%c0_24, %c0_25] : memref<1x1xf32, #tpu.memory_space<vmem>>, vector<1x1xf32>
    %49 = vector.broadcast %48 : vector<1x1xf32> to vector<288x1xf32>
    %50 = arith.addf %47, %49 : vector<288x1xf32>
    %51 = arith.negf %50 : vector<288x1xf32>
    %52 = math.exp %51 : vector<288x1xf32>
    %cst_26 = arith.constant 1.000000e+00 : f32
    %53 = vector.broadcast %cst_26 : f32 to vector<288x1xf32>
    %54 = arith.addf %53, %52 : vector<288x1xf32>
    %55 = arith.divf %53, %54 : vector<288x1xf32>
    %56 = vector.extract_strided_slice %6 {offsets = [0, 2], sizes = [288, 1], strides = [1, 1]} : vector<288x6xf32> to vector<288x1xf32>
    %57 = arith.mulf %55, %56 : vector<288x1xf32>
    %58 = vector.broadcast %57 : vector<288x1xf32> to vector<288x32xf32>
    %59 = arith.mulf %42, %58 : vector<288x32xf32>
    %c0_27 = arith.constant 0 : index
    %c0_28 = arith.constant 0 : index
    %60 = vector.load %arg22[%c0_27, %c0_28] : memref<24x32xf32, #tpu.memory_space<vmem>>, vector<24x32xf32>
    %cst_29 = arith.constant dense<0.000000e+00> : vector<24x32xf32>
    %61 = tpu.matmul %12, %59, %cst_29 {dimension_numbers = #tpu.dot_dimension_numbers<[0], [0], [1], [1], [0, 1, 1, 1], [], []>} : vector<288x24xf32>, vector<288x32xf32>, vector<24x32xf32> -> vector<24x32xf32>
    %62 = arith.addf %60, %61 : vector<24x32xf32>
    %c0_30 = arith.constant 0 : index
    %c0_31 = arith.constant 0 : index
    %63 = vector.load %arg22[%c0_30, %c0_31] : memref<24x32xf32, #tpu.memory_space<vmem>>, vector<24x32xf32>
    tpu.vector_store %arg22[%c0_30, %c0_31], %62 {strides = array<i32>} : memref<24x32xf32, #tpu.memory_space<vmem>>, vector<24x32xf32>,
    %c1_i32 = arith.constant 1 : i32
    %64 = arith.cmpi eq, %arg1, %c1_i32 : i32
    %65 = arith.extui %64 : i1 to i32
    %c0_i32_32 = arith.constant 0 : i32
    %66 = arith.cmpi ne, %65, %c0_i32_32 : i32
    scf.if %66 {
      %c0_33 = arith.constant 0 : index
      %c0_34 = arith.constant 0 : index
      %67 = vector.load %arg22[%c0_33, %c0_34] : memref<24x32xf32, #tpu.memory_space<vmem>>, vector<24x32xf32>
      %cst_35 = arith.constant 0.00999999977 : f32
      %68 = vector.broadcast %cst_35 : f32 to vector<24x32xf32>
      %69 = arith.mulf %67, %68 : vector<24x32xf32>
      %c0_36 = arith.constant 0 : index
      %c0_37 = arith.constant 0 : index
      %c0_38 = arith.constant 0 : index
      %70 = vector.load %arg4[%c0_36, %c0_37, %c0_38] : memref<1x24x32xf32, #tpu.memory_space<vmem>>, vector<1x24x32xf32>
      %71 = vector.shape_cast %70 : vector<1x24x32xf32> to vector<24x32xf32>
      %c0_39 = arith.constant 0 : index
      %c0_40 = arith.constant 0 : index
      %72 = vector.load %arg14[%c0_39, %c0_40] : memref<32x32xf32, #tpu.memory_space<vmem>>, vector<32x32xf32>
      %cst_41 = arith.constant dense<0.000000e+00> : vector<24x32xf32>
      %73 = tpu.matmul %71, %72, %cst_41 {dimension_numbers = #tpu.dot_dimension_numbers<[1], [0], [0], [1], [0, 0, 1, 1], [], []>} : vector<24x32xf32>, vector<32x32xf32>, vector<24x32xf32> -> vector<24x32xf32>
      %c0_42 = arith.constant 0 : index
      %c0_43 = arith.constant 0 : index
      %74 = vector.load %arg15[%c0_42, %c0_43] : memref<32x32xf32, #tpu.memory_space<vmem>>, vector<32x32xf32>
      %cst_44 = arith.constant dense<0.000000e+00> : vector<24x32xf32>
      %75 = tpu.matmul %69, %74, %cst_44 {dimension_numbers = #tpu.dot_dimension_numbers<[1], [0], [0], [1], [0, 0, 1, 1], [], []>} : vector<24x32xf32>, vector<32x32xf32>, vector<24x32xf32> -> vector<24x32xf32>
      %76 = arith.addf %73, %75 : vector<24x32xf32>
      %c0_45 = arith.constant 0 : index
      %c0_46 = arith.constant 0 : index
      %77 = vector.load %arg16[%c0_45, %c0_46] : memref<1x32xf32, #tpu.memory_space<vmem>>, vector<1x32xf32>
      %78 = vector.broadcast %77 : vector<1x32xf32> to vector<24x32xf32>
      %79 = arith.addf %76, %78 : vector<24x32xf32>
      %80 = arith.negf %79 : vector<24x32xf32>
      %81 = math.exp %80 : vector<24x32xf32>
      %cst_47 = arith.constant 1.000000e+00 : f32
      %82 = vector.broadcast %cst_47 : f32 to vector<24x32xf32>
      %83 = arith.addf %82, %81 : vector<24x32xf32>
      %84 = arith.divf %82, %83 : vector<24x32xf32>
      %85 = arith.mulf %79, %84 : vector<24x32xf32>
      %c0_48 = arith.constant 0 : index
      %c0_49 = arith.constant 0 : index
      %86 = vector.load %arg17[%c0_48, %c0_49] : memref<32x32xf32, #tpu.memory_space<vmem>>, vector<32x32xf32>
      %cst_50 = arith.constant dense<0.000000e+00> : vector<24x32xf32>
      %87 = tpu.matmul %85, %86, %cst_50 {dimension_numbers = #tpu.dot_dimension_numbers<[1], [0], [0], [1], [0, 0, 1, 1], [], []>} : vector<24x32xf32>, vector<32x32xf32>, vector<24x32xf32> -> vector<24x32xf32>
      %88 = arith.addf %71, %87 : vector<24x32xf32>
      %c0_51 = arith.constant 0 : index
      %c0_52 = arith.constant 0 : index
      %89 = vector.load %arg18[%c0_51, %c0_52] : memref<1x32xf32, #tpu.memory_space<vmem>>, vector<1x32xf32>
      %90 = vector.broadcast %89 : vector<1x32xf32> to vector<24x32xf32>
      %91 = arith.addf %88, %90 : vector<24x32xf32>
      %c0_53 = arith.constant 0 : index
      %c0_54 = arith.constant 0 : index
      %c0_55 = arith.constant 0 : index
      %92 = vector.load %arg5[%c0_53, %c0_54, %c0_55] : memref<1x24x1xf32, #tpu.memory_space<vmem>>, vector<1x24x1xf32>
      %93 = vector.shape_cast %92 : vector<1x24x1xf32> to vector<24x1xf32>
      %94 = vector.broadcast %93 : vector<24x1xf32> to vector<24x32xf32>
      %95 = arith.mulf %91, %94 : vector<24x32xf32>
      %c0_56 = arith.constant 0 : index
      %c0_57 = arith.constant 0 : index
      %c0_58 = arith.constant 0 : index
      %96 = vector.load %arg19[%c0_56, %c0_57, %c0_58] : memref<1x24x32xf32, #tpu.memory_space<vmem>>, vector<1x24x32xf32>
      %97 = vector.shape_cast %96 : vector<1x24x32xf32> to vector<24x32xf32>
      %98 = vector.shape_cast %95 : vector<24x32xf32> to vector<1x24x32xf32>
      tpu.vector_store %arg19[%c0_56, %c0_57, %c0_58], %98 {strides = array<i32>} : memref<1x24x32xf32, #tpu.memory_space<vmem>>, vector<1x24x32xf32>,
    } else {
    }
    return
  }
  func.func @transform_0(%arg0: i32, %arg1: i32) -> (i32, i32, i32) {
    %c0_i32 = arith.constant 0 : i32
    %c0_i32_0 = arith.constant 0 : i32
    return %arg0, %arg1, %c0_i32 : i32, i32, i32
  }
  func.func @transform_1(%arg0: i32, %arg1: i32) -> (i32, i32, i32) {
    %c0_i32 = arith.constant 0 : i32
    %c0_i32_0 = arith.constant 0 : i32
    return %arg0, %arg1, %c0_i32 : i32, i32, i32
  }
  func.func @transform_2(%arg0: i32, %arg1: i32) -> (i32, i32, i32) {
    %c0_i32 = arith.constant 0 : i32
    %c0_i32_0 = arith.constant 0 : i32
    %c0_i32_1 = arith.constant 0 : i32
    return %arg0, %c0_i32, %c0_i32_0 : i32, i32, i32
  }
  func.func @transform_3(%arg0: i32, %arg1: i32) -> (i32, i32, i32) {
    %c0_i32 = arith.constant 0 : i32
    %c0_i32_0 = arith.constant 0 : i32
    %c0_i32_1 = arith.constant 0 : i32
    return %arg0, %c0_i32, %c0_i32_0 : i32, i32, i32
  }
  func.func @transform_4(%arg0: i32, %arg1: i32) -> (i32, i32) {
    %c0_i32 = arith.constant 0 : i32
    %c0_i32_0 = arith.constant 0 : i32
    %c0_i32_1 = arith.constant 0 : i32
    return %c0_i32, %c0_i32_0 : i32, i32
  }
  func.func @transform_5(%arg0: i32, %arg1: i32) -> (i32, i32) {
    %c0_i32 = arith.constant 0 : i32
    %c0_i32_0 = arith.constant 0 : i32
    %c0_i32_1 = arith.constant 0 : i32
    return %c0_i32, %c0_i32_0 : i32, i32
  }
  func.func @transform_6(%arg0: i32, %arg1: i32) -> (i32, i32) {
    %c0_i32 = arith.constant 0 : i32
    %c0_i32_0 = arith.constant 0 : i32
    %c0_i32_1 = arith.constant 0 : i32
    return %c0_i32, %c0_i32_0 : i32, i32
  }
  func.func @transform_7(%arg0: i32, %arg1: i32) -> (i32, i32) {
    %c0_i32 = arith.constant 0 : i32
    %c0_i32_0 = arith.constant 0 : i32
    %c0_i32_1 = arith.constant 0 : i32
    return %c0_i32, %c0_i32_0 : i32, i32
  }
  func.func @transform_8(%arg0: i32, %arg1: i32) -> (i32, i32) {
    %c0_i32 = arith.constant 0 : i32
    %c0_i32_0 = arith.constant 0 : i32
    %c0_i32_1 = arith.constant 0 : i32
    return %c0_i32, %c0_i32_0 : i32, i32
  }
  func.func @transform_9(%arg0: i32, %arg1: i32) -> (i32, i32) {
    %c0_i32 = arith.constant 0 : i32
    %c0_i32_0 = arith.constant 0 : i32
    %c0_i32_1 = arith.constant 0 : i32
    return %c0_i32, %c0_i32_0 : i32, i32
  }
  func.func @transform_10(%arg0: i32, %arg1: i32) -> (i32, i32) {
    %c0_i32 = arith.constant 0 : i32
    %c0_i32_0 = arith.constant 0 : i32
    %c0_i32_1 = arith.constant 0 : i32
    return %c0_i32, %c0_i32_0 : i32, i32
  }
  func.func @transform_11(%arg0: i32, %arg1: i32) -> (i32, i32) {
    %c0_i32 = arith.constant 0 : i32
    %c0_i32_0 = arith.constant 0 : i32
    %c0_i32_1 = arith.constant 0 : i32
    return %c0_i32, %c0_i32_0 : i32, i32
  }
  func.func @transform_12(%arg0: i32, %arg1: i32) -> (i32, i32) {
    %c0_i32 = arith.constant 0 : i32
    %c0_i32_0 = arith.constant 0 : i32
    %c0_i32_1 = arith.constant 0 : i32
    return %c0_i32, %c0_i32_0 : i32, i32
  }
  func.func @transform_13(%arg0: i32, %arg1: i32) -> (i32, i32) {
    %c0_i32 = arith.constant 0 : i32
    %c0_i32_0 = arith.constant 0 : i32
    %c0_i32_1 = arith.constant 0 : i32
    return %c0_i32, %c0_i32_0 : i32, i32
  }
  func.func @transform_14(%arg0: i32, %arg1: i32) -> (i32, i32) {
    %c0_i32 = arith.constant 0 : i32
    %c0_i32_0 = arith.constant 0 : i32
    %c0_i32_1 = arith.constant 0 : i32
    return %c0_i32, %c0_i32_0 : i32, i32
  }
  func.func @transform_15(%arg0: i32, %arg1: i32) -> (i32, i32) {
    %c0_i32 = arith.constant 0 : i32
    %c0_i32_0 = arith.constant 0 : i32
    %c0_i32_1 = arith.constant 0 : i32
    return %c0_i32, %c0_i32_0 : i32, i32
  }
  func.func @transform_16(%arg0: i32, %arg1: i32) -> (i32, i32) {
    %c0_i32 = arith.constant 0 : i32
    %c0_i32_0 = arith.constant 0 : i32
    %c0_i32_1 = arith.constant 0 : i32
    return %c0_i32, %c0_i32_0 : i32, i32
  }
  func.func @transform_17(%arg0: i32, %arg1: i32) -> (i32, i32, i32) {
    %c0_i32 = arith.constant 0 : i32
    %c0_i32_0 = arith.constant 0 : i32
    %c0_i32_1 = arith.constant 0 : i32
    return %arg0, %c0_i32, %c0_i32_0 : i32, i32, i32
  }
}

module attributes {stable_mosaic.version = 11 : i64} {
  func.func @_equiv_fused_kernel(%arg0: i32, %arg1: i32, %arg2: memref<1x288x2xi32, #tpu.memory_space<vmem>>, %arg3: memref<1x288x6xf32, #tpu.memory_space<vmem>>, %arg4: memref<1x24x32xf32, #tpu.memory_space<vmem>>, %arg5: memref<1x24x3xf32, #tpu.memory_space<vmem>>, %arg6: memref<1x24x1xf32, #tpu.memory_space<vmem>>, %arg7: memref<32x32xf32, #tpu.memory_space<vmem>>, %arg8: memref<32x32xf32, #tpu.memory_space<vmem>>, %arg9: memref<6x32xf32, #tpu.memory_space<vmem>>, %arg10: memref<1x32xf32, #tpu.memory_space<vmem>>, %arg11: memref<32x32xf32, #tpu.memory_space<vmem>>, %arg12: memref<1x32xf32, #tpu.memory_space<vmem>>, %arg13: memref<1x32xf32, #tpu.memory_space<vmem>>, %arg14: memref<1x24x3xf32, #tpu.memory_space<vmem>>, %arg15: memref<24x32xf32, #tpu.memory_space<vmem>>, %arg16: memref<24x32xf32, #tpu.memory_space<vmem>>, %arg17: memref<24x3xf32, #tpu.memory_space<vmem>>) attributes {dimension_semantics = [#tpu.dimension_semantics<parallel>, #tpu.dimension_semantics<arbitrary>], iteration_bounds = array<i64: 2, 2>, scalar_prefetch = 0 : i64, scratch_operands = 3 : i64, tpu.core_type = #tpu.core_type<tc>, window_params = [{transform_indices = @transform_0, window_bounds = array<i64: 1, 288, 2>}, {transform_indices = @transform_1, window_bounds = array<i64: 1, 288, 6>}, {transform_indices = @transform_2, window_bounds = array<i64: 1, 24, 32>}, {transform_indices = @transform_3, window_bounds = array<i64: 1, 24, 3>}, {transform_indices = @transform_4, window_bounds = array<i64: 1, 24, 1>}, {pipeline_mode = #tpu.pipeline_mode<synchronous>, transform_indices = @transform_5, window_bounds = array<i64: 32, 32>}, {pipeline_mode = #tpu.pipeline_mode<synchronous>, transform_indices = @transform_6, window_bounds = array<i64: 32, 32>}, {pipeline_mode = #tpu.pipeline_mode<synchronous>, transform_indices = @transform_7, window_bounds = array<i64: 6, 32>}, {pipeline_mode = #tpu.pipeline_mode<synchronous>, transform_indices = @transform_8, window_bounds = array<i64: 1, 32>}, {pipeline_mode = #tpu.pipeline_mode<synchronous>, transform_indices = @transform_9, window_bounds = array<i64: 32, 32>}, {pipeline_mode = #tpu.pipeline_mode<synchronous>, transform_indices = @transform_10, window_bounds = array<i64: 1, 32>}, {pipeline_mode = #tpu.pipeline_mode<synchronous>, transform_indices = @transform_11, window_bounds = array<i64: 1, 32>}, {transform_indices = @transform_12, window_bounds = array<i64: 1, 24, 3>}]} {
    %c0_i32 = arith.constant 0 : i32
    %0 = arith.cmpi eq, %arg1, %c0_i32 : i32
    %1 = arith.extui %0 : i1 to i32
    %c0_i32_0 = arith.constant 0 : i32
    %2 = arith.cmpi ne, %1, %c0_i32_0 : i32
    scf.if %2 {
      %c0_30 = arith.constant 0 : index
      %c0_31 = arith.constant 0 : index
      %c0_32 = arith.constant 0 : index
      %60 = vector.load %arg4[%c0_30, %c0_31, %c0_32] : memref<1x24x32xf32, #tpu.memory_space<vmem>>, vector<1x24x32xf32>
      %61 = vector.shape_cast %60 : vector<1x24x32xf32> to vector<24x32xf32>
      %c0_33 = arith.constant 0 : index
      %c0_34 = arith.constant 0 : index
      %62 = vector.load %arg7[%c0_33, %c0_34] : memref<32x32xf32, #tpu.memory_space<vmem>>, vector<32x32xf32>
      %cst_35 = arith.constant dense<0.000000e+00> : vector<24x32xf32>
      %63 = tpu.matmul %61, %62, %cst_35 {dimension_numbers = #tpu.dot_dimension_numbers<[1], [0], [0], [1], [0, 0, 1, 1], [], []>} : vector<24x32xf32>, vector<32x32xf32>, vector<24x32xf32> -> vector<24x32xf32>
      %c0_36 = arith.constant 0 : index
      %c0_37 = arith.constant 0 : index
      %64 = vector.load %arg10[%c0_36, %c0_37] : memref<1x32xf32, #tpu.memory_space<vmem>>, vector<1x32xf32>
      %65 = vector.broadcast %64 : vector<1x32xf32> to vector<24x32xf32>
      %66 = arith.addf %63, %65 : vector<24x32xf32>
      %c0_38 = arith.constant 0 : index
      %c0_39 = arith.constant 0 : index
      %67 = vector.load %arg15[%c0_38, %c0_39] : memref<24x32xf32, #tpu.memory_space<vmem>>, vector<24x32xf32>
      tpu.vector_store %arg15[%c0_38, %c0_39], %66 {strides = array<i32>} : memref<24x32xf32, #tpu.memory_space<vmem>>, vector<24x32xf32>,
      %c0_40 = arith.constant 0 : index
      %c0_41 = arith.constant 0 : index
      %68 = vector.load %arg8[%c0_40, %c0_41] : memref<32x32xf32, #tpu.memory_space<vmem>>, vector<32x32xf32>
      %cst_42 = arith.constant dense<0.000000e+00> : vector<24x32xf32>
      %69 = tpu.matmul %61, %68, %cst_42 {dimension_numbers = #tpu.dot_dimension_numbers<[1], [0], [0], [1], [0, 0, 1, 1], [], []>} : vector<24x32xf32>, vector<32x32xf32>, vector<24x32xf32> -> vector<24x32xf32>
      %c0_43 = arith.constant 0 : index
      %c0_44 = arith.constant 0 : index
      %70 = vector.load %arg16[%c0_43, %c0_44] : memref<24x32xf32, #tpu.memory_space<vmem>>, vector<24x32xf32>
      tpu.vector_store %arg16[%c0_43, %c0_44], %69 {strides = array<i32>} : memref<24x32xf32, #tpu.memory_space<vmem>>, vector<24x32xf32>,
      %cst_45 = arith.constant 0.000000e+00 : f32
      %71 = vector.broadcast %cst_45 : f32 to vector<24x3xf32>
      %c0_46 = arith.constant 0 : index
      %c0_47 = arith.constant 0 : index
      %72 = vector.load %arg17[%c0_46, %c0_47] : memref<24x3xf32, #tpu.memory_space<vmem>>, vector<24x3xf32>
      tpu.vector_store %arg17[%c0_46, %c0_47], %71 {strides = array<i32>} : memref<24x3xf32, #tpu.memory_space<vmem>>, vector<24x3xf32>,
    } else {
    }
    %c0 = arith.constant 0 : index
    %c0_1 = arith.constant 0 : index
    %c0_2 = arith.constant 0 : index
    %3 = vector.load %arg2[%c0, %c0_1, %c0_2] : memref<1x288x2xi32, #tpu.memory_space<vmem>>, vector<1x288x2xi32>
    %4 = vector.shape_cast %3 : vector<1x288x2xi32> to vector<288x2xi32>
    %c0_3 = arith.constant 0 : index
    %c0_4 = arith.constant 0 : index
    %c0_5 = arith.constant 0 : index
    %5 = vector.load %arg3[%c0_3, %c0_4, %c0_5] : memref<1x288x6xf32, #tpu.memory_space<vmem>>, vector<1x288x6xf32>
    %6 = vector.shape_cast %5 : vector<1x288x6xf32> to vector<288x6xf32>
    %7 = tpu.iota {dimensions = array<i32: 1>} : vector<288x24xi32>
    %8 = vector.extract_strided_slice %4 {offsets = [0, 0], sizes = [288, 1], strides = [1, 1]} : vector<288x2xi32> to vector<288x1xi32>
    %9 = vector.broadcast %8 : vector<288x1xi32> to vector<288x24xi32>
    %10 = arith.cmpi eq, %9, %7 : vector<288x24xi32>
    %11 = arith.extui %10 : vector<288x24xi1> to vector<288x24xi32>
    %12 = arith.sitofp %11 : vector<288x24xi32> to vector<288x24xf32>
    %13 = vector.extract_strided_slice %4 {offsets = [0, 1], sizes = [288, 1], strides = [1, 1]} : vector<288x2xi32> to vector<288x1xi32>
    %14 = vector.broadcast %13 : vector<288x1xi32> to vector<288x24xi32>
    %15 = arith.cmpi eq, %14, %7 : vector<288x24xi32>
    %16 = arith.extui %15 : vector<288x24xi1> to vector<288x24xi32>
    %17 = arith.sitofp %16 : vector<288x24xi32> to vector<288x24xf32>
    %c0_6 = arith.constant 0 : index
    %c0_7 = arith.constant 0 : index
    %18 = vector.load %arg15[%c0_6, %c0_7] : memref<24x32xf32, #tpu.memory_space<vmem>>, vector<24x32xf32>
    %cst = arith.constant dense<0.000000e+00> : vector<288x32xf32>
    %19 = tpu.matmul %12, %18, %cst {dimension_numbers = #tpu.dot_dimension_numbers<[1], [0], [0], [1], [0, 0, 1, 1], [], []>} : vector<288x24xf32>, vector<24x32xf32>, vector<288x32xf32> -> vector<288x32xf32>
    %c0_8 = arith.constant 0 : index
    %c0_9 = arith.constant 0 : index
    %20 = vector.load %arg16[%c0_8, %c0_9] : memref<24x32xf32, #tpu.memory_space<vmem>>, vector<24x32xf32>
    %cst_10 = arith.constant dense<0.000000e+00> : vector<288x32xf32>
    %21 = tpu.matmul %17, %20, %cst_10 {dimension_numbers = #tpu.dot_dimension_numbers<[1], [0], [0], [1], [0, 0, 1, 1], [], []>} : vector<288x24xf32>, vector<24x32xf32>, vector<288x32xf32> -> vector<288x32xf32>
    %22 = arith.addf %19, %21 : vector<288x32xf32>
    %c0_11 = arith.constant 0 : index
    %c0_12 = arith.constant 0 : index
    %23 = vector.load %arg9[%c0_11, %c0_12] : memref<6x32xf32, #tpu.memory_space<vmem>>, vector<6x32xf32>
    %cst_13 = arith.constant dense<0.000000e+00> : vector<288x32xf32>
    %24 = tpu.matmul %6, %23, %cst_13 {dimension_numbers = #tpu.dot_dimension_numbers<[1], [0], [0], [1], [0, 0, 1, 1], [], []>} : vector<288x6xf32>, vector<6x32xf32>, vector<288x32xf32> -> vector<288x32xf32>
    %25 = arith.addf %22, %24 : vector<288x32xf32>
    %26 = arith.negf %25 : vector<288x32xf32>
    %27 = math.exp %26 : vector<288x32xf32>
    %cst_14 = arith.constant 1.000000e+00 : f32
    %28 = vector.broadcast %cst_14 : f32 to vector<288x32xf32>
    %29 = arith.addf %28, %27 : vector<288x32xf32>
    %30 = arith.divf %28, %29 : vector<288x32xf32>
    %31 = arith.mulf %25, %30 : vector<288x32xf32>
    %c0_15 = arith.constant 0 : index
    %c0_16 = arith.constant 0 : index
    %32 = vector.load %arg11[%c0_15, %c0_16] : memref<32x32xf32, #tpu.memory_space<vmem>>, vector<32x32xf32>
    %cst_17 = arith.constant dense<0.000000e+00> : vector<288x32xf32>
    %33 = tpu.matmul %31, %32, %cst_17 {dimension_numbers = #tpu.dot_dimension_numbers<[1], [0], [0], [1], [0, 0, 1, 1], [], []>} : vector<288x32xf32>, vector<32x32xf32>, vector<288x32xf32> -> vector<288x32xf32>
    %c0_18 = arith.constant 0 : index
    %c0_19 = arith.constant 0 : index
    %34 = vector.load %arg12[%c0_18, %c0_19] : memref<1x32xf32, #tpu.memory_space<vmem>>, vector<1x32xf32>
    %35 = vector.broadcast %34 : vector<1x32xf32> to vector<288x32xf32>
    %36 = arith.addf %33, %35 : vector<288x32xf32>
    %37 = arith.negf %36 : vector<288x32xf32>
    %38 = math.exp %37 : vector<288x32xf32>
    %cst_20 = arith.constant 1.000000e+00 : f32
    %39 = vector.broadcast %cst_20 : f32 to vector<288x32xf32>
    %40 = arith.addf %39, %38 : vector<288x32xf32>
    %41 = arith.divf %39, %40 : vector<288x32xf32>
    %42 = arith.mulf %36, %41 : vector<288x32xf32>
    %c0_21 = arith.constant 0 : index
    %c0_22 = arith.constant 0 : index
    %43 = vector.load %arg13[%c0_21, %c0_22] : memref<1x32xf32, #tpu.memory_space<vmem>>, vector<1x32xf32>
    %44 = vector.broadcast %43 : vector<1x32xf32> to vector<288x32xf32>
    %45 = arith.mulf %42, %44 : vector<288x32xf32>
    %cst_23 = arith.constant dense<0.000000e+00> : vector<288xf32>
    %46 = vector.multi_reduction <add>, %45, %cst_23 [1] : vector<288x32xf32> to vector<288xf32>
    %47 = vector.shape_cast %46 : vector<288xf32> to vector<288x1xf32>
    %48 = vector.extract_strided_slice %6 {offsets = [0, 2], sizes = [288, 1], strides = [1, 1]} : vector<288x6xf32> to vector<288x1xf32>
    %49 = vector.extract_strided_slice %6 {offsets = [0, 3], sizes = [288, 3], strides = [1, 1]} : vector<288x6xf32> to vector<288x3xf32>
    %50 = arith.mulf %47, %48 : vector<288x1xf32>
    %51 = vector.broadcast %50 : vector<288x1xf32> to vector<288x3xf32>
    %52 = arith.mulf %49, %51 : vector<288x3xf32>
    %c0_24 = arith.constant 0 : index
    %c0_25 = arith.constant 0 : index
    %53 = vector.load %arg17[%c0_24, %c0_25] : memref<24x3xf32, #tpu.memory_space<vmem>>, vector<24x3xf32>
    %cst_26 = arith.constant dense<0.000000e+00> : vector<24x3xf32>
    %54 = tpu.matmul %12, %52, %cst_26 {dimension_numbers = #tpu.dot_dimension_numbers<[0], [0], [1], [1], [0, 1, 1, 1], [], []>} : vector<288x24xf32>, vector<288x3xf32>, vector<24x3xf32> -> vector<24x3xf32>
    %55 = arith.addf %53, %54 : vector<24x3xf32>
    %c0_27 = arith.constant 0 : index
    %c0_28 = arith.constant 0 : index
    %56 = vector.load %arg17[%c0_27, %c0_28] : memref<24x3xf32, #tpu.memory_space<vmem>>, vector<24x3xf32>
    tpu.vector_store %arg17[%c0_27, %c0_28], %55 {strides = array<i32>} : memref<24x3xf32, #tpu.memory_space<vmem>>, vector<24x3xf32>,
    %c1_i32 = arith.constant 1 : i32
    %57 = arith.cmpi eq, %arg1, %c1_i32 : i32
    %58 = arith.extui %57 : i1 to i32
    %c0_i32_29 = arith.constant 0 : i32
    %59 = arith.cmpi ne, %58, %c0_i32_29 : i32
    scf.if %59 {
      %c0_30 = arith.constant 0 : index
      %c0_31 = arith.constant 0 : index
      %c0_32 = arith.constant 0 : index
      %60 = vector.load %arg5[%c0_30, %c0_31, %c0_32] : memref<1x24x3xf32, #tpu.memory_space<vmem>>, vector<1x24x3xf32>
      %61 = vector.shape_cast %60 : vector<1x24x3xf32> to vector<24x3xf32>
      %c0_33 = arith.constant 0 : index
      %c0_34 = arith.constant 0 : index
      %62 = vector.load %arg17[%c0_33, %c0_34] : memref<24x3xf32, #tpu.memory_space<vmem>>, vector<24x3xf32>
      %cst_35 = arith.constant 0.00999999977 : f32
      %63 = vector.broadcast %cst_35 : f32 to vector<24x3xf32>
      %64 = arith.mulf %62, %63 : vector<24x3xf32>
      %65 = arith.addf %61, %64 : vector<24x3xf32>
      %c0_36 = arith.constant 0 : index
      %c0_37 = arith.constant 0 : index
      %c0_38 = arith.constant 0 : index
      %66 = vector.load %arg6[%c0_36, %c0_37, %c0_38] : memref<1x24x1xf32, #tpu.memory_space<vmem>>, vector<1x24x1xf32>
      %67 = vector.shape_cast %66 : vector<1x24x1xf32> to vector<24x1xf32>
      %68 = vector.broadcast %67 : vector<24x1xf32> to vector<24x3xf32>
      %69 = arith.mulf %65, %68 : vector<24x3xf32>
      %c0_39 = arith.constant 0 : index
      %c0_40 = arith.constant 0 : index
      %c0_41 = arith.constant 0 : index
      %70 = vector.load %arg14[%c0_39, %c0_40, %c0_41] : memref<1x24x3xf32, #tpu.memory_space<vmem>>, vector<1x24x3xf32>
      %71 = vector.shape_cast %70 : vector<1x24x3xf32> to vector<24x3xf32>
      %72 = vector.shape_cast %69 : vector<24x3xf32> to vector<1x24x3xf32>
      tpu.vector_store %arg14[%c0_39, %c0_40, %c0_41], %72 {strides = array<i32>} : memref<1x24x3xf32, #tpu.memory_space<vmem>>, vector<1x24x3xf32>,
    } else {
    }
    return
  }
  func.func @transform_0(%arg0: i32, %arg1: i32) -> (i32, i32, i32) {
    %c0_i32 = arith.constant 0 : i32
    %c0_i32_0 = arith.constant 0 : i32
    return %arg0, %arg1, %c0_i32 : i32, i32, i32
  }
  func.func @transform_1(%arg0: i32, %arg1: i32) -> (i32, i32, i32) {
    %c0_i32 = arith.constant 0 : i32
    %c0_i32_0 = arith.constant 0 : i32
    return %arg0, %arg1, %c0_i32 : i32, i32, i32
  }
  func.func @transform_2(%arg0: i32, %arg1: i32) -> (i32, i32, i32) {
    %c0_i32 = arith.constant 0 : i32
    %c0_i32_0 = arith.constant 0 : i32
    %c0_i32_1 = arith.constant 0 : i32
    return %arg0, %c0_i32, %c0_i32_0 : i32, i32, i32
  }
  func.func @transform_3(%arg0: i32, %arg1: i32) -> (i32, i32, i32) {
    %c0_i32 = arith.constant 0 : i32
    %c0_i32_0 = arith.constant 0 : i32
    %c0_i32_1 = arith.constant 0 : i32
    return %arg0, %c0_i32, %c0_i32_0 : i32, i32, i32
  }
  func.func @transform_4(%arg0: i32, %arg1: i32) -> (i32, i32, i32) {
    %c0_i32 = arith.constant 0 : i32
    %c0_i32_0 = arith.constant 0 : i32
    %c0_i32_1 = arith.constant 0 : i32
    return %arg0, %c0_i32, %c0_i32_0 : i32, i32, i32
  }
  func.func @transform_5(%arg0: i32, %arg1: i32) -> (i32, i32) {
    %c0_i32 = arith.constant 0 : i32
    %c0_i32_0 = arith.constant 0 : i32
    %c0_i32_1 = arith.constant 0 : i32
    return %c0_i32, %c0_i32_0 : i32, i32
  }
  func.func @transform_6(%arg0: i32, %arg1: i32) -> (i32, i32) {
    %c0_i32 = arith.constant 0 : i32
    %c0_i32_0 = arith.constant 0 : i32
    %c0_i32_1 = arith.constant 0 : i32
    return %c0_i32, %c0_i32_0 : i32, i32
  }
  func.func @transform_7(%arg0: i32, %arg1: i32) -> (i32, i32) {
    %c0_i32 = arith.constant 0 : i32
    %c0_i32_0 = arith.constant 0 : i32
    %c0_i32_1 = arith.constant 0 : i32
    return %c0_i32, %c0_i32_0 : i32, i32
  }
  func.func @transform_8(%arg0: i32, %arg1: i32) -> (i32, i32) {
    %c0_i32 = arith.constant 0 : i32
    %c0_i32_0 = arith.constant 0 : i32
    %c0_i32_1 = arith.constant 0 : i32
    return %c0_i32, %c0_i32_0 : i32, i32
  }
  func.func @transform_9(%arg0: i32, %arg1: i32) -> (i32, i32) {
    %c0_i32 = arith.constant 0 : i32
    %c0_i32_0 = arith.constant 0 : i32
    %c0_i32_1 = arith.constant 0 : i32
    return %c0_i32, %c0_i32_0 : i32, i32
  }
  func.func @transform_10(%arg0: i32, %arg1: i32) -> (i32, i32) {
    %c0_i32 = arith.constant 0 : i32
    %c0_i32_0 = arith.constant 0 : i32
    %c0_i32_1 = arith.constant 0 : i32
    return %c0_i32, %c0_i32_0 : i32, i32
  }
  func.func @transform_11(%arg0: i32, %arg1: i32) -> (i32, i32) {
    %c0_i32 = arith.constant 0 : i32
    %c0_i32_0 = arith.constant 0 : i32
    %c0_i32_1 = arith.constant 0 : i32
    return %c0_i32, %c0_i32_0 : i32, i32
  }
  func.func @transform_12(%arg0: i32, %arg1: i32) -> (i32, i32, i32) {
    %c0_i32 = arith.constant 0 : i32
    %c0_i32_0 = arith.constant 0 : i32
    %c0_i32_1 = arith.constant 0 : i32
    return %arg0, %c0_i32, %c0_i32_0 : i32, i32, i32
  }
}

</mosaic_0001>

<bundles_post_ra>
// kernel: custom-call.11
= control target key start
LH: loop header
LB: loop body
LE: loop exit
PB: predicated region body
PF: predicated region fallthrough
CT: control target
= control target key end

     0   :  { %5 = vsyncpa [#allocation6], 0  ;;  %s896_s0 = inlined_call_operand.vmem [shape: f32[2,3,3], index: 0, kind: input, shape index: {}]   ;;  %s897_s1 = inlined_call_operand.vmem [shape: f32[2,3,3], index: 1, kind: output, shape index: {0}]   ;;  %s898_s2 = inlined_call_operand.hbm [shape: s32[2,3], index: 2, kind: output, shape index: {1}]   ;;  %s899_s3 = inlined_call_operand.vmem [shape: s32[2,3], index: 3, kind: output, shape index: {2}]  }
   0x1   :  { %7 = vsyncpa [#allocation6 + $0x1], 0  ;;  %s715_s12 = smov 0   ;;  %s717_s13 = smov 0  }
   0x2   :  { %s719_s14 = smov 0   ;;  %s721_s15 = smov 0  }
   0x3 LB: > { %s736_s16 = sadd.s32 4294967295, %s687_s15   ;;  %s550_s17 = sadd.s32 4294967294, %s687_s15   ;;  %s687_s15 = sphi %s721_s15, %s907_s15   ;;  %s683_s14 = sphi %s719_s14, %s906_s14   ;;  %s679_s13 = sphi %s717_s13, %s905_s13   ;;  %s675_s12 = sphi %s715_s12, %s904_s12  }
   0x4   : > { %s740_s18 = sadd.s32 1, %s687_s15   ;;  %s17_s19 = sshrl.u32 %s687_s15, 3 }
   0x5   : > { %s18_s20 = sshrl.u32 %s740_s18, 3  ;;  %s22_s21 = sadd.s32 1, %s683_s14 }
   0x6   : > { %s19_s22 = ssub.s32 %s17_s19, %s18_s20  ;;  %p32_p0 = scmp.ne.s32.totalorder %s683_s14, %s679_s13 }
   0x7   : > { %p20_p1 = scmp.eq.s32.totalorder %s19_s22, 0  ;;  %p33_p2 = scmp.eq.s32.totalorder %s736_s16, 1 }
   0x8   : > { %p38_p3 = scmp.ne.s32.totalorder %s679_s13, %s675_s12  ;;  %p39_p4 = scmp.eq.s32.totalorder %s550_s17, 1 }
   0x9   : > { %s751_s23 = scalar_select %p20_p1, %s683_s14, %s22_s21  }
   0xa   : > { %p753_p5 = por %p33_p2, %p32_p0  ;;  %p757_p6 = por %p39_p4, %p38_p3 }
   0xb   : > { %p552_p7 = scmp.ge.s32.totalorder %s687_s15, 2 }
   0xc   : > { %s85_s26 = sand.u32 (!%p552_p7), 1, %s687_s15   ;;  %s554_s27 = sshll.u32 (!%p552_p7), %s687_s15, 2 }
   0xd   : > { %83 = sbr.rel (%p552_p7) target bundleno = 20 (0x14), region = 16  ;;  %s553_s28 = sshll.u32 (!%p552_p7), %s85_s26, 2 }
   0xe   : > { %s89_s4 = scalar_lea.vmem (!%p552_p7), %s896_s0, %s554_s27  ;;  %s87_s5 = scalar_lea.vmem (!%p552_p7), [#allocation1], %s553_s28 }
   0xf   : > { %v105_v0 = vld [vmem:[%s89_s4] sm:$0xf] (!%p552_p7) }
  0x10   : > { %106 = vst [vmem:[%s87_s5] sm:$0xf] (!%p552_p7), %v105_v0 }
  0x14 PF: > { %p555_p8 = scmp.ge.s32.totalorder %s687_s15, 1  ;;  %p122_p9 = scmp.lt.s32.totalorder %s687_s15, 3 }
  0x16   : > { %p123_p10 = pnand %p555_p8, %p122_p9 }
  0x18   : > { %126 = sbr.rel (%p123_p10) target bundleno = 451 (0x1c3), region = 50 }
  0x1f   : > { %s133_s6 = sand.u32 1, %s736_s16   ;;  %s144_s7 = sand.u32 1, %s679_s13   ;;  %v166_v1 = vlaneseq  ;;  %v693_v4 = vmov 0  }
  0x20   : > { %s773_s8 = sshll.u32 %s133_s6, 2  ;;  %s777_s9 = sshll.u32 %s144_s7, 1 }
  0x21   : > { %v780_v2 = vshrl.u32 %v166_v1, 7  ;;  %s135_s10 = scalar_lea.vmem [#allocation1], %s773_s8  ;;  %s161_s11 = sand.u32 7, %s736_s16  }
  0x22   : > { %v155_v3 = vld [vmem:[%s135_s10] sm:$0xf]  ;;  %s785_s17 = scalar_lea.vmem [#allocation4], %s161_s11  ;;  %s139_s19 = scalar_lea.vmem [#allocation3], %s773_s8 }
  0x23   : > { %156 = vst [vmem:[#allocation0] sm:$0xf] %v155_v3  ;;  %170 = vst [vmem:[#allocation9] sm:$0xff] %v780_v2  ;;  %s146_s20 = scalar_lea.vmem [#allocation5], %s777_s9  ;;  %s152_s21 = scalar_lea.vmem [#allocation8], %s777_s9 }
  0x24   : > { %165 = vst [vmem:[%s785_s17] sm:$0x1] %v693_v4  ;;  %s791_s22 = scalar_lea.vmem [#allocation7], %s161_s11  ;;  %s793_s26 = smov 0  }
  0x2a   : > { %v159_v5 = vld [vmem:[#allocation0] sm:$0xff] }
  0x2b   : > { %160 = vst [vmem:[#allocation2] sm:$0xff] %v159_v5 }
  0x2c LB: >> { %vm186_vm0 = vcmp.lt.s32.totalorder %v780_v2, 3  ;;  %v800_v8 = vstv %s691_s26  ;;  %s227_s27 = ssub.s32 128, %s691_s26  ;;  %v233_v38 = vand.u32 127, %v166_v1  ;;  %v236_v40 = vld [vmem:[%s785_s17] ss:$0 sm:$0xff]  ;;  %s239_s28 = scalar_lea.vmem [#allocation2], %s691_s26  ;;  %s691_s26 = sphi %s793_s26, %s176_s26  }
  0x2d   : >> { %vm185_vm1 = vcmp.ge.s32.totalorder %v780_v2, %v800_v8  ;;  %s245_s30 = scalar_lea.vmem [#allocation9], %s691_s26  ;;  %vm265_vm15 = vcmp.gt.s32.totalorder %v780_v2, %v800_v8  ;;  %s176_s26 = sadd.s32 1, %s691_s26  }
  0x2e   : >> { %vm187_vm3 = vmand %vm185_vm1, %vm186_vm0  ;;  %vm257_vm12 = vcmp.gt.s32.totalorder %v233_v38, %v800_v8  ;;  %vm234_vm13 = vcmp.eq.s32.totalorder %v233_v38, %v800_v8  ;;  %v247_v42 = vld [vmem:[%s245_s30] ss:$0 sm:$0xff]  ;;  %p173_p11 = scmp.ge.s32.totalorder %s176_s26, 3  }
  0x2f   : >> { %vm269_vm1 = vmand %vm265_vm15, %vm234_vm13  ;;  %s900_s6 = sshrl.u32 (%p173_p11), %s736_s16, 3  ;;  %s564_s10 = sshll.u32 (%p173_p11), %s736_s16, 2 }
  0x30   : > { %s565_s11 = sshll.u32 (%p173_p11), %s900_s6, 5 }
  0x32   : >> { %v181_v6 = vld [vmem:[#allocation2] sm:$0xff]  ;;  %v241_v41 = vld [vmem:[%s239_s28] ss:$0 sm:$0xff] }
  0x33   : >> { %v182_v7 = vand.u32 2147483647, %v181_v6 }
  0x35   : >> { %vm560_vm2 = vcmp.gt.f32.partialorder %v182_v7, -inf }
  0x36   : >> { %vm189_vm4 = vmand %vm187_vm3, %vm560_vm2 }
  0x37   : >> { %v190_v9 = vsel %vm189_vm4, %v780_v2, %v800_v8  ;;  %v191_v10 = vsel %vm189_vm4, %v182_v7, -inf }
  0x38   : >> { %v192_v11 = vrot.slane %v191_v10, 1  ;;  %v193_v12 = vrot.slane %v190_v9, 1 }
  0x3a   : >> { %vm194_vm5 = vcmp.ge.f32.partialorder %v192_v11, %v191_v10  ;;  %v197_v13 = vrot.slane %v192_v11, 1  ;;  %v198_v14 = vrot.slane %v193_v12, 1 }
  0x3b   : >> { %v195_v15 = vsel %vm194_vm5, %v192_v11, %v191_v10  ;;  %v196_v16 = vsel %vm194_vm5, %v193_v12, %v190_v9 }
  0x3c   : >> { %vm199_vm6 = vcmp.ge.f32.partialorder %v197_v13, %v195_v15  ;;  %v202_v17 = vrot.slane %v197_v13, 1  ;;  %v203_v18 = vrot.slane %v198_v14, 1 }
  0x3d   : >> { %v200_v19 = vsel %vm199_vm6, %v197_v13, %v195_v15  ;;  %v201_v20 = vsel %vm199_vm6, %v198_v14, %v196_v16 }
  0x3e   : >> { %vm204_vm7 = vcmp.ge.f32.partialorder %v202_v17, %v200_v19  ;;  %v207_v21 = vrot.slane %v202_v17, 1  ;;  %v208_v22 = vrot.slane %v203_v18, 1 }
  0x3f   : >> { %v205_v23 = vsel %vm204_vm7, %v202_v17, %v200_v19  ;;  %v206_v24 = vsel %vm204_vm7, %v203_v18, %v201_v20 }
  0x40   : >> { %vm209_vm8 = vcmp.ge.f32.partialorder %v207_v21, %v205_v23  ;;  %v212_v25 = vrot.slane %v207_v21, 1  ;;  %v213_v26 = vrot.slane %v208_v22, 1 }
  0x41   : >> { %v210_v27 = vsel %vm209_vm8, %v207_v21, %v205_v23  ;;  %v211_v28 = vsel %vm209_vm8, %v208_v22, %v206_v24 }
  0x42   : >> { %vm214_vm9 = vcmp.ge.f32.partialorder %v212_v25, %v210_v27  ;;  %v217_v29 = vrot.slane %v212_v25, 1  ;;  %v218_v30 = vrot.slane %v213_v26, 1 }
  0x43   : >> { %v215_v31 = vsel %vm214_vm9, %v212_v25, %v210_v27  ;;  %v216_v32 = vsel %vm214_vm9, %v213_v26, %v211_v28 }
  0x44   : >> { %vm219_vm10 = vcmp.ge.f32.partialorder %v217_v29, %v215_v31  ;;  %v222_v33 = vrot.slane %v217_v29, 1  ;;  %v223_v34 = vrot.slane %v218_v30, 1 }
  0x45   : >> { %v220_v35 = vsel %vm219_vm10, %v217_v29, %v215_v31  ;;  %v221_v36 = vsel %vm219_vm10, %v218_v30, %v216_v32 }
  0x46   : >> { %vm224_vm11 = vcmp.ge.f32.partialorder %v222_v33, %v220_v35 }
  0x47   : >> { %v226_v37 = vsel %vm224_vm11, %v223_v34, %v221_v36 }
  0x48   : >> { %228 = vrot.lane.b32.xlu0 %v226_v37, %s227_s27  ;;  %s357_s27 = scalar_lea.vmem (%p173_p11), %s897_s1, %s564_s10 }
  0xba   : >> { %v229_v39 = vpop.permute.xlu0 %228 }
  0xbb   : >> { %569 = vpush %v229_v39 }
  0xec   : >> { %s570_s29 = spop %569 }
  0xed   : >> { %v235_v43 = vstv %s570_s29  ;;  %s240_s4 = scalar_lea.vmem [#allocation2], %s570_s29  ;;  %s246_s5 = scalar_lea.vmem [#allocation9], %s570_s29 }
  0xee   : >> { %v242_v44 = vld [vmem:[%s240_s4] ss:$0 sm:$0xff]  ;;  %v237_v46 = vsel %vm234_vm13, %v235_v43, %v236_v40 }
  0xef   : >> { %v248_v45 = vld [vmem:[%s246_s5] ss:$0 sm:$0xff]  ;;  %243 = vst [vmem:[%s240_s4] sm:$0x1] %v241_v41  ;;  %vm251_vm14 = vcmp.ne.f32.partialorder %v242_v44, 0.0  ;;  %238 = vst [vmem:[%s785_s17] sm:$0x1] %v237_v46  ;;  %v258_v53 = vsel %vm257_vm12, %v242_v44, 0.0 }
  0xf0   : >> { %249 = vst [vmem:[%s246_s5] sm:$0x1] %v247_v42  ;;  %244 = vst [vmem:[%s239_s28] sm:$0x1] %v242_v44  ;;  %s399_s4 = sshll.u32 (%p173_p11), %s146_s20, 4  ;;  %s348_s5 = scalar_lea.sflag (%p173_p11), [#allocation6], %s144_s7  ;;  %s400_s4 = int_to_ptr.vmem [resolvable:$true] %s399_s4 }
  0xf1   : >> { %250 = vst [vmem:[%s245_s30] sm:$0x1] %v248_v45  ;;  %vm252_vm0 = vmand %vm234_vm13, %vm251_vm14  ;;  %s843_s30 = scalar_lea.hbm (%p173_p11), %s898_s2, %s565_s11  ;;  %s621_s6 = scalar_lea.vmem (%p173_p11), %s400_s4, 32 }
  0xf2   : >> { %v253_v47 = vsel %vm252_vm0, %v242_v44, 1.0  ;;  %p622_p12 = scmp.ne.s32.totalorder (%p173_p11), %s400_s4, %s621_s6  ;;  %s694_s17 = smov (%p173_p11), [#allocation5]  }
  0xf3   : >> { %v266_v48 = vsel %vm265_vm15, %v253_v47, 1.0  ;;  %s625_s10 = sshll.u32 (%p173_p11), %s694_s17, 4  ;;  %s626_s10 = int_to_ptr.vmem [resolvable:$false] %s625_s10 }
  0xf4   : >> { %619 = vrcp.f32 %v266_v48  ;;  %p623_p13 = pnand (%p173_p11), %p622_p12, %p753_p5  ;;  %s627_s8 = scalar_lea.vmem (%p173_p11), %s626_s10, 64 }
  0xf5   : > { %p628_p1 = scmp.lt.s32.totalorder (%p173_p11), %s400_s4, %s626_s10  ;;  %p629_p2 = scmp.lt.s32.totalorder (%p173_p11), %s627_s8, %s621_s6 }
  0xf6   : > { %v334_v59 = vld [vmem:[#allocation4] sm:$0x3] (%p173_p11)  ;;  %p624_p0 = pneg (%p173_p11), %p623_p13 }
  0xf7   : >> { %v262_v50 = vld [vmem:[#allocation2] sm:$0xff]  ;;  %336 = vst [vmem:[%s146_s20] sm:$0x3] (%p173_p11), %v334_v59  ;;  %p630_p3 = por (%p173_p11), %p629_p2, %p628_p1 }
  0xf8   : > { %v276_v57 = vld [vmem:[#allocation9] sm:$0xff] (%p173_p11) }
  0xf9   : > { %p631_p4 = pnand (%p173_p11), %p630_p3, %p624_p0 }
  0xfe   : >> { %v620_v49 = vpop.eup %619 }
  0xff   : >> { %v268_v51 = vmul.f32 %v620_v49, %v262_v50 }
 0x101   : >> { %v270_v52 = vsel %vm269_vm1, %v268_v51, 0.0 }
 0x102   : >> { %271 = vadd.xlane.f32.xlu0 %v270_v52 }
 0x12f   : > { %292 = vxpose.xlu0.b32.start.end [1/1] (short) (narrow) (%p173_p11), %v276_v57, 8 }
 0x18e   : > { %175 = sbr.rel (!%p173_p11) target bundleno = 44 (0x2c), region = 202 }
 0x18f   : >> { %v272_v54 = vpop.xlane.xlu0 %271 }
 0x190   : >> { %v273_v55 = vmul.f32 %v272_v54, %v258_v53 }
 0x192   : >> { %v274_v56 = vsub.f32 %v268_v51, %v273_v55 }
 0x194   : >> { %275 = vst [vmem:[#allocation2] sm:$0xff] %v274_v56 }
 0x19b   : > { %v328_v58 = vld [vmem:[#allocation2] sm:$0xf] }
 0x19c   : > { %330 = vst [vmem:[%s139_s19] sm:$0xf] %v328_v58 }
 0x1a3   : > { %v373_v60 = vld [vmem:[%s139_s19] sm:$0xf] }
 0x1a4   : > { %374 = vst [vmem:[%s357_s27] sm:$0xf] %v373_v60 }
 0x1a5   : > { %634 = shalt.err (!%p631_p4)
}
 0x1a6   : > { %s635_s7 = scalar_lea.hbm %s843_s30, 32  ;;  %s639_s11 = scalar_lea.hbm %s898_s2, 32 }
 0x1a7   : > { %p636_p8 = scmp.ne.s32.totalorder %s843_s30, %s635_s7  ;;  %p640_p11 = scmp.lt.u32.totalorder %s843_s30, %s898_s2 }
 0x1a8   : > { %p641_p12 = scmp.lt.u32.totalorder %s639_s11, %s635_s7  ;;  %p643_p0 = scmp.lt.u32.totalorder %s635_s7, %s843_s30 }
 0x1a9   : > { %p637_p9 = pnand %p636_p8, %p753_p5 }
 0x1aa   : > { %p642_p13 = por %p641_p12, %p640_p11 }
 0x1ab   : > { %p638_p10 = pneg %p637_p9 }
 0x1ac   : > { %p644_p1 = por %p643_p0, %p642_p13 }
 0x1ae   : > { %p645_p2 = pnand %p644_p1, %p638_p10 }
 0x1b0   : > { %648 = shalt.err (!%p645_p2)
}
 0x1b1   : > { %571 = dma.vmem_to_hbm [thread:$0]  (%p753_p5), %s400_s4, 32, %s843_s30, %s348_s5   ;;  %v308_v61 = vpop.trf.xlu0 }
 0x1b2   : > { %324 = vst [vmem:[%s791_s22] sm:$0x1] %v308_v61  ;;  %s903_s6 = sshrl.u32 (%p753_p5), %s736_s16, 3 }
 0x1b3   : > { %s566_s28 = sshll.u32 (%p753_p5), %s903_s6, 1 }
 0x1b4   : > { %405 = sbr.rel (!%p753_p5) target bundleno = 451 (0x1c3), region = 96  ;;  %s408_s10 = scalar_lea.vmem (%p753_p5), %s899_s3, %s566_s28 }
 0x1b9   : > { %v340_v62 = vld [vmem:[#allocation7] sm:$0x3] }
 0x1ba   : > { %342 = vst [vmem:[%s152_s21] sm:$0x3] %v340_v62 }
 0x1c1   : > { %v424_v63 = vld [vmem:[%s152_s21] sm:$0x3] }
 0x1c2   : > { %425 = vst [vmem:[%s408_s10] sm:$0x3] %v424_v63 }
 0x1c3 PF: > { %s452_s22 = sand.u32 1, %s675_s12   ;;  %p574_p5 = pnand %p552_p7, %p757_p6 }
 0x1c4   : > { %s453_s24 = scalar_lea.sflag [#allocation6], %s452_s22 }
 0x1c5   : > { %670 = dma.done.wait (!%p574_p5), %s453_s24, 32  }
 0x1c6   : > { %672 = vsyncadd (!%p574_p5), %s453_s24, 4294967264  ;;  %p10_p3 = scmp.ge.s32.totalorder %s740_s18, 4   ;;  %s904_s12 = smov %s679_s13 }
 0x1c7   : > { %s905_s13 = smov %s683_s14  ;;  %s906_s14 = smov %s751_s23 }
 0x1c8   : > { %s907_s15 = smov %s740_s18  ;;  %12 = sbr.rel (!%p10_p3) target bundleno = 3 (0x3), region = 213 }
 0x1cf   :  { %465 = vsyncpa [#allocation6], 1 }
 0x1d0   :  { %467 = vsyncpa [#allocation6 + $0x1], 1 }

// kernel: custom-call.13
= control target key start
LH: loop header
LB: loop body
LE: loop exit
PB: predicated region body
PF: predicated region fallthrough
CT: control target
= control target key end

     0   :  { %s343_s6 = smov 0   ;;  %s345_s7 = smov 0   ;;  %s390_s0 = inlined_call_operand.vmem [shape: f32[2,1,3,3], index: 0, kind: input, shape index: {}]   ;;  %s391_s1 = inlined_call_operand.vmem [shape: f32[2,1,3,3], index: 1, kind: output, shape index: {}]  }
   0x1   :  { %s347_s8 = smov 0  }
   0x2 LB: > { %s269_s9 = sadd.s32 4294967295, %s330_s8   ;;  %s33_s10 = sadd.s32 1, %s326_s7  ;;  %s330_s8 = sphi %s347_s8, %s7_s8   ;;  %s326_s7 = sphi %s345_s7, %s393_s7   ;;  %s322_s6 = sphi %s343_s6, %s392_s6  }
   0x3   : > { %p35_p0 = scmp.ge.s32.totalorder %s33_s10, 2  ;;  %p271_p1 = scmp.ge.s32.totalorder %s330_s8, 2 }
   0x4   : > { %s49_s11 = sand.u32 (!%p271_p1), 1, %s330_s8   ;;  %s273_s12 = sshll.u32 (!%p271_p1), %s326_s7, 2 }
   0x5   : > { %s395_s10 = smov (%p35_p0, %s33_s10), 0  ;;  %47 = sbr.rel (%p271_p1) target bundleno = 12 (0xc), region = 16 }
   0x6   : > { %s272_s13 = sshll.u32 (!%p271_p1), %s49_s11, 2  ;;  %s56_s16 = scalar_lea.vmem (!%p271_p1), %s390_s0, %s273_s12 }
   0x7   : > { %v72_v0 = vld [vmem:[%s56_s16] sm:$0xf] (!%p271_p1)  ;;  %s51_s17 = scalar_lea.vmem (!%p271_p1), [#allocation1], %s272_s13 }
   0x8   : > { %73 = vst [vmem:[%s51_s17] sm:$0xf] (!%p271_p1), %v72_v0 }
   0xc PF: > { %p274_p2 = scmp.ge.s32.totalorder %s330_s8, 1  ;;  %p89_p3 = scmp.lt.s32.totalorder %s330_s8, 3 }
   0xe   : > { %p90_p4 = pnand %p274_p2, %p89_p3 }
  0x10   : > { %93 = sbr.rel (%p90_p4) target bundleno = 511 (0x1ff), region = 50 }
  0x17   : > { %s370_s18 = sand.u32 1, %s269_s9   ;;  %v111_v1 = vlaneseq  ;;  %v332_v11 = vmov -1.0   ;;  %s278_s22 = sshll.u32 %s322_s6, 2 }
  0x18   : > { %s275_s19 = sshll.u32 %s370_s18, 2  ;;  %s178_s25 = scalar_lea.vmem %s391_s1, %s278_s22 }
  0x19   : > { %s102_s20 = scalar_lea.vmem [#allocation1], %s275_s19  ;;  %v112_v3 = vand.u32 127, %v111_v1  ;;  %v115_v4 = vshrl.u32 %v111_v1, 7  ;;  %s106_s21 = scalar_lea.vmem [#allocation3], %s275_s19 }
  0x1a   : > { %v109_v2 = vld [vmem:[%s102_s20] sm:$0xf] }
  0x1b   : > { %110 = vst [vmem:[#allocation0] sm:$0xf] %v109_v2  ;;  %vm113_vm0 = vcmp.lt.s32.totalorder %v112_v3, 3  ;;  %vm122_vm1 = vcmp.ge.s32.totalorder %v115_v4, %v112_v3  ;;  %vm117_vm2 = vcmp.eq.s32.totalorder %v115_v4, %v112_v3  ;;  %vm136_vm4 = vcmp.eq.s32.totalorder %v112_v3, 0 }
  0x1c   : > { %vm123_vm3 = vmand %vm122_vm1, %vm113_vm0  ;;  %vm133_vm5 = vcmp.eq.s32.totalorder %v112_v3, %v115_v4  ;;  %v137_v12 = vsel %vm136_vm4, 1.0, %v332_v11  ;;  %vm144_vm6 = vcmp.eq.s32.totalorder %v112_v3, 1  ;;  %vm154_vm7 = vcmp.eq.s32.totalorder %v112_v3, 2 }
  0x1d   : > { %v138_v13 = vsel %vm133_vm5, %v137_v12, 0.0 }
  0x22   : > { %v118_v5 = vld [vmem:[#allocation0] sm:$0xff] }
  0x23   : > { %v119_v6 = vsel %vm117_vm2, %v118_v5, 0.0  ;;  %v124_v7 = vsel %vm123_vm3, %v118_v5, 0.0 }
  0x24   : > { %120 = vadd.xlane.f32.xlu0 %v119_v6 }
  0xb1   : > { %v121_v8 = vpop.xlane.xlu0 %120 }
  0xb2   : > { %306 = vrcp.f32 %v121_v8  ;;  %vm161_vm8 = vweird.f32 %v121_v8 }
  0xbc   : > { %v307_v9 = vpop.eup %306 }
  0xbd   : > { %v126_v10 = vmul.f32 %v307_v9, %v124_v7 }
  0xbf   : > { %127 = vst [vmem:[#allocation4] sm:$0xff] %v126_v10 }
  0xc6   : > { %v140_v14 = vld [vmem:[#allocation4 + $0x1] ss:$0 sm:$0xff]  ;;  %v150_v17 = vld [vmem:[#allocation4 + $0x2] ss:$0 sm:$0xff] }
  0xc7   : > { %v141_v15 = vxor.u32 2147483648, %v140_v14  ;;  %v151_v19 = vxor.u32 2147483648, %v150_v17 }
  0xc9   : > { %v145_v16 = vmul.f32 %v141_v15, %v138_v13 }
  0xcb   : > { %146 = vadd.xlane.f32.xlu0 %v145_v16 }
 0x158   : > { %v147_v18 = vpop.xlane.xlu0 %146 }
 0x159   : > { %v148_v20 = vsel %vm144_vm6, %v147_v18, %v138_v13 }
 0x15a   : > { %v155_v21 = vmul.f32 %v151_v19, %v148_v20 }
 0x15c   : > { %156 = vadd.xlane.f32.xlu1 %v155_v21 }
 0x1e9   : > { %v157_v22 = vpop.xlane.xlu1 %156 }
 0x1ea   : > { %v158_v23 = vsel %vm154_vm7, %v157_v22, %v148_v20 }
 0x1eb   : > { %v160_v24 = vmul.f32 %v307_v9, %v158_v23 }
 0x1ed   : > { %v162_v25 = vsel %vm161_vm8, %v158_v23, %v160_v24 }
 0x1ee   : > { %163 = vst [vmem:[#allocation2] sm:$0xff] %v162_v25 }
 0x1f5   : > { %v167_v26 = vld [vmem:[#allocation2] sm:$0xf] }
 0x1f6   : > { %169 = vst [vmem:[%s106_s21] sm:$0xf] %v167_v26 }
 0x1fd   : > { %v194_v27 = vld [vmem:[%s106_s21] sm:$0xf] }
 0x1fe   : > { %195 = vst [vmem:[%s178_s25] sm:$0xf] %v194_v27 }
 0x1ff PF: > { %s7_s8 = sadd.s32 1, %s330_s8   ;;  %s392_s6 = smov %s326_s7 }
 0x200   : > { %p4_p5 = scmp.ge.s32.totalorder %s7_s8, 4   ;;  %s393_s7 = smov %s395_s10 }
 0x202   :  { %6 = sbr.rel (!%p4_p5) target bundleno = 2 (0x2), region = 112 }

// kernel: custom-call.12
= control target key start
LH: loop header
LB: loop body
LE: loop exit
PB: predicated region body
PF: predicated region fallthrough
CT: control target
= control target key end

     0   :  { %s342_s6 = smov 0   ;;  %s344_s7 = smov 0   ;;  %s389_s0 = inlined_call_operand.vmem [shape: f32[2,1,3,3], index: 0, kind: input, shape index: {}]   ;;  %s390_s1 = inlined_call_operand.vmem [shape: f32[2,1,3,3], index: 1, kind: output, shape index: {}]  }
   0x1   :  { %s346_s8 = smov 0  }
   0x2 LB: > { %s268_s9 = sadd.s32 4294967295, %s329_s8   ;;  %s33_s10 = sadd.s32 1, %s325_s7  ;;  %s329_s8 = sphi %s346_s8, %s7_s8   ;;  %s325_s7 = sphi %s344_s7, %s392_s7   ;;  %s321_s6 = sphi %s342_s6, %s391_s6  }
   0x3   : > { %p35_p0 = scmp.ge.s32.totalorder %s33_s10, 2  ;;  %p270_p1 = scmp.ge.s32.totalorder %s329_s8, 2 }
   0x4   : > { %s49_s11 = sand.u32 (!%p270_p1), 1, %s329_s8   ;;  %s272_s12 = sshll.u32 (!%p270_p1), %s325_s7, 2 }
   0x5   : > { %s394_s10 = smov (%p35_p0, %s33_s10), 0  ;;  %47 = sbr.rel (%p270_p1) target bundleno = 12 (0xc), region = 16 }
   0x6   : > { %s271_s13 = sshll.u32 (!%p270_p1), %s49_s11, 2  ;;  %s56_s16 = scalar_lea.vmem (!%p270_p1), %s389_s0, %s272_s12 }
   0x7   : > { %v72_v0 = vld [vmem:[%s56_s16] sm:$0xf] (!%p270_p1)  ;;  %s51_s17 = scalar_lea.vmem (!%p270_p1), [#allocation1], %s271_s13 }
   0x8   : > { %73 = vst [vmem:[%s51_s17] sm:$0xf] (!%p270_p1), %v72_v0 }
   0xc PF: > { %p273_p2 = scmp.ge.s32.totalorder %s329_s8, 1  ;;  %p89_p3 = scmp.lt.s32.totalorder %s329_s8, 3 }
   0xe   : > { %p90_p4 = pnand %p273_p2, %p89_p3 }
  0x10   : > { %93 = sbr.rel (%p90_p4) target bundleno = 511 (0x1ff), region = 50 }
  0x17   : > { %s369_s18 = sand.u32 1, %s268_s9   ;;  %v111_v1 = vlaneseq  ;;  %v331_v11 = vmov -1.0   ;;  %s277_s22 = sshll.u32 %s321_s6, 2 }
  0x18   : > { %s274_s19 = sshll.u32 %s369_s18, 2  ;;  %s177_s25 = scalar_lea.vmem %s390_s1, %s277_s22 }
  0x19   : > { %s102_s20 = scalar_lea.vmem [#allocation1], %s274_s19  ;;  %v112_v3 = vand.u32 127, %v111_v1  ;;  %v115_v4 = vshrl.u32 %v111_v1, 7  ;;  %s106_s21 = scalar_lea.vmem [#allocation3], %s274_s19 }
  0x1a   : > { %v109_v2 = vld [vmem:[%s102_s20] sm:$0xf] }
  0x1b   : > { %110 = vst [vmem:[#allocation0] sm:$0xf] %v109_v2  ;;  %vm113_vm0 = vcmp.lt.s32.totalorder %v112_v3, 3  ;;  %vm122_vm1 = vcmp.le.s32.totalorder %v115_v4, %v112_v3  ;;  %vm117_vm2 = vcmp.eq.s32.totalorder %v115_v4, %v112_v3  ;;  %vm136_vm4 = vcmp.eq.s32.totalorder %v112_v3, 2 }
  0x1c   : > { %vm123_vm3 = vmand %vm122_vm1, %vm113_vm0  ;;  %vm133_vm5 = vcmp.eq.s32.totalorder %v112_v3, %v115_v4  ;;  %v137_v12 = vsel %vm136_vm4, 1.0, %v331_v11  ;;  %vm144_vm6 = vcmp.eq.s32.totalorder %v112_v3, 1  ;;  %vm153_vm7 = vcmp.eq.s32.totalorder %v112_v3, 0 }
  0x1d   : > { %v138_v13 = vsel %vm133_vm5, %v137_v12, 0.0 }
  0x22   : > { %v118_v5 = vld [vmem:[#allocation0] sm:$0xff] }
  0x23   : > { %v119_v6 = vsel %vm117_vm2, %v118_v5, 0.0  ;;  %v124_v7 = vsel %vm123_vm3, %v118_v5, 0.0 }
  0x24   : > { %120 = vadd.xlane.f32.xlu0 %v119_v6 }
  0xb1   : > { %v121_v8 = vpop.xlane.xlu0 %120 }
  0xb2   : > { %305 = vrcp.f32 %v121_v8  ;;  %vm160_vm8 = vweird.f32 %v121_v8 }
  0xbc   : > { %v306_v9 = vpop.eup %305 }
  0xbd   : > { %v126_v10 = vmul.f32 %v306_v9, %v124_v7 }
  0xbf   : > { %127 = vst [vmem:[#allocation4] sm:$0xff] %v126_v10 }
  0xc6   : > { %v140_v14 = vld [vmem:[#allocation4 + $0x1] ss:$0 sm:$0xff]  ;;  %v149_v17 = vld [vmem:[#allocation4] ss:$0 sm:$0xff] }
  0xc7   : > { %v141_v15 = vxor.u32 2147483648, %v140_v14  ;;  %v150_v19 = vxor.u32 2147483648, %v149_v17 }
  0xc9   : > { %v145_v16 = vmul.f32 %v141_v15, %v138_v13 }
  0xcb   : > { %146 = vadd.xlane.f32.xlu0 %v145_v16 }
 0x158   : > { %v147_v18 = vpop.xlane.xlu0 %146 }
 0x159   : > { %v148_v20 = vsel %vm144_vm6, %v147_v18, %v138_v13 }
 0x15a   : > { %v154_v21 = vmul.f32 %v150_v19, %v148_v20 }
 0x15c   : > { %155 = vadd.xlane.f32.xlu1 %v154_v21 }
 0x1e9   : > { %v156_v22 = vpop.xlane.xlu1 %155 }
 0x1ea   : > { %v157_v23 = vsel %vm153_vm7, %v156_v22, %v148_v20 }
 0x1eb   : > { %v159_v24 = vmul.f32 %v306_v9, %v157_v23 }
 0x1ed   : > { %v161_v25 = vsel %vm160_vm8, %v157_v23, %v159_v24 }
 0x1ee   : > { %162 = vst [vmem:[#allocation2] sm:$0xff] %v161_v25 }
 0x1f5   : > { %v166_v26 = vld [vmem:[#allocation2] sm:$0xf] }
 0x1f6   : > { %168 = vst [vmem:[%s106_s21] sm:$0xf] %v166_v26 }
 0x1fd   : > { %v193_v27 = vld [vmem:[%s106_s21] sm:$0xf] }
 0x1fe   : > { %194 = vst [vmem:[%s177_s25] sm:$0xf] %v193_v27 }
 0x1ff PF: > { %s7_s8 = sadd.s32 1, %s329_s8   ;;  %s391_s6 = smov %s325_s7 }
 0x200   : > { %p4_p5 = scmp.ge.s32.totalorder %s7_s8, 4   ;;  %s392_s7 = smov %s394_s10 }
 0x202   :  { %6 = sbr.rel (!%p4_p5) target bundleno = 2 (0x2), region = 111 }

// kernel: sub.0
= control target key start
LH: loop header
LB: loop body
LE: loop exit
PB: predicated region body
PF: predicated region fallthrough
CT: control target
= control target key end

     0   :  { %s3325_s0 = inlined_call_operand.vmem [shape: f32[1152,3], index: 0, kind: input, shape index: {}]   ;;  %s3326_s1 = inlined_call_operand.vmem [shape: f32[1152,3], index: 1, kind: input, shape index: {}]   ;;  %s3327_s2 = inlined_call_operand.vmem [shape: bf16[1152,3], index: 2, kind: output, shape index: {}]  }
   0x1   :  { %v3_v0 = vld [vmem:[%s3325_s0] sm:$0xff]  ;;  %v1800_v2 = vld [vmem:[%s3325_s0 + $0x8] sm:$0xff]  ;;  %v1804_v5 = vld [vmem:[%s3325_s0 + $0x10] sm:$0xff] }
   0x2   :  { %v4_v1 = vld [vmem:[%s3326_s1] sm:$0xff]  ;;  %v1801_v4 = vld [vmem:[%s3326_s1 + $0x8] sm:$0xff]  ;;  %v1805_v6 = vld [vmem:[%s3326_s1 + $0x10] sm:$0xff] }
   0x3   :  { %v7_v3 = vsub.f32 %v3_v0, %v4_v1  ;;  %v15_v7 = vsub.f32 %v1800_v2, %v1801_v4  ;;  %v29_v8 = vsub.f32 %v1804_v5, %v1805_v6  ;;  %v1806_v9 = vld [vmem:[%s3325_s0 + $0x18] sm:$0xff]  ;;  %v1810_v11 = vld [vmem:[%s3325_s0 + $0x20] sm:$0xff]  ;;  %v1812_v14 = vld [vmem:[%s3325_s0 + $0x28] sm:$0xff] }
   0x4   :  { %v1807_v10 = vld [vmem:[%s3326_s1 + $0x18] sm:$0xff]  ;;  %v1811_v13 = vld [vmem:[%s3326_s1 + $0x20] sm:$0xff]  ;;  %v1813_v15 = vld [vmem:[%s3326_s1 + $0x28] sm:$0xff] }
   0x5   :  { %v38_v12 = vsub.f32 %v1806_v9, %v1807_v10  ;;  %v21_v16 = vpack.c.bf16 %v15_v7, %v7_v3  ;;  %v52_v17 = vsub.f32 %v1810_v11, %v1811_v13  ;;  %v61_v18 = vsub.f32 %v1812_v14, %v1813_v15  ;;  %v1816_v19 = vld [vmem:[%s3325_s0 + $0x30] sm:$0xff]  ;;  %v1818_v21 = vld [vmem:[%s3325_s0 + $0x38] sm:$0xff]  ;;  %v1822_v25 = vld [vmem:[%s3325_s0 + $0x40] sm:$0xff] }
   0x6   :  { %v1817_v20 = vld [vmem:[%s3326_s1 + $0x30] sm:$0xff]  ;;  %v1819_v24 = vld [vmem:[%s3326_s1 + $0x38] sm:$0xff]  ;;  %v1823_v26 = vld [vmem:[%s3326_s1 + $0x40] sm:$0xff] }
   0x7   :  { %v44_v22 = vpack.c.bf16 %v38_v12, %v29_v8  ;;  %v75_v23 = vsub.f32 %v1816_v19, %v1817_v20  ;;  %1803 = vst [vmem:[%s3327_s2] sm:$0xff] %v21_v16  ;;  %v67_v27 = vpack.c.bf16 %v61_v18, %v52_v17  ;;  %v84_v28 = vsub.f32 %v1818_v21, %v1819_v24  ;;  %v1824_v30 = vld [vmem:[%s3325_s0 + $0x48] sm:$0xff]  ;;  %v1828_v32 = vld [vmem:[%s3325_s0 + $0x50] sm:$0xff]  ;;  %v1830_v35 = vld [vmem:[%s3325_s0 + $0x58] sm:$0xff] }
   0x8   :  { %v98_v29 = vsub.f32 %v1822_v25, %v1823_v26  ;;  %v1825_v31 = vld [vmem:[%s3326_s1 + $0x48] sm:$0xff]  ;;  %v1829_v34 = vld [vmem:[%s3326_s1 + $0x50] sm:$0xff]  ;;  %v1831_v36 = vld [vmem:[%s3326_s1 + $0x58] sm:$0xff] }
   0x9   :  { %1809 = vst [vmem:[%s3327_s2 + $0x8] sm:$0xff] %v44_v22  ;;  %v107_v33 = vsub.f32 %v1824_v30, %v1825_v31  ;;  %1815 = vst [vmem:[%s3327_s2 + $0x10] sm:$0xff] %v67_v27  ;;  %v90_v37 = vpack.c.bf16 %v84_v28, %v75_v23  ;;  %v121_v38 = vsub.f32 %v1828_v32, %v1829_v34  ;;  %v1834_v40 = vld [vmem:[%s3325_s0 + $0x60] sm:$0xff]  ;;  %v1836_v42 = vld [vmem:[%s3325_s0 + $0x68] sm:$0xff] }
   0xa   :  { %v130_v39 = vsub.f32 %v1830_v35, %v1831_v36  ;;  %v1835_v41 = vld [vmem:[%s3326_s1 + $0x60] sm:$0xff]  ;;  %v1837_v45 = vld [vmem:[%s3326_s1 + $0x68] sm:$0xff]  ;;  %v1840_v46 = vld [vmem:[%s3325_s0 + $0x70] sm:$0xff] }
   0xb   :  { %v113_v43 = vpack.c.bf16 %v107_v33, %v98_v29  ;;  %v144_v44 = vsub.f32 %v1834_v40, %v1835_v41  ;;  %v1841_v47 = vld [vmem:[%s3326_s1 + $0x70] sm:$0xff]  ;;  %1821 = vst [vmem:[%s3327_s2 + $0x18] sm:$0xff] %v90_v37  ;;  %v153_v49 = vsub.f32 %v1836_v42, %v1837_v45  ;;  %v1842_v51 = vld [vmem:[%s3325_s0 + $0x78] sm:$0xff]  ;;  %v1846_v53 = vld [vmem:[%s3325_s0 + $0x80] sm:$0xff] }
   0xc   :  { %v136_v48 = vpack.c.bf16 %v130_v39, %v121_v38  ;;  %v167_v50 = vsub.f32 %v1840_v46, %v1841_v47  ;;  %v1843_v52 = vld [vmem:[%s3326_s1 + $0x78] sm:$0xff]  ;;  %v1847_v55 = vld [vmem:[%s3326_s1 + $0x80] sm:$0xff]  ;;  %v1848_v56 = vld [vmem:[%s3325_s0 + $0x88] sm:$0xff] }
   0xd   :  { %1827 = vst [vmem:[%s3327_s2 + $0x20] sm:$0xff] %v113_v43  ;;  %v176_v54 = vsub.f32 %v1842_v51, %v1843_v52  ;;  %v1849_v57 = vld [vmem:[%s3326_s1 + $0x88] sm:$0xff]  ;;  %v159_v58 = vpack.c.bf16 %v153_v49, %v144_v44  ;;  %v190_v59 = vsub.f32 %v1846_v53, %v1847_v55  ;;  %v1852_v61 = vld [vmem:[%s3325_s0 + $0x90] sm:$0xff]  ;;  %v1854_v63 = vld [vmem:[%s3325_s0 + $0x98] sm:$0xff] }
   0xe   :  { %1833 = vst [vmem:[%s3327_s2 + $0x28] sm:$0xff] %v136_v48  ;;  %v199_v60 = vsub.f32 %v1848_v56, %v1849_v57  ;;  %v1853_v62 = vld [vmem:[%s3326_s1 + $0x90] sm:$0xff]  ;;  %v1855_v2 = vld [vmem:[%s3326_s1 + $0x98] sm:$0xff]  ;;  %v1858_v3 = vld [vmem:[%s3325_s0 + $0xa0] sm:$0xff] }
   0xf   :  { %v182_v0 = vpack.c.bf16 %v176_v54, %v167_v50  ;;  %v213_v1 = vsub.f32 %v1852_v61, %v1853_v62  ;;  %v1859_v4 = vld [vmem:[%s3326_s1 + $0xa0] sm:$0xff]  ;;  %1839 = vst [vmem:[%s3327_s2 + $0x30] sm:$0xff] %v159_v58  ;;  %v222_v6 = vsub.f32 %v1854_v63, %v1855_v2  ;;  %v1860_v8 = vld [vmem:[%s3325_s0 + $0xa8] sm:$0xff]  ;;  %v1864_v10 = vld [vmem:[%s3325_s0 + $0xb0] sm:$0xff] }
  0x10   :  { %v205_v5 = vpack.c.bf16 %v199_v60, %v190_v59  ;;  %v236_v7 = vsub.f32 %v1858_v3, %v1859_v4  ;;  %v1861_v9 = vld [vmem:[%s3326_s1 + $0xa8] sm:$0xff]  ;;  %v1865_v12 = vld [vmem:[%s3326_s1 + $0xb0] sm:$0xff]  ;;  %v1866_v13 = vld [vmem:[%s3325_s0 + $0xb8] sm:$0xff] }
  0x11   :  { %1845 = vst [vmem:[%s3327_s2 + $0x38] sm:$0xff] %v182_v0  ;;  %v245_v11 = vsub.f32 %v1860_v8, %v1861_v9  ;;  %v1867_v14 = vld [vmem:[%s3326_s1 + $0xb8] sm:$0xff]  ;;  %v228_v15 = vpack.c.bf16 %v222_v6, %v213_v1  ;;  %v259_v16 = vsub.f32 %v1864_v10, %v1865_v12  ;;  %v1870_v18 = vld [vmem:[%s3325_s0 + $0xc0] sm:$0xff]  ;;  %v1872_v20 = vld [vmem:[%s3325_s0 + $0xc8] sm:$0xff] }
  0x12   :  { %1851 = vst [vmem:[%s3327_s2 + $0x40] sm:$0xff] %v205_v5  ;;  %v268_v17 = vsub.f32 %v1866_v13, %v1867_v14  ;;  %v1871_v19 = vld [vmem:[%s3326_s1 + $0xc0] sm:$0xff]  ;;  %v1873_v23 = vld [vmem:[%s3326_s1 + $0xc8] sm:$0xff]  ;;  %v1876_v24 = vld [vmem:[%s3325_s0 + $0xd0] sm:$0xff] }
  0x13   :  { %v251_v21 = vpack.c.bf16 %v245_v11, %v236_v7  ;;  %v282_v22 = vsub.f32 %v1870_v18, %v1871_v19  ;;  %v1877_v25 = vld [vmem:[%s3326_s1 + $0xd0] sm:$0xff]  ;;  %1857 = vst [vmem:[%s3327_s2 + $0x48] sm:$0xff] %v228_v15  ;;  %v291_v27 = vsub.f32 %v1872_v20, %v1873_v23  ;;  %v1878_v29 = vld [vmem:[%s3325_s0 + $0xd8] sm:$0xff]  ;;  %v1882_v31 = vld [vmem:[%s3325_s0 + $0xe0] sm:$0xff] }
  0x14   :  { %v274_v26 = vpack.c.bf16 %v268_v17, %v259_v16  ;;  %v305_v28 = vsub.f32 %v1876_v24, %v1877_v25  ;;  %v1879_v30 = vld [vmem:[%s3326_s1 + $0xd8] sm:$0xff]  ;;  %v1883_v33 = vld [vmem:[%s3326_s1 + $0xe0] sm:$0xff]  ;;  %v1884_v34 = vld [vmem:[%s3325_s0 + $0xe8] sm:$0xff] }
  0x15   :  { %1863 = vst [vmem:[%s3327_s2 + $0x50] sm:$0xff] %v251_v21  ;;  %v314_v32 = vsub.f32 %v1878_v29, %v1879_v30  ;;  %v1885_v35 = vld [vmem:[%s3326_s1 + $0xe8] sm:$0xff]  ;;  %v297_v36 = vpack.c.bf16 %v291_v27, %v282_v22  ;;  %v328_v37 = vsub.f32 %v1882_v31, %v1883_v33  ;;  %v1888_v39 = vld [vmem:[%s3325_s0 + $0xf0] sm:$0xff]  ;;  %v1890_v41 = vld [vmem:[%s3325_s0 + $0xf8] sm:$0xff] }
  0x16   :  { %1869 = vst [vmem:[%s3327_s2 + $0x58] sm:$0xff] %v274_v26  ;;  %v337_v38 = vsub.f32 %v1884_v34, %v1885_v35  ;;  %v1889_v40 = vld [vmem:[%s3326_s1 + $0xf0] sm:$0xff]  ;;  %v1891_v44 = vld [vmem:[%s3326_s1 + $0xf8] sm:$0xff]  ;;  %v1894_v45 = vld [vmem:[%s3325_s0 + $0x100] sm:$0xff] }
  0x17   :  { %v320_v42 = vpack.c.bf16 %v314_v32, %v305_v28  ;;  %v351_v43 = vsub.f32 %v1888_v39, %v1889_v40  ;;  %v1895_v46 = vld [vmem:[%s3326_s1 + $0x100] sm:$0xff]  ;;  %1875 = vst [vmem:[%s3327_s2 + $0x60] sm:$0xff] %v297_v36  ;;  %v360_v48 = vsub.f32 %v1890_v41, %v1891_v44  ;;  %v1896_v50 = vld [vmem:[%s3325_s0 + $0x108] sm:$0xff]  ;;  %v1900_v52 = vld [vmem:[%s3325_s0 + $0x110] sm:$0xff] }
  0x18   :  { %v343_v47 = vpack.c.bf16 %v337_v38, %v328_v37  ;;  %v374_v49 = vsub.f32 %v1894_v45, %v1895_v46  ;;  %v1897_v51 = vld [vmem:[%s3326_s1 + $0x108] sm:$0xff]  ;;  %v1901_v54 = vld [vmem:[%s3326_s1 + $0x110] sm:$0xff]  ;;  %v1902_v55 = vld [vmem:[%s3325_s0 + $0x118] sm:$0xff] }
  0x19   :  { %1881 = vst [vmem:[%s3327_s2 + $0x68] sm:$0xff] %v320_v42  ;;  %v383_v53 = vsub.f32 %v1896_v50, %v1897_v51  ;;  %v1903_v56 = vld [vmem:[%s3326_s1 + $0x118] sm:$0xff]  ;;  %v366_v57 = vpack.c.bf16 %v360_v48, %v351_v43  ;;  %v397_v58 = vsub.f32 %v1900_v52, %v1901_v54  ;;  %v1906_v60 = vld [vmem:[%s3325_s0 + $0x120] sm:$0xff]  ;;  %v1908_v62 = vld [vmem:[%s3325_s0 + $0x128] sm:$0xff] }
  0x1a   :  { %1887 = vst [vmem:[%s3327_s2 + $0x70] sm:$0xff] %v343_v47  ;;  %v406_v59 = vsub.f32 %v1902_v55, %v1903_v56  ;;  %v1907_v61 = vld [vmem:[%s3326_s1 + $0x120] sm:$0xff]  ;;  %v1909_v1 = vld [vmem:[%s3326_s1 + $0x128] sm:$0xff]  ;;  %v1912_v2 = vld [vmem:[%s3325_s0 + $0x130] sm:$0xff] }
  0x1b   :  { %v389_v63 = vpack.c.bf16 %v383_v53, %v374_v49  ;;  %v420_v0 = vsub.f32 %v1906_v60, %v1907_v61  ;;  %v1913_v3 = vld [vmem:[%s3326_s1 + $0x130] sm:$0xff]  ;;  %1893 = vst [vmem:[%s3327_s2 + $0x78] sm:$0xff] %v366_v57  ;;  %v429_v5 = vsub.f32 %v1908_v62, %v1909_v1  ;;  %v1914_v7 = vld [vmem:[%s3325_s0 + $0x138] sm:$0xff]  ;;  %v1918_v9 = vld [vmem:[%s3325_s0 + $0x140] sm:$0xff] }
  0x1c   :  { %v412_v4 = vpack.c.bf16 %v406_v59, %v397_v58  ;;  %v443_v6 = vsub.f32 %v1912_v2, %v1913_v3  ;;  %v1915_v8 = vld [vmem:[%s3326_s1 + $0x138] sm:$0xff]  ;;  %v1919_v11 = vld [vmem:[%s3326_s1 + $0x140] sm:$0xff]  ;;  %v1920_v12 = vld [vmem:[%s3325_s0 + $0x148] sm:$0xff] }
  0x1d   :  { %1899 = vst [vmem:[%s3327_s2 + $0x80] sm:$0xff] %v389_v63  ;;  %v452_v10 = vsub.f32 %v1914_v7, %v1915_v8  ;;  %v1921_v13 = vld [vmem:[%s3326_s1 + $0x148] sm:$0xff]  ;;  %v435_v14 = vpack.c.bf16 %v429_v5, %v420_v0  ;;  %v466_v15 = vsub.f32 %v1918_v9, %v1919_v11  ;;  %v1924_v17 = vld [vmem:[%s3325_s0 + $0x150] sm:$0xff]  ;;  %v1926_v19 = vld [vmem:[%s3325_s0 + $0x158] sm:$0xff] }
  0x1e   :  { %1905 = vst [vmem:[%s3327_s2 + $0x88] sm:$0xff] %v412_v4  ;;  %v475_v16 = vsub.f32 %v1920_v12, %v1921_v13  ;;  %v1925_v18 = vld [vmem:[%s3326_s1 + $0x150] sm:$0xff]  ;;  %v1927_v22 = vld [vmem:[%s3326_s1 + $0x158] sm:$0xff]  ;;  %v1930_v23 = vld [vmem:[%s3325_s0 + $0x160] sm:$0xff] }
  0x1f   :  { %v458_v20 = vpack.c.bf16 %v452_v10, %v443_v6  ;;  %v489_v21 = vsub.f32 %v1924_v17, %v1925_v18  ;;  %v1931_v24 = vld [vmem:[%s3326_s1 + $0x160] sm:$0xff]  ;;  %1911 = vst [vmem:[%s3327_s2 + $0x90] sm:$0xff] %v435_v14  ;;  %v498_v26 = vsub.f32 %v1926_v19, %v1927_v22  ;;  %v1932_v28 = vld [vmem:[%s3325_s0 + $0x168] sm:$0xff]  ;;  %v1936_v30 = vld [vmem:[%s3325_s0 + $0x170] sm:$0xff] }
  0x20   :  { %v481_v25 = vpack.c.bf16 %v475_v16, %v466_v15  ;;  %v512_v27 = vsub.f32 %v1930_v23, %v1931_v24  ;;  %v1933_v29 = vld [vmem:[%s3326_s1 + $0x168] sm:$0xff]  ;;  %v1937_v32 = vld [vmem:[%s3326_s1 + $0x170] sm:$0xff]  ;;  %v1938_v33 = vld [vmem:[%s3325_s0 + $0x178] sm:$0xff] }
  0x21   :  { %1917 = vst [vmem:[%s3327_s2 + $0x98] sm:$0xff] %v458_v20  ;;  %v521_v31 = vsub.f32 %v1932_v28, %v1933_v29  ;;  %v1939_v34 = vld [vmem:[%s3326_s1 + $0x178] sm:$0xff]  ;;  %v504_v35 = vpack.c.bf16 %v498_v26, %v489_v21  ;;  %v535_v36 = vsub.f32 %v1936_v30, %v1937_v32  ;;  %v1942_v38 = vld [vmem:[%s3325_s0 + $0x180] sm:$0xff]  ;;  %v1944_v40 = vld [vmem:[%s3325_s0 + $0x188] sm:$0xff] }
  0x22   :  { %1923 = vst [vmem:[%s3327_s2 + $0xa0] sm:$0xff] %v481_v25  ;;  %v544_v37 = vsub.f32 %v1938_v33, %v1939_v34  ;;  %v1943_v39 = vld [vmem:[%s3326_s1 + $0x180] sm:$0xff]  ;;  %v1945_v43 = vld [vmem:[%s3326_s1 + $0x188] sm:$0xff]  ;;  %v1948_v44 = vld [vmem:[%s3325_s0 + $0x190] sm:$0xff] }
  0x23   :  { %v527_v41 = vpack.c.bf16 %v521_v31, %v512_v27  ;;  %v558_v42 = vsub.f32 %v1942_v38, %v1943_v39  ;;  %v1949_v45 = vld [vmem:[%s3326_s1 + $0x190] sm:$0xff]  ;;  %1929 = vst [vmem:[%s3327_s2 + $0xa8] sm:$0xff] %v504_v35  ;;  %v567_v47 = vsub.f32 %v1944_v40, %v1945_v43  ;;  %v1950_v49 = vld [vmem:[%s3325_s0 + $0x198] sm:$0xff]  ;;  %v1954_v51 = vld [vmem:[%s3325_s0 + $0x1a0] sm:$0xff] }
  0x24   :  { %v550_v46 = vpack.c.bf16 %v544_v37, %v535_v36  ;;  %v581_v48 = vsub.f32 %v1948_v44, %v1949_v45  ;;  %v1951_v50 = vld [vmem:[%s3326_s1 + $0x198] sm:$0xff]  ;;  %v1955_v53 = vld [vmem:[%s3326_s1 + $0x1a0] sm:$0xff]  ;;  %v1956_v54 = vld [vmem:[%s3325_s0 + $0x1a8] sm:$0xff] }
  0x25   :  { %1935 = vst [vmem:[%s3327_s2 + $0xb0] sm:$0xff] %v527_v41  ;;  %v590_v52 = vsub.f32 %v1950_v49, %v1951_v50  ;;  %v1957_v55 = vld [vmem:[%s3326_s1 + $0x1a8] sm:$0xff]  ;;  %v573_v56 = vpack.c.bf16 %v567_v47, %v558_v42  ;;  %v604_v57 = vsub.f32 %v1954_v51, %v1955_v53  ;;  %v1960_v59 = vld [vmem:[%s3325_s0 + $0x1b0] sm:$0xff]  ;;  %v1962_v61 = vld [vmem:[%s3325_s0 + $0x1b8] sm:$0xff] }
  0x26   :  { %1941 = vst [vmem:[%s3327_s2 + $0xb8] sm:$0xff] %v550_v46  ;;  %v613_v58 = vsub.f32 %v1956_v54, %v1957_v55  ;;  %v1961_v60 = vld [vmem:[%s3326_s1 + $0x1b0] sm:$0xff]  ;;  %v1963_v0 = vld [vmem:[%s3326_s1 + $0x1b8] sm:$0xff]  ;;  %v1966_v1 = vld [vmem:[%s3325_s0 + $0x1c0] sm:$0xff] }
  0x27   :  { %v596_v62 = vpack.c.bf16 %v590_v52, %v581_v48  ;;  %v627_v63 = vsub.f32 %v1960_v59, %v1961_v60  ;;  %v1967_v2 = vld [vmem:[%s3326_s1 + $0x1c0] sm:$0xff]  ;;  %1947 = vst [vmem:[%s3327_s2 + $0xc0] sm:$0xff] %v573_v56  ;;  %v636_v4 = vsub.f32 %v1962_v61, %v1963_v0  ;;  %v1968_v6 = vld [vmem:[%s3325_s0 + $0x1c8] sm:$0xff]  ;;  %v1972_v8 = vld [vmem:[%s3325_s0 + $0x1d0] sm:$0xff] }
  0x28   :  { %v619_v3 = vpack.c.bf16 %v613_v58, %v604_v57  ;;  %v650_v5 = vsub.f32 %v1966_v1, %v1967_v2  ;;  %v1969_v7 = vld [vmem:[%s3326_s1 + $0x1c8] sm:$0xff]  ;;  %v1973_v10 = vld [vmem:[%s3326_s1 + $0x1d0] sm:$0xff]  ;;  %v1974_v11 = vld [vmem:[%s3325_s0 + $0x1d8] sm:$0xff] }
  0x29   :  { %1953 = vst [vmem:[%s3327_s2 + $0xc8] sm:$0xff] %v596_v62  ;;  %v659_v9 = vsub.f32 %v1968_v6, %v1969_v7  ;;  %v1975_v12 = vld [vmem:[%s3326_s1 + $0x1d8] sm:$0xff]  ;;  %v642_v13 = vpack.c.bf16 %v636_v4, %v627_v63  ;;  %v673_v14 = vsub.f32 %v1972_v8, %v1973_v10  ;;  %v1978_v16 = vld [vmem:[%s3325_s0 + $0x1e0] sm:$0xff]  ;;  %v1980_v18 = vld [vmem:[%s3325_s0 + $0x1e8] sm:$0xff] }
  0x2a   :  { %1959 = vst [vmem:[%s3327_s2 + $0xd0] sm:$0xff] %v619_v3  ;;  %v682_v15 = vsub.f32 %v1974_v11, %v1975_v12  ;;  %v1979_v17 = vld [vmem:[%s3326_s1 + $0x1e0] sm:$0xff]  ;;  %v1981_v21 = vld [vmem:[%s3326_s1 + $0x1e8] sm:$0xff]  ;;  %v1984_v22 = vld [vmem:[%s3325_s0 + $0x1f0] sm:$0xff] }
  0x2b   :  { %v665_v19 = vpack.c.bf16 %v659_v9, %v650_v5  ;;  %v696_v20 = vsub.f32 %v1978_v16, %v1979_v17  ;;  %v1985_v23 = vld [vmem:[%s3326_s1 + $0x1f0] sm:$0xff]  ;;  %1965 = vst [vmem:[%s3327_s2 + $0xd8] sm:$0xff] %v642_v13  ;;  %v705_v25 = vsub.f32 %v1980_v18, %v1981_v21  ;;  %v1986_v27 = vld [vmem:[%s3325_s0 + $0x1f8] sm:$0xff]  ;;  %v1990_v29 = vld [vmem:[%s3325_s0 + $0x200] sm:$0xff] }
  0x2c   :  { %v688_v24 = vpack.c.bf16 %v682_v15, %v673_v14  ;;  %v719_v26 = vsub.f32 %v1984_v22, %v1985_v23  ;;  %v1987_v28 = vld [vmem:[%s3326_s1 + $0x1f8] sm:$0xff]  ;;  %v1991_v31 = vld [vmem:[%s3326_s1 + $0x200] sm:$0xff]  ;;  %v1992_v32 = vld [vmem:[%s3325_s0 + $0x208] sm:$0xff] }
  0x2d   :  { %1971 = vst [vmem:[%s3327_s2 + $0xe0] sm:$0xff] %v665_v19  ;;  %v728_v30 = vsub.f32 %v1986_v27, %v1987_v28  ;;  %v1993_v33 = vld [vmem:[%s3326_s1 + $0x208] sm:$0xff]  ;;  %v711_v34 = vpack.c.bf16 %v705_v25, %v696_v20  ;;  %v742_v35 = vsub.f32 %v1990_v29, %v1991_v31  ;;  %v1996_v37 = vld [vmem:[%s3325_s0 + $0x210] sm:$0xff]  ;;  %v1998_v39 = vld [vmem:[%s3325_s0 + $0x218] sm:$0xff] }
  0x2e   :  { %1977 = vst [vmem:[%s3327_s2 + $0xe8] sm:$0xff] %v688_v24  ;;  %v751_v36 = vsub.f32 %v1992_v32, %v1993_v33  ;;  %v1997_v38 = vld [vmem:[%s3326_s1 + $0x210] sm:$0xff]  ;;  %v1999_v42 = vld [vmem:[%s3326_s1 + $0x218] sm:$0xff]  ;;  %v2002_v43 = vld [vmem:[%s3325_s0 + $0x220] sm:$0xff] }
  0x2f   :  { %v734_v40 = vpack.c.bf16 %v728_v30, %v719_v26  ;;  %v765_v41 = vsub.f32 %v1996_v37, %v1997_v38  ;;  %v2003_v44 = vld [vmem:[%s3326_s1 + $0x220] sm:$0xff]  ;;  %1983 = vst [vmem:[%s3327_s2 + $0xf0] sm:$0xff] %v711_v34  ;;  %v774_v46 = vsub.f32 %v1998_v39, %v1999_v42  ;;  %v2004_v48 = vld [vmem:[%s3325_s0 + $0x228] sm:$0xff]  ;;  %v2008_v50 = vld [vmem:[%s3325_s0 + $0x230] sm:$0xff] }
  0x30   :  { %v757_v45 = vpack.c.bf16 %v751_v36, %v742_v35  ;;  %v788_v47 = vsub.f32 %v2002_v43, %v2003_v44  ;;  %v2005_v49 = vld [vmem:[%s3326_s1 + $0x228] sm:$0xff]  ;;  %v2009_v52 = vld [vmem:[%s3326_s1 + $0x230] sm:$0xff]  ;;  %v2010_v53 = vld [vmem:[%s3325_s0 + $0x238] sm:$0xff] }
  0x31   :  { %1989 = vst [vmem:[%s3327_s2 + $0xf8] sm:$0xff] %v734_v40  ;;  %v797_v51 = vsub.f32 %v2004_v48, %v2005_v49  ;;  %v2011_v54 = vld [vmem:[%s3326_s1 + $0x238] sm:$0xff]  ;;  %v780_v55 = vpack.c.bf16 %v774_v46, %v765_v41  ;;  %v811_v56 = vsub.f32 %v2008_v50, %v2009_v52  ;;  %v2014_v58 = vld [vmem:[%s3325_s0 + $0x240] sm:$0xff]  ;;  %v2016_v60 = vld [vmem:[%s3325_s0 + $0x248] sm:$0xff] }
  0x32   :  { %1995 = vst [vmem:[%s3327_s2 + $0x100] sm:$0xff] %v757_v45  ;;  %v820_v57 = vsub.f32 %v2010_v53, %v2011_v54  ;;  %v2015_v59 = vld [vmem:[%s3326_s1 + $0x240] sm:$0xff]  ;;  %v2017_v63 = vld [vmem:[%s3326_s1 + $0x248] sm:$0xff]  ;;  %v2020_v0 = vld [vmem:[%s3325_s0 + $0x250] sm:$0xff] }
  0x33   :  { %v803_v61 = vpack.c.bf16 %v797_v51, %v788_v47  ;;  %v834_v62 = vsub.f32 %v2014_v58, %v2015_v59  ;;  %v2021_v1 = vld [vmem:[%s3326_s1 + $0x250] sm:$0xff]  ;;  %2001 = vst [vmem:[%s3327_s2 + $0x108] sm:$0xff] %v780_v55  ;;  %v843_v3 = vsub.f32 %v2016_v60, %v2017_v63  ;;  %v2022_v5 = vld [vmem:[%s3325_s0 + $0x258] sm:$0xff]  ;;  %v2026_v7 = vld [vmem:[%s3325_s0 + $0x260] sm:$0xff] }
  0x34   :  { %v826_v2 = vpack.c.bf16 %v820_v57, %v811_v56  ;;  %v857_v4 = vsub.f32 %v2020_v0, %v2021_v1  ;;  %v2023_v6 = vld [vmem:[%s3326_s1 + $0x258] sm:$0xff]  ;;  %v2027_v9 = vld [vmem:[%s3326_s1 + $0x260] sm:$0xff]  ;;  %v2028_v10 = vld [vmem:[%s3325_s0 + $0x268] sm:$0xff] }
  0x35   :  { %2007 = vst [vmem:[%s3327_s2 + $0x110] sm:$0xff] %v803_v61  ;;  %v866_v8 = vsub.f32 %v2022_v5, %v2023_v6  ;;  %v2029_v11 = vld [vmem:[%s3326_s1 + $0x268] sm:$0xff]  ;;  %v849_v12 = vpack.c.bf16 %v843_v3, %v834_v62  ;;  %v880_v13 = vsub.f32 %v2026_v7, %v2027_v9  ;;  %v2032_v15 = vld [vmem:[%s3325_s0 + $0x270] sm:$0xff]  ;;  %v2034_v17 = vld [vmem:[%s3325_s0 + $0x278] sm:$0xff] }
  0x36   :  { %2013 = vst [vmem:[%s3327_s2 + $0x118] sm:$0xff] %v826_v2  ;;  %v889_v14 = vsub.f32 %v2028_v10, %v2029_v11  ;;  %v2033_v16 = vld [vmem:[%s3326_s1 + $0x270] sm:$0xff]  ;;  %v2035_v20 = vld [vmem:[%s3326_s1 + $0x278] sm:$0xff]  ;;  %v2038_v21 = vld [vmem:[%s3325_s0 + $0x280] sm:$0xff] }
  0x37   :  { %v872_v18 = vpack.c.bf16 %v866_v8, %v857_v4  ;;  %v903_v19 = vsub.f32 %v2032_v15, %v2033_v16  ;;  %v2039_v22 = vld [vmem:[%s3326_s1 + $0x280] sm:$0xff]  ;;  %2019 = vst [vmem:[%s3327_s2 + $0x120] sm:$0xff] %v849_v12  ;;  %v912_v24 = vsub.f32 %v2034_v17, %v2035_v20  ;;  %v2040_v26 = vld [vmem:[%s3325_s0 + $0x288] sm:$0xff]  ;;  %v2044_v28 = vld [vmem:[%s3325_s0 + $0x290] sm:$0xff] }
  0x38   :  { %v895_v23 = vpack.c.bf16 %v889_v14, %v880_v13  ;;  %v926_v25 = vsub.f32 %v2038_v21, %v2039_v22  ;;  %v2041_v27 = vld [vmem:[%s3326_s1 + $0x288] sm:$0xff]  ;;  %v2045_v30 = vld [vmem:[%s3326_s1 + $0x290] sm:$0xff]  ;;  %v2046_v31 = vld [vmem:[%s3325_s0 + $0x298] sm:$0xff] }
  0x39   :  { %2025 = vst [vmem:[%s3327_s2 + $0x128] sm:$0xff] %v872_v18  ;;  %v935_v29 = vsub.f32 %v2040_v26, %v2041_v27  ;;  %v2047_v32 = vld [vmem:[%s3326_s1 + $0x298] sm:$0xff]  ;;  %v918_v33 = vpack.c.bf16 %v912_v24, %v903_v19  ;;  %v949_v34 = vsub.f32 %v2044_v28, %v2045_v30  ;;  %v2050_v36 = vld [vmem:[%s3325_s0 + $0x2a0] sm:$0xff]  ;;  %v2052_v38 = vld [vmem:[%s3325_s0 + $0x2a8] sm:$0xff] }
  0x3a   :  { %2031 = vst [vmem:[%s3327_s2 + $0x130] sm:$0xff] %v895_v23  ;;  %v958_v35 = vsub.f32 %v2046_v31, %v2047_v32  ;;  %v2051_v37 = vld [vmem:[%s3326_s1 + $0x2a0] sm:$0xff]  ;;  %v2053_v41 = vld [vmem:[%s3326_s1 + $0x2a8] sm:$0xff]  ;;  %v2056_v42 = vld [vmem:[%s3325_s0 + $0x2b0] sm:$0xff] }
  0x3b   :  { %v941_v39 = vpack.c.bf16 %v935_v29, %v926_v25  ;;  %v972_v40 = vsub.f32 %v2050_v36, %v2051_v37  ;;  %v2057_v43 = vld [vmem:[%s3326_s1 + $0x2b0] sm:$0xff]  ;;  %2037 = vst [vmem:[%s3327_s2 + $0x138] sm:$0xff] %v918_v33  ;;  %v981_v45 = vsub.f32 %v2052_v38, %v2053_v41  ;;  %v2058_v47 = vld [vmem:[%s3325_s0 + $0x2b8] sm:$0xff]  ;;  %v2062_v49 = vld [vmem:[%s3325_s0 + $0x2c0] sm:$0xff] }
  0x3c   :  { %v964_v44 = vpack.c.bf16 %v958_v35, %v949_v34  ;;  %v995_v46 = vsub.f32 %v2056_v42, %v2057_v43  ;;  %v2059_v48 = vld [vmem:[%s3326_s1 + $0x2b8] sm:$0xff]  ;;  %v2063_v51 = vld [vmem:[%s3326_s1 + $0x2c0] sm:$0xff]  ;;  %v2064_v52 = vld [vmem:[%s3325_s0 + $0x2c8] sm:$0xff] }
  0x3d   :  { %2043 = vst [vmem:[%s3327_s2 + $0x140] sm:$0xff] %v941_v39  ;;  %v1004_v50 = vsub.f32 %v2058_v47, %v2059_v48  ;;  %v2065_v53 = vld [vmem:[%s3326_s1 + $0x2c8] sm:$0xff]  ;;  %v987_v54 = vpack.c.bf16 %v981_v45, %v972_v40  ;;  %v1018_v55 = vsub.f32 %v2062_v49, %v2063_v51  ;;  %v2068_v57 = vld [vmem:[%s3325_s0 + $0x2d0] sm:$0xff]  ;;  %v2070_v59 = vld [vmem:[%s3325_s0 + $0x2d8] sm:$0xff] }
  0x3e   :  { %2049 = vst [vmem:[%s3327_s2 + $0x148] sm:$0xff] %v964_v44  ;;  %v1027_v56 = vsub.f32 %v2064_v52, %v2065_v53  ;;  %v2069_v58 = vld [vmem:[%s3326_s1 + $0x2d0] sm:$0xff]  ;;  %v2071_v62 = vld [vmem:[%s3326_s1 + $0x2d8] sm:$0xff]  ;;  %v2074_v63 = vld [vmem:[%s3325_s0 + $0x2e0] sm:$0xff] }
  0x3f   :  { %v1010_v60 = vpack.c.bf16 %v1004_v50, %v995_v46  ;;  %v1041_v61 = vsub.f32 %v2068_v57, %v2069_v58  ;;  %v2075_v0 = vld [vmem:[%s3326_s1 + $0x2e0] sm:$0xff]  ;;  %2055 = vst [vmem:[%s3327_s2 + $0x150] sm:$0xff] %v987_v54  ;;  %v1050_v2 = vsub.f32 %v2070_v59, %v2071_v62  ;;  %v2076_v4 = vld [vmem:[%s3325_s0 + $0x2e8] sm:$0xff]  ;;  %v2080_v6 = vld [vmem:[%s3325_s0 + $0x2f0] sm:$0xff] }
  0x40   :  { %v1033_v1 = vpack.c.bf16 %v1027_v56, %v1018_v55  ;;  %v1064_v3 = vsub.f32 %v2074_v63, %v2075_v0  ;;  %v2077_v5 = vld [vmem:[%s3326_s1 + $0x2e8] sm:$0xff]  ;;  %v2081_v8 = vld [vmem:[%s3326_s1 + $0x2f0] sm:$0xff]  ;;  %v2082_v9 = vld [vmem:[%s3325_s0 + $0x2f8] sm:$0xff] }
  0x41   :  { %2061 = vst [vmem:[%s3327_s2 + $0x158] sm:$0xff] %v1010_v60  ;;  %v1073_v7 = vsub.f32 %v2076_v4, %v2077_v5  ;;  %v2083_v10 = vld [vmem:[%s3326_s1 + $0x2f8] sm:$0xff]  ;;  %v1056_v11 = vpack.c.bf16 %v1050_v2, %v1041_v61  ;;  %v1087_v12 = vsub.f32 %v2080_v6, %v2081_v8  ;;  %v2086_v14 = vld [vmem:[%s3325_s0 + $0x300] sm:$0xff]  ;;  %v2088_v16 = vld [vmem:[%s3325_s0 + $0x308] sm:$0xff] }
  0x42   :  { %2067 = vst [vmem:[%s3327_s2 + $0x160] sm:$0xff] %v1033_v1  ;;  %v1096_v13 = vsub.f32 %v2082_v9, %v2083_v10  ;;  %v2087_v15 = vld [vmem:[%s3326_s1 + $0x300] sm:$0xff]  ;;  %v2089_v19 = vld [vmem:[%s3326_s1 + $0x308] sm:$0xff]  ;;  %v2092_v20 = vld [vmem:[%s3325_s0 + $0x310] sm:$0xff] }
  0x43   :  { %v1079_v17 = vpack.c.bf16 %v1073_v7, %v1064_v3  ;;  %v1110_v18 = vsub.f32 %v2086_v14, %v2087_v15  ;;  %v2093_v21 = vld [vmem:[%s3326_s1 + $0x310] sm:$0xff]  ;;  %2073 = vst [vmem:[%s3327_s2 + $0x168] sm:$0xff] %v1056_v11  ;;  %v1119_v23 = vsub.f32 %v2088_v16, %v2089_v19  ;;  %v2094_v25 = vld [vmem:[%s3325_s0 + $0x318] sm:$0xff]  ;;  %v2098_v27 = vld [vmem:[%s3325_s0 + $0x320] sm:$0xff] }
  0x44   :  { %v1102_v22 = vpack.c.bf16 %v1096_v13, %v1087_v12  ;;  %v1133_v24 = vsub.f32 %v2092_v20, %v2093_v21  ;;  %v2095_v26 = vld [vmem:[%s3326_s1 + $0x318] sm:$0xff]  ;;  %v2099_v29 = vld [vmem:[%s3326_s1 + $0x320] sm:$0xff]  ;;  %v2100_v30 = vld [vmem:[%s3325_s0 + $0x328] sm:$0xff] }
  0x45   :  { %2079 = vst [vmem:[%s3327_s2 + $0x170] sm:$0xff] %v1079_v17  ;;  %v1142_v28 = vsub.f32 %v2094_v25, %v2095_v26  ;;  %v2101_v31 = vld [vmem:[%s3326_s1 + $0x328] sm:$0xff]  ;;  %v1125_v32 = vpack.c.bf16 %v1119_v23, %v1110_v18  ;;  %v1156_v33 = vsub.f32 %v2098_v27, %v2099_v29  ;;  %v2104_v35 = vld [vmem:[%s3325_s0 + $0x330] sm:$0xff]  ;;  %v2106_v37 = vld [vmem:[%s3325_s0 + $0x338] sm:$0xff] }
  0x46   :  { %2085 = vst [vmem:[%s3327_s2 + $0x178] sm:$0xff] %v1102_v22  ;;  %v1165_v34 = vsub.f32 %v2100_v30, %v2101_v31  ;;  %v2105_v36 = vld [vmem:[%s3326_s1 + $0x330] sm:$0xff]  ;;  %v2107_v40 = vld [vmem:[%s3326_s1 + $0x338] sm:$0xff]  ;;  %v2110_v41 = vld [vmem:[%s3325_s0 + $0x340] sm:$0xff] }
  0x47   :  { %v1148_v38 = vpack.c.bf16 %v1142_v28, %v1133_v24  ;;  %v1179_v39 = vsub.f32 %v2104_v35, %v2105_v36  ;;  %v2111_v42 = vld [vmem:[%s3326_s1 + $0x340] sm:$0xff]  ;;  %2091 = vst [vmem:[%s3327_s2 + $0x180] sm:$0xff] %v1125_v32  ;;  %v1188_v44 = vsub.f32 %v2106_v37, %v2107_v40  ;;  %v2112_v46 = vld [vmem:[%s3325_s0 + $0x348] sm:$0xff]  ;;  %v2116_v48 = vld [vmem:[%s3325_s0 + $0x350] sm:$0xff] }
  0x48   :  { %v1171_v43 = vpack.c.bf16 %v1165_v34, %v1156_v33  ;;  %v1202_v45 = vsub.f32 %v2110_v41, %v2111_v42  ;;  %v2113_v47 = vld [vmem:[%s3326_s1 + $0x348] sm:$0xff]  ;;  %v2117_v50 = vld [vmem:[%s3326_s1 + $0x350] sm:$0xff]  ;;  %v2118_v51 = vld [vmem:[%s3325_s0 + $0x358] sm:$0xff] }
  0x49   :  { %2097 = vst [vmem:[%s3327_s2 + $0x188] sm:$0xff] %v1148_v38  ;;  %v1211_v49 = vsub.f32 %v2112_v46, %v2113_v47  ;;  %v2119_v52 = vld [vmem:[%s3326_s1 + $0x358] sm:$0xff]  ;;  %v1194_v53 = vpack.c.bf16 %v1188_v44, %v1179_v39  ;;  %v1225_v54 = vsub.f32 %v2116_v48, %v2117_v50  ;;  %v2122_v56 = vld [vmem:[%s3325_s0 + $0x360] sm:$0xff]  ;;  %v2124_v58 = vld [vmem:[%s3325_s0 + $0x368] sm:$0xff] }
  0x4a   :  { %2103 = vst [vmem:[%s3327_s2 + $0x190] sm:$0xff] %v1171_v43  ;;  %v1234_v55 = vsub.f32 %v2118_v51, %v2119_v52  ;;  %v2123_v57 = vld [vmem:[%s3326_s1 + $0x360] sm:$0xff]  ;;  %v2125_v61 = vld [vmem:[%s3326_s1 + $0x368] sm:$0xff]  ;;  %v2128_v62 = vld [vmem:[%s3325_s0 + $0x370] sm:$0xff] }
  0x4b   :  { %v1217_v59 = vpack.c.bf16 %v1211_v49, %v1202_v45  ;;  %v1248_v60 = vsub.f32 %v2122_v56, %v2123_v57  ;;  %v2129_v63 = vld [vmem:[%s3326_s1 + $0x370] sm:$0xff]  ;;  %2109 = vst [vmem:[%s3327_s2 + $0x198] sm:$0xff] %v1194_v53  ;;  %v1257_v1 = vsub.f32 %v2124_v58, %v2125_v61  ;;  %v2130_v3 = vld [vmem:[%s3325_s0 + $0x378] sm:$0xff]  ;;  %v2134_v5 = vld [vmem:[%s3325_s0 + $0x380] sm:$0xff] }
  0x4c   :  { %v1240_v0 = vpack.c.bf16 %v1234_v55, %v1225_v54  ;;  %v1271_v2 = vsub.f32 %v2128_v62, %v2129_v63  ;;  %v2131_v4 = vld [vmem:[%s3326_s1 + $0x378] sm:$0xff]  ;;  %v2135_v7 = vld [vmem:[%s3326_s1 + $0x380] sm:$0xff]  ;;  %v2136_v8 = vld [vmem:[%s3325_s0 + $0x388] sm:$0xff] }
  0x4d   :  { %2115 = vst [vmem:[%s3327_s2 + $0x1a0] sm:$0xff] %v1217_v59  ;;  %v1280_v6 = vsub.f32 %v2130_v3, %v2131_v4  ;;  %v2137_v9 = vld [vmem:[%s3326_s1 + $0x388] sm:$0xff]  ;;  %v1263_v10 = vpack.c.bf16 %v1257_v1, %v1248_v60  ;;  %v1294_v11 = vsub.f32 %v2134_v5, %v2135_v7  ;;  %v2140_v13 = vld [vmem:[%s3325_s0 + $0x390] sm:$0xff]  ;;  %v2142_v15 = vld [vmem:[%s3325_s0 + $0x398] sm:$0xff] }
  0x4e   :  { %2121 = vst [vmem:[%s3327_s2 + $0x1a8] sm:$0xff] %v1240_v0  ;;  %v1303_v12 = vsub.f32 %v2136_v8, %v2137_v9  ;;  %v2141_v14 = vld [vmem:[%s3326_s1 + $0x390] sm:$0xff]  ;;  %v2143_v18 = vld [vmem:[%s3326_s1 + $0x398] sm:$0xff]  ;;  %v2146_v19 = vld [vmem:[%s3325_s0 + $0x3a0] sm:$0xff] }
  0x4f   :  { %v1286_v16 = vpack.c.bf16 %v1280_v6, %v1271_v2  ;;  %v1317_v17 = vsub.f32 %v2140_v13, %v2141_v14  ;;  %v2147_v20 = vld [vmem:[%s3326_s1 + $0x3a0] sm:$0xff]  ;;  %2127 = vst [vmem:[%s3327_s2 + $0x1b0] sm:$0xff] %v1263_v10  ;;  %v1326_v22 = vsub.f32 %v2142_v15, %v2143_v18  ;;  %v2148_v24 = vld [vmem:[%s3325_s0 + $0x3a8] sm:$0xff]  ;;  %v2152_v26 = vld [vmem:[%s3325_s0 + $0x3b0] sm:$0xff] }
  0x50   :  { %v1309_v21 = vpack.c.bf16 %v1303_v12, %v1294_v11  ;;  %v1340_v23 = vsub.f32 %v2146_v19, %v2147_v20  ;;  %v2149_v25 = vld [vmem:[%s3326_s1 + $0x3a8] sm:$0xff]  ;;  %v2153_v28 = vld [vmem:[%s3326_s1 + $0x3b0] sm:$0xff]  ;;  %v2154_v29 = vld [vmem:[%s3325_s0 + $0x3b8] sm:$0xff] }
  0x51   :  { %2133 = vst [vmem:[%s3327_s2 + $0x1b8] sm:$0xff] %v1286_v16  ;;  %v1349_v27 = vsub.f32 %v2148_v24, %v2149_v25  ;;  %v2155_v30 = vld [vmem:[%s3326_s1 + $0x3b8] sm:$0xff]  ;;  %v1332_v31 = vpack.c.bf16 %v1326_v22, %v1317_v17  ;;  %v1363_v32 = vsub.f32 %v2152_v26, %v2153_v28  ;;  %v2158_v34 = vld [vmem:[%s3325_s0 + $0x3c0] sm:$0xff]  ;;  %v2160_v36 = vld [vmem:[%s3325_s0 + $0x3c8] sm:$0xff] }
  0x52   :  { %2139 = vst [vmem:[%s3327_s2 + $0x1c0] sm:$0xff] %v1309_v21  ;;  %v1372_v33 = vsub.f32 %v2154_v29, %v2155_v30  ;;  %v2159_v35 = vld [vmem:[%s3326_s1 + $0x3c0] sm:$0xff]  ;;  %v2161_v39 = vld [vmem:[%s3326_s1 + $0x3c8] sm:$0xff]  ;;  %v2164_v40 = vld [vmem:[%s3325_s0 + $0x3d0] sm:$0xff] }
  0x53   :  { %v1355_v37 = vpack.c.bf16 %v1349_v27, %v1340_v23  ;;  %v1386_v38 = vsub.f32 %v2158_v34, %v2159_v35  ;;  %v2165_v41 = vld [vmem:[%s3326_s1 + $0x3d0] sm:$0xff]  ;;  %2145 = vst [vmem:[%s3327_s2 + $0x1c8] sm:$0xff] %v1332_v31  ;;  %v1395_v43 = vsub.f32 %v2160_v36, %v2161_v39  ;;  %v2166_v45 = vld [vmem:[%s3325_s0 + $0x3d8] sm:$0xff]  ;;  %v2170_v47 = vld [vmem:[%s3325_s0 + $0x3e0] sm:$0xff] }
  0x54   :  { %v1378_v42 = vpack.c.bf16 %v1372_v33, %v1363_v32  ;;  %v1409_v44 = vsub.f32 %v2164_v40, %v2165_v41  ;;  %v2167_v46 = vld [vmem:[%s3326_s1 + $0x3d8] sm:$0xff]  ;;  %v2171_v49 = vld [vmem:[%s3326_s1 + $0x3e0] sm:$0xff]  ;;  %v2172_v50 = vld [vmem:[%s3325_s0 + $0x3e8] sm:$0xff] }
  0x55   :  { %2151 = vst [vmem:[%s3327_s2 + $0x1d0] sm:$0xff] %v1355_v37  ;;  %v1418_v48 = vsub.f32 %v2166_v45, %v2167_v46  ;;  %v2173_v51 = vld [vmem:[%s3326_s1 + $0x3e8] sm:$0xff]  ;;  %v1401_v52 = vpack.c.bf16 %v1395_v43, %v1386_v38  ;;  %v1432_v53 = vsub.f32 %v2170_v47, %v2171_v49  ;;  %v2176_v55 = vld [vmem:[%s3325_s0 + $0x3f0] sm:$0xff]  ;;  %v2178_v57 = vld [vmem:[%s3325_s0 + $0x3f8] sm:$0xff] }
  0x56   :  { %2157 = vst [vmem:[%s3327_s2 + $0x1d8] sm:$0xff] %v1378_v42  ;;  %v1441_v54 = vsub.f32 %v2172_v50, %v2173_v51  ;;  %v2177_v56 = vld [vmem:[%s3326_s1 + $0x3f0] sm:$0xff]  ;;  %v2179_v60 = vld [vmem:[%s3326_s1 + $0x3f8] sm:$0xff]  ;;  %v2182_v61 = vld [vmem:[%s3325_s0 + $0x400] sm:$0xff] }
  0x57   :  { %v1424_v58 = vpack.c.bf16 %v1418_v48, %v1409_v44  ;;  %v1455_v59 = vsub.f32 %v2176_v55, %v2177_v56  ;;  %v2183_v62 = vld [vmem:[%s3326_s1 + $0x400] sm:$0xff]  ;;  %2163 = vst [vmem:[%s3327_s2 + $0x1e0] sm:$0xff] %v1401_v52  ;;  %v1464_v0 = vsub.f32 %v2178_v57, %v2179_v60  ;;  %v2184_v2 = vld [vmem:[%s3325_s0 + $0x408] sm:$0xff]  ;;  %v2188_v4 = vld [vmem:[%s3325_s0 + $0x410] sm:$0xff] }
  0x58   :  { %v1447_v63 = vpack.c.bf16 %v1441_v54, %v1432_v53  ;;  %v1478_v1 = vsub.f32 %v2182_v61, %v2183_v62  ;;  %v2185_v3 = vld [vmem:[%s3326_s1 + $0x408] sm:$0xff]  ;;  %v2189_v6 = vld [vmem:[%s3326_s1 + $0x410] sm:$0xff]  ;;  %v2190_v7 = vld [vmem:[%s3325_s0 + $0x418] sm:$0xff] }
  0x59   :  { %2169 = vst [vmem:[%s3327_s2 + $0x1e8] sm:$0xff] %v1424_v58  ;;  %v1487_v5 = vsub.f32 %v2184_v2, %v2185_v3  ;;  %v2191_v8 = vld [vmem:[%s3326_s1 + $0x418] sm:$0xff]  ;;  %v1470_v9 = vpack.c.bf16 %v1464_v0, %v1455_v59  ;;  %v1501_v10 = vsub.f32 %v2188_v4, %v2189_v6  ;;  %v2194_v12 = vld [vmem:[%s3325_s0 + $0x420] sm:$0xff]  ;;  %v2196_v14 = vld [vmem:[%s3325_s0 + $0x428] sm:$0xff] }
  0x5a   :  { %2175 = vst [vmem:[%s3327_s2 + $0x1f0] sm:$0xff] %v1447_v63  ;;  %v1510_v11 = vsub.f32 %v2190_v7, %v2191_v8  ;;  %v2195_v13 = vld [vmem:[%s3326_s1 + $0x420] sm:$0xff]  ;;  %v2197_v17 = vld [vmem:[%s3326_s1 + $0x428] sm:$0xff]  ;;  %v2200_v18 = vld [vmem:[%s3325_s0 + $0x430] sm:$0xff] }
  0x5b   :  { %v1493_v15 = vpack.c.bf16 %v1487_v5, %v1478_v1  ;;  %v1524_v16 = vsub.f32 %v2194_v12, %v2195_v13  ;;  %v2201_v19 = vld [vmem:[%s3326_s1 + $0x430] sm:$0xff]  ;;  %2181 = vst [vmem:[%s3327_s2 + $0x1f8] sm:$0xff] %v1470_v9  ;;  %v1533_v21 = vsub.f32 %v2196_v14, %v2197_v17  ;;  %v2202_v23 = vld [vmem:[%s3325_s0 + $0x438] sm:$0xff]  ;;  %v2206_v25 = vld [vmem:[%s3325_s0 + $0x440] sm:$0xff] }
  0x5c   :  { %v1516_v20 = vpack.c.bf16 %v1510_v11, %v1501_v10  ;;  %v1547_v22 = vsub.f32 %v2200_v18, %v2201_v19  ;;  %v2203_v24 = vld [vmem:[%s3326_s1 + $0x438] sm:$0xff]  ;;  %v2207_v27 = vld [vmem:[%s3326_s1 + $0x440] sm:$0xff]  ;;  %v2208_v28 = vld [vmem:[%s3325_s0 + $0x448] sm:$0xff] }
  0x5d   :  { %2187 = vst [vmem:[%s3327_s2 + $0x200] sm:$0xff] %v1493_v15  ;;  %v1556_v26 = vsub.f32 %v2202_v23, %v2203_v24  ;;  %v2209_v29 = vld [vmem:[%s3326_s1 + $0x448] sm:$0xff]  ;;  %v1539_v30 = vpack.c.bf16 %v1533_v21, %v1524_v16  ;;  %v1570_v31 = vsub.f32 %v2206_v25, %v2207_v27  ;;  %v2212_v33 = vld [vmem:[%s3325_s0 + $0x450] sm:$0xff]  ;;  %v2214_v35 = vld [vmem:[%s3325_s0 + $0x458] sm:$0xff] }
  0x5e   :  { %2193 = vst [vmem:[%s3327_s2 + $0x208] sm:$0xff] %v1516_v20  ;;  %v1579_v32 = vsub.f32 %v2208_v28, %v2209_v29  ;;  %v2213_v34 = vld [vmem:[%s3326_s1 + $0x450] sm:$0xff]  ;;  %v2215_v38 = vld [vmem:[%s3326_s1 + $0x458] sm:$0xff]  ;;  %v2218_v39 = vld [vmem:[%s3325_s0 + $0x460] sm:$0xff] }
  0x5f   :  { %v1562_v36 = vpack.c.bf16 %v1556_v26, %v1547_v22  ;;  %v1593_v37 = vsub.f32 %v2212_v33, %v2213_v34  ;;  %v2219_v40 = vld [vmem:[%s3326_s1 + $0x460] sm:$0xff]  ;;  %2199 = vst [vmem:[%s3327_s2 + $0x210] sm:$0xff] %v1539_v30  ;;  %v1602_v42 = vsub.f32 %v2214_v35, %v2215_v38  ;;  %v2220_v44 = vld [vmem:[%s3325_s0 + $0x468] sm:$0xff]  ;;  %v2224_v46 = vld [vmem:[%s3325_s0 + $0x470] sm:$0xff] }
  0x60   :  { %v1585_v41 = vpack.c.bf16 %v1579_v32, %v1570_v31  ;;  %v1616_v43 = vsub.f32 %v2218_v39, %v2219_v40  ;;  %v2221_v45 = vld [vmem:[%s3326_s1 + $0x468] sm:$0xff]  ;;  %v2225_v48 = vld [vmem:[%s3326_s1 + $0x470] sm:$0xff]  ;;  %v2226_v49 = vld [vmem:[%s3325_s0 + $0x478] sm:$0xff] }
  0x61   :  { %2205 = vst [vmem:[%s3327_s2 + $0x218] sm:$0xff] %v1562_v36  ;;  %v1625_v47 = vsub.f32 %v2220_v44, %v2221_v45  ;;  %v2227_v50 = vld [vmem:[%s3326_s1 + $0x478] sm:$0xff]  ;;  %v1608_v51 = vpack.c.bf16 %v1602_v42, %v1593_v37  ;;  %v1639_v52 = vsub.f32 %v2224_v46, %v2225_v48 }
  0x62   :  { %2211 = vst [vmem:[%s3327_s2 + $0x220] sm:$0xff] %v1585_v41  ;;  %v1648_v53 = vsub.f32 %v2226_v49, %v2227_v50 }
  0x63   :  { %v1631_v54 = vpack.c.bf16 %v1625_v47, %v1616_v43  ;;  %2217 = vst [vmem:[%s3327_s2 + $0x228] sm:$0xff] %v1608_v51 }
  0x64   :  { %v1654_v55 = vpack.c.bf16 %v1648_v53, %v1639_v52 }
  0x65   :  { %2223 = vst [vmem:[%s3327_s2 + $0x230] sm:$0xff] %v1631_v54 }
  0x66   :  { %2229 = vst [vmem:[%s3327_s2 + $0x238] sm:$0xff] %v1654_v55 }

// kernel: mul.5
= control target key start
LH: loop header
LB: loop body
LE: loop exit
PB: predicated region body
PF: predicated region fallthrough
CT: control target
= control target key end

     0   :  { %vm7_vm0 = vcmask 195584   ;;  %s39_s0 = inlined_call_operand.vmem [shape: f32[48], index: 0, kind: input, shape index: {}]   ;;  %s40_s1 = inlined_call_operand.vmem [shape: f32[2,24], index: 1, kind: output, shape index: {}]  }
   0x1   :  { %v4_v0 = vld [vmem:[%s39_s0] sm:$0x1]  ;;  %s22_s0 = smov 104  }
   0x2   :  { %5 = vst [vmem:[#allocation1] sm:$0x1] %v4_v0 }
   0x9   :  { %v9_v1 = vld [vmem:[#allocation1] sm:$0x1]  }
   0xa   :  { %v6_v2 = vld [vmem:[#allocation1] sm:$0x1]   ;;  %10 = vrot.lane.b32.xlu0 %v9_v1, %s22_s0 }
   0xb   :  { %8 = vst.msk [vmem:[#allocation0] sm:$0x1] %vm7_vm0, %v6_v2  }
  0x7c   :  { %v11_v3 = vpop.permute.xlu0 %10  }
  0x7d   :  { %14 = vst.msk [vmem:[#allocation0 + $0x1] sm:$0x1] %vm7_vm0, %v11_v3  }
  0x84   :  { %v18_v4 = vld [vmem:[#allocation0] sm:$0x3] }
  0x85   :  { %20 = vst [vmem:[%s40_s1] sm:$0x3] %v18_v4 }

// kernel: equivariant_block_forward.5
= control target key start
LH: loop header
LB: loop body
LE: loop exit
PB: predicated region body
PF: predicated region fallthrough
CT: control target
= control target key end

     0   :  { %s5815_s21 = smov 0   ;;  %s5817_s22 = smov 0   ;;  %s7172_s0 = inlined_call_operand.vmem [shape: s32[2,576,2], index: 0, kind: input, shape index: {}]   ;;  %s7173_s1 = inlined_call_operand.vmem [shape: f32[2,576,6], index: 1, kind: input, shape index: {}]   ;;  %s7174_s2 = inlined_call_operand.vmem [shape: f32[2,24,32], index: 2, kind: input, shape index: {}]   ;;  %s7175_s3 = inlined_call_operand.vmem [shape: f32[2,24,3], index: 3, kind: input, shape index: {}, may-alias: {3,12}]   ;;  %s7176_s4 = inlined_call_operand.vmem [shape: f32[2,24,1], index: 4, kind: input, shape index: {}]   ;;  %s7177_s5 = inlined_call_operand.vmem [shape: f32[32,32], index: 5, kind: input, shape index: {}]   ;;  %s7178_s6 = inlined_call_operand.vmem [shape: f32[32,32], index: 6, kind: input, shape index: {}]   ;;  %s7179_s7 = inlined_call_operand.vmem [shape: f32[6,32], index: 7, kind: input, shape index: {}]   ;;  %s7180_s8 = inlined_call_operand.vmem [shape: f32[1,32], index: 8, kind: input, shape index: {}]   ;;  %s7181_s9 = inlined_call_operand.vmem [shape: f32[32,32], index: 9, kind: input, shape index: {}]   ;;  %s7182_s10 = inlined_call_operand.vmem [shape: f32[1,32], index: 10, kind: input, shape index: {}]   ;;  %s7183_s11 = inlined_call_operand.vmem [shape: f32[1,32], index: 11, kind: input, shape index: {}]   ;;  %s7184_s12 = inlined_call_operand.vmem [shape: f32[2,24,3], index: 12, kind: output, shape index: {}, may-alias: {3,12}]  }
   0x1   :  { %s5819_s23 = smov 0   ;;  %s5821_s24 = smov 0  }
   0x2   :  { %s5823_s25 = smov 0  }
   0x3 LB: > { %7212 = sst [smem:[#allocation5_spill]] %s5729_s23  ;;  %s31_s26 = sadd.s32 1, %s5729_s23  ;;  %s5737_s25 = sphi %s5823_s25, %s22_s25   ;;  %s5733_s24 = sphi %s5821_s24, %s7282_s24   ;;  %s5729_s23 = sphi %s5819_s23, %s7281_s23   ;;  %s5725_s22 = sphi %s5817_s22, %s7280_s22   ;;  %s5721_s21 = sphi %s5815_s21, %s7279_s21  }
   0x4   : > { %7213 = sst [smem:[#allocation6_spill]] %s5733_s24  ;;  %s34_s27 = sadd.s32 1, %s5733_s24 }
   0x5   : > { %7214 = sst [smem:[#allocation7_spill]] %s5737_s25  ;;  %p32_p0 = scmp.ge.s32.totalorder %s31_s26, 2 }
   0x6   : > { %p4215_p1 = scmp.ge.s32.totalorder %s5737_s25, 1  ;;  %p428_p2 = scmp.lt.s32.totalorder %s5737_s25, 5 }
   0x7   : > { %s7284_s26 = smov (%p32_p0, %s31_s26), 0  ;;  %s7286_s27 = smov (!%p32_p0, %s34_s27), %s5733_s24 }
   0x8   : > { %7215 = sst [smem:[#allocation8_spill]] %s7284_s26  ;;  %p429_p3 = pnand %p4215_p1, %p428_p2 }
   0x9   : > { %p36_p4 = scmp.ge.s32.totalorder %s7286_s27, 2 }
   0xa   : > { %432 = sbr.rel (%p429_p3) target bundleno = 1732 (0x6c4), region = 68 }
   0xb   : > { %s7288_s27 = smov (%p36_p4, %s7286_s27), 0 }
   0xc   : > { %7216 = sst [smem:[#allocation9_spill]] %s7288_s27 }
  0x11   : > { %s498_s28 = smul.u32 36, %s5721_s21  ;;  %p499_p5 = scmp.lt.s32.totalorder %s5725_s22, 1 }
  0x12   : > { %p4222_p7 = scmp.ne.s32.totalorder %s5721_s21, 0 }
  0x13   : > { %s7290_s22 = smov (!%p499_p5, %s5725_s22), 1  ;;  %p501_p6 = scmp.lt.s32.totalorder %s498_s28, 71  ;;  %v545_v0 = vld [vmem:[%s7177_s5] sm:$0xff] (!%p4222_p7)  ;;  %v546_v1 = vld [vmem:[%s7177_s5 + $0x8] sm:$0xff] (!%p4222_p7)  ;;  %v5739_v3 = vmov (!%p4222_p7), 0.0|0.0   ;;  %v547_v6 = vld [vmem:[%s7177_s5 + $0x10] sm:$0xff] (!%p4222_p7) }
  0x14   : > { %s5175_s29 = smul.u32 72, %s7290_s22  ;;  %v649_v2 = vld [vmem:[%s7178_s6] sm:$0xff] (!%p4222_p7)  ;;  %5033 = vmatprep.subr.bf16.mxu0 (!%p4222_p7), %v5739_v3  ;;  %v5034_v4 = vpack.c.bf16 (!%p4222_p7), %v546_v1, %v545_v0  ;;  %5039 = vmatprep.subr.bf16.mxu1 (!%p4222_p7), %v5739_v3  ;;  %v650_v5 = vld [vmem:[%s7178_s6 + $0x8] sm:$0xff] (!%p4222_p7)  ;;  %v548_v7 = vld [vmem:[%s7177_s5 + $0x18] sm:$0xff] (!%p4222_p7)  ;;  %vm736_vm0 = vcmask (!%p4222_p7), 23552   ;;  %vm5740_vm1 = vmmov (!%p4222_p7), 0  }
  0x15   : > { %s7292_s28 = smov (!%p501_p6, %s498_s28), 71  ;;  %s5176_s30 = smul.u32 24, %s7290_s22  ;;  %v5040_v8 = vpack.c.bf16 (!%p4222_p7), %v650_v5, %v649_v2  ;;  %v651_v9 = vld [vmem:[%s7178_s6 + $0x10] sm:$0xff] (!%p4222_p7)  ;;  %v652_v10 = vld [vmem:[%s7178_s6 + $0x18] sm:$0xff] (!%p4222_p7)  ;;  %v5741_v11 = vmov (!%p4222_p7), 0.0   ;;  %v5037_v12 = vpack.c.bf16 (!%p4222_p7), %v548_v7, %v547_v6  ;;  %vm556_vm2 = vcmask (!%p4222_p7), 261120  }
  0x16   : > { %s504_s13 = sadd.s32 %s5175_s29, %s7292_s28  ;;  %541 = sbr.rel (%p4222_p7) target bundleno = 253 (0xfd), region = 72  ;;  %4752 = vmatprep.mubr.msk.f32.mxu0 (!%p4222_p7), %vm5740_vm1, %v5741_v11  ;;  %737 = vst.msk [vmem:[#allocation4] sm:$0xff] (!%p4222_p7), %vm736_vm0, %v5741_v11  ;;  %738 = vst.msk [vmem:[#allocation4 + $0x8] sm:$0xff] (!%p4222_p7), %vm736_vm0, %v5741_v11  ;;  %4769 = vmatprep.mubr.msk.f32.mxu1 (!%p4222_p7), %vm5740_vm1, %v5741_v11  ;;  %v5043_v13 = vpack.c.bf16 (!%p4222_p7), %v652_v10, %v651_v9  ;;  %v4223_v17 = vld [vmem:[%s7180_s8] ss:$0 sm:$0xff] (!%p4222_p7) }
  0x17   : > { %s4216_s14 = sshll.u32 %s504_s13, 3  ;;  %s5851_s17 = scalar_lea.vmem %s7174_s2, %s5176_s30  ;;  %739 = vst.msk [vmem:[#allocation4 + $0x10] sm:$0xff] (!%p4222_p7), %vm736_vm0, %v5741_v11  ;;  %5035 = vmatpush3.bf16.msra.mxu0 (!%p4222_p7), %v5034_v4  ;;  %5041 = vmatpush3.bf16.msra.mxu1 (!%p4222_p7), %v5040_v8 }
  0x18   : > { %s5856_s20 = scalar_lea.vmem %s7172_s0, %s4216_s14  ;;  %s5861_s24 = scalar_lea.vmem %s7173_s1, %s4216_s14  ;;  %5036 = vmatprep.subr.bf16.mxu0 (!%p4222_p7), %v5739_v3  ;;  %5042 = vmatprep.subr.bf16.mxu1 (!%p4222_p7), %v5739_v3  ;;  %v542_v14 = vld [vmem:[%s5851_s17] sm:$0xff] (!%p4222_p7)  ;;  %v543_v15 = vld [vmem:[%s5851_s17 + $0x8] sm:$0xff] (!%p4222_p7)  ;;  %v544_v16 = vld [vmem:[%s5851_s17 + $0x10] sm:$0xff] (!%p4222_p7) }
  0x19   : > { %s5866_s22 = scalar_lea.vmem %s7175_s3, %s5176_s30  ;;  %s5871_s13 = scalar_lea.vmem %s7176_s4, %s5176_s30 }
  0x1a   : > { %s5876_s18 = scalar_lea.vmem %s7184_s12, %s5176_s30 }
  0x1b   : > { %5038 = vmatpush3.bf16.msra.mxu0 (!%p4222_p7), %v5037_v12  ;;  %5044 = vmatpush3.bf16.msra.mxu1 (!%p4222_p7), %v5043_v13 }
  0x1e   : > { %4753 = vmatmul.mubr.msk.f32.vlgmr.msra.gmra.mrb[0].mxu0 %vm556_vm2, %v542_v14  ;;  %4770 = vmatmul.mubr.msk.f32.vlgmr.msra.gmra.mrb[0].mxu1 %vm556_vm2, %v542_v14 }
  0x1f   : > { %4755 = vmatprep.mubr.msk.f32.mxu0 %vm5740_vm1, %v5741_v11  ;;  %4772 = vmatprep.mubr.msk.f32.mxu1 %vm5740_vm1, %v5741_v11 }
  0x22   : > { %4756 = vmatmul.mubr.msk.f32.gmra.mrb[2].mxu0 %vm556_vm2, %v543_v15  ;;  %4773 = vmatmul.mubr.msk.f32.gmra.mrb[2].mxu1 %vm556_vm2, %v543_v15 }
  0x23   : > { %4758 = vmatprep.mubr.msk.f32.mxu0 %vm5740_vm1, %v5741_v11  ;;  %4775 = vmatprep.mubr.msk.f32.mxu1 %vm5740_vm1, %v5741_v11 }
  0x26   : > { %4759 = vmatmul.mubr.msk.f32.gmra.mrb[4].mxu0 %vm556_vm2, %v544_v16  ;;  %4776 = vmatmul.mubr.msk.f32.gmra.mrb[4].mxu1 %vm556_vm2, %v544_v16 }
  0xf1   : > { %v632_v18 = vpop.f32.mrb[0].mxu0  ;;  %v719_v21 = vpop.f32.mrb[0].mxu1 }
  0xf2   : > { %v633_v19 = vadd.f32 %v4223_v17, %v632_v18  ;;  %v4754_v20 = vpop.f32.mrb[1].mxu0  ;;  %733 = vst.msk [vmem:[#allocation3] sm:$0xff] %vm556_vm2, %v719_v21  ;;  %v4771_v22 = vpop.f32.mrb[1].mxu1 }
  0xf4   : > { %646 = vst.msk [vmem:[#allocation2] sm:$0xff] %vm556_vm2, %v633_v19 }
  0xf5   : > { %v637_v23 = vpop.f32.mrb[2].mxu0  ;;  %v724_v26 = vpop.f32.mrb[2].mxu1 }
  0xf6   : > { %v638_v24 = vadd.f32 %v4223_v17, %v637_v23  ;;  %v4757_v25 = vpop.f32.mrb[3].mxu0  ;;  %734 = vst.msk [vmem:[#allocation3 + $0x8] sm:$0xff] %vm556_vm2, %v724_v26  ;;  %v4774_v27 = vpop.f32.mrb[3].mxu1 }
  0xf8   : > { %647 = vst.msk [vmem:[#allocation2 + $0x8] sm:$0xff] %vm556_vm2, %v638_v24 }
  0xf9   : > { %v642_v28 = vpop.f32.mrb[4].mxu0  ;;  %v729_v31 = vpop.f32.mrb[4].mxu1 }
  0xfa   : > { %v643_v29 = vadd.f32 %v4223_v17, %v642_v28  ;;  %v4760_v30 = vpop.f32.mrb[5].mxu0  ;;  %735 = vst.msk [vmem:[#allocation3 + $0x10] sm:$0xff] %vm556_vm2, %v729_v31  ;;  %v4777_v32 = vpop.f32.mrb[5].mxu1 }
  0xfc   : > { %648 = vst.msk [vmem:[#allocation2 + $0x10] sm:$0xff] %vm556_vm2, %v643_v29 }
  0xfd PF: > { %v742_v33 = vld [vmem:[%s5856_s20 + $0x10] sm:$0xff]  ;;  %v740_v34 = vld [vmem:[%s5856_s20] sm:$0xff]  ;;  %v5742_v35 = vmov 1   ;;  %v743_v36 = vld [vmem:[%s5856_s20 + $0x18] sm:$0xff]  ;;  %v5743_v43 = vmov 0   ;;  %v812_v14 = vlaneseq  ;;  %vm1252_vm4 = vcmask 195584  }
  0xfe   : > { %5229 = vset.pattern.permute.xlu1 %v5742_v35  ;;  %5228 = vset.pattern.permute.xlu0 %v5742_v35  ;;  %v741_v37 = vld [vmem:[%s5856_s20 + $0x8] sm:$0xff]  ;;  %v744_v39 = vld [vmem:[%s5856_s20 + $0x20] sm:$0xff]  ;;  %v1249_v40 = vld [vmem:[#allocation3] sm:$0xff]  ;;  %v7188_v18 = vmov 0.0   ;;  %vm2069_vm9 = vcmask 1045504   ;;  %p4524_p8 = scmp.ne.s32.totalorder %s5721_s21, 1 }
  0xff   : > { %1037 = vperm.xlu1 %5229, %v742_v33   ;;  %1031 = vperm.xlu0 %5228, %v740_v34   ;;  %v745_v38 = vld [vmem:[%s5856_s20 + $0x28] sm:$0xff]  ;;  %v1250_v41 = vld [vmem:[#allocation3 + $0x8] sm:$0xff]  ;;  %v746_v48 = vld [vmem:[%s5856_s20 + $0x30] sm:$0xff]  ;;  %v5979_v15 = vand.u32 127, %v812_v14 }
 0x100   : > { %v5045_v42 = vpack.c.bf16 %v1250_v41, %v1249_v40  ;;  %v1246_v45 = vld [vmem:[#allocation2] sm:$0xff]  ;;  %v1247_v46 = vld [vmem:[#allocation2 + $0x8] sm:$0xff]  ;;  %v747_v49 = vld [vmem:[%s5856_s20 + $0x38] sm:$0xff] }
 0x101   : > { %v1251_v44 = vld [vmem:[#allocation3 + $0x10] sm:$0xff]  ;;  %v5935_v47 = vpack.c.bf16 %v1247_v46, %v1246_v45  ;;  %v748_v50 = vld [vmem:[%s5856_s20 + $0x40] sm:$0xff]  ;;  %v750_v52 = vld [vmem:[%s5856_s20 + $0x50] sm:$0xff] }
 0x102   : > { %5046 = vmatprep.subr.bf16.mxu0 %v5045_v42  ;;  %5099 = vmatprep.subr.bf16.mxu1 %v5045_v42  ;;  %v749_v51 = vld [vmem:[%s5856_s20 + $0x48] sm:$0xff]  ;;  %v751_v53 = vld [vmem:[%s5856_s20 + $0x58] sm:$0xff]  ;;  %v752_v54 = vld [vmem:[%s5856_s20 + $0x60] sm:$0xff] }
 0x103   : > { %1040 = vperm.xlu1 %5229, %v743_v36   ;;  %1034 = vperm.xlu0 %5228, %v741_v37   ;;  %v753_v55 = vld [vmem:[%s5856_s20 + $0x68] sm:$0xff]  ;;  %v754_v56 = vld [vmem:[%s5856_s20 + $0x70] sm:$0xff]  ;;  %v755_v57 = vld [vmem:[%s5856_s20 + $0x78] sm:$0xff] }
 0x104   : > { %5048 = vmatpush3.bf16.msra.mxu0 %v5045_v42  ;;  %5101 = vmatpush3.bf16.msra.mxu1 %v5045_v42  ;;  %v756_v58 = vld [vmem:[%s5856_s20 + $0x80] sm:$0xff]  ;;  %v757_v59 = vld [vmem:[%s5856_s20 + $0x88] sm:$0xff]  ;;  %v758_v60 = vld [vmem:[%s5856_s20 + $0x90] sm:$0xff] }
 0x105   : > { %4782 = vmatprep.subr.mxu0 %v1251_v44  ;;  %5100 = vmatprep.subr.mxu1 %v1251_v44  ;;  %v759_v61 = vld [vmem:[%s5856_s20 + $0x98] sm:$0xff]  ;;  %v760_v62 = vld [vmem:[%s5856_s20 + $0xa0] sm:$0xff]  ;;  %v761_v63 = vld [vmem:[%s5856_s20 + $0xa8] sm:$0xff] }
 0x106   : > { %v762_v0 = vld [vmem:[%s5856_s20 + $0xb0] sm:$0xff]  ;;  %v763_v1 = vld [vmem:[%s5856_s20 + $0xb8] sm:$0xff]  ;;  %v764_v2 = vld [vmem:[%s5856_s20 + $0xc0] sm:$0xff] }
 0x107   : > { %1046 = vperm.xlu1 %5229, %v745_v38   ;;  %1043 = vperm.xlu0 %5228, %v744_v39   ;;  %v765_v3 = vld [vmem:[%s5856_s20 + $0xc8] sm:$0xff]  ;;  %v766_v4 = vld [vmem:[%s5856_s20 + $0xd0] sm:$0xff]  ;;  %v767_v5 = vld [vmem:[%s5856_s20 + $0xd8] sm:$0xff] }
 0x108   : > { %4783 = vmatpush3.msra.mxu0 %v1251_v44  ;;  %5102 = vmatpush3.msra.mxu1 %v1251_v44  ;;  %v768_v6 = vld [vmem:[%s5856_s20 + $0xe0] sm:$0xff]  ;;  %v769_v7 = vld [vmem:[%s5856_s20 + $0xe8] sm:$0xff]  ;;  %v770_v8 = vld [vmem:[%s5856_s20 + $0xf0] sm:$0xff] }
 0x109   : > { %5050 = vmatprep.subr.bf16.mxu0 %v5935_v47  ;;  %v5964_v9 = vld [vmem:[%s5856_s20 + $0xf8] sm:$0xff]  ;;  %v772_v10 = vld [vmem:[%s5856_s20 + $0x100] sm:$0xff]  ;;  %v5969_v11 = vld [vmem:[%s5856_s20 + $0x108] sm:$0xff] }
 0x10a   : > { %v774_v12 = vld [vmem:[%s5856_s20 + $0x110] sm:$0xff]  ;;  %v5974_v13 = vld [vmem:[%s5856_s20 + $0x118] sm:$0xff]  ;;  %v1959_v29 = vld [vmem:[%s7179_s7] sm:$0x3f]  ;;  %s5746_s20 = smov 125  }
 0x10b   : > { %5231 = vset.pattern.permute.xlu1 %v5743_v43  ;;  %5230 = vset.pattern.permute.xlu0 %v5743_v43  ;;  %v1248_v23 = vld [vmem:[#allocation2 + $0x10] sm:$0xff] }
 0x10c   : > { %818 = vperm.xlu1 %5231, %v741_v37   ;;  %815 = vperm.xlu0 %5230, %v740_v34  }
 0x110   : > { %821 = vperm.xlu1 %5231, %v742_v33   ;;  %824 = vperm.xlu0 %5230, %v743_v36  }
 0x114   : > { %827 = vperm.xlu1 %5231, %v744_v39   ;;  %830 = vperm.xlu0 %5230, %v745_v38  }
 0x118   : > { %833 = vperm.xlu1 %5231, %v746_v48   ;;  %836 = vperm.xlu0 %5230, %v747_v49  }
 0x11c   : > { %839 = vperm.xlu1 %5231, %v748_v50   ;;  %842 = vperm.xlu0 %5230, %v749_v51  }
 0x120   : > { %845 = vperm.xlu1 %5231, %v750_v52   ;;  %848 = vperm.xlu0 %5230, %v751_v53  }
 0x124   : > { %851 = vperm.xlu1 %5231, %v752_v54   ;;  %854 = vperm.xlu0 %5230, %v753_v55  }
 0x128   : > { %857 = vperm.xlu1 %5231, %v754_v56   ;;  %860 = vperm.xlu0 %5230, %v755_v57  }
 0x12c   : > { %863 = vperm.xlu1 %5231, %v756_v58   ;;  %866 = vperm.xlu0 %5230, %v757_v59  }
 0x130   : > { %869 = vperm.xlu1 %5231, %v758_v60   ;;  %872 = vperm.xlu0 %5230, %v759_v61  }
 0x134   : > { %875 = vperm.xlu1 %5231, %v760_v62   ;;  %878 = vperm.xlu0 %5230, %v761_v63  }
 0x138   : > { %881 = vperm.xlu1 %5231, %v762_v0   ;;  %884 = vperm.xlu0 %5230, %v763_v1  }
 0x13c   : > { %887 = vperm.xlu1 %5231, %v764_v2   ;;  %890 = vperm.xlu0 %5230, %v765_v3  }
 0x140   : > { %893 = vperm.xlu1 %5231, %v766_v4   ;;  %896 = vperm.xlu0 %5230, %v767_v5  }
 0x144   : > { %899 = vperm.xlu1 %5231, %v768_v6   ;;  %902 = vperm.xlu0 %5230, %v769_v7  }
 0x148   : > { %905 = vperm.xlu1 %5231, %v770_v8   ;;  %908 = vperm.xlu0 %5230, %v5964_v9  }
 0x14c   : > { %911 = vperm.xlu1 %5231, %v772_v10   ;;  %914 = vperm.xlu0 %5230, %v5969_v11  }
 0x150   : > { %917 = vperm.xlu1 %5231, %v774_v12   ;;  %920 = vperm.xlu0 %5230, %v5974_v13  }
 0x154   : > { %5232 = vset.pattern.permute.xlu1 %v5742_v35  ;;  %5233 = vset.pattern.permute.xlu0 %v5742_v35 }
 0x155   : > { %1049 = vperm.xlu1 %5232, %v746_v48   ;;  %1052 = vperm.xlu0 %5233, %v747_v49  }
 0x159   : > { %1055 = vperm.xlu1 %5232, %v748_v50   ;;  %1061 = vperm.xlu0 %5233, %v750_v52   ;;  %v2606_v50 = vld [vmem:[%s7181_s9] sm:$0xff] }
 0x15d   : > { %1058 = vperm.xlu1 %5232, %v749_v51   ;;  %1067 = vperm.xlu0 %5233, %v752_v54   ;;  %v2607_v51 = vld [vmem:[%s7181_s9 + $0x8] sm:$0xff] }
 0x15e   : > { %v6069_v54 = vpack.c.bf16 %v2607_v51, %v2606_v50 }
 0x160   : > { %5054 = vmatprep.subr.bf16.mxu1 %v6069_v54 }
 0x161   : > { %1064 = vperm.xlu1 %5232, %v751_v53   ;;  %1073 = vperm.xlu0 %5233, %v754_v56  }
 0x165   : > { %1070 = vperm.xlu1 %5232, %v753_v55   ;;  %1079 = vperm.xlu0 %5233, %v756_v58  }
 0x169   : > { %1076 = vperm.xlu1 %5232, %v755_v57   ;;  %1085 = vperm.xlu0 %5233, %v758_v60  }
 0x16d   : > { %1082 = vperm.xlu1 %5232, %v757_v59   ;;  %1091 = vperm.xlu0 %5233, %v760_v62  }
 0x171   : > { %1088 = vperm.xlu1 %5232, %v759_v61   ;;  %1097 = vperm.xlu0 %5233, %v762_v0  }
 0x175   : > { %1094 = vperm.xlu1 %5232, %v761_v63   ;;  %1103 = vperm.xlu0 %5233, %v764_v2  }
 0x179   : > { %1100 = vperm.xlu1 %5232, %v763_v1   ;;  %1109 = vperm.xlu0 %5233, %v766_v4  }
 0x17d   : > { %1106 = vperm.xlu1 %5232, %v765_v3   ;;  %1115 = vperm.xlu0 %5233, %v768_v6  }
 0x17e   : > { %v1038_v16 = vpop.permute.xlu1 %1037  ;;  %v1032_v17 = vpop.permute.xlu0 %1031 }
 0x17f   : > { %vm1138_vm3 = vcmp.eq.s32.totalorder %v1032_v17, %v5979_v15  ;;  %vm1140_vm5 = vcmp.eq.s32.totalorder %v1038_v16, %v5979_v15 }
 0x180   : > { %v4266_v19 = vsel %vm1138_vm3, 1.0, %v7188_v18  ;;  %v4268_v24 = vsel %vm1140_vm5, 1.0, %v7188_v18 }
 0x181   : > { %1112 = vperm.xlu1 %5232, %v767_v5   ;;  %1121 = vperm.xlu0 %5233, %v770_v8  }
 0x182   : > { %4784 = vmatprep.mubr.msk.f32.mxu0 %vm1252_vm4, %v4266_v19  ;;  %v1041_v20 = vpop.permute.xlu1 %1040  ;;  %v1035_v21 = vpop.permute.xlu0 %1034 }
 0x183   : > { %vm1139_vm6 = vcmp.eq.s32.totalorder %v1035_v21, %v5979_v15  ;;  %vm1141_vm7 = vcmp.eq.s32.totalorder %v1041_v20, %v5979_v15 }
 0x184   : > { %v4267_v22 = vsel %vm1139_vm6, 1.0, %v7188_v18  ;;  %v4269_v28 = vsel %vm1141_vm7, 1.0, %v7188_v18 }
 0x185   : > { %1118 = vperm.xlu1 %5232, %v769_v7   ;;  %1127 = vperm.xlu0 %5233, %v772_v10  }
 0x186   : > { %4785 = vmatmul.mubr.msk.f32.vlgmr.msra.gmra.mrb[0].mxu0 %vm1252_vm4, %v4267_v22  ;;  %v1047_v25 = vpop.permute.xlu1 %1046  ;;  %v1044_v26 = vpop.permute.xlu0 %1043 }
 0x187   : > { %5052 = vmatpush3.bf16.msra.mxu0 %v5935_v47  ;;  %4787 = vmatprep.mubr.msk.f32.mxu0 %vm1252_vm4, %v4268_v24  ;;  %vm1142_vm8 = vcmp.eq.s32.totalorder %v1044_v26, %v5979_v15  ;;  %vm1143_vm10 = vcmp.eq.s32.totalorder %v1047_v25, %v5979_v15 }
 0x188   : > { %v4270_v27 = vsel %vm1142_vm8, 1.0, %v7188_v18  ;;  %4842 = vmatprep.subr.mxu0 %v1248_v23  ;;  %v4271_v32 = vsel %vm1143_vm10, 1.0, %v7188_v18 }
 0x189   : > { %1124 = vperm.xlu1 %5232, %v5964_v9   ;;  %1133 = vperm.xlu0 %5233, %v774_v12  }
 0x18a   : > { %4788 = vmatmul.mubr.msk.f32.gmra.mrb[2].mxu0 %vm1252_vm4, %v4269_v28 }
 0x18b   : > { %4790 = vmatprep.mubr.msk.f32.mxu0 %vm1252_vm4, %v4270_v27  ;;  %v819_v30 = vpop.permute.xlu1 %818  ;;  %4843 = vmatpush3.msra.mxu0 %v1248_v23  ;;  %v816_v31 = vpop.permute.xlu0 %815 }
 0x18c   : > { %vm923_vm11 = vcmp.eq.s32.totalorder %v819_v30, %v5979_v15  ;;  %vm922_vm12 = vcmp.eq.s32.totalorder %v816_v31, %v5979_v15  ;;  %4898 = vmatprep.subr.msk.mxu0 %vm2069_vm9, %v1959_v29 }
 0x18d   : > { %v6007_v33 = vsel %vm922_vm12, 1.0, %v7188_v18  ;;  %1130 = vperm.xlu1 %5232, %v5969_v11   ;;  %v6012_v34 = vsel %vm923_vm11, 1.0, %v7188_v18 }
 0x18e   : > { %4791 = vmatmul.mubr.msk.f32.gmra.mrb[4].mxu0 %vm1252_vm4, %v4271_v32 }
 0x18f   : > { %v822_v35 = vpop.permute.xlu1 %821  ;;  %v825_v36 = vpop.permute.xlu0 %824  ;;  %4844 = vmatprep.mubr.msk.f32.mxu0 %vm1252_vm4, %v6007_v33 }
 0x190   : > { %vm924_vm13 = vcmp.eq.s32.totalorder %v822_v35, %v5979_v15  ;;  %vm925_vm14 = vcmp.eq.s32.totalorder %v825_v36, %v5979_v15 }
 0x191   : > { %v6018_v37 = vsel %vm924_vm13, 1.0, %v7188_v18  ;;  %1136 = vperm.xlu1 %5232, %v5974_v13   ;;  %v6029_v40 = vsel %vm925_vm14, 1.0, %v7188_v18 }
 0x192   : > { %4845 = vmatmul.mubr.msk.f32.vlgmr.msra.gmra.mrb[0].mxu0 %vm1252_vm4, %v6012_v34 }
 0x193   : > { %4899 = vmatpush3.msk.msra.mxu0 %vm2069_vm9, %v1959_v29  ;;  %4847 = vmatprep.mubr.msk.f32.mxu0 %vm1252_vm4, %v6018_v37  ;;  %v828_v38 = vpop.permute.xlu1 %827  ;;  %v831_v39 = vpop.permute.xlu0 %830 }
 0x194   : > { %vm926_vm15 = vcmp.eq.s32.totalorder %v828_v38, %v5979_v15  ;;  %vm927_vm0 = vcmp.eq.s32.totalorder %v831_v39, %v5979_v15 }
 0x195   : > { %v6032_v41 = vsel %vm926_vm15, 1.0, %v7188_v18  ;;  %v6041_v44 = vsel %vm927_vm0, 1.0, %v7188_v18 }
 0x196   : > { %4848 = vmatmul.mubr.msk.f32.gmra.mrb[2].mxu0 %vm1252_vm4, %v6029_v40 }
 0x197   : > { %4850 = vmatprep.mubr.msk.f32.mxu0 %vm1252_vm4, %v6032_v41  ;;  %v834_v42 = vpop.permute.xlu1 %833  ;;  %v837_v43 = vpop.permute.xlu0 %836 }
 0x198   : > { %vm928_vm1 = vcmp.eq.s32.totalorder %v834_v42, %v5979_v15  ;;  %vm929_vm2 = vcmp.eq.s32.totalorder %v837_v43, %v5979_v15 }
 0x199   : > { %v6044_v45 = vsel %vm928_vm1, 1.0, %v7188_v18  ;;  %v6053_v48 = vsel %vm929_vm2, 1.0, %v7188_v18 }
 0x19a   : > { %7217 = vst [vmem:[#allocation10_spill] sm:$0xff] %v6044_v45  ;;  %4851 = vmatmul.mubr.msk.f32.gmra.mrb[4].mxu0 %vm1252_vm4, %v6041_v44  ;;  %7218 = vst [vmem:[#allocation11_spill] sm:$0xff] %v6053_v48 }
 0x19b   : > { %4853 = vmatprep.mubr.msk.f32.mxu0 %vm1252_vm4, %v6044_v45  ;;  %v840_v46 = vpop.permute.xlu1 %839  ;;  %v843_v47 = vpop.permute.xlu0 %842 }
 0x19c   : > { %vm930_vm3 = vcmp.eq.s32.totalorder %v840_v46, %v5979_v15  ;;  %vm931_vm5 = vcmp.eq.s32.totalorder %v843_v47, %v5979_v15 }
 0x19d   : > { %v6056_v49 = vsel %vm930_vm3, 1.0, %v7188_v18  ;;  %v6073_v55 = vsel %vm931_vm5, 1.0, %v7188_v18 }
 0x19e   : > { %7219 = vst [vmem:[#allocation12_spill] sm:$0xff] %v6056_v49  ;;  %4854 = vmatmul.mubr.msk.f32.gmra.mrb[6].mxu0 %vm1252_vm4, %v6053_v48  ;;  %7220 = vst [vmem:[#allocation13_spill] sm:$0xff] %v6073_v55 }
 0x19f   : > { %4856 = vmatprep.mubr.msk.f32.mxu0 %vm1252_vm4, %v6056_v49  ;;  %v846_v52 = vpop.permute.xlu1 %845  ;;  %v849_v53 = vpop.permute.xlu0 %848 }
 0x1a0   : > { %vm932_vm6 = vcmp.eq.s32.totalorder %v846_v52, %v5979_v15  ;;  %vm933_vm7 = vcmp.eq.s32.totalorder %v849_v53, %v5979_v15 }
 0x1a1   : > { %v6076_v56 = vsel %vm932_vm6, 1.0, %v7188_v18  ;;  %v6086_v59 = vsel %vm933_vm7, 1.0, %v7188_v18 }
 0x1a2   : > { %7221 = vst [vmem:[#allocation14_spill] sm:$0xff] %v6076_v56  ;;  %4857 = vmatmul.mubr.msk.f32.gmra.mrb[8].mxu0 %vm1252_vm4, %v6073_v55  ;;  %7222 = vst [vmem:[#allocation15_spill] sm:$0xff] %v6086_v59  ;;  %v7013_v55 = vld [vmem:[%s5861_s24 + $0x110] sm:$0xff] }
 0x1a3   : > { %4859 = vmatprep.mubr.msk.f32.mxu0 %vm1252_vm4, %v6076_v56  ;;  %v852_v57 = vpop.permute.xlu1 %851  ;;  %v855_v58 = vpop.permute.xlu0 %854  ;;  %v7005_v56 = vld [vmem:[%s5861_s24 + $0x100] sm:$0xff] }
 0x1a4   : > { %vm934_vm8 = vcmp.eq.s32.totalorder %v852_v57, %v5979_v15  ;;  %vm935_vm9 = vcmp.eq.s32.totalorder %v855_v58, %v5979_v15 }
 0x1a5   : > { %v6089_v60 = vsel %vm934_vm8, 1.0, %v7188_v18  ;;  %v6098_v63 = vsel %vm935_vm9, 1.0, %v7188_v18 }
 0x1a6   : > { %7223 = vst [vmem:[#allocation16_spill] sm:$0xff] %v6089_v60  ;;  %4860 = vmatmul.mubr.msk.f32.gmra.mrb[10].mxu0 %vm1252_vm4, %v6086_v59  ;;  %7224 = vst [vmem:[#allocation17_spill] sm:$0xff] %v6098_v63 }
 0x1a7   : > { %4862 = vmatprep.mubr.msk.f32.mxu0 %vm1252_vm4, %v6089_v60  ;;  %v858_v61 = vpop.permute.xlu1 %857  ;;  %v861_v62 = vpop.permute.xlu0 %860 }
 0x1a8   : > { %vm936_vm10 = vcmp.eq.s32.totalorder %v858_v61, %v5979_v15  ;;  %vm937_vm11 = vcmp.eq.s32.totalorder %v861_v62, %v5979_v15 }
 0x1a9   : > { %v6101_v0 = vsel %vm936_vm10, 1.0, %v7188_v18  ;;  %v6111_v3 = vsel %vm937_vm11, 1.0, %v7188_v18 }
 0x1aa   : > { %7225 = vst [vmem:[#allocation18_spill] sm:$0xff] %v6101_v0  ;;  %4863 = vmatmul.mubr.msk.f32.gmra.mrb[12].mxu0 %vm1252_vm4, %v6098_v63  ;;  %7226 = vst [vmem:[#allocation19_spill] sm:$0xff] %v6111_v3 }
 0x1ab   : > { %4865 = vmatprep.mubr.msk.f32.mxu0 %vm1252_vm4, %v6101_v0  ;;  %v864_v1 = vpop.permute.xlu1 %863  ;;  %v867_v2 = vpop.permute.xlu0 %866 }
 0x1ac   : > { %vm938_vm12 = vcmp.eq.s32.totalorder %v864_v1, %v5979_v15  ;;  %vm939_vm13 = vcmp.eq.s32.totalorder %v867_v2, %v5979_v15 }
 0x1ad   : > { %v6114_v4 = vsel %vm938_vm12, 1.0, %v7188_v18  ;;  %v6117_v5 = vsel %vm939_vm13, 1.0, %v7188_v18 }
 0x1ae   : > { %4866 = vmatmul.mubr.msk.f32.gmra.mrb[14].mxu0 %vm1252_vm4, %v6111_v3 }
 0x1af   : > { %4868 = vmatprep.mubr.msk.f32.mxu0 %vm1252_vm4, %v6114_v4  ;;  %v870_v8 = vpop.permute.xlu1 %869  ;;  %v873_v9 = vpop.permute.xlu0 %872 }
 0x1b0   : > { %vm940_vm14 = vcmp.eq.s32.totalorder %v870_v8, %v5979_v15  ;;  %vm941_vm15 = vcmp.eq.s32.totalorder %v873_v9, %v5979_v15 }
 0x1b1   : > { %v6130_v10 = vsel %vm940_vm14, 1.0, %v7188_v18  ;;  %v6133_v11 = vsel %vm941_vm15, 1.0, %v7188_v18 }
 0x1b2   : > { %4869 = vmatmul.mubr.msk.f32.gmra.mrb[16].mxu0 %vm1252_vm4, %v6117_v5 }
 0x1b3   : > { %4871 = vmatprep.mubr.msk.f32.mxu0 %vm1252_vm4, %v6130_v10  ;;  %v876_v14 = vpop.permute.xlu1 %875  ;;  %v879_v16 = vpop.permute.xlu0 %878 }
 0x1b4   : > { %vm942_vm0 = vcmp.eq.s32.totalorder %v876_v14, %v5979_v15  ;;  %vm943_vm1 = vcmp.eq.s32.totalorder %v879_v16, %v5979_v15 }
 0x1b5   : > { %v6146_v17 = vsel %vm942_vm0, 1.0, %v7188_v18  ;;  %v6149_v19 = vsel %vm943_vm1, 1.0, %v7188_v18  ;;  %vm1960_vm1 = vcmask 48128  }
 0x1b6   : > { %4872 = vmatmul.mubr.msk.f32.gmra.mrb[18].mxu0 %vm1252_vm4, %v6133_v11 }
 0x1b7   : > { %4874 = vmatprep.mubr.msk.f32.mxu0 %vm1252_vm4, %v6146_v17  ;;  %v882_v22 = vpop.permute.xlu1 %881  ;;  %v885_v23 = vpop.permute.xlu0 %884 }
 0x1b8   : > { %vm944_vm2 = vcmp.eq.s32.totalorder %v882_v22, %v5979_v15  ;;  %vm945_vm3 = vcmp.eq.s32.totalorder %v885_v23, %v5979_v15 }
 0x1b9   : > { %v6162_v24 = vsel %vm944_vm2, 1.0, %v7188_v18  ;;  %v6165_v25 = vsel %vm945_vm3, 1.0, %v7188_v18 }
 0x1ba   : > { %7227 = vst [vmem:[#allocation20_spill] sm:$0xff] %v6162_v24  ;;  %7228 = vst [vmem:[#allocation21_spill] sm:$0xff] %v6165_v25  ;;  %4875 = vmatmul.mubr.msk.f32.gmra.mrb[20].mxu0 %vm1252_vm4, %v6149_v19 }
 0x1bb   : > { %4877 = vmatprep.mubr.msk.f32.mxu0 %vm1252_vm4, %v6162_v24  ;;  %v888_v28 = vpop.permute.xlu1 %887  ;;  %v891_v29 = vpop.permute.xlu0 %890 }
 0x1bc   : > { %vm946_vm5 = vcmp.eq.s32.totalorder %v888_v28, %v5979_v15  ;;  %vm947_vm6 = vcmp.eq.s32.totalorder %v891_v29, %v5979_v15 }
 0x1bd   : > { %v6178_v30 = vsel %vm946_vm5, 1.0, %v7188_v18  ;;  %v6181_v31 = vsel %vm947_vm6, 1.0, %v7188_v18 }
 0x1be   : > { %7229 = vst [vmem:[#allocation22_spill] sm:$0xff] %v6178_v30  ;;  %7230 = vst [vmem:[#allocation23_spill] sm:$0xff] %v6181_v31  ;;  %4878 = vmatmul.mubr.msk.f32.gmra.mrb[22].mxu0 %vm1252_vm4, %v6165_v25 }
 0x1bf   : > { %4880 = vmatprep.mubr.msk.f32.mxu0 %vm1252_vm4, %v6178_v30  ;;  %v894_v36 = vpop.permute.xlu1 %893  ;;  %v897_v38 = vpop.permute.xlu0 %896  ;;  %v7017_v30 = vld [vmem:[%s5861_s24 + $0x78] sm:$0xff] }
 0x1c0   : > { %vm948_vm7 = vcmp.eq.s32.totalorder %v894_v36, %v5979_v15  ;;  %vm949_vm8 = vcmp.eq.s32.totalorder %v897_v38, %v5979_v15 }
 0x1c1   : > { %v6194_v39 = vsel %vm948_vm7, 1.0, %v7188_v18  ;;  %v6197_v42 = vsel %vm949_vm8, 1.0, %v7188_v18 }
 0x1c2   : > { %7231 = vst [vmem:[#allocation24_spill] sm:$0xff] %v6194_v39  ;;  %7232 = vst [vmem:[#allocation25_spill] sm:$0xff] %v6197_v42  ;;  %4881 = vmatmul.mubr.msk.f32.gmra.mrb[24].mxu0 %vm1252_vm4, %v6181_v31  ;;  %v7009_v31 = vld [vmem:[%s5861_s24 + $0xf8] sm:$0xff] }
 0x1c3   : > { %4883 = vmatprep.mubr.msk.f32.mxu0 %vm1252_vm4, %v6194_v39  ;;  %v900_v47 = vpop.permute.xlu1 %899  ;;  %v903_v50 = vpop.permute.xlu0 %902 }
 0x1c4   : > { %vm950_vm9 = vcmp.eq.s32.totalorder %v900_v47, %v5979_v15  ;;  %vm951_vm10 = vcmp.eq.s32.totalorder %v903_v50, %v5979_v15  ;;  %v776_v47 = vld [vmem:[%s5861_s24] sm:$0xff] }
 0x1c5   : > { %v6210_v51 = vsel %vm950_vm9, 1.0, %v7188_v18  ;;  %v6213_v52 = vsel %vm951_vm10, 1.0, %v7188_v18 }
 0x1c6   : > { %7233 = vst [vmem:[#allocation26_spill] sm:$0xff] %v6210_v51  ;;  %7234 = vst [vmem:[#allocation27_spill] sm:$0xff] %v6213_v52  ;;  %4884 = vmatmul.mubr.msk.f32.gmra.mrb[26].mxu0 %vm1252_vm4, %v6197_v42 }
 0x1c7   : > { %4886 = vmatprep.mubr.msk.f32.mxu0 %vm1252_vm4, %v6210_v51  ;;  %v906_v58 = vpop.permute.xlu1 %905  ;;  %v909_v61 = vpop.permute.xlu0 %908 }
 0x1c8   : > { %vm952_vm11 = vcmp.eq.s32.totalorder %v906_v58, %v5979_v15  ;;  %vm953_vm12 = vcmp.eq.s32.totalorder %v909_v61, %v5979_v15 }
 0x1c9   : > { %v6226_v62 = vsel %vm952_vm11, 1.0, %v7188_v18  ;;  %v6229_v1 = vsel %vm953_vm12, 1.0, %v7188_v18 }
 0x1ca   : > { %7235 = vst [vmem:[#allocation28_spill] sm:$0xff] %v6226_v62  ;;  %7236 = vst [vmem:[#allocation29_spill] sm:$0xff] %v6229_v1  ;;  %4887 = vmatmul.mubr.msk.f32.gmra.mrb[28].mxu0 %vm1252_vm4, %v6213_v52 }
 0x1cb   : > { %4889 = vmatprep.mubr.msk.f32.mxu0 %vm1252_vm4, %v6226_v62  ;;  %v912_v9 = vpop.permute.xlu1 %911  ;;  %v915_v14 = vpop.permute.xlu0 %914 }
 0x1cc   : > { %vm954_vm13 = vcmp.eq.s32.totalorder %v912_v9, %v5979_v15  ;;  %vm955_vm14 = vcmp.eq.s32.totalorder %v915_v14, %v5979_v15  ;;  %v777_v9 = vld [vmem:[%s5861_s24 + $0x8] sm:$0xff] }
 0x1cd   : > { %v6241_v16 = vsel %vm954_vm13, 1.0, %v7188_v18  ;;  %v6250_v28 = vsel %vm955_vm14, 1.0, %v7188_v18 }
 0x1ce   : > { %4890 = vmatmul.mubr.msk.f32.gmra.mrb[30].mxu0 %vm1252_vm4, %v6229_v1 }
 0x1cf   : > { %4892 = vmatprep.mubr.msk.f32.mxu0 %vm1252_vm4, %v6241_v16  ;;  %v918_v22 = vpop.permute.xlu1 %917  ;;  %v921_v23 = vpop.permute.xlu0 %920 }
 0x1d0   : > { %vm956_vm15 = vcmp.eq.s32.totalorder %v918_v22, %v5979_v15  ;;  %vm957_vm0 = vcmp.eq.s32.totalorder %v921_v23, %v5979_v15  ;;  %v778_v23 = vld [vmem:[%s5861_s24 + $0x10] sm:$0xff] }
 0x1d1   : > { %v6253_v29 = vsel %vm956_vm15, 1.0, %v7188_v18  ;;  %v6262_v50 = vsel %vm957_vm0, 1.0, %v7188_v18 }
 0x1d2   : > { %7237 = vst [vmem:[#allocation30_spill] sm:$0xff] %v6253_v29  ;;  %4893 = vmatmul.mubr.msk.f32.gmra.mrb[32].mxu0 %vm1252_vm4, %v6250_v28  ;;  %7238 = vst [vmem:[#allocation31_spill] sm:$0xff] %v6262_v50 }
 0x1d3   : > { %4895 = vmatprep.mubr.msk.f32.mxu0 %vm1252_vm4, %v6253_v29 }
 0x1d4   : > { %v1050_v36 = vpop.permute.xlu1 %1049  ;;  %v1053_v38 = vpop.permute.xlu0 %1052 }
 0x1d5   : > { %vm1145_vm2 = vcmp.eq.s32.totalorder %v1053_v38, %v5979_v15  ;;  %vm1144_vm3 = vcmp.eq.s32.totalorder %v1050_v36, %v5979_v15  ;;  %v779_v38 = vld [vmem:[%s5861_s24 + $0x18] sm:$0xff] }
 0x1d6   : > { %v4273_v58 = vsel %vm1145_vm2, 1.0, %v7188_v18  ;;  %4896 = vmatmul.mubr.msk.f32.gmra.mrb[34].mxu0 %vm1252_vm4, %v6262_v50  ;;  %v4272_v61 = vsel %vm1144_vm3, 1.0, %v7188_v18 }
 0x1d7   : > { %4900 = vmatprep.mubr.msk.f32.mxu0 %vm1960_vm1, %v776_v47  ;;  %4793 = vmatprep.mubr.msk.f32.mxu1 %vm1252_vm4, %v4272_v61  ;;  %v780_v61 = vld [vmem:[%s5861_s24 + $0x20] sm:$0xff] }
 0x1d8   : > { %v1056_v14 = vpop.permute.xlu1 %1055  ;;  %v1062_v22 = vpop.permute.xlu0 %1061  ;;  %4794 = vmatmul.mubr.msk.f32.vlgmr.msra.gmra.mrb[0].mxu1 %vm1252_vm4, %v4273_v58 }
 0x1d9   : > { %vm1146_vm5 = vcmp.eq.s32.totalorder %v1056_v14, %v5979_v15  ;;  %5056 = vmatpush3.bf16.msra.mxu1 %v6069_v54  ;;  %vm1148_vm6 = vcmp.eq.s32.totalorder %v1062_v22, %v5979_v15 }
 0x1da   : > { %v4274_v36 = vsel %vm1146_vm5, 1.0, %v7188_v18  ;;  %4901 = vmatmul.mubr.msk.f32.vlgmr.msra.gmra.mrb[0].mxu0 %vm1960_vm1, %v777_v9  ;;  %v4276_v14 = vsel %vm1148_vm6, 1.0, %v7188_v18  ;;  %v781_v9 = vld [vmem:[%s5861_s24 + $0x28] sm:$0xff] }
 0x1db   : > { %4903 = vmatprep.mubr.msk.f32.mxu0 %vm1960_vm1, %v778_v23  ;;  %4796 = vmatprep.mubr.msk.f32.mxu1 %vm1252_vm4, %v4274_v36  ;;  %v782_v36 = vld [vmem:[%s5861_s24 + $0x30] sm:$0xff] }
 0x1dc   : > { %v1059_v47 = vpop.permute.xlu1 %1058  ;;  %v1068_v58 = vpop.permute.xlu0 %1067 }
 0x1dd   : > { %vm1147_vm7 = vcmp.eq.s32.totalorder %v1059_v47, %v5979_v15  ;;  %vm1150_vm8 = vcmp.eq.s32.totalorder %v1068_v58, %v5979_v15 }
 0x1de   : > { %v4275_v54 = vsel %vm1147_vm7, 1.0, %v7188_v18  ;;  %4904 = vmatmul.mubr.msk.f32.gmra.mrb[2].mxu0 %vm1960_vm1, %v779_v38  ;;  %v4278_v47 = vsel %vm1150_vm8, 1.0, %v7188_v18  ;;  %v783_v38 = vld [vmem:[%s5861_s24 + $0x38] sm:$0xff] }
 0x1df   : > { %4797 = vmatmul.mubr.msk.f32.gmra.mrb[2].mxu1 %vm1252_vm4, %v4275_v54  ;;  %4906 = vmatprep.mubr.msk.f32.mxu0 %vm1960_vm1, %v780_v61 }
 0x1e0   : > { %v1065_v22 = vpop.permute.xlu1 %1064  ;;  %v1074_v23 = vpop.permute.xlu0 %1073  ;;  %4799 = vmatprep.mubr.msk.f32.mxu1 %vm1252_vm4, %v4276_v14  ;;  %v784_v14 = vld [vmem:[%s5861_s24 + $0x40] sm:$0xff] }
 0x1e1   : > { %vm1149_vm9 = vcmp.eq.s32.totalorder %v1065_v22, %v5979_v15  ;;  %vm1152_vm10 = vcmp.eq.s32.totalorder %v1074_v23, %v5979_v15 }
 0x1e2   : > { %v4277_v8 = vsel %vm1149_vm9, 1.0, %v7188_v18  ;;  %4907 = vmatmul.mubr.msk.f32.gmra.mrb[4].mxu0 %vm1960_vm1, %v781_v9  ;;  %v785_v9 = vld [vmem:[%s5861_s24 + $0x48] sm:$0xff] }
 0x1e3   : > { %4800 = vmatmul.mubr.msk.f32.gmra.mrb[4].mxu1 %vm1252_vm4, %v4277_v8  ;;  %4909 = vmatprep.mubr.msk.f32.mxu0 %vm1960_vm1, %v782_v36  ;;  %v4280_v8 = vsel %vm1152_vm10, 1.0, %v7188_v18  ;;  %v786_v36 = vld [vmem:[%s5861_s24 + $0x50] sm:$0xff] }
 0x1e4   : > { %v1071_v58 = vpop.permute.xlu1 %1070  ;;  %v1080_v61 = vpop.permute.xlu0 %1079  ;;  %4802 = vmatprep.mubr.msk.f32.mxu1 %vm1252_vm4, %v4278_v47 }
 0x1e5   : > { %vm1151_vm11 = vcmp.eq.s32.totalorder %v1071_v58, %v5979_v15  ;;  %vm1154_vm12 = vcmp.eq.s32.totalorder %v1080_v61, %v5979_v15  ;;  %v787_v58 = vld [vmem:[%s5861_s24 + $0x58] sm:$0xff] }
 0x1e6   : > { %v4279_v54 = vsel %vm1151_vm11, 1.0, %v7188_v18  ;;  %4910 = vmatmul.mubr.msk.f32.gmra.mrb[6].mxu0 %vm1960_vm1, %v783_v38  ;;  %v4282_v38 = vsel %vm1154_vm12, 1.0, %v7188_v18 }
 0x1e7   : > { %4803 = vmatmul.mubr.msk.f32.gmra.mrb[6].mxu1 %vm1252_vm4, %v4279_v54  ;;  %4912 = vmatprep.mubr.msk.f32.mxu0 %vm1960_vm1, %v784_v14  ;;  %v788_v54 = vld [vmem:[%s5861_s24 + $0x60] sm:$0xff] }
 0x1e8   : > { %v1077_v22 = vpop.permute.xlu1 %1076  ;;  %4805 = vmatprep.mubr.msk.f32.mxu1 %vm1252_vm4, %v4280_v8  ;;  %v1086_v23 = vpop.permute.xlu0 %1085 }
 0x1e9   : > { %vm1153_vm13 = vcmp.eq.s32.totalorder %v1077_v22, %v5979_v15  ;;  %vm1156_vm14 = vcmp.eq.s32.totalorder %v1086_v23, %v5979_v15  ;;  %v789_v22 = vld [vmem:[%s5861_s24 + $0x68] sm:$0xff] }
 0x1ea   : > { %v4281_v47 = vsel %vm1153_vm13, 1.0, %v7188_v18  ;;  %4913 = vmatmul.mubr.msk.f32.gmra.mrb[8].mxu0 %vm1960_vm1, %v785_v9  ;;  %v4284_v9 = vsel %vm1156_vm14, 1.0, %v7188_v18 }
 0x1eb   : > { %4806 = vmatmul.mubr.msk.f32.gmra.mrb[8].mxu1 %vm1252_vm4, %v4281_v47  ;;  %4915 = vmatprep.mubr.msk.f32.mxu0 %vm1960_vm1, %v786_v36  ;;  %v790_v47 = vld [vmem:[%s5861_s24 + $0x70] sm:$0xff] }
 0x1ec   : > { %v1083_v61 = vpop.permute.xlu1 %1082  ;;  %4808 = vmatprep.mubr.msk.f32.mxu1 %vm1252_vm4, %v4282_v38  ;;  %v1092_v14 = vpop.permute.xlu0 %1091 }
 0x1ed   : > { %vm1155_vm15 = vcmp.eq.s32.totalorder %v1083_v61, %v5979_v15  ;;  %vm1158_vm0 = vcmp.eq.s32.totalorder %v1092_v14, %v5979_v15  ;;  %v791_v61 = vld [vmem:[%s5861_s24 + $0x78] sm:$0xff] }
 0x1ee   : > { %v4283_v8 = vsel %vm1155_vm15, 1.0, %v7188_v18  ;;  %4916 = vmatmul.mubr.msk.f32.gmra.mrb[10].mxu0 %vm1960_vm1, %v787_v58  ;;  %v4286_v58 = vsel %vm1158_vm0, 1.0, %v7188_v18 }
 0x1ef   : > { %4809 = vmatmul.mubr.msk.f32.gmra.mrb[10].mxu1 %vm1252_vm4, %v4283_v8  ;;  %4918 = vmatprep.mubr.msk.f32.mxu0 %vm1960_vm1, %v788_v54  ;;  %v792_v8 = vld [vmem:[%s5861_s24 + $0x80] sm:$0xff] }
 0x1f0   : > { %v1089_v23 = vpop.permute.xlu1 %1088  ;;  %4811 = vmatprep.mubr.msk.f32.mxu1 %vm1252_vm4, %v4284_v9  ;;  %v1098_v36 = vpop.permute.xlu0 %1097 }
 0x1f1   : > { %vm1157_vm2 = vcmp.eq.s32.totalorder %v1089_v23, %v5979_v15  ;;  %vm1160_vm3 = vcmp.eq.s32.totalorder %v1098_v36, %v5979_v15  ;;  %v793_v23 = vld [vmem:[%s5861_s24 + $0x88] sm:$0xff] }
 0x1f2   : > { %v4285_v38 = vsel %vm1157_vm2, 1.0, %v7188_v18  ;;  %4919 = vmatmul.mubr.msk.f32.gmra.mrb[12].mxu0 %vm1960_vm1, %v789_v22  ;;  %v4288_v22 = vsel %vm1160_vm3, 1.0, %v7188_v18 }
 0x1f3   : > { %4812 = vmatmul.mubr.msk.f32.gmra.mrb[12].mxu1 %vm1252_vm4, %v4285_v38  ;;  %4921 = vmatprep.mubr.msk.f32.mxu0 %vm1960_vm1, %v790_v47  ;;  %v794_v38 = vld [vmem:[%s5861_s24 + $0x90] sm:$0xff] }
 0x1f4   : > { %v1095_v14 = vpop.permute.xlu1 %1094  ;;  %4814 = vmatprep.mubr.msk.f32.mxu1 %vm1252_vm4, %v4286_v58  ;;  %v1104_v54 = vpop.permute.xlu0 %1103 }
 0x1f5   : > { %vm1159_vm5 = vcmp.eq.s32.totalorder %v1095_v14, %v5979_v15  ;;  %vm1162_vm6 = vcmp.eq.s32.totalorder %v1104_v54, %v5979_v15  ;;  %v795_v14 = vld [vmem:[%s5861_s24 + $0x98] sm:$0xff] }
 0x1f6   : > { %v4287_v9 = vsel %vm1159_vm5, 1.0, %v7188_v18  ;;  %4922 = vmatmul.mubr.msk.f32.gmra.mrb[14].mxu0 %vm1960_vm1, %v791_v61  ;;  %v4290_v61 = vsel %vm1162_vm6, 1.0, %v7188_v18  ;;  %vm4041_vm5 = vcmask 23552  }
 0x1f7   : > { %4815 = vmatmul.mubr.msk.f32.gmra.mrb[14].mxu1 %vm1252_vm4, %v4287_v9  ;;  %4924 = vmatprep.mubr.msk.f32.mxu0 %vm1960_vm1, %v792_v8  ;;  %v796_v9 = vld [vmem:[%s5861_s24 + $0xa0] sm:$0xff] }
 0x1f8   : > { %v1101_v36 = vpop.permute.xlu1 %1100  ;;  %4817 = vmatprep.mubr.msk.f32.mxu1 %vm1252_vm4, %v4288_v22  ;;  %v1110_v47 = vpop.permute.xlu0 %1109 }
 0x1f9   : > { %vm1161_vm7 = vcmp.eq.s32.totalorder %v1101_v36, %v5979_v15  ;;  %vm1164_vm8 = vcmp.eq.s32.totalorder %v1110_v47, %v5979_v15  ;;  %v797_v36 = vld [vmem:[%s5861_s24 + $0xa8] sm:$0xff] }
 0x1fa   : > { %v4289_v58 = vsel %vm1161_vm7, 1.0, %v7188_v18  ;;  %4925 = vmatmul.mubr.msk.f32.gmra.mrb[16].mxu0 %vm1960_vm1, %v793_v23  ;;  %v4292_v23 = vsel %vm1164_vm8, 1.0, %v7188_v18 }
 0x1fb   : > { %4818 = vmatmul.mubr.msk.f32.gmra.mrb[16].mxu1 %vm1252_vm4, %v4289_v58  ;;  %4927 = vmatprep.mubr.msk.f32.mxu0 %vm1960_vm1, %v794_v38  ;;  %v798_v58 = vld [vmem:[%s5861_s24 + $0xb0] sm:$0xff] }
 0x1fc   : > { %v1107_v54 = vpop.permute.xlu1 %1106  ;;  %4820 = vmatprep.mubr.msk.f32.mxu1 %vm1252_vm4, %v4290_v61  ;;  %v1116_v8 = vpop.permute.xlu0 %1115 }
 0x1fd   : > { %vm1163_vm9 = vcmp.eq.s32.totalorder %v1107_v54, %v5979_v15  ;;  %vm1166_vm10 = vcmp.eq.s32.totalorder %v1116_v8, %v5979_v15  ;;  %v799_v54 = vld [vmem:[%s5861_s24 + $0xb8] sm:$0xff] }
 0x1fe   : > { %v4291_v22 = vsel %vm1163_vm9, 1.0, %v7188_v18  ;;  %4928 = vmatmul.mubr.msk.f32.gmra.mrb[18].mxu0 %vm1960_vm1, %v795_v14  ;;  %v4294_v14 = vsel %vm1166_vm10, 1.0, %v7188_v18 }
 0x1ff   : > { %4821 = vmatmul.mubr.msk.f32.gmra.mrb[18].mxu1 %vm1252_vm4, %v4291_v22  ;;  %4930 = vmatprep.mubr.msk.f32.mxu0 %vm1960_vm1, %v796_v9  ;;  %v800_v22 = vld [vmem:[%s5861_s24 + $0xc0] sm:$0xff] }
 0x200   : > { %v1113_v47 = vpop.permute.xlu1 %1112  ;;  %4823 = vmatprep.mubr.msk.f32.mxu1 %vm1252_vm4, %v4292_v23  ;;  %v1122_v38 = vpop.permute.xlu0 %1121 }
 0x201   : > { %vm1165_vm11 = vcmp.eq.s32.totalorder %v1113_v47, %v5979_v15  ;;  %vm1168_vm12 = vcmp.eq.s32.totalorder %v1122_v38, %v5979_v15  ;;  %v801_v47 = vld [vmem:[%s5861_s24 + $0xc8] sm:$0xff] }
 0x202   : > { %v4293_v61 = vsel %vm1165_vm11, 1.0, %v7188_v18  ;;  %4931 = vmatmul.mubr.msk.f32.gmra.mrb[20].mxu0 %vm1960_vm1, %v797_v36  ;;  %v4296_v36 = vsel %vm1168_vm12, 1.0, %v7188_v18 }
 0x203   : > { %4824 = vmatmul.mubr.msk.f32.gmra.mrb[20].mxu1 %vm1252_vm4, %v4293_v61  ;;  %4933 = vmatprep.mubr.msk.f32.mxu0 %vm1960_vm1, %v798_v58  ;;  %v802_v58 = vld [vmem:[%s5861_s24 + $0xd0] sm:$0xff] }
 0x204   : > { %v1119_v8 = vpop.permute.xlu1 %1118  ;;  %4826 = vmatprep.mubr.msk.f32.mxu1 %vm1252_vm4, %v4294_v14  ;;  %v1128_v9 = vpop.permute.xlu0 %1127 }
 0x205   : > { %vm1167_vm13 = vcmp.eq.s32.totalorder %v1119_v8, %v5979_v15  ;;  %vm1170_vm14 = vcmp.eq.s32.totalorder %v1128_v9, %v5979_v15  ;;  %v803_v8 = vld [vmem:[%s5861_s24 + $0xd8] sm:$0xff] }
 0x206   : > { %v4295_v23 = vsel %vm1167_vm13, 1.0, %v7188_v18  ;;  %4934 = vmatmul.mubr.msk.f32.gmra.mrb[22].mxu0 %vm1960_vm1, %v799_v54  ;;  %v4298_v54 = vsel %vm1170_vm14, 1.0, %v7188_v18 }
 0x207   : > { %4827 = vmatmul.mubr.msk.f32.gmra.mrb[22].mxu1 %vm1252_vm4, %v4295_v23  ;;  %4936 = vmatprep.mubr.msk.f32.mxu0 %vm1960_vm1, %v800_v22  ;;  %v804_v22 = vld [vmem:[%s5861_s24 + $0xe0] sm:$0xff] }
 0x208   : > { %v1125_v38 = vpop.permute.xlu1 %1124  ;;  %4829 = vmatprep.mubr.msk.f32.mxu1 %vm1252_vm4, %v4296_v36  ;;  %v1134_v61 = vpop.permute.xlu0 %1133 }
 0x209   : > { %vm1169_vm15 = vcmp.eq.s32.totalorder %v1125_v38, %v5979_v15  ;;  %vm1172_vm0 = vcmp.eq.s32.totalorder %v1134_v61, %v5979_v15 }
 0x20a   : > { %v4297_v14 = vsel %vm1169_vm15, 1.0, %v7188_v18  ;;  %4937 = vmatmul.mubr.msk.f32.gmra.mrb[24].mxu0 %vm1960_vm1, %v801_v47  ;;  %v4300_v36 = vsel %vm1172_vm0, 1.0, %v7188_v18  ;;  %v805_v47 = vld [vmem:[%s5861_s24 + $0xe8] sm:$0xff] }
 0x20b   : > { %4830 = vmatmul.mubr.msk.f32.gmra.mrb[24].mxu1 %vm1252_vm4, %v4297_v14  ;;  %4939 = vmatprep.mubr.msk.f32.mxu0 %vm1960_vm1, %v802_v58  ;;  %v806_v58 = vld [vmem:[%s5861_s24 + $0xf0] sm:$0xff]  ;;  %v807_v14 = vld [vmem:[%s5861_s24 + $0xf8] sm:$0xff] }
 0x20c   : > { %v1131_v9 = vpop.permute.xlu1 %1130  ;;  %4832 = vmatprep.mubr.msk.f32.mxu1 %vm1252_vm4, %v4298_v54  ;;  %v808_v54 = vld [vmem:[%s5861_s24 + $0x100] sm:$0xff] }
 0x20d   : > { %vm1171_vm2 = vcmp.eq.s32.totalorder %v1131_v9, %v5979_v15  ;;  %v810_v9 = vld [vmem:[%s5861_s24 + $0x110] sm:$0xff] }
 0x20e   : > { %v4299_v23 = vsel %vm1171_vm2, 1.0, %v7188_v18  ;;  %4940 = vmatmul.mubr.msk.f32.gmra.mrb[26].mxu0 %vm1960_vm1, %v803_v8  ;;  %v809_v8 = vld [vmem:[%s5861_s24 + $0x108] sm:$0xff] }
 0x20f   : > { %4833 = vmatmul.mubr.msk.f32.gmra.mrb[26].mxu1 %vm1252_vm4, %v4299_v23  ;;  %4942 = vmatprep.mubr.msk.f32.mxu0 %vm1960_vm1, %v804_v22  ;;  %v2608_v22 = vld [vmem:[%s7181_s9 + $0x10] sm:$0xff]  ;;  %v2609_v23 = vld [vmem:[%s7181_s9 + $0x18] sm:$0xff] }
 0x210   : > { %v1137_v38 = vpop.permute.xlu1 %1136  ;;  %4835 = vmatprep.mubr.msk.f32.mxu1 %vm1252_vm4, %v4300_v36  ;;  %v5057_v36 = vpack.c.bf16 %v2609_v23, %v2608_v22 }
 0x211   : > { %vm1173_vm3 = vcmp.eq.s32.totalorder %v1137_v38, %v5979_v15  ;;  %v811_v15 = vld [vmem:[%s5861_s24 + $0x118] sm:$0xff] }
 0x212   : > { %v4301_v61 = vsel %vm1173_vm3, 1.0, %v7188_v18  ;;  %4943 = vmatmul.mubr.msk.f32.gmra.mrb[28].mxu0 %vm1960_vm1, %v805_v47  ;;  %5058 = vmatprep.subr.bf16.mxu1 %v5057_v36 }
 0x213   : > { %4836 = vmatmul.mubr.msk.f32.gmra.mrb[28].mxu1 %vm1252_vm4, %v4301_v61  ;;  %4945 = vmatprep.mubr.msk.f32.mxu0 %vm1960_vm1, %v806_v58  ;;  %vm2617_vm4 = vcmask 261120  }
 0x214   : > { %5060 = vmatpush3.bf16.msra.mxu1 %v5057_v36 }
 0x216   : > { %4946 = vmatmul.mubr.msk.f32.gmra.mrb[30].mxu0 %vm1960_vm1, %v807_v14 }
 0x217   : > { %4948 = vmatprep.mubr.msk.f32.mxu0 %vm1960_vm1, %v808_v54 }
 0x21a   : > { %4949 = vmatmul.mubr.msk.f32.gmra.mrb[32].mxu0 %vm1960_vm1, %v809_v8 }
 0x21b   : > { %4951 = vmatprep.mubr.msk.f32.mxu0 %vm1960_vm1, %v810_v9 }
 0x21e   : > { %4952 = vmatmul.mubr.msk.f32.gmra.mrb[34].mxu0 %vm1960_vm1, %v811_v15  ;;  %vm5748_vm1 = vmmov 0  }
 0x2ab   : > { %v4795_v47 = vpop.f32.mrb[0].mxu1 }
 0x2ac   : > { %v1457_v38 = vpop.f32.mrb[1].mxu1 }
 0x2ad   : > { %v6434_v58 = vpop.f32.mrb[0].mxu0 }
 0x2ae   : > { %v4412_v61 = vmul.f32 -1.442695, %v6434_v58  ;;  %v6437_v14 = vpop.f32.mrb[1].mxu0 }
 0x2af   : > { %v4411_v54 = vmul.f32 -1.442695, %v6437_v14 }
 0x2b0   : > { %5373 = vpow2.f32 %v4412_v61 }
 0x2b1   : > { %5375 = vpow2.f32 %v4411_v54  ;;  %v6440_v8 = vpop.f32.mrb[2].mxu0 }
 0x2b2   : > { %v4414_v9 = vmul.f32 -1.442695, %v6440_v8  ;;  %v6443_v15 = vpop.f32.mrb[3].mxu0  ;;  %v4798_v22 = vpop.f32.mrb[2].mxu1 }
 0x2b3   : > { %v4413_v23 = vmul.f32 -1.442695, %v6443_v15  ;;  %v1467_v36 = vpop.f32.mrb[3].mxu1 }
 0x2b4   : > { %5377 = vpow2.f32 %v4414_v9 }
 0x2b5   : > { %5379 = vpow2.f32 %v4413_v23  ;;  %v6446_v18 = vpop.f32.mrb[4].mxu0 }
 0x2b6   : > { %v4416_v2 = vmul.f32 -1.442695, %v6446_v18  ;;  %v6449_v57 = vpop.f32.mrb[5].mxu0  ;;  %v4801_v61 = vpop.f32.mrb[4].mxu1 }
 0x2b7   : > { %v4415_v54 = vmul.f32 -1.442695, %v6449_v57  ;;  %v1477_v53 = vpop.f32.mrb[5].mxu1 }
 0x2b8   : > { %5381 = vpow2.f32 %v4416_v2 }
 0x2b9   : > { %5383 = vpow2.f32 %v4415_v54  ;;  %v4911_v46 = vpop.f32.mrb[6].mxu0 }
 0x2ba   : > { %v5374_v43 = vpop.eup %5373  ;;  %v6452_v35 = vadd.f32 %v4911_v46, %v4795_v47  ;;  %v2169_v32 = vpop.f32.mrb[7].mxu0 }
 0x2bb   : > { %v4804_v27 = vpop.f32.mrb[6].mxu1  ;;  %v5376_v9 = vpop.eup %5375  ;;  %v2463_v23 = vadd.f32 1.0, %v5374_v43  ;;  %v6454_v26 = vadd.f32 %v2169_v32, %v1457_v38 }
 0x2bc   : > { %v1487_v21 = vpop.f32.mrb[7].mxu1  ;;  %v2462_v20 = vadd.f32 1.0, %v5376_v9  ;;  %v4418_v13 = vmul.f32 -1.442695, %v6452_v35 }
 0x2bd   : > { %5385 = vrcp.f32 %v2463_v23  ;;  %v4417_v12 = vmul.f32 -1.442695, %v6454_v26  ;;  %v4914_v7 = vpop.f32.mrb[8].mxu0 }
 0x2be   : > { %v5378_v2 = vpop.eup %5377  ;;  %5387 = vrcp.f32 %v2462_v20  ;;  %v6458_v54 = vadd.f32 %v4914_v7, %v4798_v22  ;;  %v2179_v46 = vpop.f32.mrb[9].mxu0 }
 0x2bf   : > { %v4807_v47 = vpop.f32.mrb[8].mxu1  ;;  %v5380_v6 = vpop.eup %5379  ;;  %v2465_v1 = vadd.f32 1.0, %v5378_v2  ;;  %5389 = vpow2.f32 %v4418_v13  ;;  %v6460_v43 = vadd.f32 %v2179_v46, %v1467_v36 }
 0x2c0   : > { %v1497_v32 = vpop.f32.mrb[9].mxu1  ;;  %v2464_v38 = vadd.f32 1.0, %v5380_v6  ;;  %5391 = vpow2.f32 %v4417_v12  ;;  %v4420_v9 = vmul.f32 -1.442695, %v6458_v54 }
 0x2c1   : > { %5393 = vrcp.f32 %v2465_v1  ;;  %v4419_v23 = vmul.f32 -1.442695, %v6460_v43  ;;  %v4917_v3 = vpop.f32.mrb[10].mxu0 }
 0x2c2   : > { %v5382_v62 = vpop.eup %5381  ;;  %5395 = vrcp.f32 %v2464_v38  ;;  %v6464_v7 = vadd.f32 %v4917_v3, %v4801_v61  ;;  %v2189_v20 = vpop.f32.mrb[11].mxu0 }
 0x2c3   : > { %v4810_v22 = vpop.f32.mrb[10].mxu1  ;;  %v5384_v0 = vpop.eup %5383  ;;  %v2467_v2 = vadd.f32 1.0, %v5382_v62  ;;  %5397 = vpow2.f32 %v4420_v9  ;;  %v6466_v13 = vadd.f32 %v2189_v20, %v1477_v53 }
 0x2c4   : > { %v1507_v36 = vpop.f32.mrb[11].mxu1  ;;  %v2466_v6 = vadd.f32 1.0, %v5384_v0  ;;  %5399 = vpow2.f32 %v4419_v23  ;;  %v4422_v12 = vmul.f32 -1.442695, %v6464_v7 }
 0x2c5   : > { %5401 = vrcp.f32 %v2467_v2  ;;  %v4421_v1 = vmul.f32 -1.442695, %v6466_v13  ;;  %v4920_v46 = vpop.f32.mrb[12].mxu0 }
 0x2c6   : > { %5403 = vrcp.f32 %v2466_v6  ;;  %v6470_v38 = vadd.f32 %v4920_v46, %v4804_v27  ;;  %v2199_v3 = vpop.f32.mrb[13].mxu0  ;;  %v4813_v61 = vpop.f32.mrb[12].mxu1 }
 0x2c7   : > { %v5386_v52 = vpop.eup %5385  ;;  %5405 = vpow2.f32 %v4422_v12  ;;  %v6472_v62 = vadd.f32 %v2199_v3, %v1487_v21  ;;  %v1517_v53 = vpop.f32.mrb[13].mxu1 }
 0x2c8   : > { %v5388_v9 = vpop.eup %5387  ;;  %5407 = vpow2.f32 %v4421_v1  ;;  %v4424_v0 = vmul.f32 -1.442695, %v6470_v38  ;;  %v2571_v46 = vmul.f32 %v5386_v52, %v6434_v58 }
 0x2c9   : > { %v5390_v23 = vpop.eup %5389  ;;  %v2570_v20 = vmul.f32 %v5388_v9, %v6437_v14  ;;  %v4423_v2 = vmul.f32 -1.442695, %v6472_v62  ;;  %v4923_v6 = vpop.f32.mrb[14].mxu0 }
 0x2ca   : > { %v5392_v27 = vpop.eup %5391  ;;  %v2469_v63 = vadd.f32 1.0, %v5390_v23  ;;  %5409 = vpow2.f32 %v4424_v0  ;;  %v6478_v12 = vadd.f32 %v4923_v6, %v4807_v47  ;;  %v2209_v21 = vpop.f32.mrb[15].mxu0 }
 0x2cb   : > { %v4816_v3 = vpop.f32.mrb[14].mxu1  ;;  %v5394_v51 = vpop.eup %5393  ;;  %v2468_v1 = vadd.f32 1.0, %v5392_v27  ;;  %5411 = vpow2.f32 %v4423_v2  ;;  %v6480_v60 = vadd.f32 %v2209_v21, %v1497_v32  ;;  %4962 = vmatprep.mubr.msk.f32.mxu1 %vm2617_vm4, %v2570_v20 }
 0x2cc   : > { %v1527_v14 = vpop.f32.mrb[15].mxu1  ;;  %v5396_v9 = vpop.eup %5395  ;;  %5413 = vrcp.f32 %v2469_v63  ;;  %v4426_v42 = vmul.f32 -1.442695, %v6478_v12  ;;  %4963 = vmatmul.mubr.msk.f32.vlgmr.msra.gmra.mrb[30].mxu1 %vm2617_vm4, %v2571_v46  ;;  %v2573_v32 = vmul.f32 %v5394_v51, %v6440_v8 }
 0x2cd   : > { %v5398_v52 = vpop.eup %5397  ;;  %v2572_v58 = vmul.f32 %v5396_v9, %v6443_v15  ;;  %5415 = vrcp.f32 %v2468_v1  ;;  %v4425_v47 = vmul.f32 -1.442695, %v6480_v60  ;;  %v4926_v0 = vpop.f32.mrb[16].mxu0 }
 0x2ce   : > { %v5400_v23 = vpop.eup %5399  ;;  %v2471_v2 = vadd.f32 1.0, %v5398_v52  ;;  %5417 = vpow2.f32 %v4426_v42  ;;  %v6488_v20 = vadd.f32 %v4926_v0, %v4810_v22  ;;  %v2219_v6 = vpop.f32.mrb[17].mxu0 }
 0x2cf   : > { %v4819_v63 = vpop.f32.mrb[16].mxu1  ;;  %v5402_v27 = vpop.eup %5401  ;;  %v2470_v21 = vadd.f32 1.0, %v5400_v23  ;;  %5419 = vpow2.f32 %v4425_v47  ;;  %v6490_v46 = vadd.f32 %v2219_v6, %v1507_v36  ;;  %4965 = vmatprep.mubr.msk.f32.mxu1 %vm2617_vm4, %v2572_v58 }
 0x2d0   : > { %v1537_v15 = vpop.f32.mrb[17].mxu1  ;;  %v5404_v1 = vpop.eup %5403  ;;  %5421 = vrcp.f32 %v2471_v2  ;;  %v4428_v9 = vmul.f32 -1.442695, %v6488_v20  ;;  %4966 = vmatmul.mubr.msk.f32.gmra.mrb[32].mxu1 %vm2617_vm4, %v2573_v32  ;;  %v2575_v36 = vmul.f32 %v5402_v27, %v6446_v18 }
 0x2d1   : > { %v5406_v51 = vpop.eup %5405  ;;  %v2574_v42 = vmul.f32 %v5404_v1, %v6449_v57  ;;  %5423 = vrcp.f32 %v2470_v21  ;;  %v4427_v8 = vmul.f32 -1.442695, %v6490_v46  ;;  %v4929_v22 = vpop.f32.mrb[18].mxu0 }
 0x2d2   : > { %v5408_v52 = vpop.eup %5407  ;;  %v2473_v47 = vadd.f32 1.0, %v5406_v51  ;;  %5425 = vpow2.f32 %v4428_v9  ;;  %v6498_v58 = vadd.f32 %v4929_v22, %v4813_v61  ;;  %v2229_v0 = vpop.f32.mrb[19].mxu0 }
 0x2d3   : > { %v4822_v23 = vpop.f32.mrb[18].mxu1  ;;  %v2472_v2 = vadd.f32 1.0, %v5408_v52  ;;  %5427 = vpow2.f32 %v4427_v8  ;;  %v6500_v6 = vadd.f32 %v2229_v0, %v1517_v53  ;;  %4968 = vmatprep.mubr.msk.f32.mxu1 %vm2617_vm4, %v2574_v42 }
 0x2d4   : > { %v1547_v57 = vpop.f32.mrb[19].mxu1  ;;  %v5410_v32 = vpop.eup %5409  ;;  %5429 = vrcp.f32 %v2473_v47  ;;  %v4430_v21 = vmul.f32 -1.442695, %v6498_v58  ;;  %4969 = vmatmul.mubr.msk.f32.gmra.mrb[34].mxu1 %vm2617_vm4, %v2575_v36 }
 0x2d5   : > { %v5412_v18 = vpop.eup %5411  ;;  %5431 = vrcp.f32 %v2472_v2  ;;  %v2475_v27 = vadd.f32 1.0, %v5410_v32  ;;  %v4429_v61 = vmul.f32 -1.442695, %v6500_v6  ;;  %v4932_v1 = vpop.f32.mrb[20].mxu0 }
 0x2d6   : > { %v5414_v9 = vpop.eup %5413  ;;  %v2474_v51 = vadd.f32 1.0, %v5412_v18  ;;  %5433 = vpow2.f32 %v4430_v21  ;;  %v6506_v53 = vadd.f32 %v4932_v1, %v4816_v3  ;;  %v2239_v8 = vpop.f32.mrb[21].mxu0 }
 0x2d7   : > { %v4825_v42 = vpop.f32.mrb[20].mxu1  ;;  %v5416_v22 = vpop.eup %5415  ;;  %5435 = vrcp.f32 %v2475_v27  ;;  %v6508_v52 = vadd.f32 %v2239_v8, %v1527_v14  ;;  %v2577_v18 = vmul.f32 %v5414_v9, %v6452_v35 }
 0x2d8   : > { %v6510_v47 = vpop.f32.mrb[21].mxu1  ;;  %v5418_v36 = vpop.eup %5417  ;;  %v2576_v0 = vmul.f32 %v5416_v22, %v6454_v26  ;;  %5437 = vrcp.f32 %v2474_v51  ;;  %v4432_v2 = vmul.f32 -1.442695, %v6506_v53 }
 0x2d9   : > { %v5420_v32 = vpop.eup %5419  ;;  %v2477_v21 = vadd.f32 1.0, %v5418_v36  ;;  %5439 = vpow2.f32 %v4429_v61  ;;  %v4431_v3 = vmul.f32 -1.442695, %v6508_v52  ;;  %v4935_v1 = vpop.f32.mrb[22].mxu0 }
 0x2da   : > { %v5422_v59 = vpop.eup %5421  ;;  %v2476_v27 = vadd.f32 1.0, %v5420_v32  ;;  %5441 = vpow2.f32 %v4432_v2  ;;  %v6516_v14 = vadd.f32 %v4935_v1, %v4819_v63  ;;  %4971 = vmatprep.mubr.msk.f32.mxu1 %vm2617_vm4, %v2576_v0  ;;  %v2249_v8 = vpop.f32.mrb[23].mxu0 }
 0x2db   : > { %v4828_v26 = vpop.f32.mrb[22].mxu1  ;;  %v5424_v51 = vpop.eup %5423  ;;  %5443 = vrcp.f32 %v2477_v21  ;;  %v6519_v22 = vadd.f32 %v2249_v8, %v1537_v15  ;;  %4972 = vmatmul.mubr.msk.f32.gmra.mrb[36].mxu1 %vm2617_vm4, %v2577_v18  ;;  %v2579_v2 = vmul.f32 %v5422_v59, %v6458_v54 }
 0x2dc   : > { %v6522_v35 = vpop.f32.mrb[23].mxu1  ;;  %v5426_v61 = vpop.eup %5425  ;;  %v2578_v9 = vmul.f32 %v5424_v51, %v6460_v43  ;;  %5445 = vrcp.f32 %v2476_v27  ;;  %v4434_v36 = vmul.f32 -1.442695, %v6516_v14 }
 0x2dd   : > { %v5428_v63 = vpop.eup %5427  ;;  %v2479_v0 = vadd.f32 1.0, %v5426_v61  ;;  %5447 = vpow2.f32 %v4431_v3  ;;  %v4433_v32 = vmul.f32 -1.442695, %v6519_v22  ;;  %v4938_v21 = vpop.f32.mrb[24].mxu0 }
 0x2de   : > { %v5430_v15 = vpop.eup %5429  ;;  %v2478_v1 = vadd.f32 1.0, %v5428_v63  ;;  %5449 = vpow2.f32 %v4434_v36  ;;  %v6528_v18 = vadd.f32 %v4938_v21, %v4822_v23  ;;  %4974 = vmatprep.mubr.msk.f32.mxu1 %vm2617_vm4, %v2578_v9  ;;  %v2259_v8 = vpop.f32.mrb[25].mxu0 }
 0x2df   : > { %v4831_v43 = vpop.f32.mrb[24].mxu1  ;;  %v5432_v27 = vpop.eup %5431  ;;  %5451 = vrcp.f32 %v2479_v0  ;;  %v6531_v51 = vadd.f32 %v2259_v8, %v1547_v57  ;;  %4975 = vmatmul.mubr.msk.f32.gmra.mrb[38].mxu1 %vm2617_vm4, %v2579_v2  ;;  %v2581_v23 = vmul.f32 %v5430_v15, %v6464_v7 }
 0x2e0   : > { %v1577_v59 = vpop.f32.mrb[25].mxu1  ;;  %v5434_v54 = vpop.eup %5433  ;;  %v2580_v3 = vmul.f32 %v5432_v27, %v6466_v13  ;;  %5453 = vrcp.f32 %v2478_v1  ;;  %v4436_v61 = vmul.f32 -1.442695, %v6528_v18 }
 0x2e1   : > { %v5436_v36 = vpop.eup %5435  ;;  %v2481_v63 = vadd.f32 1.0, %v5434_v54  ;;  %5455 = vpow2.f32 %v4433_v32  ;;  %v4435_v9 = vmul.f32 -1.442695, %v6531_v51  ;;  %v4941_v21 = vpop.f32.mrb[26].mxu0 }
 0x2e2   : > { %v5438_v0 = vpop.eup %5437  ;;  %5457 = vpow2.f32 %v4436_v61  ;;  %v6538_v57 = vadd.f32 %v4941_v21, %v4825_v42  ;;  %4977 = vmatprep.mubr.msk.f32.mxu1 %vm2617_vm4, %v2580_v3  ;;  %v2269_v2 = vpop.f32.mrb[27].mxu0  ;;  %v2583_v61 = vmul.f32 %v5436_v36, %v6470_v38 }
 0x2e3   : > { %v4834_v8 = vpop.f32.mrb[26].mxu1  ;;  %v5440_v13 = vpop.eup %5439  ;;  %v2582_v1 = vmul.f32 %v5438_v0, %v6472_v62  ;;  %v6543_v27 = vadd.f32 %v2269_v2, %v6510_v47  ;;  %4978 = vmatmul.mubr.msk.f32.gmra.mrb[40].mxu1 %vm2617_vm4, %v2581_v23  ;;  %5459 = vpow2.f32 %v4435_v9 }
 0x2e4   : > { %v1587_v7 = vpop.f32.mrb[27].mxu1  ;;  %v5442_v32 = vpop.eup %5441  ;;  %v2480_v15 = vadd.f32 1.0, %v5440_v13  ;;  %v4438_v54 = vmul.f32 -1.442695, %v6538_v57  ;;  %5461 = vrcp.f32 %v2481_v63 }
 0x2e5   : > { %v5444_v42 = vpop.eup %5443  ;;  %v2483_v3 = vadd.f32 1.0, %v5442_v32  ;;  %v4437_v21 = vmul.f32 -1.442695, %v6543_v27  ;;  %v4944_v39 = vpop.f32.mrb[28].mxu0  ;;  %4980 = vmatprep.mubr.msk.f32.mxu1 %vm2617_vm4, %v2582_v1 }
 0x2e6   : > { %v5446_v62 = vpop.eup %5445  ;;  %5463 = vrcp.f32 %v2480_v15  ;;  %v6550_v47 = vadd.f32 %v4944_v39, %v4828_v26  ;;  %v2279_v23 = vpop.f32.mrb[29].mxu0  ;;  %v2585_v39 = vmul.f32 %v5444_v42, %v6478_v12 }
 0x2e7   : > { %v4837_v0 = vpop.f32.mrb[28].mxu1  ;;  %v5448_v2 = vpop.eup %5447  ;;  %v2584_v9 = vmul.f32 %v5446_v62, %v6480_v60  ;;  %5465 = vrcp.f32 %v2483_v3  ;;  %v6554_v13 = vadd.f32 %v2279_v23, %v6522_v35  ;;  %4981 = vmatmul.mubr.msk.f32.gmra.mrb[42].mxu1 %vm2617_vm4, %v2583_v61 }
 0x2e8   : > { %v1597_v38 = vpop.f32.mrb[29].mxu1  ;;  %v5450_v36 = vpop.eup %5449  ;;  %v2482_v63 = vadd.f32 1.0, %v5448_v2  ;;  %5467 = vpow2.f32 %v4438_v54  ;;  %v4440_v1 = vmul.f32 -1.442695, %v6550_v47 }
 0x2e9   : > { %v5452_v32 = vpop.eup %5451  ;;  %v2485_v26 = vadd.f32 1.0, %v5450_v36  ;;  %5469 = vpow2.f32 %v4437_v21  ;;  %v4439_v15 = vmul.f32 -1.442695, %v6554_v13  ;;  %v4947_v60 = vpop.f32.mrb[30].mxu0  ;;  %4983 = vmatprep.mubr.msk.f32.mxu1 %vm2617_vm4, %v2584_v9 }
 0x2ea   : > { %v5454_v35 = vpop.eup %5453  ;;  %5471 = vrcp.f32 %v2482_v63  ;;  %v6561_v3 = vadd.f32 %v4947_v60, %v4831_v43  ;;  %v2289_v61 = vpop.f32.mrb[31].mxu0  ;;  %v2587_v2 = vmul.f32 %v5452_v32, %v6488_v20 }
 0x2eb   : > { %v5456_v62 = vpop.eup %5455  ;;  %v2586_v54 = vmul.f32 %v5454_v35, %v6490_v46  ;;  %5473 = vrcp.f32 %v2485_v26  ;;  %v6564_v23 = vadd.f32 %v2289_v61, %v1577_v59  ;;  %4984 = vmatmul.mubr.msk.f32.gmra.mrb[44].mxu1 %vm2617_vm4, %v2585_v39 }
 0x2ec   : > { %v5458_v12 = vpop.eup %5457  ;;  %v2484_v42 = vadd.f32 1.0, %v5456_v62  ;;  %5475 = vpow2.f32 %v4440_v1  ;;  %v4442_v21 = vmul.f32 -1.442695, %v6561_v3 }
 0x2ed   : > { %v2487_v9 = vadd.f32 1.0, %v5458_v12  ;;  %5477 = vpow2.f32 %v4439_v15  ;;  %v4950_v43 = vpop.f32.mrb[32].mxu0  ;;  %4986 = vmatprep.mubr.msk.f32.mxu1 %vm2617_vm4, %v2586_v54  ;;  %v5460_v36 = vpop.eup %5459  ;;  %v4441_v46 = vmul.f32 -1.442695, %v6564_v23 }
 0x2ee   : > { %5479 = vrcp.f32 %v2484_v42  ;;  %v6571_v59 = vadd.f32 %v4950_v43, %v4834_v8  ;;  %v2299_v63 = vpop.f32.mrb[33].mxu0  ;;  %v5462_v39 = vpop.eup %5461  ;;  %v2486_v26 = vadd.f32 1.0, %v5460_v36 }
 0x2ef   : > { %5481 = vrcp.f32 %v2487_v9  ;;  %v6573_v1 = vadd.f32 %v2299_v63, %v1587_v7  ;;  %4987 = vmatmul.mubr.msk.f32.gmra.mrb[46].mxu1 %vm2617_vm4, %v2587_v2  ;;  %v2589_v62 = vmul.f32 %v5462_v39, %v6498_v58 }
 0x2f0   : > { %v5464_v20 = vpop.eup %5463  ;;  %5483 = vpow2.f32 %v4442_v21  ;;  %v4444_v32 = vmul.f32 -1.442695, %v6571_v59 }
 0x2f1   : > { %v5466_v15 = vpop.eup %5465  ;;  %v2588_v60 = vmul.f32 %v5464_v20, %v6500_v6  ;;  %5485 = vrcp.f32 %v2486_v26  ;;  %v4443_v35 = vmul.f32 -1.442695, %v6573_v1  ;;  %v4953_v8 = vpop.f32.mrb[34].mxu0 }
 0x2f2   : > { %v5468_v61 = vpop.eup %5467  ;;  %5487 = vpow2.f32 %v4441_v46  ;;  %v6580_v54 = vadd.f32 %v4953_v8, %v4837_v0  ;;  %v2309_v7 = vpop.f32.mrb[35].mxu0  ;;  %v2591_v46 = vmul.f32 %v5466_v15, %v6506_v53 }
 0x2f3   : > { %v5470_v12 = vpop.eup %5469  ;;  %v2489_v42 = vadd.f32 1.0, %v5468_v61  ;;  %5489 = vpow2.f32 %v4444_v32  ;;  %4989 = vmatprep.mubr.msk.f32.mxu1 %vm2617_vm4, %v2588_v60  ;;  %v6583_v21 = vadd.f32 %v2309_v7, %v1597_v38 }
 0x2f4   : > { %v5472_v2 = vpop.eup %5471  ;;  %v2488_v6 = vadd.f32 1.0, %v5470_v12  ;;  %5491 = vpow2.f32 %v4443_v35  ;;  %v4446_v9 = vmul.f32 -1.442695, %v6580_v54  ;;  %4990 = vmatmul.mubr.msk.f32.gmra.mrb[48].mxu1 %vm2617_vm4, %v2589_v62 }
 0x2f5   : > { %v5474_v43 = vpop.eup %5473  ;;  %v2590_v58 = vmul.f32 %v5472_v2, %v6508_v52  ;;  %5493 = vrcp.f32 %v2489_v42  ;;  %v4445_v0 = vmul.f32 -1.442695, %v6583_v21 }
 0x2f6   : > { %v5476_v36 = vpop.eup %5475  ;;  %5495 = vrcp.f32 %v2488_v6  ;;  %v2593_v60 = vmul.f32 %v5474_v43, %v6516_v14 }
 0x2f7   : > { %v5478_v63 = vpop.eup %5477  ;;  %v2491_v38 = vadd.f32 1.0, %v5476_v36  ;;  %5497 = vpow2.f32 %v4446_v9  ;;  %4992 = vmatprep.mubr.msk.f32.mxu1 %vm2617_vm4, %v2590_v58 }
 0x2f8   : > { %v5480_v39 = vpop.eup %5479  ;;  %v2490_v26 = vadd.f32 1.0, %v5478_v63  ;;  %5499 = vpow2.f32 %v4445_v0  ;;  %4993 = vmatmul.mubr.msk.f32.gmra.mrb[50].mxu1 %vm2617_vm4, %v2591_v46 }
 0x2f9   : > { %v5482_v20 = vpop.eup %5481  ;;  %v2592_v52 = vmul.f32 %v5480_v39, %v6519_v22  ;;  %5501 = vrcp.f32 %v2491_v38 }
 0x2fa   : > { %v5484_v32 = vpop.eup %5483  ;;  %5503 = vrcp.f32 %v2490_v26  ;;  %v2595_v12 = vmul.f32 %v5482_v20, %v6528_v18 }
 0x2fb   : > { %v5486_v53 = vpop.eup %5485  ;;  %v2493_v15 = vadd.f32 1.0, %v5484_v32  ;;  %4995 = vmatprep.mubr.msk.f32.mxu1 %vm2617_vm4, %v2592_v52 }
 0x2fc   : > { %v5488_v35 = vpop.eup %5487  ;;  %v2594_v8 = vmul.f32 %v5486_v53, %v6531_v51  ;;  %4996 = vmatmul.mubr.msk.f32.gmra.mrb[52].mxu1 %vm2617_vm4, %v2593_v60 }
 0x2fd   : > { %v5490_v61 = vpop.eup %5489  ;;  %v2492_v62 = vadd.f32 1.0, %v5488_v35  ;;  %5505 = vrcp.f32 %v2493_v15 }
 0x2fe   : > { %v5492_v7 = vpop.eup %5491  ;;  %v2495_v22 = vadd.f32 1.0, %v5490_v61  ;;  %4998 = vmatprep.mubr.msk.f32.mxu1 %vm2617_vm4, %v2594_v8 }
 0x2ff   : > { %v5494_v14 = vpop.eup %5493  ;;  %5507 = vrcp.f32 %v2492_v62  ;;  %v2494_v42 = vadd.f32 1.0, %v5492_v7 }
 0x300   : > { %v5496_v2 = vpop.eup %5495  ;;  %4999 = vmatmul.mubr.msk.f32.gmra.mrb[54].mxu1 %vm2617_vm4, %v2595_v12  ;;  %v2597_v43 = vmul.f32 %v5494_v14, %v6538_v57 }
 0x301   : > { %v5498_v6 = vpop.eup %5497  ;;  %v2596_v51 = vmul.f32 %v5496_v2, %v6543_v27  ;;  %5509 = vrcp.f32 %v2494_v42 }
 0x302   : > { %v5500_v9 = vpop.eup %5499  ;;  %5511 = vrcp.f32 %v2495_v22  ;;  %v2497_v58 = vadd.f32 1.0, %v5498_v6 }
 0x303   : > { %v5502_v18 = vpop.eup %5501  ;;  %v2496_v0 = vadd.f32 1.0, %v5500_v9  ;;  %5001 = vmatprep.mubr.msk.f32.mxu1 %vm2617_vm4, %v2596_v51 }
 0x304   : > { %v5504_v36 = vpop.eup %5503  ;;  %5002 = vmatmul.mubr.msk.f32.gmra.mrb[56].mxu1 %vm2617_vm4, %v2597_v43  ;;  %v2599_v63 = vmul.f32 %v5502_v18, %v6550_v47 }
 0x305   : > { %v2598_v46 = vmul.f32 %v5504_v36, %v6554_v13  ;;  %5513 = vrcp.f32 %v2496_v0 }
 0x306   : > { %5515 = vrcp.f32 %v2497_v58 }
 0x307   : > { %5004 = vmatprep.mubr.msk.f32.mxu1 %vm2617_vm4, %v2598_v46  ;;  %v5506_v27 = vpop.eup %5505 }
 0x308   : > { %5005 = vmatmul.mubr.msk.f32.gmra.mrb[58].mxu1 %vm2617_vm4, %v2599_v63  ;;  %v2601_v26 = vmul.f32 %v5506_v27, %v6561_v3 }
 0x309   : > { %v5508_v57 = vpop.eup %5507 }
 0x30a   : > { %v2600_v38 = vmul.f32 %v5508_v57, %v6564_v23  ;;  %v6623_v23 = vld [vmem:[%s7182_s10] ss:$0 sm:$0xff] }
 0x30b   : > { %v5510_v39 = vpop.eup %5509 }
 0x30c   : > { %v5512_v20 = vpop.eup %5511  ;;  %v2602_v52 = vmul.f32 %v5510_v39, %v6573_v1  ;;  %5007 = vmatprep.mubr.msk.f32.mxu1 %vm2617_vm4, %v2600_v38 }
 0x30d   : > { %5008 = vmatmul.mubr.msk.f32.gmra.mrb[60].mxu1 %vm2617_vm4, %v2601_v26  ;;  %v2603_v13 = vmul.f32 %v5512_v20, %v6571_v59 }
 0x30e   : > { %5010 = vmatprep.mubr.msk.f32.mxu1 %vm2617_vm4, %v2602_v52 }
 0x30f   : > { %v5514_v47 = vpop.eup %5513 }
 0x310   : > { %v5516_v32 = vpop.eup %5515  ;;  %v2604_v60 = vmul.f32 %v5514_v47, %v6583_v21 }
 0x311   : > { %5011 = vmatmul.mubr.msk.f32.gmra.mrb[62].mxu1 %vm2617_vm4, %v2603_v13  ;;  %v2605_v3 = vmul.f32 %v5516_v32, %v6580_v54 }
 0x312   : > { %5013 = vmatprep.mubr.msk.f32.mxu1 %vm2617_vm4, %v2604_v60 }
 0x315   : > { %5014 = vmatmul.mubr.msk.f32.gmra.mrb[64].mxu1 %vm2617_vm4, %v2605_v3 }
 0x39f   : > { %v4964_v1 = vpop.f32.mrb[30].mxu1 }
 0x3a0   : > { %v6626_v53 = vadd.f32 %v4964_v1, %v6623_v23  ;;  %v2792_v59 = vpop.f32.mrb[31].mxu1 }
 0x3a1   : > { %v6629_v21 = vadd.f32 %v6623_v23, %v2792_v59 }
 0x3a2   : > { %v4485_v15 = vmul.f32 -1.442695, %v6626_v53 }
 0x3a3   : > { %v4484_v35 = vmul.f32 -1.442695, %v6629_v21  ;;  %v4967_v54 = vpop.f32.mrb[32].mxu1 }
 0x3a4   : > { %5517 = vpow2.f32 %v4485_v15  ;;  %v6634_v8 = vadd.f32 %v4967_v54, %v6623_v23  ;;  %v2802_v61 = vpop.f32.mrb[33].mxu1 }
 0x3a5   : > { %5519 = vpow2.f32 %v4484_v35  ;;  %v6637_v62 = vadd.f32 %v6623_v23, %v2802_v61 }
 0x3a6   : > { %v4487_v7 = vmul.f32 -1.442695, %v6634_v8 }
 0x3a7   : > { %v4486_v12 = vmul.f32 -1.442695, %v6637_v62  ;;  %v4970_v22 = vpop.f32.mrb[34].mxu1 }
 0x3a8   : > { %5521 = vpow2.f32 %v4487_v7  ;;  %v6642_v14 = vadd.f32 %v4970_v22, %v6623_v23  ;;  %v2812_v42 = vpop.f32.mrb[35].mxu1 }
 0x3a9   : > { %5523 = vpow2.f32 %v4486_v12  ;;  %v6645_v2 = vadd.f32 %v6623_v23, %v2812_v42 }
 0x3aa   : > { %v4489_v6 = vmul.f32 -1.442695, %v6642_v14 }
 0x3ab   : > { %v4488_v51 = vmul.f32 -1.442695, %v6645_v2 }
 0x3ac   : > { %5525 = vpow2.f32 %v4489_v6 }
 0x3ad   : > { %5527 = vpow2.f32 %v4488_v51 }
 0x3ae   : > { %v5518_v9 = vpop.eup %5517  ;;  %v4973_v43 = vpop.f32.mrb[36].mxu1 }
 0x3af   : > { %v5520_v58 = vpop.eup %5519  ;;  %v3080_v18 = vadd.f32 1.0, %v5518_v9  ;;  %v6650_v0 = vadd.f32 %v4973_v43, %v6623_v23  ;;  %v2822_v36 = vpop.f32.mrb[37].mxu1 }
 0x3b0   : > { %v3079_v46 = vadd.f32 1.0, %v5520_v58  ;;  %v6653_v63 = vadd.f32 %v6623_v23, %v2822_v36  ;;  %v6679_v58 = vld [vmem:[%s7183_s11] ss:$0 sm:$0xff] }
 0x3b1   : > { %5529 = vrcp.f32 %v3080_v18  ;;  %v4491_v27 = vmul.f32 -1.442695, %v6650_v0 }
 0x3b2   : > { %v5522_v57 = vpop.eup %5521  ;;  %5531 = vrcp.f32 %v3079_v46  ;;  %v4490_v38 = vmul.f32 -1.442695, %v6653_v63  ;;  %v4976_v39 = vpop.f32.mrb[38].mxu1 }
 0x3b3   : > { %v5524_v26 = vpop.eup %5523  ;;  %v3082_v20 = vadd.f32 1.0, %v5522_v57  ;;  %5533 = vpow2.f32 %v4491_v27  ;;  %v6658_v52 = vadd.f32 %v4976_v39, %v6623_v23  ;;  %v2832_v47 = vpop.f32.mrb[39].mxu1 }
 0x3b4   : > { %v3081_v13 = vadd.f32 1.0, %v5524_v26  ;;  %5535 = vpow2.f32 %v4490_v38  ;;  %v6661_v32 = vadd.f32 %v6623_v23, %v2832_v47 }
 0x3b5   : > { %5537 = vrcp.f32 %v3082_v20  ;;  %v4493_v60 = vmul.f32 -1.442695, %v6658_v52 }
 0x3b6   : > { %v5526_v3 = vpop.eup %5525  ;;  %5539 = vrcp.f32 %v3081_v13  ;;  %v4492_v1 = vmul.f32 -1.442695, %v6661_v32  ;;  %v4979_v59 = vpop.f32.mrb[40].mxu1 }
 0x3b7   : > { %v5528_v15 = vpop.eup %5527  ;;  %v3084_v35 = vadd.f32 1.0, %v5526_v3  ;;  %5541 = vpow2.f32 %v4493_v60  ;;  %v6666_v54 = vadd.f32 %v4979_v59, %v6623_v23  ;;  %v2842_v61 = vpop.f32.mrb[41].mxu1 }
 0x3b8   : > { %v3083_v7 = vadd.f32 1.0, %v5528_v15  ;;  %5543 = vpow2.f32 %v4492_v1  ;;  %v6669_v12 = vadd.f32 %v6623_v23, %v2842_v61 }
 0x3b9   : > { %5545 = vrcp.f32 %v3084_v35  ;;  %v4495_v22 = vmul.f32 -1.442695, %v6666_v54 }
 0x3ba   : > { %5547 = vrcp.f32 %v3083_v7  ;;  %v4494_v42 = vmul.f32 -1.442695, %v6669_v12  ;;  %v4982_v6 = vpop.f32.mrb[42].mxu1 }
 0x3bb   : > { %v5530_v51 = vpop.eup %5529  ;;  %5549 = vpow2.f32 %v4495_v22  ;;  %v6674_v9 = vadd.f32 %v4982_v6, %v6623_v23  ;;  %v2852_v43 = vpop.f32.mrb[43].mxu1 }
 0x3bc   : > { %v5532_v18 = vpop.eup %5531  ;;  %v3188_v36 = vmul.f32 %v5530_v51, %v6626_v53  ;;  %5551 = vpow2.f32 %v4494_v42  ;;  %v6683_v46 = vadd.f32 %v6623_v23, %v2852_v43 }
 0x3bd   : > { %v5534_v27 = vpop.eup %5533  ;;  %v3187_v57 = vmul.f32 %v5532_v18, %v6629_v21  ;;  %v4497_v38 = vmul.f32 -1.442695, %v6674_v9 }
 0x3be   : > { %v5536_v39 = vpop.eup %5535  ;;  %v3086_v26 = vadd.f32 1.0, %v5534_v27  ;;  %v4496_v20 = vmul.f32 -1.442695, %v6683_v46  ;;  %v4985_v47 = vpop.f32.mrb[44].mxu1  ;;  %v3231_v13 = vmul.f32 %v6679_v58, %v3188_v36 }
 0x3bf   : > { %v5538_v60 = vpop.eup %5537  ;;  %v3085_v3 = vadd.f32 1.0, %v5536_v39  ;;  %5553 = vpow2.f32 %v4497_v38  ;;  %v6690_v53 = vadd.f32 %v4985_v47, %v6623_v23  ;;  %v2862_v1 = vpop.f32.mrb[45].mxu1  ;;  %v3230_v59 = vmul.f32 %v6679_v58, %v3187_v57 }
 0x3c0   : > { %v5540_v15 = vpop.eup %5539  ;;  %v3190_v21 = vmul.f32 %v5538_v60, %v6634_v8  ;;  %5555 = vrcp.f32 %v3086_v26  ;;  %v6695_v35 = vadd.f32 %v6623_v23, %v2862_v1  ;;  %v3269_v61 = vsel %vm2617_vm4, %v3231_v13, 0.0 }
 0x3c1   : > { %v5542_v7 = vpop.eup %5541  ;;  %v3189_v22 = vmul.f32 %v5540_v15, %v6637_v62  ;;  %5557 = vrcp.f32 %v3085_v3  ;;  %v4499_v42 = vmul.f32 -1.442695, %v6690_v53  ;;  %3270 = vadd.xlane.f32.xlu0 %v3269_v61  ;;  %v3266_v8 = vsel %vm2617_vm4, %v3230_v59, 0.0 }
 0x3c2   : > { %v5544_v6 = vpop.eup %5543  ;;  %v3088_v51 = vadd.f32 1.0, %v5542_v7  ;;  %5559 = vpow2.f32 %v4496_v20  ;;  %v4498_v43 = vmul.f32 -1.442695, %v6695_v35  ;;  %v4988_v18 = vpop.f32.mrb[46].mxu1  ;;  %v3233_v47 = vmul.f32 %v6679_v58, %v3190_v21 }
 0x3c3   : > { %v5546_v36 = vpop.eup %5545  ;;  %v3087_v27 = vadd.f32 1.0, %v5544_v6  ;;  %5561 = vpow2.f32 %v4499_v42  ;;  %v6703_v57 = vadd.f32 %v4988_v18, %v6623_v23  ;;  %v2872_v38 = vpop.f32.mrb[47].mxu1  ;;  %v3232_v62 = vmul.f32 %v6679_v58, %v3189_v22 }
 0x3c4   : > { %v5548_v39 = vpop.eup %5547  ;;  %v3192_v26 = vmul.f32 %v5546_v36, %v6642_v14  ;;  %5563 = vrcp.f32 %v3088_v51  ;;  %v6708_v20 = vadd.f32 %v6623_v23, %v2872_v38  ;;  %v3275_v42 = vsel %vm2617_vm4, %v3233_v47, 0.0 }
 0x3c5   : > { %v5550_v13 = vpop.eup %5549  ;;  %v3191_v60 = vmul.f32 %v5548_v39, %v6645_v2  ;;  %5565 = vrcp.f32 %v3087_v27  ;;  %v4501_v3 = vmul.f32 -1.442695, %v6703_v57  ;;  %3267 = vadd.xlane.f32.xlu0 %v3266_v8  ;;  %v3272_v1 = vsel %vm2617_vm4, %v3232_v62, 0.0 }
 0x3c6   : > { %v5552_v59 = vpop.eup %5551  ;;  %v3090_v15 = vadd.f32 1.0, %v5550_v13  ;;  %5567 = vpow2.f32 %v4498_v43  ;;  %v4500_v14 = vmul.f32 -1.442695, %v6708_v20  ;;  %3273 = vadd.xlane.f32.xlu1 %v3272_v1  ;;  %v3235_v6 = vmul.f32 %v6679_v58, %v3192_v26 }
 0x3c7   : > { %v3089_v61 = vadd.f32 1.0, %v5552_v59  ;;  %5569 = vpow2.f32 %v4501_v3  ;;  %v4991_v7 = vpop.f32.mrb[48].mxu1  ;;  %v3234_v21 = vmul.f32 %v6679_v58, %v3191_v60 }
 0x3c8   : > { %5571 = vrcp.f32 %v3090_v15  ;;  %v6717_v2 = vadd.f32 %v4991_v7, %v6623_v23  ;;  %v2882_v22 = vpop.f32.mrb[49].mxu1  ;;  %v3281_v1 = vsel %vm2617_vm4, %v3235_v6, 0.0 }
 0x3c9   : > { %v5554_v51 = vpop.eup %5553  ;;  %5573 = vrcp.f32 %v3089_v61  ;;  %v6722_v43 = vadd.f32 %v6623_v23, %v2882_v22  ;;  %3276 = vadd.xlane.f32.xlu0 %v3275_v42  ;;  %v3278_v18 = vsel %vm2617_vm4, %v3234_v21, 0.0 }
 0x3ca   : > { %v5556_v8 = vpop.eup %5555  ;;  %v3092_v36 = vadd.f32 1.0, %v5554_v51  ;;  %5575 = vpow2.f32 %v4500_v14  ;;  %v4503_v27 = vmul.f32 -1.442695, %v6717_v2  ;;  %3279 = vadd.xlane.f32.xlu1 %v3278_v18 }
 0x3cb   : > { %v5558_v38 = vpop.eup %5557  ;;  %v3194_v62 = vmul.f32 %v5556_v8, %v6650_v0  ;;  %v4502_v39 = vmul.f32 -1.442695, %v6722_v43  ;;  %v4994_v26 = vpop.f32.mrb[50].mxu1 }
 0x3cc   : > { %v5560_v47 = vpop.eup %5559  ;;  %v3193_v13 = vmul.f32 %v5558_v38, %v6653_v63  ;;  %5577 = vrcp.f32 %v3092_v36  ;;  %v6730_v60 = vadd.f32 %v4994_v26, %v6623_v23  ;;  %v2892_v3 = vpop.f32.mrb[51].mxu1 }
 0x3cd   : > { %v5562_v59 = vpop.eup %5561  ;;  %v3091_v15 = vadd.f32 1.0, %v5560_v47  ;;  %5579 = vpow2.f32 %v4503_v27  ;;  %v6734_v14 = vadd.f32 %v6623_v23, %v2892_v3  ;;  %3282 = vadd.xlane.f32.xlu0 %v3281_v1  ;;  %v3237_v0 = vmul.f32 %v6679_v58, %v3194_v62 }
 0x3ce   : > { %v5564_v61 = vpop.eup %5563  ;;  %v3094_v7 = vadd.f32 1.0, %v5562_v59  ;;  %5581 = vpow2.f32 %v4502_v39  ;;  %v4505_v63 = vmul.f32 -1.442695, %v6730_v60  ;;  %v3236_v21 = vmul.f32 %v6679_v58, %v3193_v13 }
 0x3cf   : > { %v5566_v22 = vpop.eup %5565  ;;  %v3196_v42 = vmul.f32 %v5564_v61, %v6658_v52  ;;  %5583 = vrcp.f32 %v3091_v15  ;;  %v4504_v6 = vmul.f32 -1.442695, %v6734_v14  ;;  %v4997_v51 = vpop.f32.mrb[52].mxu1  ;;  %v3287_v18 = vsel %vm2617_vm4, %v3237_v0, 0.0 }
 0x3d0   : > { %v5568_v8 = vpop.eup %5567  ;;  %v3195_v36 = vmul.f32 %v5566_v22, %v6661_v32  ;;  %5585 = vrcp.f32 %v3094_v7  ;;  %v6744_v27 = vadd.f32 %v4997_v51, %v6623_v23  ;;  %v2902_v38 = vpop.f32.mrb[53].mxu1  ;;  %v3284_v62 = vsel %vm2617_vm4, %v3236_v21, 0.0 }
 0x3d1   : > { %v5570_v39 = vpop.eup %5569  ;;  %v3093_v26 = vadd.f32 1.0, %v5568_v8  ;;  %5587 = vpow2.f32 %v4505_v63  ;;  %v6748_v52 = vadd.f32 %v6623_v23, %v2902_v38  ;;  %3285 = vadd.xlane.f32.xlu1 %v3284_v62  ;;  %3288 = vadd.xlane.f32.xlu0 %v3287_v18  ;;  %v3239_v47 = vmul.f32 %v6679_v58, %v3196_v42 }
 0x3d2   : > { %v5572_v13 = vpop.eup %5571  ;;  %v3096_v3 = vadd.f32 1.0, %v5570_v39  ;;  %5589 = vpow2.f32 %v4504_v6  ;;  %v4507_v32 = vmul.f32 -1.442695, %v6744_v27  ;;  %v3238_v1 = vmul.f32 %v6679_v58, %v3195_v36 }
 0x3d3   : > { %v5574_v59 = vpop.eup %5573  ;;  %v3198_v15 = vmul.f32 %v5572_v13, %v6666_v54  ;;  %5591 = vrcp.f32 %v3093_v26  ;;  %v4506_v0 = vmul.f32 -1.442695, %v6748_v52  ;;  %v5000_v61 = vpop.f32.mrb[54].mxu1  ;;  %v3293_v7 = vsel %vm2617_vm4, %v3239_v47, 0.0 }
 0x3d4   : > { %v5576_v63 = vpop.eup %5575  ;;  %v3197_v21 = vmul.f32 %v5574_v59, %v6669_v12  ;;  %5593 = vrcp.f32 %v3096_v3  ;;  %v6758_v22 = vadd.f32 %v5000_v61, %v6623_v23  ;;  %v2912_v42 = vpop.f32.mrb[55].mxu1  ;;  %v3290_v6 = vsel %vm2617_vm4, %v3238_v1, 0.0 }
 0x3d5   : > { %v3095_v51 = vadd.f32 1.0, %v5576_v63  ;;  %5595 = vpow2.f32 %v4507_v32  ;;  %v6762_v54 = vadd.f32 %v6623_v23, %v2912_v42  ;;  %3291 = vadd.xlane.f32.xlu1 %v3290_v6  ;;  %3294 = vadd.xlane.f32.xlu0 %v3293_v7  ;;  %v3241_v18 = vmul.f32 %v6679_v58, %v3198_v15 }
 0x3d6   : > { %v5578_v8 = vpop.eup %5577  ;;  %5597 = vpow2.f32 %v4506_v0  ;;  %v4509_v12 = vmul.f32 -1.442695, %v6758_v22  ;;  %v3240_v36 = vmul.f32 %v6679_v58, %v3197_v21  ;;  %v5745_v13 = vmov 2  }
 0x3d7   : > { %v5580_v38 = vpop.eup %5579  ;;  %v3200_v62 = vmul.f32 %v5578_v8, %v6674_v9  ;;  %5599 = vrcp.f32 %v3095_v51  ;;  %v4508_v39 = vmul.f32 -1.442695, %v6762_v54  ;;  %v5003_v26 = vpop.f32.mrb[56].mxu1  ;;  %v3299_v47 = vsel %vm2617_vm4, %v3241_v18, 0.0  ;;  %5234 = vset.pattern.permute.xlu1 %v5745_v13  ;;  %5235 = vset.pattern.permute.xlu0 %v5745_v13 }
 0x3d8   : > { %v5582_v3 = vpop.eup %5581  ;;  %v3098_v32 = vadd.f32 1.0, %v5580_v38  ;;  %5601 = vpow2.f32 %v4509_v12  ;;  %v6771_v1 = vadd.f32 %v5003_v26, %v6623_v23  ;;  %v2922_v59 = vpop.f32.mrb[57].mxu1  ;;  %v3296_v15 = vsel %vm2617_vm4, %v3240_v36, 0.0 }
 0x3d9   : > { %v5584_v0 = vpop.eup %5583  ;;  %v3097_v9 = vadd.f32 1.0, %v5582_v3  ;;  %5603 = vpow2.f32 %v4508_v39  ;;  %v6775_v61 = vadd.f32 %v6623_v23, %v2922_v59  ;;  %3297 = vadd.xlane.f32.xlu1 %v3296_v15  ;;  %3300 = vadd.xlane.f32.xlu0 %v3299_v47  ;;  %v3243_v7 = vmul.f32 %v6679_v58, %v3200_v62 }
 0x3da   : > { %v5586_v63 = vpop.eup %5585  ;;  %v3199_v21 = vmul.f32 %v5584_v0, %v6683_v46  ;;  %5605 = vrcp.f32 %v3098_v32  ;;  %v4511_v42 = vmul.f32 -1.442695, %v6771_v1 }
 0x3db   : > { %v5588_v6 = vpop.eup %5587  ;;  %v3202_v51 = vmul.f32 %v5586_v63, %v6690_v53  ;;  %5607 = vrcp.f32 %v3097_v9  ;;  %v4510_v18 = vmul.f32 -1.442695, %v6775_v61  ;;  %v5006_v8 = vpop.f32.mrb[58].mxu1  ;;  %v3305_v12 = vsel %vm2617_vm4, %v3243_v7, 0.0 }
 0x3dc   : > { %v5590_v36 = vpop.eup %5589  ;;  %v3100_v38 = vadd.f32 1.0, %v5588_v6  ;;  %5609 = vpow2.f32 %v4511_v42  ;;  %v6784_v62 = vadd.f32 %v5006_v8, %v6623_v23  ;;  %v2932_v39 = vpop.f32.mrb[59].mxu1  ;;  %v3242_v46 = vmul.f32 %v6679_v58, %v3199_v21 }
 0x3dd   : > { %v5592_v26 = vpop.eup %5591  ;;  %v3099_v47 = vadd.f32 1.0, %v5590_v36  ;;  %5611 = vpow2.f32 %v4510_v18  ;;  %v6788_v53 = vadd.f32 %v6623_v23, %v2932_v39  ;;  %3306 = vadd.xlane.f32.xlu0 %v3305_v12  ;;  %v3245_v13 = vmul.f32 %v6679_v58, %v3202_v51 }
 0x3de   : > { %v5594_v3 = vpop.eup %5593  ;;  %v3201_v32 = vmul.f32 %v5592_v26, %v6695_v35  ;;  %5613 = vrcp.f32 %v3100_v38  ;;  %v4513_v59 = vmul.f32 -1.442695, %v6784_v62  ;;  %v3302_v15 = vsel %vm2617_vm4, %v3242_v46, 0.0 }
 0x3df   : > { %v5596_v0 = vpop.eup %5595  ;;  %v3204_v9 = vmul.f32 %v5594_v3, %v6703_v57  ;;  %5615 = vrcp.f32 %v3099_v47  ;;  %v4512_v7 = vmul.f32 -1.442695, %v6788_v53  ;;  %3303 = vadd.xlane.f32.xlu1 %v3302_v15  ;;  %v3311_v35 = vsel %vm2617_vm4, %v3245_v13, 0.0 }
 0x3e0   : > { %v5598_v63 = vpop.eup %5597  ;;  %v3102_v21 = vadd.f32 1.0, %v5596_v0  ;;  %5617 = vpow2.f32 %v4513_v59  ;;  %v5009_v42 = vpop.f32.mrb[60].mxu1  ;;  %v3244_v6 = vmul.f32 %v6679_v58, %v3201_v32 }
 0x3e1   : > { %v5600_v51 = vpop.eup %5599  ;;  %v3101_v18 = vadd.f32 1.0, %v5598_v63  ;;  %5619 = vpow2.f32 %v4512_v7  ;;  %v6799_v8 = vadd.f32 %v5009_v42, %v6623_v23  ;;  %v2942_v12 = vpop.f32.mrb[61].mxu1  ;;  %3312 = vadd.xlane.f32.xlu0 %v3311_v35  ;;  %v3247_v57 = vmul.f32 %v6679_v58, %v3204_v9 }
 0x3e2   : > { %v5602_v36 = vpop.eup %5601  ;;  %v3203_v38 = vmul.f32 %v5600_v51, %v6708_v20  ;;  %5621 = vrcp.f32 %v3102_v21  ;;  %v6804_v39 = vadd.f32 %v6623_v23, %v2942_v12  ;;  %v3308_v46 = vsel %vm2617_vm4, %v3244_v6, 0.0 }
 0x3e3   : > { %v5604_v26 = vpop.eup %5603  ;;  %5623 = vrcp.f32 %v3101_v18  ;;  %v3104_v47 = vadd.f32 1.0, %v5602_v36  ;;  %v4515_v13 = vmul.f32 -1.442695, %v6799_v8  ;;  %3309 = vadd.xlane.f32.xlu1 %v3308_v46  ;;  %v3317_v0 = vsel %vm2617_vm4, %v3247_v57, 0.0 }
 0x3e4   : > { %v5606_v3 = vpop.eup %5605  ;;  %v3103_v32 = vadd.f32 1.0, %v5604_v26  ;;  %v4514_v59 = vmul.f32 -1.442695, %v6804_v39  ;;  %v5012_v15 = vpop.f32.mrb[62].mxu1  ;;  %v3246_v20 = vmul.f32 %v6679_v58, %v3203_v38 }
 0x3e5   : > { %v5608_v9 = vpop.eup %5607  ;;  %v3206_v7 = vmul.f32 %v5606_v3, %v6717_v2  ;;  %5625 = vrcp.f32 %v3104_v47  ;;  %v6813_v63 = vadd.f32 %v5012_v15, %v6623_v23  ;;  %v2952_v21 = vpop.f32.mrb[63].mxu1 }
 0x3e6   : > { %v5610_v42 = vpop.eup %5609  ;;  %v3205_v6 = vmul.f32 %v5608_v9, %v6722_v43  ;;  %5627 = vrcp.f32 %v3103_v32  ;;  %v6817_v35 = vadd.f32 %v6623_v23, %v2952_v21  ;;  %v3314_v51 = vsel %vm2617_vm4, %v3246_v20, 0.0 }
 0x3e7   : > { %v5612_v18 = vpop.eup %5611  ;;  %v3106_v12 = vadd.f32 1.0, %v5610_v42  ;;  %5629 = vpow2.f32 %v4515_v13  ;;  %v4517_v57 = vmul.f32 -1.442695, %v6813_v63  ;;  %3318 = vadd.xlane.f32.xlu1 %v3317_v0  ;;  %3315 = vadd.xlane.f32.xlu0 %v3314_v51  ;;  %v3249_v2 = vmul.f32 %v6679_v58, %v3206_v7 }
 0x3e8   : > { %v5614_v36 = vpop.eup %5613  ;;  %v3105_v38 = vadd.f32 1.0, %v5612_v18  ;;  %5631 = vpow2.f32 %v4514_v59  ;;  %v4516_v43 = vmul.f32 -1.442695, %v6817_v35  ;;  %v5015_v46 = vpop.f32.mrb[64].mxu1  ;;  %v3248_v26 = vmul.f32 %v6679_v58, %v3205_v6 }
 0x3e9   : > { %v5616_v47 = vpop.eup %5615  ;;  %v3208_v3 = vmul.f32 %v5614_v36, %v6730_v60  ;;  %5633 = vrcp.f32 %v3106_v12  ;;  %v6826_v13 = vadd.f32 %v5015_v46, %v6623_v23  ;;  %v2962_v32 = vpop.f32.mrb[65].mxu1  ;;  %v3323_v15 = vsel %vm2617_vm4, %v3249_v2, 0.0 }
 0x3ea   : > { %v5618_v0 = vpop.eup %5617  ;;  %v3207_v20 = vmul.f32 %v5616_v47, %v6734_v14  ;;  %5635 = vrcp.f32 %v3105_v38  ;;  %v6831_v59 = vadd.f32 %v6623_v23, %v2962_v32  ;;  %v3320_v9 = vsel %vm2617_vm4, %v3248_v26, 0.0 }
 0x3eb   : > { %v5620_v7 = vpop.eup %5619  ;;  %v3108_v21 = vadd.f32 1.0, %v5618_v0  ;;  %5637 = vpow2.f32 %v4517_v57  ;;  %v4519_v60 = vmul.f32 -1.442695, %v6826_v13  ;;  %3321 = vadd.xlane.f32.xlu1 %v3320_v9  ;;  %3324 = vadd.xlane.f32.xlu0 %v3323_v15  ;;  %v3251_v42 = vmul.f32 %v6679_v58, %v3208_v3 }
 0x3ec   : > { %v5622_v6 = vpop.eup %5621  ;;  %v3107_v51 = vadd.f32 1.0, %v5620_v7  ;;  %5639 = vpow2.f32 %v4516_v43  ;;  %v4518_v14 = vmul.f32 -1.442695, %v6831_v59  ;;  %v3250_v18 = vmul.f32 %v6679_v58, %v3207_v20 }
 0x3ed   : > { %v5624_v23 = vpop.eup %5623  ;;  %v3210_v12 = vmul.f32 %v5622_v6, %v6744_v27  ;;  %5641 = vrcp.f32 %v3108_v21  ;;  %v3329_v36 = vsel %vm2617_vm4, %v3251_v42, 0.0 }
 0x3ee   : > { %v3209_v2 = vmul.f32 %v5624_v23, %v6748_v52  ;;  %5643 = vrcp.f32 %v3107_v51  ;;  %v3326_v57 = vsel %vm2617_vm4, %v3250_v18, 0.0 }
 0x3ef   : > { %v5626_v38 = vpop.eup %5625  ;;  %5645 = vpow2.f32 %v4519_v60  ;;  %3327 = vadd.xlane.f32.xlu1 %v3326_v57  ;;  %3330 = vadd.xlane.f32.xlu0 %v3329_v36  ;;  %v3253_v43 = vmul.f32 %v6679_v58, %v3210_v12 }
 0x3f0   : > { %v5628_v46 = vpop.eup %5627  ;;  %v3212_v26 = vmul.f32 %v5626_v38, %v6758_v22  ;;  %5647 = vpow2.f32 %v4518_v14  ;;  %v3252_v27 = vmul.f32 %v6679_v58, %v3209_v2 }
 0x3f1   : > { %v5630_v47 = vpop.eup %5629  ;;  %v3211_v52 = vmul.f32 %v5628_v46, %v6762_v54  ;;  %v3335_v0 = vsel %vm2617_vm4, %v3253_v43, 0.0 }
 0x3f2   : > { %v5632_v3 = vpop.eup %5631  ;;  %v3110_v32 = vadd.f32 1.0, %v5630_v47  ;;  %v3332_v15 = vsel %vm2617_vm4, %v3252_v27, 0.0  ;;  %v3255_v20 = vmul.f32 %v6679_v58, %v3212_v26 }
 0x3f3   : > { %v5634_v9 = vpop.eup %5633  ;;  %v3109_v7 = vadd.f32 1.0, %v5632_v3  ;;  %3333 = vadd.xlane.f32.xlu1 %v3332_v15  ;;  %3336 = vadd.xlane.f32.xlu0 %v3335_v0  ;;  %v3254_v22 = vmul.f32 %v6679_v58, %v3211_v52 }
 0x3f4   : > { %v5636_v21 = vpop.eup %5635  ;;  %v3214_v60 = vmul.f32 %v5634_v9, %v6771_v1  ;;  %5649 = vrcp.f32 %v3110_v32  ;;  %v3341_v18 = vsel %vm2617_vm4, %v3255_v20, 0.0 }
 0x3f5   : > { %v5638_v42 = vpop.eup %5637  ;;  %v3213_v54 = vmul.f32 %v5636_v21, %v6775_v61  ;;  %5651 = vrcp.f32 %v3109_v7  ;;  %v3338_v6 = vsel %vm2617_vm4, %v3254_v22, 0.0 }
 0x3f6   : > { %v5640_v51 = vpop.eup %5639  ;;  %v3112_v14 = vadd.f32 1.0, %v5638_v42  ;;  %v3257_v23 = vmul.f32 %v6679_v58, %v3214_v60 }
 0x3f7   : > { %v5642_v12 = vpop.eup %5641  ;;  %v3111_v2 = vadd.f32 1.0, %v5640_v51  ;;  %3339 = vadd.xlane.f32.xlu1 %v3338_v6  ;;  %3342 = vadd.xlane.f32.xlu0 %v3341_v18  ;;  %v3256_v57 = vmul.f32 %v6679_v58, %v3213_v54 }
 0x3f8   : > { %v5644_v1 = vpop.eup %5643  ;;  %v3216_v36 = vmul.f32 %v5642_v12, %v6784_v62  ;;  %5653 = vrcp.f32 %v3112_v14  ;;  %v3347_v27 = vsel %vm2617_vm4, %v3257_v23, 0.0 }
 0x3f9   : > { %v5646_v61 = vpop.eup %5645  ;;  %v3215_v38 = vmul.f32 %v5644_v1, %v6788_v53  ;;  %5655 = vrcp.f32 %v3111_v2  ;;  %v3344_v43 = vsel %vm2617_vm4, %v3256_v57, 0.0 }
 0x3fa   : > { %v5648_v46 = vpop.eup %5647  ;;  %v3114_v26 = vadd.f32 1.0, %v5646_v61  ;;  %v3259_v47 = vmul.f32 %v6679_v58, %v3216_v36  ;;  %v6883_v36 = vld [vmem:[%s5861_s24 + $0x8] sm:$0xff] }
 0x3fb   : > { %v3113_v52 = vadd.f32 1.0, %v5648_v46  ;;  %3345 = vadd.xlane.f32.xlu1 %v3344_v43  ;;  %3348 = vadd.xlane.f32.xlu0 %v3347_v27  ;;  %v3258_v3 = vmul.f32 %v6679_v58, %v3215_v38  ;;  %v6887_v38 = vld [vmem:[%s5861_s24] sm:$0xff] }
 0x3fc   : > { %5657 = vrcp.f32 %v3114_v26  ;;  %v3353_v53 = vsel %vm2617_vm4, %v3259_v47, 0.0  ;;  %v6891_v26 = vld [vmem:[%s5861_s24 + $0x18] sm:$0xff] }
 0x3fd   : > { %5659 = vrcp.f32 %v3113_v52  ;;  %v3350_v62 = vsel %vm2617_vm4, %v3258_v3, 0.0  ;;  %v6895_v52 = vld [vmem:[%s5861_s24 + $0x20] sm:$0xff] }
 0x3fe   : > { %v5650_v32 = vpop.eup %5649 }
 0x3ff   : > { %v5652_v15 = vpop.eup %5651  ;;  %v3218_v0 = vmul.f32 %v5650_v32, %v6799_v8  ;;  %3351 = vadd.xlane.f32.xlu1 %v3350_v62  ;;  %3354 = vadd.xlane.f32.xlu0 %v3353_v53  ;;  %v6899_v32 = vld [vmem:[%s5861_s24 + $0x10] sm:$0xff] }
 0x400   : > { %v3217_v20 = vmul.f32 %v5652_v15, %v6804_v39 }
 0x401   : > { %v3261_v9 = vmul.f32 %v6679_v58, %v3218_v0 }
 0x402   : > { %v5654_v7 = vpop.eup %5653  ;;  %v3260_v22 = vmul.f32 %v6679_v58, %v3217_v20  ;;  %v6903_v20 = vld [vmem:[%s5861_s24 + $0x28] sm:$0xff] }
 0x403   : > { %v5656_v21 = vpop.eup %5655  ;;  %v3220_v60 = vmul.f32 %v5654_v7, %v6813_v63  ;;  %v3359_v42 = vsel %vm2617_vm4, %v3261_v9, 0.0  ;;  %v6907_v7 = vld [vmem:[%s5861_s24 + $0x30] sm:$0xff] }
 0x404   : > { %v3219_v54 = vmul.f32 %v5656_v21, %v6817_v35  ;;  %v3356_v6 = vsel %vm2617_vm4, %v3260_v22, 0.0  ;;  %3360 = vadd.xlane.f32.xlu0 %v3359_v42  ;;  %v6911_v42 = vld [vmem:[%s5861_s24 + $0x38] sm:$0xff] }
 0x405   : > { %3357 = vadd.xlane.f32.xlu1 %v3356_v6  ;;  %v3263_v8 = vmul.f32 %v6679_v58, %v3220_v60  ;;  %v6915_v6 = vld [vmem:[%s5861_s24 + $0x40] sm:$0xff] }
 0x406   : > { %v5658_v51 = vpop.eup %5657  ;;  %v3262_v39 = vmul.f32 %v6679_v58, %v3219_v54 }
 0x407   : > { %v5660_v14 = vpop.eup %5659  ;;  %v3222_v18 = vmul.f32 %v5658_v51, %v6826_v13  ;;  %v3365_v23 = vsel %vm2617_vm4, %v3263_v8, 0.0 }
 0x408   : > { %v3221_v63 = vmul.f32 %v5660_v14, %v6831_v59  ;;  %v3362_v35 = vsel %vm2617_vm4, %v3262_v39, 0.0  ;;  %3366 = vadd.xlane.f32.xlu0 %v3365_v23  ;;  %v6919_v14 = vld [vmem:[%s5861_s24 + $0x48] sm:$0xff]  ;;  %v6923_v23 = vld [vmem:[%s5861_s24 + $0x50] sm:$0xff] }
 0x409   : > { %3363 = vadd.xlane.f32.xlu1 %v3362_v35  ;;  %v3265_v12 = vmul.f32 %v6679_v58, %v3222_v18 }
 0x40a   : > { %v3264_v2 = vmul.f32 %v6679_v58, %v3221_v63 }
 0x40b   : > { %v3371_v57 = vsel %vm2617_vm4, %v3265_v12, 0.0  ;;  %v6927_v12 = vld [vmem:[%s5861_s24 + $0x58] sm:$0xff] }
 0x40c   : > { %v3368_v1 = vsel %vm2617_vm4, %v3264_v2, 0.0  ;;  %3372 = vadd.xlane.f32.xlu0 %v3371_v57 }
 0x40d   : > { %3369 = vadd.xlane.f32.xlu1 %v3368_v1  ;;  %v6931_v1 = vld [vmem:[%s5861_s24 + $0x60] sm:$0xff] }
 0x44e   : > { %v3271_v13 = vpop.xlane.xlu0 %3270 }
 0x44f   : > { %v3375_v59 = vmul.f32 %v6883_v36, %v3271_v13 }
 0x451   : > { %3417 = vperm.xlu1 %5234, %v3375_v59  }
 0x452   : > { %v3268_v61 = vpop.xlane.xlu0 %3267 }
 0x453   : > { %v3374_v43 = vmul.f32 %v6887_v38, %v3268_v61  ;;  %v3274_v58 = vpop.xlane.xlu1 %3273  ;;  %v6937_v61 = vld [vmem:[%s5861_s24 + $0x68] sm:$0xff] }
 0x454   : > { %v3376_v53 = vmul.f32 %v6899_v32, %v3274_v58 }
 0x455   : > { %3412 = vperm.xlu1 %5234, %v3374_v43  }
 0x456   : > { %v3277_v46 = vpop.xlane.xlu0 %3276 }
 0x457   : > { %v3377_v27 = vmul.f32 %v6891_v26, %v3277_v46  ;;  %v3280_v47 = vpop.xlane.xlu1 %3279  ;;  %v6941_v46 = vld [vmem:[%s5861_s24 + $0x70] sm:$0xff] }
 0x458   : > { %v3378_v3 = vmul.f32 %v6895_v52, %v3280_v47 }
 0x459   : > { %3427 = vperm.xlu1 %5234, %v3377_v27  }
 0x45a   : > { %v3283_v62 = vpop.xlane.xlu0 %3282  ;;  %3432 = vperm.xlu0 %5235, %v3378_v3  }
 0x45b   : > { %v3379_v9 = vmul.f32 %v6903_v20, %v3283_v62  ;;  %v6945_v62 = vld [vmem:[%s5861_s24 + $0x88] sm:$0xff] }
 0x45d   : > { %3422 = vperm.xlu1 %5234, %v3376_v53  }
 0x45e   : > { %v3286_v15 = vpop.xlane.xlu1 %3285  ;;  %v3289_v0 = vpop.xlane.xlu0 %3288 }
 0x45f   : > { %v3380_v22 = vmul.f32 %v6907_v7, %v3286_v15  ;;  %v3381_v54 = vmul.f32 %v6911_v42, %v3289_v0  ;;  %v6949_v15 = vld [vmem:[%s5861_s24 + $0x80] sm:$0xff] }
 0x461   : > { %3442 = vperm.xlu0 %5235, %v3380_v22   ;;  %3437 = vperm.xlu1 %5234, %v3379_v9  }
 0x462   : > { %v3292_v21 = vpop.xlane.xlu1 %3291  ;;  %v3295_v60 = vpop.xlane.xlu0 %3294 }
 0x463   : > { %v3382_v8 = vmul.f32 %v6915_v6, %v3292_v21  ;;  %v3383_v18 = vmul.f32 %v6919_v14, %v3295_v60  ;;  %v6953_v21 = vld [vmem:[%s5861_s24 + $0x98] sm:$0xff] }
 0x465   : > { %3452 = vperm.xlu0 %5235, %v3382_v8   ;;  %3447 = vperm.xlu1 %5234, %v3381_v54  }
 0x466   : > { %v3298_v51 = vpop.xlane.xlu1 %3297  ;;  %v3301_v39 = vpop.xlane.xlu0 %3300 }
 0x467   : > { %v3384_v63 = vmul.f32 %v6923_v23, %v3298_v51  ;;  %v3385_v2 = vmul.f32 %v6927_v12, %v3301_v39  ;;  %v6957_v51 = vld [vmem:[%s5861_s24 + $0x90] sm:$0xff] }
 0x469   : > { %3462 = vperm.xlu0 %5235, %v3384_v63   ;;  %3457 = vperm.xlu1 %5234, %v3383_v18  }
 0x46a   : > { %v3307_v35 = vpop.xlane.xlu0 %3306 }
 0x46b   : > { %v3387_v43 = vmul.f32 %v6937_v61, %v3307_v35  ;;  %v6961_v35 = vld [vmem:[%s5861_s24 + $0xa8] sm:$0xff] }
 0x46c   : > { %v3304_v57 = vpop.xlane.xlu1 %3303 }
 0x46d   : > { %v3386_v13 = vmul.f32 %v6931_v1, %v3304_v57  ;;  %3467 = vperm.xlu1 %5234, %v3385_v2   ;;  %v6965_v57 = vld [vmem:[%s5861_s24 + $0xb0] sm:$0xff] }
 0x46e   : > { %v6934_v59 = vpop.xlane.xlu0 %3312 }
 0x46f   : > { %3472 = vperm.xlu0 %5235, %v3386_v13   ;;  %v3389_v49 = vmul.f32 %v7017_v30, %v6934_v59 }
 0x470   : > { %v3310_v58 = vpop.xlane.xlu1 %3309 }
 0x471   : > { %v3388_v27 = vmul.f32 %v6941_v46, %v3310_v58  ;;  %3477 = vperm.xlu1 %5234, %v3387_v43  }
 0x473   : > { %3482 = vperm.xlu0 %5235, %v3388_v27   ;;  %v6969_v27 = vld [vmem:[%s5861_s24 + $0xa0] sm:$0xff] }
 0x474   : > { %v3319_v47 = vpop.xlane.xlu1 %3318  ;;  %v3316_v3 = vpop.xlane.xlu0 %3315 }
 0x475   : > { %v3391_v53 = vmul.f32 %v6945_v62, %v3319_v47  ;;  %v3390_v0 = vmul.f32 %v6949_v15, %v3316_v3  ;;  %v6973_v3 = vld [vmem:[%s5861_s24 + $0xc0] sm:$0xff] }
 0x477   : > { %3497 = vperm.xlu0 %5235, %v3391_v53   ;;  %3492 = vperm.xlu1 %5234, %v3390_v0  }
 0x478   : > { %v3322_v9 = vpop.xlane.xlu1 %3321  ;;  %v3325_v22 = vpop.xlane.xlu0 %3324 }
 0x479   : > { %v3393_v60 = vmul.f32 %v6953_v21, %v3325_v22  ;;  %v3392_v39 = vmul.f32 %v6957_v51, %v3322_v9  ;;  %v6977_v9 = vld [vmem:[%s5861_s24 + $0xb8] sm:$0xff] }
 0x47b   : > { %3507 = vperm.xlu1 %5234, %v3393_v60   ;;  %v6981_v60 = vld [vmem:[%s5861_s24 + $0xd0] sm:$0xff] }
 0x47c   : > { %v3328_v54 = vpop.xlane.xlu1 %3327  ;;  %v3331_v8 = vpop.xlane.xlu0 %3330 }
 0x47d   : > { %v3395_v2 = vmul.f32 %v6961_v35, %v3331_v8  ;;  %v3394_v47 = vmul.f32 %v6969_v27, %v3328_v54 }
 0x47f   : > { %3502 = vperm.xlu1 %5234, %v3392_v39  }
 0x480   : > { %v3334_v18 = vpop.xlane.xlu1 %3333  ;;  %v3337_v63 = vpop.xlane.xlu0 %3336 }
 0x481   : > { %v3396_v13 = vmul.f32 %v6965_v57, %v3334_v18  ;;  %v3397_v22 = vmul.f32 %v6977_v9, %v3337_v63  ;;  %v6985_v18 = vld [vmem:[%s5861_s24 + $0xc8] sm:$0xff] }
 0x483   : > { %3522 = vperm.xlu0 %5235, %v3396_v13   ;;  %3517 = vperm.xlu1 %5234, %v3395_v2   ;;  %v6989_v13 = vld [vmem:[%s5861_s24 + $0xe0] sm:$0xff] }
 0x484   : > { %v3340_v43 = vpop.xlane.xlu1 %3339  ;;  %v3343_v58 = vpop.xlane.xlu0 %3342 }
 0x485   : > { %v3398_v53 = vmul.f32 %v6973_v3, %v3340_v43  ;;  %v3399_v2 = vmul.f32 %v6985_v18, %v3343_v58  ;;  %v7001_v58 = vld [vmem:[%s5861_s24 + $0xe8] sm:$0xff] }
 0x487   : > { %3532 = vperm.xlu0 %5235, %v3398_v53   ;;  %3512 = vperm.xlu1 %5234, %v3394_v47   ;;  %v6993_v47 = vld [vmem:[%s5861_s24 + $0xd8] sm:$0xff] }
 0x488   : > { %v3346_v0 = vpop.xlane.xlu1 %3345  ;;  %v3349_v39 = vpop.xlane.xlu0 %3348 }
 0x489   : > { %v3400_v8 = vmul.f32 %v6981_v60, %v3346_v0  ;;  %v3401_v53 = vmul.f32 %v6993_v47, %v3349_v39 }
 0x48b   : > { %3542 = vperm.xlu0 %5235, %v3400_v8   ;;  %3527 = vperm.xlu1 %5234, %v3397_v22   ;;  %v6997_v22 = vld [vmem:[%s5861_s24 + $0xf0] sm:$0xff] }
 0x48c   : > { %v3352_v54 = vpop.xlane.xlu1 %3351  ;;  %v3355_v63 = vpop.xlane.xlu0 %3354 }
 0x48d   : > { %v3402_v43 = vmul.f32 %v6989_v13, %v3352_v54  ;;  %v3403_v54 = vmul.f32 %v7001_v58, %v3355_v63 }
 0x48f   : > { %3552 = vperm.xlu0 %5235, %v3402_v43   ;;  %3537 = vperm.xlu1 %5234, %v3399_v2  }
 0x491   : > { %v3361_v2 = vpop.xlane.xlu0 %3360 }
 0x492   : > { %v3358_v0 = vpop.xlane.xlu1 %3357 }
 0x493   : > { %v3404_v8 = vmul.f32 %v6997_v22, %v3358_v0  ;;  %3547 = vperm.xlu1 %5234, %v3401_v53   ;;  %v3405_v0 = vmul.f32 %v7009_v31, %v3361_v2 }
 0x495   : > { %3562 = vperm.xlu0 %5235, %v3404_v8   ;;  %v3367_v8 = vpop.xlane.xlu0 %3366 }
 0x496   : > { %v3364_v43 = vpop.xlane.xlu1 %3363 }
 0x497   : > { %v3406_v39 = vmul.f32 %v7005_v56, %v3364_v43  ;;  %3557 = vperm.xlu1 %5234, %v3403_v54   ;;  %v7022_v54 = vld [vmem:[%s5861_s24 + $0x108] sm:$0xff] }
 0x498   : > { %v3407_v43 = vmul.f32 %v7022_v54, %v3367_v8 }
 0x499   : > { %3572 = vperm.xlu0 %5235, %v3406_v39   ;;  %v3373_v2 = vpop.xlane.xlu0 %3372  ;;  %v7026_v39 = vld [vmem:[%s5861_s24 + $0x118] sm:$0xff] }
 0x49a   : > { %v3370_v53 = vpop.xlane.xlu1 %3369  ;;  %v3409_v25 = vmul.f32 %v7026_v39, %v3373_v2 }
 0x49b   : > { %v3408_v63 = vmul.f32 %v7013_v55, %v3370_v53  ;;  %3567 = vperm.xlu1 %5234, %v3405_v0  }
 0x49d   : > { %3582 = vperm.xlu0 %5235, %v3408_v63  }
 0x49f   : > { %3487 = vperm.xlu1 %5234, %v3389_v49  }
 0x4a3   : > { %3577 = vperm.xlu1 %5234, %v3407_v43  }
 0x4a7   : > { %3587 = vperm.xlu1 %5234, %v3409_v25  }
 0x4d0   : > { %v3418_v0 = vpop.permute.xlu1 %3417 }
 0x4d1   : > { %v3591_v48 = vmul.f32 %v6883_v36, %v3418_v0 }
 0x4d4   : > { %v3413_v53 = vpop.permute.xlu1 %3412 }
 0x4d5   : > { %v3590_v50 = vmul.f32 %v6887_v38, %v3413_v53 }
 0x4d7   : > { %v5236_v59 = vpack.i.bf16 %v3591_v48, %v3590_v50 }
 0x4d8   : > { %v3428_v63 = vpop.permute.xlu1 %3427 }
 0x4d9   : > { %5237 = vrot.lane.b32.xlu1 %v5236_v59, %s5746_s20  ;;  %v3433_v49 = vpop.permute.xlu0 %3432  ;;  %v3593_v43 = vmul.f32 %v6891_v26, %v3428_v63 }
 0x4da   : > { %v3594_v29 = vmul.f32 %v6895_v52, %v3433_v49 }
 0x4dc   : > { %v3423_v8 = vpop.permute.xlu1 %3422 }
 0x4dd   : > { %v3592_v24 = vmul.f32 %v6899_v32, %v3423_v8 }
 0x4df   : > { %v5241_v45 = vpack.i.bf16 %v3593_v43, %v3592_v24 }
 0x4e0   : > { %v3443_v2 = vpop.permute.xlu0 %3442  ;;  %v3438_v25 = vpop.permute.xlu1 %3437 }
 0x4e1   : > { %v3595_v36 = vmul.f32 %v6903_v20, %v3438_v25  ;;  %5242 = vrot.lane.b32.xlu1 %v5241_v45, %s5746_s20  ;;  %v3596_v0 = vmul.f32 %v6907_v7, %v3443_v2 }
 0x4e3   : > { %v5246_v48 = vpack.i.bf16 %v3595_v36, %v3594_v29 }
 0x4e4   : > { %v3453_v50 = vpop.permute.xlu0 %3452  ;;  %v3448_v38 = vpop.permute.xlu1 %3447 }
 0x4e5   : > { %v3597_v53 = vmul.f32 %v6911_v42, %v3448_v38  ;;  %5247 = vrot.lane.b32.xlu1 %v5246_v48, %s5746_s20  ;;  %v3598_v59 = vmul.f32 %v6915_v6, %v3453_v50 }
 0x4e7   : > { %v5251_v26 = vpack.i.bf16 %v3597_v53, %v3596_v0 }
 0x4e8   : > { %v3463_v32 = vpop.permute.xlu0 %3462  ;;  %v3458_v24 = vpop.permute.xlu1 %3457 }
 0x4e9   : > { %v3599_v52 = vmul.f32 %v6919_v14, %v3458_v24  ;;  %5252 = vrot.lane.b32.xlu1 %v5251_v26, %s5746_s20  ;;  %v3600_v29 = vmul.f32 %v6923_v23, %v3463_v32 }
 0x4eb   : > { %v5256_v20 = vpack.i.bf16 %v3599_v52, %v3598_v59 }
 0x4ec   : > { %v3468_v45 = vpop.permute.xlu1 %3467 }
 0x4ed   : > { %v3601_v63 = vmul.f32 %v6927_v12, %v3468_v45  ;;  %5257 = vrot.lane.b32.xlu1 %v5256_v20, %s5746_s20 }
 0x4ee   : > { %v3473_v7 = vpop.permute.xlu0 %3472 }
 0x4ef   : > { %v5261_v42 = vpack.i.bf16 %v3601_v63, %v3600_v29  ;;  %v3602_v8 = vmul.f32 %v6931_v1, %v3473_v7 }
 0x4f0   : > { %v3478_v49 = vpop.permute.xlu1 %3477 }
 0x4f1   : > { %v3603_v43 = vmul.f32 %v6937_v61, %v3478_v49  ;;  %5262 = vrot.lane.b32.xlu1 %v5261_v42, %s5746_s20 }
 0x4f2   : > { %v3483_v6 = vpop.permute.xlu0 %3482 }
 0x4f3   : > { %v5266_v14 = vpack.i.bf16 %v3603_v43, %v3602_v8 }
 0x4f5   : > { %5267 = vrot.lane.b32.xlu1 %v5266_v14, %s5746_s20 }
 0x4f6   : > { %v3498_v2 = vpop.permute.xlu0 %3497  ;;  %v3493_v25 = vpop.permute.xlu1 %3492 }
 0x4f7   : > { %v3607_v23 = vmul.f32 %v6945_v62, %v3498_v2  ;;  %v3606_v12 = vmul.f32 %v6949_v15, %v3493_v25 }
 0x4f9   : > { %v5276_v36 = vpack.i.bf16 %v3607_v23, %v3606_v12  ;;  %v3604_v12 = vmul.f32 %v6941_v46, %v3483_v6  ;;  %v7239_v46 = vpack.i.bf16 %v6007_v33, %v6114_v4  ;;  %v7244_v33 = vpack.i.bf16 %v6041_v44, %v6149_v19  ;;  %v7247_v4 = vld [vmem:[#allocation20_spill] sm:$0xff]  ;;  %v7257_v44 = vld [vmem:[#allocation23_spill] sm:$0xff] }
 0x4fa   : > { %v3508_v48 = vpop.permute.xlu1 %3507 }
 0x4fb   : > { %5277 = vrot.lane.b32.xlu0 %v5276_v36, %s5746_s20  ;;  %v3609_v1 = vmul.f32 %v6953_v21, %v3508_v48 }
 0x4fe   : > { %v3503_v50 = vpop.permute.xlu1 %3502 }
 0x4ff   : > { %v3608_v61 = vmul.f32 %v6957_v51, %v3503_v50 }
 0x501   : > { %v5281_v38 = vpack.i.bf16 %v3609_v1, %v3608_v61 }
 0x502   : > { %v3523_v0 = vpop.permute.xlu0 %3522  ;;  %v3518_v53 = vpop.permute.xlu1 %3517 }
 0x503   : > { %5282 = vrot.lane.b32.xlu0 %v5281_v38, %s5746_s20  ;;  %v3611_v62 = vmul.f32 %v6961_v35, %v3518_v53  ;;  %v3612_v52 = vmul.f32 %v6965_v57, %v3523_v0  ;;  %v7256_v0 = vld [vmem:[#allocation13_spill] sm:$0xff] }
 0x504   : > { %v7258_v19 = vpack.i.bf16 %v7256_v0, %v7257_v44 }
 0x506   : > { %v3533_v26 = vpop.permute.xlu0 %3532  ;;  %v3513_v32 = vpop.permute.xlu1 %3512 }
 0x507   : > { %v3610_v15 = vmul.f32 %v6969_v27, %v3513_v32  ;;  %v3614_v29 = vmul.f32 %v6973_v3, %v3533_v26 }
 0x509   : > { %v5286_v24 = vpack.i.bf16 %v3611_v62, %v3610_v15  ;;  %v7259_v15 = vld [vmem:[#allocation14_spill] sm:$0xff] }
 0x50a   : > { %v3528_v59 = vpop.permute.xlu1 %3527  ;;  %v3543_v21 = vpop.permute.xlu0 %3542 }
 0x50b   : > { %v3613_v20 = vmul.f32 %v6977_v9, %v3528_v59  ;;  %5287 = vrot.lane.b32.xlu0 %v5286_v24, %s5746_s20  ;;  %v3616_v42 = vmul.f32 %v6981_v60, %v3543_v21  ;;  %v7260_v24 = vld [vmem:[#allocation24_spill] sm:$0xff] }
 0x50c   : > { %v7261_v59 = vpack.i.bf16 %v7259_v15, %v7260_v24 }
 0x50d   : > { %v5291_v51 = vpack.i.bf16 %v3613_v20, %v3612_v52 }
 0x50e   : > { %v3538_v45 = vpop.permute.xlu1 %3537  ;;  %v3553_v7 = vpop.permute.xlu0 %3552 }
 0x50f   : > { %v3615_v63 = vmul.f32 %v6985_v18, %v3538_v45  ;;  %5292 = vrot.lane.b32.xlu0 %v5291_v51, %s5746_s20  ;;  %v3618_v8 = vmul.f32 %v6989_v13, %v3553_v7  ;;  %v7262_v45 = vld [vmem:[#allocation15_spill] sm:$0xff] }
 0x511   : > { %v5296_v35 = vpack.i.bf16 %v3615_v63, %v3614_v29  ;;  %v7263_v29 = vld [vmem:[#allocation25_spill] sm:$0xff] }
 0x512   : > { %v3548_v27 = vpop.permute.xlu1 %3547  ;;  %v7264_v63 = vpack.i.bf16 %v7262_v45, %v7263_v29 }
 0x513   : > { %v3617_v57 = vmul.f32 %v6993_v47, %v3548_v27  ;;  %5297 = vrot.lane.b32.xlu0 %v5296_v35, %s5746_s20 }
 0x514   : > { %v3563_v3 = vpop.permute.xlu0 %3562 }
 0x515   : > { %v5301_v9 = vpack.i.bf16 %v3617_v57, %v3616_v42  ;;  %v3620_v2 = vmul.f32 %v6997_v22, %v3563_v3  ;;  %v7265_v57 = vld [vmem:[#allocation16_spill] sm:$0xff] }
 0x516   : > { %v3558_v49 = vpop.permute.xlu1 %3557 }
 0x517   : > { %v3619_v43 = vmul.f32 %v7001_v58, %v3558_v49  ;;  %5302 = vrot.lane.b32.xlu0 %v5301_v9, %s5746_s20  ;;  %v7266_v9 = vld [vmem:[#allocation26_spill] sm:$0xff] }
 0x518   : > { %v3573_v47 = vpop.permute.xlu0 %3572  ;;  %v7267_v49 = vpack.i.bf16 %v7265_v57, %v7266_v9 }
 0x519   : > { %v5306_v18 = vpack.i.bf16 %v3619_v43, %v3618_v8  ;;  %v3622_v48 = vmul.f32 %v7005_v56, %v3573_v47  ;;  %v7240_v56 = vpack.i.bf16 %v6012_v34, %v6117_v5  ;;  %v7245_v34 = vld [vmem:[#allocation30_spill] sm:$0xff] }
 0x51a   : > { %v3568_v14 = vpop.permute.xlu1 %3567 }
 0x51b   : > { %v3621_v25 = vmul.f32 %v7009_v31, %v3568_v14  ;;  %5307 = vrot.lane.b32.xlu0 %v5306_v18, %s5746_s20 }
 0x51c   : > { %v3583_v31 = vpop.permute.xlu0 %3582 }
 0x51d   : > { %v5311_v60 = vpack.i.bf16 %v3621_v25, %v3620_v2  ;;  %v3624_v61 = vmul.f32 %v7013_v55, %v3583_v31  ;;  %v7242_v55 = vpack.i.bf16 %v6029_v40, %v6133_v11  ;;  %v7249_v40 = vld [vmem:[#allocation31_spill] sm:$0xff]  ;;  %v7251_v11 = vld [vmem:[#allocation21_spill] sm:$0xff] }
 0x51e   : > { %v3488_v23 = vpop.permute.xlu1 %3487  ;;  %v7268_v2 = vld [vmem:[#allocation17_spill] sm:$0xff]  ;;  %v7269_v25 = vld [vmem:[#allocation27_spill] sm:$0xff] }
 0x51f   : > { %v3605_v13 = vmul.f32 %v7017_v30, %v3488_v23  ;;  %5312 = vrot.lane.b32.xlu0 %v5311_v60, %s5746_s20  ;;  %v7270_v60 = vpack.i.bf16 %v7268_v2, %v7269_v25 }
 0x521   : > { %v5271_v58 = vpack.i.bf16 %v3605_v13, %v3604_v12  ;;  %v7271_v13 = vld [vmem:[#allocation18_spill] sm:$0xff] }
 0x522   : > { %v3578_v36 = vpop.permute.xlu1 %3577 }
 0x523   : > { %v3623_v50 = vmul.f32 %v7022_v54, %v3578_v36  ;;  %5272 = vrot.lane.b32.xlu1 %v5271_v58, %s5746_s20  ;;  %v7241_v54 = vpack.i.bf16 %v6018_v37, %v6130_v10  ;;  %v7246_v37 = vld [vmem:[#allocation10_spill] sm:$0xff]  ;;  %v7250_v10 = vld [vmem:[#allocation11_spill] sm:$0xff]  ;;  %v7272_v58 = vld [vmem:[#allocation28_spill] sm:$0xff] }
 0x524   : > { %v7248_v5 = vpack.i.bf16 %v7246_v37, %v7247_v4  ;;  %v7273_v36 = vpack.i.bf16 %v7271_v13, %v7272_v58 }
 0x525   : > { %v5316_v22 = vpack.i.bf16 %v3623_v50, %v3622_v48 }
 0x526   : > { %v3588_v1 = vpop.permute.xlu1 %3587 }
 0x527   : > { %v3625_v38 = vmul.f32 %v7026_v39, %v3588_v1  ;;  %5317 = vrot.lane.b32.xlu0 %v5316_v22, %s5746_s20  ;;  %v7243_v39 = vpack.i.bf16 %v6032_v41, %v6146_v17  ;;  %v7253_v41 = vld [vmem:[#allocation12_spill] sm:$0xff]  ;;  %v7254_v17 = vld [vmem:[#allocation22_spill] sm:$0xff] }
 0x528   : > { %v7255_v6 = vpack.i.bf16 %v7253_v41, %v7254_v17 }
 0x529   : > { %v5321_v30 = vpack.i.bf16 %v3625_v38, %v3624_v61 }
 0x52b   : > { %5322 = vrot.lane.b32.xlu1 %v5321_v30, %s5746_s20 }
 0x545   : > { %5327 = vxpose.xlu0.b32.start [1/16] (narrow) %v7239_v46, 24  ;;  %v7274_v46 = vld [vmem:[#allocation19_spill] sm:$0xff] }
 0x549   : > { %5329 = vxpose.xlu0.b32.cont [2/16] (narrow) %v7240_v56, 24  ;;  %v7275_v56 = vld [vmem:[#allocation29_spill] sm:$0xff] }
 0x54d   : > { %5331 = vxpose.xlu0.b32.cont [3/16] (narrow) %v7241_v54, 24  ;;  %v7276_v54 = vpack.i.bf16 %v7274_v46, %v7275_v56 }
 0x551   : > { %5333 = vxpose.xlu0.b32.cont [4/16] (narrow) %v7242_v55, 24 }
 0x554   : > { %3693 = vxpose.xlu1.b32.start [1/4] (short) (narrow) %v6241_v16, 24  ;;  %v7252_v16 = vpack.i.bf16 %v7250_v10, %v7251_v11 }
 0x555   : > { %5335 = vxpose.xlu0.b32.cont [5/16] (narrow) %v7243_v39, 24 }
 0x558   : > { %3694 = vxpose.xlu1.b32.cont [2/4] (short) (narrow) %v6250_v28, 24  ;;  %v5238_v28 = vpop.permute.xlu1 %5237 }
 0x559   : > { %5337 = vxpose.xlu0.b32.cont [6/16] (narrow) %v7244_v33, 24  ;;  %v5240_v26 = vunpack.i.h.bf16 %v5238_v28  ;;  %v5239_v32 = vunpack.i.l.bf16 %v5238_v28 }
 0x55b   : > { %v5063_v51 = vpack.c.bf16 %v5240_v26, %v5239_v32 }
 0x55c   : > { %3695 = vxpose.xlu1.b32.cont [3/4] (short) (narrow) %v7245_v34, 24  ;;  %v5243_v53 = vpop.permute.xlu1 %5242 }
 0x55d   : > { %5339 = vxpose.xlu0.b32.cont [7/16] (narrow) %v7248_v5, 24  ;;  %v5245_v7 = vunpack.i.h.bf16 %v5243_v53  ;;  %v5244_v27 = vunpack.i.l.bf16 %v5243_v53 }
 0x55f   : > { %v5067_v14 = vpack.c.bf16 %v5245_v7, %v5244_v27 }
 0x560   : > { %3696 = vxpose.xlu1.b32.end [4/4] (short) (narrow) %v7249_v40, 24  ;;  %v5248_v35 = vpop.permute.xlu1 %5247 }
 0x561   : > { %5341 = vxpose.xlu0.b32.cont [8/16] (narrow) %v7252_v16, 24  ;;  %v5250_v47 = vunpack.i.h.bf16 %v5248_v35  ;;  %v5249_v23 = vunpack.i.l.bf16 %v5248_v35 }
 0x563   : > { %v5071_v1 = vpack.c.bf16 %v5250_v47, %v5249_v23 }
 0x564   : > { %v5253_v3 = vpop.permute.xlu1 %5252 }
 0x565   : > { %5343 = vxpose.xlu0.b32.cont [9/16] (narrow) %v7255_v6, 24  ;;  %v5255_v61 = vunpack.i.h.bf16 %v5253_v3  ;;  %v5254_v38 = vunpack.i.l.bf16 %v5253_v3 }
 0x567   : > { %v5075_v37 = vpack.c.bf16 %v5255_v61, %v5254_v38 }
 0x568   : > { %v5258_v48 = vpop.permute.xlu1 %5257 }
 0x569   : > { %5345 = vxpose.xlu0.b32.cont [10/16] (narrow) %v7258_v19, 24  ;;  %v5260_v4 = vunpack.i.h.bf16 %v5258_v48  ;;  %v5259_v5 = vunpack.i.l.bf16 %v5258_v48  ;;  %v7277_v48 = vmov 0.0  }
 0x56b   : > { %v5079_v41 = vpack.c.bf16 %v5260_v4, %v5259_v5 }
 0x56c   : > { %v5263_v33 = vpop.permute.xlu1 %5262 }
 0x56d   : > { %v5278_v62 = vpop.permute.xlu0 %5277  ;;  %5347 = vxpose.xlu0.b32.cont [11/16] (narrow) %v7261_v59, 24  ;;  %v5265_v17 = vunpack.i.h.bf16 %v5263_v33  ;;  %v5264_v6 = vunpack.i.l.bf16 %v5263_v33  ;;  %v3626_v33 = vld [vmem:[#allocation4] sm:$0xff] }
 0x56e   : > { %v5280_v52 = vunpack.i.h.bf16 %v5278_v62  ;;  %v5279_v20 = vunpack.i.l.bf16 %v5278_v62 }
 0x56f   : > { %v5083_v26 = vpack.c.bf16 %v5265_v17, %v5264_v6  ;;  %v3628_v17 = vld [vmem:[#allocation4 + $0x10] sm:$0xff] }
 0x570   : > { %v5061_v21 = vpack.c.bf16 %v5280_v52, %v5279_v20  ;;  %v5268_v0 = vpop.permute.xlu1 %5267 }
 0x571   : > { %5349 = vxpose.xlu0.b32.cont [12/16] (narrow) %v7264_v63, 24  ;;  %v5270_v32 = vunpack.i.h.bf16 %v5268_v0  ;;  %v5269_v62 = vunpack.i.l.bf16 %v5268_v0 }
 0x572   : > { %5062 = vmatprep.subr.bf16.mxu1 %v5061_v21 }
 0x573   : > { %5064 = vmatpush3.bf16.msra.mxu1 %v5063_v51  ;;  %v5087_v20 = vpack.c.bf16 %v5270_v32, %v5269_v62  ;;  %v4062_v32 = vld [vmem:[%s5871_s13 + $0x8] sm:$0xff] (!%p4524_p8) }
 0x575   : > { %v5283_v42 = vpop.permute.xlu0 %5282  ;;  %5351 = vxpose.xlu0.b32.cont [13/16] (narrow) %v7267_v49, 24 }
 0x576   : > { %v5285_v8 = vunpack.i.h.bf16 %v5283_v42  ;;  %v5284_v43 = vunpack.i.l.bf16 %v5283_v42  ;;  %v5747_v42 = vmov 0.0|0.0  }
 0x578   : > { %v5065_v18 = vpack.c.bf16 %v5285_v8, %v5284_v43 }
 0x579   : > { %5353 = vxpose.xlu0.b32.cont [14/16] (narrow) %v7270_v60, 24 }
 0x57a   : > { %5066 = vmatprep.subr.bf16.mxu1 %v5065_v18 }
 0x57b   : > { %5068 = vmatpush3.bf16.msra.mxu1 %v5067_v14 }
 0x57d   : > { %v5288_v12 = vpop.permute.xlu0 %5287  ;;  %5355 = vxpose.xlu0.b32.cont [15/16] (narrow) %v7273_v36, 24 }
 0x57e   : > { %v5290_v50 = vunpack.i.h.bf16 %v5288_v12  ;;  %v5289_v31 = vunpack.i.l.bf16 %v5288_v12 }
 0x580   : > { %v5069_v22 = vpack.c.bf16 %v5290_v50, %v5289_v31 }
 0x581   : > { %v5293_v30 = vpop.permute.xlu0 %5292  ;;  %5357 = vxpose.xlu0.b32.end [16/16] (narrow) %v7276_v54, 24 }
 0x582   : > { %v5295_v55 = vunpack.i.h.bf16 %v5293_v30  ;;  %v5294_v39 = vunpack.i.l.bf16 %v5293_v30  ;;  %5070 = vmatprep.subr.bf16.mxu1 %v5069_v22 }
 0x583   : > { %5072 = vmatpush3.bf16.msra.mxu1 %v5071_v1 }
 0x584   : > { %v5073_v34 = vpack.c.bf16 %v5295_v55, %v5294_v39 }
 0x585   : > { %v5298_v40 = vpop.permute.xlu0 %5297 }
 0x586   : > { %v5300_v10 = vunpack.i.h.bf16 %v5298_v40  ;;  %v5299_v11 = vunpack.i.l.bf16 %v5298_v40  ;;  %5074 = vmatprep.subr.bf16.mxu1 %v5073_v34  ;;  %v3627_v40 = vld [vmem:[#allocation4 + $0x8] sm:$0xff] }
 0x587   : > { %5076 = vmatpush3.bf16.msra.mxu1 %v5075_v37 }
 0x588   : > { %v5077_v16 = vpack.c.bf16 %v5300_v10, %v5299_v11 }
 0x589   : > { %v5303_v28 = vpop.permute.xlu0 %5302 }
 0x58a   : > { %v5305_v44 = vunpack.i.h.bf16 %v5303_v28  ;;  %v5304_v19 = vunpack.i.l.bf16 %v5303_v28  ;;  %5078 = vmatprep.subr.bf16.mxu1 %v5077_v16 }
 0x58b   : > { %5080 = vmatpush3.bf16.msra.mxu1 %v5079_v41 }
 0x58c   : > { %v5081_v53 = vpack.c.bf16 %v5305_v44, %v5304_v19  ;;  %v4061_v19 = vld [vmem:[%s5871_s13] sm:$0xff] (!%p4524_p8) }
 0x58d   : > { %v5308_v15 = vpop.permute.xlu0 %5307 }
 0x58e   : > { %v5310_v24 = vunpack.i.h.bf16 %v5308_v15  ;;  %v5309_v59 = vunpack.i.l.bf16 %v5308_v15  ;;  %5082 = vmatprep.subr.bf16.mxu1 %v5081_v53  ;;  %v4063_v53 = vld [vmem:[%s5871_s13 + $0x10] sm:$0xff] (!%p4524_p8) }
 0x58f   : > { %5084 = vmatpush3.bf16.msra.mxu1 %v5083_v26  ;;  %v5749_v26 = vmov (!%p4524_p8), 0  }
 0x590   : > { %v5085_v52 = vpack.c.bf16 %v5310_v24, %v5309_v59  ;;  %5698 = vset.pattern.permute.xlu1 (!%p4524_p8), %v5749_v26 }
 0x591   : > { %v5313_v21 = vpop.permute.xlu0 %5312  ;;  %4076 = vperm.xlu1 (!%p4524_p8), %5698, %v4063_v53  }
 0x592   : > { %v5315_v51 = vunpack.i.h.bf16 %v5313_v21  ;;  %v5314_v45 = vunpack.i.l.bf16 %v5313_v21  ;;  %5086 = vmatprep.subr.bf16.mxu1 %v5085_v52  ;;  %v4049_v52 = vld [vmem:[%s5866_s22] sm:$0xff] (!%p4524_p8) }
 0x593   : > { %5088 = vmatpush3.bf16.msra.mxu1 %v5087_v20  ;;  %v4051_v20 = vld [vmem:[%s5866_s22 + $0x10] sm:$0xff] (!%p4524_p8) }
 0x594   : > { %v5089_v29 = vpack.c.bf16 %v5315_v51, %v5314_v45 }
 0x595   : > { %v5273_v63 = vpop.permute.xlu1 %5272 }
 0x596   : > { %v5275_v35 = vunpack.i.h.bf16 %v5273_v63  ;;  %v5274_v7 = vunpack.i.l.bf16 %v5273_v63  ;;  %5090 = vmatprep.subr.bf16.mxu1 %v5089_v29  ;;  %v4050_v63 = vld [vmem:[%s5866_s22 + $0x8] sm:$0xff] (!%p4524_p8) }
 0x598   : > { %v5091_v27 = vpack.c.bf16 %v5275_v35, %v5274_v7 }
 0x599   : > { %v5318_v57 = vpop.permute.xlu0 %5317 }
 0x59a   : > { %5092 = vmatpush3.bf16.msra.mxu1 %v5091_v27  ;;  %v5320_v9 = vunpack.i.h.bf16 %v5318_v57  ;;  %v5319_v49 = vunpack.i.l.bf16 %v5318_v57 }
 0x59b   : > { %5093 = vmatprep.subr.bf16.mxu1 %v5747_v42 }
 0x59c   : > { %v5094_v14 = vpack.c.bf16 %v5320_v9, %v5319_v49 }
 0x59d   : > { %v5323_v8 = vpop.permute.xlu1 %5322 }
 0x59e   : > { %v5325_v2 = vunpack.i.h.bf16 %v5323_v8  ;;  %v5324_v25 = vunpack.i.l.bf16 %v5323_v8 }
 0x5a0   : > { %v5097_v12 = vpack.c.bf16 %v5325_v2, %v5324_v25 }
 0x5aa   : > { %5697 = vset.pattern.permute.xlu0 (!%p4524_p8), %v5749_v26 }
 0x5ab   : > { %4066 = vperm.xlu0 (!%p4524_p8), %5697, %v4061_v19  }
 0x5af   : > { %4071 = vperm.xlu0 (!%p4524_p8), %5697, %v4062_v32  }
 0x5c5   : > { %v5358_v43 = vpop.trf.xlu0 }
 0x5c6   : > { %v5362_v3 = vunpack.i.h.bf16 %v5358_v43  ;;  %v5359_v18 = vunpack.i.l.bf16 %v5358_v43 }
 0x5c8   : > { %3942 = vmatprep.mubr.f32.mxu1 %v5359_v18 }
 0x5c9   : > { %v5363_v60 = vpop.trf.xlu0  ;;  %3943 = vmatmul.mubr.f32.vlgmr.msra.gmra.mrb[66].mxu1 %v5362_v3 }
 0x5ca   : > { %5095 = vmatpush3.bf16.msra.mxu1 %v5094_v14  ;;  %v5364_v47 = vunpack.i.l.bf16 %v5363_v60  ;;  %v5367_v23 = vunpack.i.h.bf16 %v5363_v60 }
 0x5cb   : > { %5096 = vmatprep.subr.bf16.mxu1 %v5747_v42 }
 0x5cc   : > { %3947 = vmatprep.mubr.f32.mxu1 %v5364_v47 }
 0x5cd   : > { %v5368_v13 = vpop.trf.xlu0  ;;  %3948 = vmatmul.mubr.f32.gmra.mrb[68].mxu1 %v5367_v23 }
 0x5ce   : > { %v5372_v58 = vunpack.i.h.bf16 %v5368_v13  ;;  %v5369_v36 = vunpack.i.l.bf16 %v5368_v13  ;;  %5098 = vmatpush3.bf16.msra.mxu1 %v5097_v12 }
 0x5d0   : > { %3952 = vmatprep.mubr.f32.mxu1 %v5369_v36 }
 0x5d1   : > { %3953 = vmatmul.mubr.f32.gmra.mrb[70].mxu1 %v5372_v58 }
 0x5d2   : > { %5024 = vmatprep.mubr.msk.f32.mxu1 %vm5748_vm1, %v7277_v48 }
 0x5d4   : > { %v3709_v50 = vpop.trf.xlu1 }
 0x5d5   : > { %5025 = vmatmul.mubr.msk.f32.vlgmr.msra.gmra.mrb[72].mxu1 %vm2617_vm4, %v3709_v50 }
 0x5d6   : > { %5027 = vmatprep.mubr.msk.f32.mxu1 %vm5748_vm1, %v7277_v48 }
 0x5d8   : > { %v3710_v31 = vpop.trf.xlu1 }
 0x5d9   : > { %5028 = vmatmul.mubr.msk.f32.gmra.mrb[74].mxu1 %vm2617_vm4, %v3710_v31 }
 0x5da   : > { %5030 = vmatprep.mubr.msk.f32.mxu1 %vm5748_vm1, %v7277_v48 }
 0x5dc   : > { %v3711_v22 = vpop.trf.xlu1 }
 0x5dd   : > { %5031 = vmatmul.mubr.msk.f32.gmra.mrb[76].mxu1 %vm2617_vm4, %v3711_v22 }
 0x610   : > { %v4077_v7 = vpop.permute.xlu1 (!%p4524_p8), %4076 }
 0x62a   : > { %v4067_v35 = vpop.permute.xlu0 (!%p4524_p8), %4066 }
 0x62e   : > { %v4072_v9 = vpop.permute.xlu0 (!%p4524_p8), %4071 }
 0x69c   : > { %v4728_v1 = vpop.f32.mrb[66].mxu1 }
 0x69d   : > { %v4729_v61 = vpop.f32.mrb[67].mxu1 }
 0x69e   : > { %v4730_v38 = vadd.f32 %v4729_v61, %v4728_v1 }
 0x6a0   : > { %v4731_v30 = vpop.f32.mrb[68].mxu1 }
 0x6a1   : > { %v4732_v46 = vpop.f32.mrb[69].mxu1 }
 0x6a2   : > { %v4733_v56 = vadd.f32 %v4732_v46, %v4731_v30 }
 0x6a4   : > { %v4734_v54 = vpop.f32.mrb[70].mxu1 }
 0x6a5   : > { %v4735_v55 = vpop.f32.mrb[71].mxu1 }
 0x6a6   : > { %v4736_v39 = vadd.f32 %v4735_v55, %v4734_v54 }
 0x6a8   : > { %v4024_v34 = vpop.f32.mrb[72].mxu1 }
 0x6a9   : > { %v4025_v37 = vadd.f32 %v4730_v38, %v4024_v34  ;;  %v5026_v4 = vpop.f32.mrb[73].mxu1 }
 0x6ab   : > { %v4038_v5 = vadd.f32 %v4025_v37, %v3626_v33 }
 0x6ac   : > { %v4029_v10 = vpop.f32.mrb[74].mxu1 }
 0x6ad   : > { %4042 = vst.msk [vmem:[#allocation4] sm:$0xff] %vm4041_vm5, %v4038_v5  ;;  %v4030_v11 = vadd.f32 %v4733_v56, %v4029_v10  ;;  %v5029_v16 = vpop.f32.mrb[75].mxu1 }
 0x6af   : > { %v4039_v41 = vadd.f32 %v4030_v11, %v3627_v40  ;;  %4048 = sbr.rel (%p4524_p8) target bundleno = 1732 (0x6c4), region = 76 }
 0x6b0   : > { %v4034_v6 = vpop.f32.mrb[76].mxu1 }
 0x6b1   : > { %4043 = vst.msk [vmem:[#allocation4 + $0x8] sm:$0xff] %vm4041_vm5, %v4039_v41  ;;  %v4035_v28 = vadd.f32 %v4736_v39, %v4034_v6  ;;  %v5032_v0 = vpop.f32.mrb[77].mxu1 }
 0x6b3   : > { %v4040_v44 = vadd.f32 %v4035_v28, %v3628_v17 }
 0x6b4   : > { %v4052_v62 = vld [vmem:[#allocation4] sm:$0xff] (!%p4524_p8) }
 0x6b5   : > { %4044 = vst.msk [vmem:[#allocation4 + $0x10] sm:$0xff] %vm4041_vm5, %v4040_v44  ;;  %v4055_v24 = vmul.f32 (!%p4524_p8), 0.01, %v4052_v62 }
 0x6b7   : > { %v4058_v51 = vadd.f32 %v4055_v24, %v4049_v52 }
 0x6b8   : > { %v4053_v21 = vld [vmem:[#allocation4 + $0x8] sm:$0xff] }
 0x6b9   : > { %v4056_v29 = vmul.f32 0.01, %v4053_v21  ;;  %v4079_v27 = vmul.f32 %v4067_v35, %v4058_v51 }
 0x6bb   : > { %v4059_v57 = vadd.f32 %v4056_v29, %v4050_v63  ;;  %4082 = vst.msk [vmem:[%s5876_s18] sm:$0xff] %vm4041_vm5, %v4079_v27 }
 0x6bc   : > { %v4054_v15 = vld [vmem:[#allocation4 + $0x10] sm:$0xff] }
 0x6bd   : > { %v4057_v59 = vmul.f32 0.01, %v4054_v15  ;;  %v4080_v49 = vmul.f32 %v4072_v9, %v4059_v57 }
 0x6bf   : > { %v4060_v45 = vadd.f32 %v4057_v59, %v4051_v20  ;;  %4083 = vst.msk [vmem:[%s5876_s18 + $0x8] sm:$0xff] %vm4041_vm5, %v4080_v49 }
 0x6c1   : > { %v4081_v42 = vmul.f32 %v4077_v7, %v4060_v45 }
 0x6c3   : > { %4084 = vst.msk [vmem:[%s5876_s18 + $0x10] sm:$0xff] %vm4041_vm5, %v4081_v42 }
 0x6c4 PF: > { %s7278_s21 = sld [smem:[#allocation7_spill]]  ;;  %s7280_s22 = sld [smem:[#allocation6_spill]] }
 0x6c5   : > { %s7281_s23 = sld [smem:[#allocation8_spill]]  ;;  %s7282_s24 = sld [smem:[#allocation9_spill]] }
 0x6ca   : > { %s22_s25 = sadd.s32 1, %s7278_s21   ;;  %s7279_s21 = sld [smem:[#allocation5_spill]] }
 0x6cb   : > { %p19_p9 = scmp.ge.s32.totalorder %s22_s25, 6  }
 0x6cd   :  { %21 = sbr.rel (!%p19_p9) target bundleno = 3 (0x3), region = 118 }

// kernel: equivariant_block_forward.3
= control target key start
LH: loop header
LB: loop body
LE: loop exit
PB: predicated region body
PF: predicated region fallthrough
CT: control target
= control target key end

     0   :  { %s6669_s26 = smov 0   ;;  %s6671_s27 = smov 0   ;;  %s8412_s0 = inlined_call_operand.vmem [shape: s32[2,576,2], index: 0, kind: input, shape index: {}]   ;;  %s8413_s1 = inlined_call_operand.vmem [shape: f32[2,576,6], index: 1, kind: input, shape index: {}]   ;;  %s8414_s2 = inlined_call_operand.vmem [shape: f32[2,24,32], index: 2, kind: input, shape index: {}, may-alias: {2,17}]   ;;  %s8415_s3 = inlined_call_operand.vmem [shape: f32[2,24,1], index: 3, kind: input, shape index: {}]   ;;  %s8416_s4 = inlined_call_operand.vmem [shape: f32[32,32], index: 4, kind: input, shape index: {}]   ;;  %s8417_s5 = inlined_call_operand.vmem [shape: f32[32,32], index: 5, kind: input, shape index: {}]   ;;  %s8418_s6 = inlined_call_operand.vmem [shape: f32[6,32], index: 6, kind: input, shape index: {}]   ;;  %s8419_s7 = inlined_call_operand.vmem [shape: f32[1,32], index: 7, kind: input, shape index: {}]   ;;  %s8420_s8 = inlined_call_operand.vmem [shape: f32[32,32], index: 8, kind: input, shape index: {}]   ;;  %s8421_s9 = inlined_call_operand.vmem [shape: f32[1,32], index: 9, kind: input, shape index: {}]   ;;  %s8422_s10 = inlined_call_operand.vmem [shape: f32[1,32], index: 10, kind: input, shape index: {}]   ;;  %s8423_s11 = inlined_call_operand.<no memory space> [shape: f32[1,1], index: 11, kind: input, shape index: {}]   ;;  %s8424_s12 = inlined_call_operand.vmem [shape: f32[32,32], index: 12, kind: input, shape index: {}]   ;;  %s8425_s13 = inlined_call_operand.vmem [shape: f32[32,32], index: 13, kind: input, shape index: {}]   ;;  %s8426_s14 = inlined_call_operand.vmem [shape: f32[1,32], index: 14, kind: input, shape index: {}]   ;;  %s8427_s15 = inlined_call_operand.vmem [shape: f32[32,32], index: 15, kind: input, shape index: {}]   ;;  %s8428_s16 = inlined_call_operand.vmem [shape: f32[1,32], index: 16, kind: input, shape index: {}]   ;;  %s8429_s17 = inlined_call_operand.vmem [shape: f32[2,24,32], index: 17, kind: output, shape index: {}, may-alias: {2,17}]  }
   0x1   :  { %8498 = sst [smem:[#allocation72_spill]] %s8412_s0  ;;  %v22_v0 = vstv %s8423_s11  ;;  %s6673_s28 = smov 0  }
   0x2   :  { %8499 = sst [smem:[#allocation73_spill]] %s8413_s1  ;;  %23 = vst [vmem:[#allocation5] sm:$0x1] %v22_v0  ;;  %s6675_s29 = smov 0  }
   0x3   :  { %8500 = sst [smem:[#allocation74_spill]] %s8424_s12  ;;  %s6677_s0 = smov 0  }
   0x4   :  { %8501 = sst [smem:[#allocation75_spill]] %s8426_s14 }
   0x5   :  { %8502 = sst [smem:[#allocation76_spill]] %s8427_s15 }
   0x6   :  { %8503 = sst [smem:[#allocation77_spill]] %s8428_s16 }
   0x7 LB: > { %8504 = sst [smem:[#allocation6_spill]] %s6553_s28  ;;  %s38_s11 = sadd.s32 1, %s6553_s28  ;;  %s6561_s0 = sphi %s6677_s0, %s29_s0   ;;  %s6557_s29 = sphi %s6675_s29, %s8659_s29   ;;  %s6553_s28 = sphi %s6673_s28, %s8658_s28   ;;  %s6549_s27 = sphi %s6671_s27, %s8657_s27   ;;  %s6545_s26 = sphi %s6669_s26, %s8656_s26  }
   0x8   : > { %8505 = sst [smem:[#allocation7_spill]] %s6557_s29  ;;  %s41_s30 = sadd.s32 1, %s6557_s29 }
   0x9   : > { %8506 = sst [smem:[#allocation8_spill]] %s6561_s0  ;;  %p39_p0 = scmp.ge.s32.totalorder %s38_s11, 2 }
   0xa   : > { %p4861_p1 = scmp.ge.s32.totalorder %s6561_s0, 1  ;;  %p545_p2 = scmp.lt.s32.totalorder %s6561_s0, 5 }
   0xb   : > { %s8661_s11 = smov (%p39_p0, %s38_s11), 0  ;;  %s8663_s30 = smov (!%p39_p0, %s41_s30), %s6557_s29 }
   0xc   : > { %8507 = sst [smem:[#allocation9_spill]] %s8661_s11  ;;  %p546_p3 = pnand %p4861_p1, %p545_p2 }
   0xd   : > { %p43_p4 = scmp.ge.s32.totalorder %s8663_s30, 2 }
   0xe   : > { %549 = sbr.rel (%p546_p3) target bundleno = 2160 (0x870), region = 88 }
   0xf   : > { %s8665_s30 = smov (%p43_p4, %s8663_s30), 0 }
  0x10   : > { %8508 = sst [smem:[#allocation10_spill]] %s8665_s30 }
  0x15   : > { %s620_s18 = smul.u32 36, %s6545_s26  ;;  %p621_p5 = scmp.lt.s32.totalorder %s6549_s27, 1 }
  0x16   : > { %s8509_s29 = sld [smem:[#allocation72_spill]]  ;;  %s8510_s16 = sld [smem:[#allocation73_spill]] }
  0x17   : > { %s8667_s27 = smov (!%p621_p5, %s6549_s27), 1  ;;  %p623_p6 = scmp.lt.s32.totalorder %s620_s18, 71 }
  0x18   : > { %s5965_s19 = smul.u32 72, %s8667_s27  ;;  %p4867_p7 = scmp.ne.s32.totalorder %s6545_s26, 0 }
  0x19   : > { %s8669_s18 = smov (!%p623_p6, %s620_s18), 71  ;;  %s5966_s1 = smul.u32 24, %s8667_s27  ;;  %v662_v1 = vld [vmem:[%s8416_s4] sm:$0xff] (!%p4867_p7)  ;;  %v663_v2 = vld [vmem:[%s8416_s4 + $0x8] sm:$0xff] (!%p4867_p7)  ;;  %v6563_v4 = vmov (!%p4867_p7), 0.0|0.0   ;;  %v664_v7 = vld [vmem:[%s8416_s4 + $0x10] sm:$0xff] (!%p4867_p7) }
  0x1a   : > { %s626_s20 = sadd.s32 %s5965_s19, %s8669_s18  ;;  %658 = sbr.rel (%p4867_p7) target bundleno = 259 (0x103), region = 92  ;;  %v766_v3 = vld [vmem:[%s8417_s5] sm:$0xff] (!%p4867_p7)  ;;  %5801 = vmatprep.subr.bf16.mxu0 (!%p4867_p7), %v6563_v4  ;;  %v5802_v5 = vpack.c.bf16 (!%p4867_p7), %v663_v2, %v662_v1  ;;  %5807 = vmatprep.subr.bf16.mxu1 (!%p4867_p7), %v6563_v4  ;;  %v767_v6 = vld [vmem:[%s8417_s5 + $0x8] sm:$0xff] (!%p4867_p7)  ;;  %v665_v8 = vld [vmem:[%s8416_s4 + $0x18] sm:$0xff] (!%p4867_p7)  ;;  %vm673_vm0 = vcmask (!%p4867_p7), 261120   ;;  %vm6564_vm1 = vmmov (!%p4867_p7), 0  }
  0x1b   : > { %s4862_s21 = sshll.u32 %s626_s20, 3  ;;  %s6705_s24 = scalar_lea.vmem %s8414_s2, %s5966_s1  ;;  %v5808_v9 = vpack.c.bf16 (!%p4867_p7), %v767_v6, %v766_v3  ;;  %v768_v10 = vld [vmem:[%s8417_s5 + $0x10] sm:$0xff] (!%p4867_p7)  ;;  %v769_v11 = vld [vmem:[%s8417_s5 + $0x18] sm:$0xff] (!%p4867_p7)  ;;  %v6565_v12 = vmov (!%p4867_p7), 0.0   ;;  %v5805_v13 = vpack.c.bf16 (!%p4867_p7), %v665_v8, %v664_v7  ;;  %v4868_v18 = vld [vmem:[%s8419_s7] ss:$0 sm:$0xff] (!%p4867_p7) }
  0x1c   : > { %s6710_s30 = scalar_lea.vmem %s8509_s29, %s4862_s21  ;;  %s6715_s14 = scalar_lea.vmem %s8510_s16, %s4862_s21  ;;  %5469 = vmatprep.mubr.msk.f32.mxu0 (!%p4867_p7), %vm6564_vm1, %v6565_v12  ;;  %853 = vst.msk [vmem:[#allocation4] sm:$0xff] (!%p4867_p7), %vm673_vm0, %v6565_v12  ;;  %854 = vst.msk [vmem:[#allocation4 + $0x8] sm:$0xff] (!%p4867_p7), %vm673_vm0, %v6565_v12  ;;  %5486 = vmatprep.mubr.msk.f32.mxu1 (!%p4867_p7), %vm6564_vm1, %v6565_v12  ;;  %v5811_v14 = vpack.c.bf16 (!%p4867_p7), %v769_v11, %v768_v10  ;;  %v659_v15 = vld [vmem:[%s6705_s24] sm:$0xff] (!%p4867_p7)  ;;  %v660_v16 = vld [vmem:[%s6705_s24 + $0x8] sm:$0xff] (!%p4867_p7) }
  0x1d   : > { %s6720_s27 = scalar_lea.vmem %s8415_s3, %s5966_s1  ;;  %s6725_s20 = scalar_lea.vmem %s8429_s17, %s5966_s1  ;;  %855 = vst.msk [vmem:[#allocation4 + $0x10] sm:$0xff] (!%p4867_p7), %vm673_vm0, %v6565_v12  ;;  %5803 = vmatpush3.bf16.msra.mxu0 (!%p4867_p7), %v5802_v5  ;;  %5809 = vmatpush3.bf16.msra.mxu1 (!%p4867_p7), %v5808_v9  ;;  %v661_v17 = vld [vmem:[%s6705_s24 + $0x10] sm:$0xff] (!%p4867_p7) }
  0x1e   : > { %5804 = vmatprep.subr.bf16.mxu0 (!%p4867_p7), %v6563_v4  ;;  %5810 = vmatprep.subr.bf16.mxu1 (!%p4867_p7), %v6563_v4 }
  0x21   : > { %5806 = vmatpush3.bf16.msra.mxu0 %v5805_v13  ;;  %5812 = vmatpush3.bf16.msra.mxu1 %v5811_v14 }
  0x24   : > { %5470 = vmatmul.mubr.msk.f32.vlgmr.msra.gmra.mrb[0].mxu0 %vm673_vm0, %v659_v15  ;;  %5487 = vmatmul.mubr.msk.f32.vlgmr.msra.gmra.mrb[0].mxu1 %vm673_vm0, %v659_v15 }
  0x25   : > { %5472 = vmatprep.mubr.msk.f32.mxu0 %vm6564_vm1, %v6565_v12  ;;  %5489 = vmatprep.mubr.msk.f32.mxu1 %vm6564_vm1, %v6565_v12 }
  0x28   : > { %5473 = vmatmul.mubr.msk.f32.gmra.mrb[2].mxu0 %vm673_vm0, %v660_v16  ;;  %5490 = vmatmul.mubr.msk.f32.gmra.mrb[2].mxu1 %vm673_vm0, %v660_v16 }
  0x29   : > { %5475 = vmatprep.mubr.msk.f32.mxu0 %vm6564_vm1, %v6565_v12  ;;  %5492 = vmatprep.mubr.msk.f32.mxu1 %vm6564_vm1, %v6565_v12 }
  0x2c   : > { %5476 = vmatmul.mubr.msk.f32.gmra.mrb[4].mxu0 %vm673_vm0, %v661_v17  ;;  %5493 = vmatmul.mubr.msk.f32.gmra.mrb[4].mxu1 %vm673_vm0, %v661_v17 }
  0xf7   : > { %v749_v19 = vpop.f32.mrb[0].mxu0  ;;  %v836_v22 = vpop.f32.mrb[0].mxu1 }
  0xf8   : > { %v750_v20 = vadd.f32 %v4868_v18, %v749_v19  ;;  %v5471_v21 = vpop.f32.mrb[1].mxu0  ;;  %850 = vst.msk [vmem:[#allocation3] sm:$0xff] %vm673_vm0, %v836_v22  ;;  %v5488_v23 = vpop.f32.mrb[1].mxu1 }
  0xfa   : > { %763 = vst.msk [vmem:[#allocation2] sm:$0xff] %vm673_vm0, %v750_v20 }
  0xfb   : > { %v754_v24 = vpop.f32.mrb[2].mxu0  ;;  %v841_v27 = vpop.f32.mrb[2].mxu1 }
  0xfc   : > { %v755_v25 = vadd.f32 %v4868_v18, %v754_v24  ;;  %v5474_v26 = vpop.f32.mrb[3].mxu0  ;;  %851 = vst.msk [vmem:[#allocation3 + $0x8] sm:$0xff] %vm673_vm0, %v841_v27  ;;  %v5491_v28 = vpop.f32.mrb[3].mxu1 }
  0xfe   : > { %764 = vst.msk [vmem:[#allocation2 + $0x8] sm:$0xff] %vm673_vm0, %v755_v25 }
  0xff   : > { %v759_v29 = vpop.f32.mrb[4].mxu0  ;;  %v846_v32 = vpop.f32.mrb[4].mxu1 }
 0x100   : > { %v760_v30 = vadd.f32 %v4868_v18, %v759_v29  ;;  %v5477_v31 = vpop.f32.mrb[5].mxu0  ;;  %852 = vst.msk [vmem:[#allocation3 + $0x10] sm:$0xff] %vm673_vm0, %v846_v32  ;;  %v5494_v33 = vpop.f32.mrb[5].mxu1 }
 0x102   : > { %765 = vst.msk [vmem:[#allocation2 + $0x10] sm:$0xff] %vm673_vm0, %v760_v30 }
 0x103 PF: > { %v858_v34 = vld [vmem:[%s6710_s30 + $0x10] sm:$0xff]  ;;  %v856_v35 = vld [vmem:[%s6710_s30] sm:$0xff]  ;;  %v6566_v36 = vmov 1   ;;  %v859_v37 = vld [vmem:[%s6710_s30 + $0x18] sm:$0xff]  ;;  %v6567_v44 = vmov 0   ;;  %v928_v15 = vlaneseq  ;;  %vm1368_vm3 = vcmask 195584  }
 0x104   : > { %6021 = vset.pattern.permute.xlu1 %v6566_v36  ;;  %6020 = vset.pattern.permute.xlu0 %v6566_v36  ;;  %v857_v38 = vld [vmem:[%s6710_s30 + $0x8] sm:$0xff]  ;;  %v860_v40 = vld [vmem:[%s6710_s30 + $0x20] sm:$0xff]  ;;  %v1365_v41 = vld [vmem:[#allocation3] sm:$0xff]  ;;  %v8445_v19 = vmov 0.0   ;;  %vm2185_vm8 = vcmask 1045504   ;;  %s6569_s19 = smov 126  }
 0x105   : > { %1153 = vperm.xlu1 %6021, %v858_v34   ;;  %1147 = vperm.xlu0 %6020, %v856_v35   ;;  %v861_v39 = vld [vmem:[%s6710_s30 + $0x28] sm:$0xff]  ;;  %v1366_v42 = vld [vmem:[#allocation3 + $0x8] sm:$0xff]  ;;  %v862_v49 = vld [vmem:[%s6710_s30 + $0x30] sm:$0xff]  ;;  %v6833_v16 = vand.u32 127, %v928_v15  ;;  %p5206_p8 = scmp.ne.s32.totalorder %s6545_s26, 1 }
 0x106   : > { %v5813_v43 = vpack.c.bf16 %v1366_v42, %v1365_v41  ;;  %v1362_v46 = vld [vmem:[#allocation2] sm:$0xff]  ;;  %v1363_v47 = vld [vmem:[#allocation2 + $0x8] sm:$0xff]  ;;  %v863_v50 = vld [vmem:[%s6710_s30 + $0x38] sm:$0xff]  ;;  %s8650_s25 = sld [smem:[#allocation74_spill]] (!%p5206_p8)  ;;  %s8651_s0 = sld [smem:[#allocation76_spill]] (!%p5206_p8) }
 0x107   : > { %v1367_v45 = vld [vmem:[#allocation3 + $0x10] sm:$0xff]  ;;  %v6789_v48 = vpack.c.bf16 %v1363_v47, %v1362_v46  ;;  %v864_v51 = vld [vmem:[%s6710_s30 + $0x40] sm:$0xff]  ;;  %v866_v53 = vld [vmem:[%s6710_s30 + $0x50] sm:$0xff]  ;;  %s8654_s11 = sld [smem:[#allocation77_spill]] (!%p5206_p8) }
 0x108   : > { %5814 = vmatprep.subr.bf16.mxu0 %v5813_v43  ;;  %5885 = vmatprep.subr.bf16.mxu1 %v5813_v43  ;;  %v865_v52 = vld [vmem:[%s6710_s30 + $0x48] sm:$0xff]  ;;  %v867_v54 = vld [vmem:[%s6710_s30 + $0x58] sm:$0xff]  ;;  %v868_v55 = vld [vmem:[%s6710_s30 + $0x60] sm:$0xff] }
 0x109   : > { %1156 = vperm.xlu1 %6021, %v859_v37   ;;  %1150 = vperm.xlu0 %6020, %v857_v38   ;;  %v869_v56 = vld [vmem:[%s6710_s30 + $0x68] sm:$0xff]  ;;  %v870_v57 = vld [vmem:[%s6710_s30 + $0x70] sm:$0xff]  ;;  %v871_v58 = vld [vmem:[%s6710_s30 + $0x78] sm:$0xff] }
 0x10a   : > { %5816 = vmatpush3.bf16.msra.mxu0 %v5813_v43  ;;  %5887 = vmatpush3.bf16.msra.mxu1 %v5813_v43  ;;  %v872_v59 = vld [vmem:[%s6710_s30 + $0x80] sm:$0xff]  ;;  %v873_v60 = vld [vmem:[%s6710_s30 + $0x88] sm:$0xff]  ;;  %v874_v61 = vld [vmem:[%s6710_s30 + $0x90] sm:$0xff] }
 0x10b   : > { %5499 = vmatprep.subr.mxu0 %v1367_v45  ;;  %5886 = vmatprep.subr.mxu1 %v1367_v45  ;;  %v875_v62 = vld [vmem:[%s6710_s30 + $0x98] sm:$0xff]  ;;  %v876_v63 = vld [vmem:[%s6710_s30 + $0xa0] sm:$0xff]  ;;  %v877_v0 = vld [vmem:[%s6710_s30 + $0xa8] sm:$0xff] }
 0x10c   : > { %v878_v1 = vld [vmem:[%s6710_s30 + $0xb0] sm:$0xff]  ;;  %v879_v2 = vld [vmem:[%s6710_s30 + $0xb8] sm:$0xff]  ;;  %v880_v3 = vld [vmem:[%s6710_s30 + $0xc0] sm:$0xff]  ;;  %s8652_s12 = smov (!%p5206_p8), %s8651_s0 }
 0x10d   : > { %1162 = vperm.xlu1 %6021, %v861_v39   ;;  %1159 = vperm.xlu0 %6020, %v860_v40   ;;  %v881_v4 = vld [vmem:[%s6710_s30 + $0xc8] sm:$0xff]  ;;  %v882_v5 = vld [vmem:[%s6710_s30 + $0xd0] sm:$0xff]  ;;  %v883_v6 = vld [vmem:[%s6710_s30 + $0xd8] sm:$0xff] }
 0x10e   : > { %5500 = vmatpush3.msra.mxu0 %v1367_v45  ;;  %5888 = vmatpush3.msra.mxu1 %v1367_v45  ;;  %v884_v7 = vld [vmem:[%s6710_s30 + $0xe0] sm:$0xff]  ;;  %v885_v8 = vld [vmem:[%s6710_s30 + $0xe8] sm:$0xff]  ;;  %v886_v9 = vld [vmem:[%s6710_s30 + $0xf0] sm:$0xff] }
 0x10f   : > { %5818 = vmatprep.subr.bf16.mxu0 %v6789_v48  ;;  %v6818_v10 = vld [vmem:[%s6710_s30 + $0xf8] sm:$0xff]  ;;  %v888_v11 = vld [vmem:[%s6710_s30 + $0x100] sm:$0xff]  ;;  %v6823_v12 = vld [vmem:[%s6710_s30 + $0x108] sm:$0xff] }
 0x110   : > { %v890_v13 = vld [vmem:[%s6710_s30 + $0x110] sm:$0xff]  ;;  %v6828_v14 = vld [vmem:[%s6710_s30 + $0x118] sm:$0xff]  ;;  %v2075_v30 = vld [vmem:[%s8418_s6] sm:$0x3f] }
 0x111   : > { %6023 = vset.pattern.permute.xlu1 %v6567_v44  ;;  %6022 = vset.pattern.permute.xlu0 %v6567_v44  ;;  %v1364_v24 = vld [vmem:[#allocation2 + $0x10] sm:$0xff] }
 0x112   : > { %934 = vperm.xlu1 %6023, %v857_v38   ;;  %931 = vperm.xlu0 %6022, %v856_v35  }
 0x116   : > { %937 = vperm.xlu1 %6023, %v858_v34   ;;  %940 = vperm.xlu0 %6022, %v859_v37  }
 0x11a   : > { %943 = vperm.xlu1 %6023, %v860_v40   ;;  %946 = vperm.xlu0 %6022, %v861_v39  }
 0x11e   : > { %949 = vperm.xlu1 %6023, %v862_v49   ;;  %952 = vperm.xlu0 %6022, %v863_v50  }
 0x122   : > { %955 = vperm.xlu1 %6023, %v864_v51   ;;  %958 = vperm.xlu0 %6022, %v865_v52  }
 0x126   : > { %961 = vperm.xlu1 %6023, %v866_v53   ;;  %964 = vperm.xlu0 %6022, %v867_v54  }
 0x12a   : > { %967 = vperm.xlu1 %6023, %v868_v55   ;;  %970 = vperm.xlu0 %6022, %v869_v56  }
 0x12e   : > { %973 = vperm.xlu1 %6023, %v870_v57   ;;  %976 = vperm.xlu0 %6022, %v871_v58  }
 0x132   : > { %979 = vperm.xlu1 %6023, %v872_v59   ;;  %982 = vperm.xlu0 %6022, %v873_v60  }
 0x136   : > { %985 = vperm.xlu1 %6023, %v874_v61   ;;  %988 = vperm.xlu0 %6022, %v875_v62  }
 0x13a   : > { %991 = vperm.xlu1 %6023, %v876_v63   ;;  %994 = vperm.xlu0 %6022, %v877_v0  }
 0x13e   : > { %997 = vperm.xlu1 %6023, %v878_v1   ;;  %1000 = vperm.xlu0 %6022, %v879_v2  }
 0x142   : > { %1003 = vperm.xlu1 %6023, %v880_v3   ;;  %1006 = vperm.xlu0 %6022, %v881_v4  }
 0x146   : > { %1009 = vperm.xlu1 %6023, %v882_v5   ;;  %1012 = vperm.xlu0 %6022, %v883_v6  }
 0x14a   : > { %1015 = vperm.xlu1 %6023, %v884_v7   ;;  %1018 = vperm.xlu0 %6022, %v885_v8  }
 0x14e   : > { %1021 = vperm.xlu1 %6023, %v886_v9   ;;  %1024 = vperm.xlu0 %6022, %v6818_v10  }
 0x152   : > { %1027 = vperm.xlu1 %6023, %v888_v11   ;;  %1030 = vperm.xlu0 %6022, %v6823_v12  }
 0x156   : > { %1033 = vperm.xlu1 %6023, %v890_v13   ;;  %1036 = vperm.xlu0 %6022, %v6828_v14  }
 0x15a   : > { %6024 = vset.pattern.permute.xlu1 %v6566_v36  ;;  %6025 = vset.pattern.permute.xlu0 %v6566_v36 }
 0x15b   : > { %1165 = vperm.xlu1 %6024, %v862_v49   ;;  %1168 = vperm.xlu0 %6025, %v863_v50  }
 0x15f   : > { %1171 = vperm.xlu1 %6024, %v864_v51   ;;  %1177 = vperm.xlu0 %6025, %v866_v53   ;;  %v2722_v51 = vld [vmem:[%s8420_s8] sm:$0xff] }
 0x163   : > { %1174 = vperm.xlu1 %6024, %v865_v52   ;;  %1183 = vperm.xlu0 %6025, %v868_v55   ;;  %v2723_v52 = vld [vmem:[%s8420_s8 + $0x8] sm:$0xff] }
 0x164   : > { %v6925_v55 = vpack.c.bf16 %v2723_v52, %v2722_v51 }
 0x166   : > { %5822 = vmatprep.subr.bf16.mxu1 %v6925_v55 }
 0x167   : > { %1180 = vperm.xlu1 %6024, %v867_v54   ;;  %1189 = vperm.xlu0 %6025, %v870_v57  }
 0x16b   : > { %1186 = vperm.xlu1 %6024, %v869_v56   ;;  %1195 = vperm.xlu0 %6025, %v872_v59  }
 0x16f   : > { %1192 = vperm.xlu1 %6024, %v871_v58   ;;  %1201 = vperm.xlu0 %6025, %v874_v61  }
 0x173   : > { %1198 = vperm.xlu1 %6024, %v873_v60   ;;  %1207 = vperm.xlu0 %6025, %v876_v63  }
 0x177   : > { %1204 = vperm.xlu1 %6024, %v875_v62   ;;  %1213 = vperm.xlu0 %6025, %v878_v1  }
 0x17b   : > { %1210 = vperm.xlu1 %6024, %v877_v0   ;;  %1219 = vperm.xlu0 %6025, %v880_v3  }
 0x17f   : > { %1216 = vperm.xlu1 %6024, %v879_v2   ;;  %1225 = vperm.xlu0 %6025, %v882_v5  }
 0x183   : > { %1222 = vperm.xlu1 %6024, %v881_v4   ;;  %1231 = vperm.xlu0 %6025, %v884_v7   ;;  %v7279_v7 = vld [vmem:[%s6715_s14 + $0xa0] sm:$0xff] }
 0x184   : > { %v1154_v17 = vpop.permute.xlu1 %1153  ;;  %v1148_v18 = vpop.permute.xlu0 %1147 }
 0x185   : > { %vm1254_vm2 = vcmp.eq.s32.totalorder %v1148_v18, %v6833_v16  ;;  %vm1256_vm4 = vcmp.eq.s32.totalorder %v1154_v17, %v6833_v16 }
 0x186   : > { %v4911_v20 = vsel %vm1254_vm2, 1.0, %v8445_v19  ;;  %v4913_v25 = vsel %vm1256_vm4, 1.0, %v8445_v19 }
 0x187   : > { %1228 = vperm.xlu1 %6024, %v883_v6   ;;  %1237 = vperm.xlu0 %6025, %v886_v9  }
 0x188   : > { %5501 = vmatprep.mubr.msk.f32.mxu0 %vm1368_vm3, %v4911_v20  ;;  %v1157_v21 = vpop.permute.xlu1 %1156  ;;  %v1151_v22 = vpop.permute.xlu0 %1150 }
 0x189   : > { %vm1255_vm5 = vcmp.eq.s32.totalorder %v1151_v22, %v6833_v16  ;;  %vm1257_vm6 = vcmp.eq.s32.totalorder %v1157_v21, %v6833_v16  ;;  %v7247_v21 = vld [vmem:[%s6715_s14 + $0x80] sm:$0xff] }
 0x18a   : > { %v4912_v23 = vsel %vm1255_vm5, 1.0, %v8445_v19  ;;  %v4914_v29 = vsel %vm1257_vm6, 1.0, %v8445_v19 }
 0x18b   : > { %1234 = vperm.xlu1 %6024, %v885_v8   ;;  %1243 = vperm.xlu0 %6025, %v888_v11  }
 0x18c   : > { %5502 = vmatmul.mubr.msk.f32.vlgmr.msra.gmra.mrb[0].mxu0 %vm1368_vm3, %v4912_v23  ;;  %v1163_v26 = vpop.permute.xlu1 %1162  ;;  %v1160_v27 = vpop.permute.xlu0 %1159 }
 0x18d   : > { %5820 = vmatpush3.bf16.msra.mxu0 %v6789_v48  ;;  %5504 = vmatprep.mubr.msk.f32.mxu0 %vm1368_vm3, %v4913_v25  ;;  %vm1258_vm7 = vcmp.eq.s32.totalorder %v1160_v27, %v6833_v16  ;;  %vm1259_vm9 = vcmp.eq.s32.totalorder %v1163_v26, %v6833_v16  ;;  %v7231_v27 = vld [vmem:[%s6715_s14 + $0x70] sm:$0xff] }
 0x18e   : > { %v4915_v28 = vsel %vm1258_vm7, 1.0, %v8445_v19  ;;  %5559 = vmatprep.subr.mxu0 %v1364_v24  ;;  %v4916_v33 = vsel %vm1259_vm9, 1.0, %v8445_v19 }
 0x18f   : > { %1240 = vperm.xlu1 %6024, %v6818_v10   ;;  %1249 = vperm.xlu0 %6025, %v890_v13   ;;  %v7263_v13 = vld [vmem:[%s6715_s14 + $0x90] sm:$0xff] }
 0x190   : > { %5505 = vmatmul.mubr.msk.f32.gmra.mrb[2].mxu0 %vm1368_vm3, %v4914_v29 }
 0x191   : > { %5507 = vmatprep.mubr.msk.f32.mxu0 %vm1368_vm3, %v4915_v28  ;;  %v935_v31 = vpop.permute.xlu1 %934  ;;  %5560 = vmatpush3.msra.mxu0 %v1364_v24  ;;  %v932_v32 = vpop.permute.xlu0 %931 }
 0x192   : > { %vm1039_vm10 = vcmp.eq.s32.totalorder %v935_v31, %v6833_v16  ;;  %vm1038_vm11 = vcmp.eq.s32.totalorder %v932_v32, %v6833_v16  ;;  %5615 = vmatprep.subr.msk.mxu0 %vm2185_vm8, %v2075_v30 }
 0x193   : > { %v6861_v34 = vsel %vm1038_vm11, 1.0, %v8445_v19  ;;  %1246 = vperm.xlu1 %6024, %v6823_v12   ;;  %6026 = vset.pattern.permute.xlu0 %v6567_v44  ;;  %v6867_v35 = vsel %vm1039_vm10, 1.0, %v8445_v19 }
 0x194   : > { %5508 = vmatmul.mubr.msk.f32.gmra.mrb[4].mxu0 %vm1368_vm3, %v4916_v33  ;;  %8511 = vst [vmem:[#allocation11_spill] sm:$0xff] %v6867_v35  ;;  %v7215_v33 = vld [vmem:[%s6715_s14 + $0x60] sm:$0xff] }
 0x195   : > { %v938_v36 = vpop.permute.xlu1 %937  ;;  %v941_v37 = vpop.permute.xlu0 %940  ;;  %5561 = vmatprep.mubr.msk.f32.mxu0 %vm1368_vm3, %v6861_v34 }
 0x196   : > { %vm1040_vm12 = vcmp.eq.s32.totalorder %v938_v36, %v6833_v16  ;;  %vm1041_vm13 = vcmp.eq.s32.totalorder %v941_v37, %v6833_v16 }
 0x197   : > { %v6873_v38 = vsel %vm1040_vm12, 1.0, %v8445_v19  ;;  %1252 = vperm.xlu1 %6024, %v6828_v14   ;;  %v6884_v41 = vsel %vm1041_vm13, 1.0, %v8445_v19 }
 0x198   : > { %8512 = vst [vmem:[#allocation12_spill] sm:$0xff] %v6873_v38  ;;  %5562 = vmatmul.mubr.msk.f32.vlgmr.msra.gmra.mrb[0].mxu0 %vm1368_vm3, %v6867_v35  ;;  %8513 = vst [vmem:[#allocation13_spill] sm:$0xff] %v6884_v41 }
 0x199   : > { %5616 = vmatpush3.msk.msra.mxu0 %vm2185_vm8, %v2075_v30  ;;  %5564 = vmatprep.mubr.msk.f32.mxu0 %vm1368_vm3, %v6873_v38  ;;  %v944_v39 = vpop.permute.xlu1 %943  ;;  %v947_v40 = vpop.permute.xlu0 %946 }
 0x19a   : > { %vm1042_vm14 = vcmp.eq.s32.totalorder %v944_v39, %v6833_v16  ;;  %vm1043_vm15 = vcmp.eq.s32.totalorder %v947_v40, %v6833_v16 }
 0x19b   : > { %v6887_v42 = vsel %vm1042_vm14, 1.0, %v8445_v19  ;;  %6027 = vset.pattern.permute.xlu1 %v6567_v44  ;;  %v6897_v46 = vsel %vm1043_vm15, 1.0, %v8445_v19 }
 0x19c   : > { %8514 = vst [vmem:[#allocation14_spill] sm:$0xff] %v6887_v42  ;;  %5565 = vmatmul.mubr.msk.f32.gmra.mrb[2].mxu0 %vm1368_vm3, %v6884_v41  ;;  %8515 = vst [vmem:[#allocation15_spill] sm:$0xff] %v6897_v46  ;;  %3781 = vrot.lane.b32.xlu1 %v7247_v21, %s6569_s19 }
 0x19d   : > { %5567 = vmatprep.mubr.msk.f32.mxu0 %vm1368_vm3, %v6887_v42  ;;  %v950_v43 = vpop.permute.xlu1 %949  ;;  %v953_v45 = vpop.permute.xlu0 %952 }
 0x19e   : > { %vm1044_vm0 = vcmp.eq.s32.totalorder %v950_v43, %v6833_v16  ;;  %vm1045_vm1 = vcmp.eq.s32.totalorder %v953_v45, %v6833_v16  ;;  %v7199_v45 = vld [vmem:[%s6715_s14 + $0x50] sm:$0xff] }
 0x19f   : > { %v6900_v47 = vsel %vm1044_vm0, 1.0, %v8445_v19  ;;  %v6909_v49 = vsel %vm1045_vm1, 1.0, %v8445_v19 }
 0x1a0   : > { %8516 = vst [vmem:[#allocation16_spill] sm:$0xff] %v6900_v47  ;;  %5568 = vmatmul.mubr.msk.f32.gmra.mrb[4].mxu0 %vm1368_vm3, %v6897_v46  ;;  %8517 = vst [vmem:[#allocation17_spill] sm:$0xff] %v6909_v49 }
 0x1a1   : > { %5570 = vmatprep.mubr.msk.f32.mxu0 %vm1368_vm3, %v6900_v47  ;;  %v956_v44 = vpop.permute.xlu1 %955  ;;  %v959_v48 = vpop.permute.xlu0 %958 }
 0x1a2   : > { %vm1046_vm2 = vcmp.eq.s32.totalorder %v956_v44, %v6833_v16  ;;  %vm1047_vm4 = vcmp.eq.s32.totalorder %v959_v48, %v6833_v16 }
 0x1a3   : > { %v6912_v50 = vsel %vm1046_vm2, 1.0, %v8445_v19  ;;  %v6929_v56 = vsel %vm1047_vm4, 1.0, %v8445_v19 }
 0x1a4   : > { %8518 = vst [vmem:[#allocation18_spill] sm:$0xff] %v6912_v50  ;;  %5571 = vmatmul.mubr.msk.f32.gmra.mrb[6].mxu0 %vm1368_vm3, %v6909_v49  ;;  %8519 = vst [vmem:[#allocation19_spill] sm:$0xff] %v6929_v56 }
 0x1a5   : > { %5573 = vmatprep.mubr.msk.f32.mxu0 %vm1368_vm3, %v6912_v50  ;;  %v962_v53 = vpop.permute.xlu1 %961  ;;  %v965_v54 = vpop.permute.xlu0 %964 }
 0x1a6   : > { %vm1048_vm5 = vcmp.eq.s32.totalorder %v962_v53, %v6833_v16  ;;  %vm1049_vm6 = vcmp.eq.s32.totalorder %v965_v54, %v6833_v16 }
 0x1a7   : > { %v6932_v57 = vsel %vm1048_vm5, 1.0, %v8445_v19  ;;  %v6942_v60 = vsel %vm1049_vm6, 1.0, %v8445_v19 }
 0x1a8   : > { %8520 = vst [vmem:[#allocation20_spill] sm:$0xff] %v6932_v57  ;;  %5574 = vmatmul.mubr.msk.f32.gmra.mrb[8].mxu0 %vm1368_vm3, %v6929_v56  ;;  %8521 = vst [vmem:[#allocation21_spill] sm:$0xff] %v6942_v60 }
 0x1a9   : > { %5576 = vmatprep.mubr.msk.f32.mxu0 %vm1368_vm3, %v6932_v57  ;;  %v968_v58 = vpop.permute.xlu1 %967  ;;  %v971_v59 = vpop.permute.xlu0 %970 }
 0x1aa   : > { %vm1050_vm7 = vcmp.eq.s32.totalorder %v968_v58, %v6833_v16  ;;  %vm1051_vm8 = vcmp.eq.s32.totalorder %v971_v59, %v6833_v16 }
 0x1ab   : > { %v6945_v61 = vsel %vm1050_vm7, 1.0, %v8445_v19  ;;  %v6954_v0 = vsel %vm1051_vm8, 1.0, %v8445_v19 }
 0x1ac   : > { %8522 = vst [vmem:[#allocation22_spill] sm:$0xff] %v6945_v61  ;;  %5577 = vmatmul.mubr.msk.f32.gmra.mrb[10].mxu0 %vm1368_vm3, %v6942_v60  ;;  %8523 = vst [vmem:[#allocation23_spill] sm:$0xff] %v6954_v0  ;;  %v7371_v60 = vld [vmem:[%s6715_s14 + $0x100] sm:$0xff] }
 0x1ad   : > { %5579 = vmatprep.mubr.msk.f32.mxu0 %vm1368_vm3, %v6945_v61  ;;  %v974_v62 = vpop.permute.xlu1 %973  ;;  %v977_v63 = vpop.permute.xlu0 %976 }
 0x1ae   : > { %vm1052_vm9 = vcmp.eq.s32.totalorder %v974_v62, %v6833_v16  ;;  %vm1053_vm10 = vcmp.eq.s32.totalorder %v977_v63, %v6833_v16 }
 0x1af   : > { %v6957_v1 = vsel %vm1052_vm9, 1.0, %v8445_v19  ;;  %v6967_v4 = vsel %vm1053_vm10, 1.0, %v8445_v19 }
 0x1b0   : > { %8524 = vst [vmem:[#allocation24_spill] sm:$0xff] %v6957_v1  ;;  %5580 = vmatmul.mubr.msk.f32.gmra.mrb[12].mxu0 %vm1368_vm3, %v6954_v0  ;;  %8525 = vst [vmem:[#allocation25_spill] sm:$0xff] %v6967_v4 }
 0x1b1   : > { %5582 = vmatprep.mubr.msk.f32.mxu0 %vm1368_vm3, %v6957_v1  ;;  %v980_v2 = vpop.permute.xlu1 %979  ;;  %v983_v3 = vpop.permute.xlu0 %982  ;;  %v7311_v1 = vld [vmem:[%s6715_s14 + $0xc0] sm:$0xff] }
 0x1b2   : > { %vm1054_vm11 = vcmp.eq.s32.totalorder %v980_v2, %v6833_v16  ;;  %vm1055_vm12 = vcmp.eq.s32.totalorder %v983_v3, %v6833_v16 }
 0x1b3   : > { %v6970_v5 = vsel %vm1054_vm11, 1.0, %v8445_v19  ;;  %v6973_v6 = vsel %vm1055_vm12, 1.0, %v8445_v19 }
 0x1b4   : > { %8526 = vst [vmem:[#allocation26_spill] sm:$0xff] %v6973_v6  ;;  %5583 = vmatmul.mubr.msk.f32.gmra.mrb[14].mxu0 %vm1368_vm3, %v6967_v4  ;;  %v7295_v4 = vld [vmem:[%s6715_s14 + $0xb0] sm:$0xff] }
 0x1b5   : > { %5585 = vmatprep.mubr.msk.f32.mxu0 %vm1368_vm3, %v6970_v5  ;;  %v986_v9 = vpop.permute.xlu1 %985  ;;  %v989_v10 = vpop.permute.xlu0 %988 }
 0x1b6   : > { %vm1056_vm13 = vcmp.eq.s32.totalorder %v986_v9, %v6833_v16  ;;  %vm1057_vm14 = vcmp.eq.s32.totalorder %v989_v10, %v6833_v16 }
 0x1b7   : > { %v6986_v11 = vsel %vm1056_vm13, 1.0, %v8445_v19  ;;  %v6989_v12 = vsel %vm1057_vm14, 1.0, %v8445_v19 }
 0x1b8   : > { %8527 = vst [vmem:[#allocation27_spill] sm:$0xff] %v6986_v11  ;;  %8528 = vst [vmem:[#allocation28_spill] sm:$0xff] %v6989_v12  ;;  %5586 = vmatmul.mubr.msk.f32.gmra.mrb[16].mxu0 %vm1368_vm3, %v6973_v6 }
 0x1b9   : > { %5588 = vmatprep.mubr.msk.f32.mxu0 %vm1368_vm3, %v6986_v11  ;;  %v992_v15 = vpop.permute.xlu1 %991  ;;  %v995_v17 = vpop.permute.xlu0 %994 }
 0x1ba   : > { %vm1058_vm15 = vcmp.eq.s32.totalorder %v992_v15, %v6833_v16  ;;  %vm1059_vm0 = vcmp.eq.s32.totalorder %v995_v17, %v6833_v16 }
 0x1bb   : > { %v7002_v18 = vsel %vm1058_vm15, 1.0, %v8445_v19  ;;  %v7005_v20 = vsel %vm1059_vm0, 1.0, %v8445_v19  ;;  %vm2076_vm0 = vcmask 48128  }
 0x1bc   : > { %8529 = vst [vmem:[#allocation29_spill] sm:$0xff] %v7002_v18  ;;  %8530 = vst [vmem:[#allocation30_spill] sm:$0xff] %v7005_v20  ;;  %5589 = vmatmul.mubr.msk.f32.gmra.mrb[18].mxu0 %vm1368_vm3, %v6989_v12 }
 0x1bd   : > { %5591 = vmatprep.mubr.msk.f32.mxu0 %vm1368_vm3, %v7002_v18  ;;  %v998_v23 = vpop.permute.xlu1 %997  ;;  %v1001_v24 = vpop.permute.xlu0 %1000 }
 0x1be   : > { %vm1060_vm1 = vcmp.eq.s32.totalorder %v998_v23, %v6833_v16  ;;  %vm1061_vm2 = vcmp.eq.s32.totalorder %v1001_v24, %v6833_v16 }
 0x1bf   : > { %v7018_v25 = vsel %vm1060_vm1, 1.0, %v8445_v19  ;;  %v7021_v26 = vsel %vm1061_vm2, 1.0, %v8445_v19 }
 0x1c0   : > { %8531 = vst [vmem:[#allocation31_spill] sm:$0xff] %v7018_v25  ;;  %8532 = vst [vmem:[#allocation32_spill] sm:$0xff] %v7021_v26  ;;  %5592 = vmatmul.mubr.msk.f32.gmra.mrb[20].mxu0 %vm1368_vm3, %v7005_v20 }
 0x1c1   : > { %5594 = vmatprep.mubr.msk.f32.mxu0 %vm1368_vm3, %v7018_v25  ;;  %v1004_v29 = vpop.permute.xlu1 %1003  ;;  %v1007_v30 = vpop.permute.xlu0 %1006 }
 0x1c2   : > { %vm1062_vm4 = vcmp.eq.s32.totalorder %v1004_v29, %v6833_v16  ;;  %vm1063_vm5 = vcmp.eq.s32.totalorder %v1007_v30, %v6833_v16 }
 0x1c3   : > { %v7034_v31 = vsel %vm1062_vm4, 1.0, %v8445_v19  ;;  %v7037_v32 = vsel %vm1063_vm5, 1.0, %v8445_v19 }
 0x1c4   : > { %8533 = vst [vmem:[#allocation33_spill] sm:$0xff] %v7034_v31  ;;  %8534 = vst [vmem:[#allocation34_spill] sm:$0xff] %v7037_v32  ;;  %5595 = vmatmul.mubr.msk.f32.gmra.mrb[22].mxu0 %vm1368_vm3, %v7021_v26 }
 0x1c5   : > { %5597 = vmatprep.mubr.msk.f32.mxu0 %vm1368_vm3, %v7034_v31  ;;  %v1010_v37 = vpop.permute.xlu1 %1009  ;;  %v1013_v39 = vpop.permute.xlu0 %1012 }
 0x1c6   : > { %vm1064_vm6 = vcmp.eq.s32.totalorder %v1010_v37, %v6833_v16  ;;  %vm1065_vm7 = vcmp.eq.s32.totalorder %v1013_v39, %v6833_v16 }
 0x1c7   : > { %v7050_v40 = vsel %vm1064_vm6, 1.0, %v8445_v19  ;;  %v7053_v43 = vsel %vm1065_vm7, 1.0, %v8445_v19 }
 0x1c8   : > { %8535 = vst [vmem:[#allocation35_spill] sm:$0xff] %v7050_v40  ;;  %8536 = vst [vmem:[#allocation36_spill] sm:$0xff] %v7053_v43  ;;  %5598 = vmatmul.mubr.msk.f32.gmra.mrb[24].mxu0 %vm1368_vm3, %v7037_v32 }
 0x1c9   : > { %5600 = vmatprep.mubr.msk.f32.mxu0 %vm1368_vm3, %v7050_v40  ;;  %v1016_v48 = vpop.permute.xlu1 %1015  ;;  %v1019_v51 = vpop.permute.xlu0 %1018 }
 0x1ca   : > { %vm1066_vm8 = vcmp.eq.s32.totalorder %v1016_v48, %v6833_v16  ;;  %vm1067_vm9 = vcmp.eq.s32.totalorder %v1019_v51, %v6833_v16  ;;  %v7117_v48 = vld [vmem:[%s6715_s14] sm:$0xff] }
 0x1cb   : > { %v7066_v52 = vsel %vm1066_vm8, 1.0, %v8445_v19  ;;  %v7069_v53 = vsel %vm1067_vm9, 1.0, %v8445_v19  ;;  %3749 = vrot.lane.b32.xlu1 %v7117_v48, %s6569_s19 }
 0x1cc   : > { %8537 = vst [vmem:[#allocation37_spill] sm:$0xff] %v7066_v52  ;;  %8538 = vst [vmem:[#allocation38_spill] sm:$0xff] %v7069_v53  ;;  %5601 = vmatmul.mubr.msk.f32.gmra.mrb[26].mxu0 %vm1368_vm3, %v7053_v43 }
 0x1cd   : > { %5603 = vmatprep.mubr.msk.f32.mxu0 %vm1368_vm3, %v7066_v52  ;;  %v1022_v59 = vpop.permute.xlu1 %1021  ;;  %v1025_v62 = vpop.permute.xlu0 %1024 }
 0x1ce   : > { %vm1068_vm10 = vcmp.eq.s32.totalorder %v1022_v59, %v6833_v16  ;;  %vm1069_vm11 = vcmp.eq.s32.totalorder %v1025_v62, %v6833_v16 }
 0x1cf   : > { %v7082_v63 = vsel %vm1068_vm10, 1.0, %v8445_v19  ;;  %v7085_v2 = vsel %vm1069_vm11, 1.0, %v8445_v19 }
 0x1d0   : > { %8539 = vst [vmem:[#allocation39_spill] sm:$0xff] %v7082_v63  ;;  %8540 = vst [vmem:[#allocation40_spill] sm:$0xff] %v7085_v2  ;;  %5604 = vmatmul.mubr.msk.f32.gmra.mrb[28].mxu0 %vm1368_vm3, %v7069_v53 }
 0x1d1   : > { %5606 = vmatprep.mubr.msk.f32.mxu0 %vm1368_vm3, %v7082_v63  ;;  %v1028_v10 = vpop.permute.xlu1 %1027  ;;  %v1031_v15 = vpop.permute.xlu0 %1030 }
 0x1d2   : > { %vm1070_vm12 = vcmp.eq.s32.totalorder %v1028_v10, %v6833_v16  ;;  %vm1071_vm13 = vcmp.eq.s32.totalorder %v1031_v15, %v6833_v16  ;;  %v7131_v10 = vld [vmem:[%s6715_s14 + $0x8] sm:$0xff] }
 0x1d3   : > { %v7097_v17 = vsel %vm1070_vm12, 1.0, %v8445_v19  ;;  %v7106_v29 = vsel %vm1071_vm13, 1.0, %v8445_v19  ;;  %3751 = vrot.lane.b32.xlu1 %v7131_v10, %s6569_s19 }
 0x1d4   : > { %5607 = vmatmul.mubr.msk.f32.gmra.mrb[30].mxu0 %vm1368_vm3, %v7085_v2 }
 0x1d5   : > { %5609 = vmatprep.mubr.msk.f32.mxu0 %vm1368_vm3, %v7097_v17  ;;  %v1034_v23 = vpop.permute.xlu1 %1033  ;;  %v1037_v24 = vpop.permute.xlu0 %1036 }
 0x1d6   : > { %vm1072_vm14 = vcmp.eq.s32.totalorder %v1034_v23, %v6833_v16  ;;  %vm1073_vm15 = vcmp.eq.s32.totalorder %v1037_v24, %v6833_v16  ;;  %v7136_v24 = vld [vmem:[%s6715_s14 + $0x10] sm:$0xff] }
 0x1d7   : > { %v7109_v30 = vsel %vm1072_vm14, 1.0, %v8445_v19  ;;  %v7120_v51 = vsel %vm1073_vm15, 1.0, %v8445_v19 }
 0x1d8   : > { %5610 = vmatmul.mubr.msk.f32.gmra.mrb[32].mxu0 %vm1368_vm3, %v7106_v29 }
 0x1d9   : > { %5612 = vmatprep.mubr.msk.f32.mxu0 %vm1368_vm3, %v7109_v30 }
 0x1da   : > { %v1166_v37 = vpop.permute.xlu1 %1165  ;;  %v1169_v39 = vpop.permute.xlu0 %1168 }
 0x1db   : > { %vm1261_vm1 = vcmp.eq.s32.totalorder %v1169_v39, %v6833_v16  ;;  %vm1260_vm2 = vcmp.eq.s32.totalorder %v1166_v37, %v6833_v16  ;;  %v7147_v39 = vld [vmem:[%s6715_s14 + $0x18] sm:$0xff] }
 0x1dc   : > { %v4918_v59 = vsel %vm1261_vm1, 1.0, %v8445_v19  ;;  %5613 = vmatmul.mubr.msk.f32.gmra.mrb[34].mxu0 %vm1368_vm3, %v7120_v51  ;;  %v4917_v62 = vsel %vm1260_vm2, 1.0, %v8445_v19 }
 0x1dd   : > { %5617 = vmatprep.mubr.msk.f32.mxu0 %vm2076_vm0, %v7117_v48  ;;  %5510 = vmatprep.mubr.msk.f32.mxu1 %vm1368_vm3, %v4917_v62 }
 0x1de   : > { %v1172_v15 = vpop.permute.xlu1 %1171  ;;  %v1178_v23 = vpop.permute.xlu0 %1177  ;;  %5511 = vmatmul.mubr.msk.f32.vlgmr.msra.gmra.mrb[0].mxu1 %vm1368_vm3, %v4918_v59 }
 0x1df   : > { %vm1262_vm4 = vcmp.eq.s32.totalorder %v1172_v15, %v6833_v16  ;;  %5824 = vmatpush3.bf16.msra.mxu1 %v6925_v55  ;;  %vm1264_vm5 = vcmp.eq.s32.totalorder %v1178_v23, %v6833_v16  ;;  %v7151_v15 = vld [vmem:[%s6715_s14 + $0x20] sm:$0xff] }
 0x1e0   : > { %v4919_v37 = vsel %vm1262_vm4, 1.0, %v8445_v19  ;;  %5618 = vmatmul.mubr.msk.f32.vlgmr.msra.gmra.mrb[0].mxu0 %vm2076_vm0, %v7131_v10  ;;  %v4921_v55 = vsel %vm1264_vm5, 1.0, %v8445_v19 }
 0x1e1   : > { %5620 = vmatprep.mubr.msk.f32.mxu0 %vm2076_vm0, %v7136_v24  ;;  %5513 = vmatprep.mubr.msk.f32.mxu1 %vm1368_vm3, %v4919_v37  ;;  %v7163_v37 = vld [vmem:[%s6715_s14 + $0x28] sm:$0xff] }
 0x1e2   : > { %v1175_v59 = vpop.permute.xlu1 %1174  ;;  %v1184_v62 = vpop.permute.xlu0 %1183 }
 0x1e3   : > { %vm1263_vm6 = vcmp.eq.s32.totalorder %v1175_v59, %v6833_v16  ;;  %vm1266_vm7 = vcmp.eq.s32.totalorder %v1184_v62, %v6833_v16  ;;  %v7167_v59 = vld [vmem:[%s6715_s14 + $0x30] sm:$0xff] }
 0x1e4   : > { %v4920_v23 = vsel %vm1263_vm6, 1.0, %v8445_v19  ;;  %5621 = vmatmul.mubr.msk.f32.gmra.mrb[2].mxu0 %vm2076_vm0, %v7147_v39  ;;  %v4923_v58 = vsel %vm1266_vm7, 1.0, %v8445_v19 }
 0x1e5   : > { %5514 = vmatmul.mubr.msk.f32.gmra.mrb[2].mxu1 %vm1368_vm3, %v4920_v23  ;;  %5623 = vmatprep.mubr.msk.f32.mxu0 %vm2076_vm0, %v7151_v15  ;;  %v7178_v23 = vld [vmem:[%s6715_s14 + $0x38] sm:$0xff] }
 0x1e6   : > { %v1181_v9 = vpop.permute.xlu1 %1180  ;;  %v1190_v3 = vpop.permute.xlu0 %1189  ;;  %5516 = vmatprep.mubr.msk.f32.mxu1 %vm1368_vm3, %v4921_v55 }
 0x1e7   : > { %vm1265_vm8 = vcmp.eq.s32.totalorder %v1181_v9, %v6833_v16  ;;  %vm1268_vm9 = vcmp.eq.s32.totalorder %v1190_v3, %v6833_v16  ;;  %v7183_v9 = vld [vmem:[%s6715_s14 + $0x40] sm:$0xff]  ;;  %v7194_v3 = vld [vmem:[%s6715_s14 + $0x48] sm:$0xff] }
 0x1e8   : > { %v4922_v62 = vsel %vm1265_vm8, 1.0, %v8445_v19  ;;  %5624 = vmatmul.mubr.msk.f32.gmra.mrb[4].mxu0 %vm2076_vm0, %v7163_v37 }
 0x1e9   : > { %5517 = vmatmul.mubr.msk.f32.gmra.mrb[4].mxu1 %vm1368_vm3, %v4922_v62  ;;  %5626 = vmatprep.mubr.msk.f32.mxu0 %vm2076_vm0, %v7167_v59  ;;  %v4925_v62 = vsel %vm1268_vm9, 1.0, %v8445_v19 }
 0x1ea   : > { %v1187_v55 = vpop.permute.xlu1 %1186  ;;  %v1196_v54 = vpop.permute.xlu0 %1195  ;;  %5519 = vmatprep.mubr.msk.f32.mxu1 %vm1368_vm3, %v4923_v58 }
 0x1eb   : > { %vm1267_vm10 = vcmp.eq.s32.totalorder %v1187_v55, %v6833_v16  ;;  %vm1270_vm11 = vcmp.eq.s32.totalorder %v1196_v54, %v6833_v16  ;;  %v7210_v54 = vld [vmem:[%s6715_s14 + $0x58] sm:$0xff] }
 0x1ec   : > { %v4924_v44 = vsel %vm1267_vm10, 1.0, %v8445_v19  ;;  %5627 = vmatmul.mubr.msk.f32.gmra.mrb[6].mxu0 %vm2076_vm0, %v7178_v23 }
 0x1ed   : > { %5520 = vmatmul.mubr.msk.f32.gmra.mrb[6].mxu1 %vm1368_vm3, %v4924_v44  ;;  %5629 = vmatprep.mubr.msk.f32.mxu0 %vm2076_vm0, %v7183_v9  ;;  %v4927_v44 = vsel %vm1270_vm11, 1.0, %v8445_v19 }
 0x1ee   : > { %v1193_v58 = vpop.permute.xlu1 %1192  ;;  %5522 = vmatprep.mubr.msk.f32.mxu1 %vm1368_vm3, %v4925_v62  ;;  %v1202_v55 = vpop.permute.xlu0 %1201 }
 0x1ef   : > { %vm1269_vm12 = vcmp.eq.s32.totalorder %v1193_v58, %v6833_v16  ;;  %vm1272_vm13 = vcmp.eq.s32.totalorder %v1202_v55, %v6833_v16  ;;  %v7226_v55 = vld [vmem:[%s6715_s14 + $0x68] sm:$0xff] }
 0x1f0   : > { %v4926_v36 = vsel %vm1269_vm12, 1.0, %v8445_v19  ;;  %5630 = vmatmul.mubr.msk.f32.gmra.mrb[8].mxu0 %vm2076_vm0, %v7194_v3 }
 0x1f1   : > { %5523 = vmatmul.mubr.msk.f32.gmra.mrb[8].mxu1 %vm1368_vm3, %v4926_v36  ;;  %5632 = vmatprep.mubr.msk.f32.mxu0 %vm2076_vm0, %v7199_v45  ;;  %v4929_v36 = vsel %vm1272_vm13, 1.0, %v8445_v19 }
 0x1f2   : > { %v1199_v62 = vpop.permute.xlu1 %1198  ;;  %5525 = vmatprep.mubr.msk.f32.mxu1 %vm1368_vm3, %v4927_v44  ;;  %v1208_v58 = vpop.permute.xlu0 %1207 }
 0x1f3   : > { %vm1271_vm14 = vcmp.eq.s32.totalorder %v1199_v62, %v6833_v16  ;;  %vm1274_vm15 = vcmp.eq.s32.totalorder %v1208_v58, %v6833_v16  ;;  %v7242_v58 = vld [vmem:[%s6715_s14 + $0x78] sm:$0xff] }
 0x1f4   : > { %v4928_v28 = vsel %vm1271_vm14, 1.0, %v8445_v19  ;;  %5633 = vmatmul.mubr.msk.f32.gmra.mrb[10].mxu0 %vm2076_vm0, %v7210_v54 }
 0x1f5   : > { %5526 = vmatmul.mubr.msk.f32.gmra.mrb[10].mxu1 %vm1368_vm3, %v4928_v28  ;;  %5635 = vmatprep.mubr.msk.f32.mxu0 %vm2076_vm0, %v7215_v33  ;;  %v4931_v28 = vsel %vm1274_vm15, 1.0, %v8445_v19 }
 0x1f6   : > { %v1205_v44 = vpop.permute.xlu1 %1204  ;;  %5528 = vmatprep.mubr.msk.f32.mxu1 %vm1368_vm3, %v4929_v36  ;;  %v1214_v62 = vpop.permute.xlu0 %1213 }
 0x1f7   : > { %vm1273_vm1 = vcmp.eq.s32.totalorder %v1205_v44, %v6833_v16  ;;  %vm1276_vm2 = vcmp.eq.s32.totalorder %v1214_v62, %v6833_v16  ;;  %v7258_v62 = vld [vmem:[%s6715_s14 + $0x88] sm:$0xff] }
 0x1f8   : > { %v4930_v22 = vsel %vm1273_vm1, 1.0, %v8445_v19  ;;  %5636 = vmatmul.mubr.msk.f32.gmra.mrb[12].mxu0 %vm2076_vm0, %v7226_v55  ;;  %3783 = vrot.lane.b32.xlu0 %v7258_v62, %s6569_s19 }
 0x1f9   : > { %5529 = vmatmul.mubr.msk.f32.gmra.mrb[12].mxu1 %vm1368_vm3, %v4930_v22  ;;  %5638 = vmatprep.mubr.msk.f32.mxu0 %vm2076_vm0, %v7231_v27  ;;  %v4933_v22 = vsel %vm1276_vm2, 1.0, %v8445_v19 }
 0x1fa   : > { %v1211_v36 = vpop.permute.xlu1 %1210  ;;  %5531 = vmatprep.mubr.msk.f32.mxu1 %vm1368_vm3, %v4931_v28  ;;  %v1220_v44 = vpop.permute.xlu0 %1219 }
 0x1fb   : > { %vm1275_vm4 = vcmp.eq.s32.totalorder %v1211_v36, %v6833_v16  ;;  %vm1278_vm5 = vcmp.eq.s32.totalorder %v1220_v44, %v6833_v16  ;;  %v7274_v44 = vld [vmem:[%s6715_s14 + $0x98] sm:$0xff] }
 0x1fc   : > { %v4932_v14 = vsel %vm1275_vm4, 1.0, %v8445_v19  ;;  %5639 = vmatmul.mubr.msk.f32.gmra.mrb[14].mxu0 %vm2076_vm0, %v7242_v58  ;;  %3785 = vrot.lane.b32.xlu0 %v7263_v13, %s6569_s19  ;;  %vm6573_vm4 = vmmov (!%p5206_p8), 0  }
 0x1fd   : > { %5532 = vmatmul.mubr.msk.f32.gmra.mrb[14].mxu1 %vm1368_vm3, %v4932_v14  ;;  %5641 = vmatprep.mubr.msk.f32.mxu0 %vm2076_vm0, %v7247_v21  ;;  %v4935_v14 = vsel %vm1278_vm5, 1.0, %v8445_v19 }
 0x1fe   : > { %v1217_v28 = vpop.permute.xlu1 %1216  ;;  %5534 = vmatprep.mubr.msk.f32.mxu1 %vm1368_vm3, %v4933_v22  ;;  %v1226_v36 = vpop.permute.xlu0 %1225  ;;  %3787 = vrot.lane.b32.xlu1 %v7274_v44, %s6569_s19 }
 0x1ff   : > { %vm1277_vm6 = vcmp.eq.s32.totalorder %v1217_v28, %v6833_v16  ;;  %vm1280_vm7 = vcmp.eq.s32.totalorder %v1226_v36, %v6833_v16  ;;  %v7290_v36 = vld [vmem:[%s6715_s14 + $0xa8] sm:$0xff] }
 0x200   : > { %v4934_v8 = vsel %vm1277_vm6, 1.0, %v8445_v19  ;;  %5642 = vmatmul.mubr.msk.f32.gmra.mrb[16].mxu0 %vm2076_vm0, %v7258_v62  ;;  %3753 = vrot.lane.b32.xlu0 %v7136_v24, %s6569_s19 }
 0x201   : > { %5535 = vmatmul.mubr.msk.f32.gmra.mrb[16].mxu1 %vm1368_vm3, %v4934_v8  ;;  %5644 = vmatprep.mubr.msk.f32.mxu0 %vm2076_vm0, %v7263_v13  ;;  %v4937_v8 = vsel %vm1280_vm7, 1.0, %v8445_v19 }
 0x202   : > { %v1223_v22 = vpop.permute.xlu1 %1222  ;;  %5537 = vmatprep.mubr.msk.f32.mxu1 %vm1368_vm3, %v4935_v14  ;;  %v1232_v28 = vpop.permute.xlu0 %1231  ;;  %3755 = vrot.lane.b32.xlu1 %v7147_v39, %s6569_s19 }
 0x203   : > { %vm1279_vm8 = vcmp.eq.s32.totalorder %v1223_v22, %v6833_v16  ;;  %vm1282_vm9 = vcmp.eq.s32.totalorder %v1232_v28, %v6833_v16  ;;  %v7306_v28 = vld [vmem:[%s6715_s14 + $0xb8] sm:$0xff] }
 0x204   : > { %v4936_v2 = vsel %vm1279_vm8, 1.0, %v8445_v19  ;;  %5645 = vmatmul.mubr.msk.f32.gmra.mrb[18].mxu0 %vm2076_vm0, %v7274_v44  ;;  %3789 = vrot.lane.b32.xlu0 %v7279_v7, %s6569_s19 }
 0x205   : > { %5538 = vmatmul.mubr.msk.f32.gmra.mrb[18].mxu1 %vm1368_vm3, %v4936_v2  ;;  %5647 = vmatprep.mubr.msk.f32.mxu0 %vm2076_vm0, %v7279_v7  ;;  %v4939_v2 = vsel %vm1282_vm9, 1.0, %v8445_v19 }
 0x206   : > { %v1229_v14 = vpop.permute.xlu1 %1228  ;;  %5540 = vmatprep.mubr.msk.f32.mxu1 %vm1368_vm3, %v4937_v8  ;;  %v1238_v22 = vpop.permute.xlu0 %1237  ;;  %3791 = vrot.lane.b32.xlu1 %v7290_v36, %s6569_s19 }
 0x207   : > { %vm1281_vm10 = vcmp.eq.s32.totalorder %v1229_v14, %v6833_v16  ;;  %vm1284_vm11 = vcmp.eq.s32.totalorder %v1238_v22, %v6833_v16  ;;  %v7322_v22 = vld [vmem:[%s6715_s14 + $0xc8] sm:$0xff] }
 0x208   : > { %v4938_v63 = vsel %vm1281_vm10, 1.0, %v8445_v19  ;;  %5648 = vmatmul.mubr.msk.f32.gmra.mrb[20].mxu0 %vm2076_vm0, %v7290_v36  ;;  %3757 = vrot.lane.b32.xlu0 %v7151_v15, %s6569_s19 }
 0x209   : > { %5541 = vmatmul.mubr.msk.f32.gmra.mrb[20].mxu1 %vm1368_vm3, %v4938_v63  ;;  %5650 = vmatprep.mubr.msk.f32.mxu0 %vm2076_vm0, %v7295_v4  ;;  %v4941_v63 = vsel %vm1284_vm11, 1.0, %v8445_v19 }
 0x20a   : > { %v1235_v8 = vpop.permute.xlu1 %1234  ;;  %5543 = vmatprep.mubr.msk.f32.mxu1 %vm1368_vm3, %v4939_v2  ;;  %v1244_v14 = vpop.permute.xlu0 %1243  ;;  %3759 = vrot.lane.b32.xlu1 %v7163_v37, %s6569_s19 }
 0x20b   : > { %vm1283_vm12 = vcmp.eq.s32.totalorder %v1235_v8, %v6833_v16  ;;  %vm1286_vm13 = vcmp.eq.s32.totalorder %v1244_v14, %v6833_v16  ;;  %v7327_v8 = vld [vmem:[%s6715_s14 + $0xd0] sm:$0xff]  ;;  %v7338_v14 = vld [vmem:[%s6715_s14 + $0xd8] sm:$0xff] }
 0x20c   : > { %v4940_v53 = vsel %vm1283_vm12, 1.0, %v8445_v19  ;;  %5651 = vmatmul.mubr.msk.f32.gmra.mrb[22].mxu0 %vm2076_vm0, %v7306_v28  ;;  %3793 = vrot.lane.b32.xlu0 %v7295_v4, %s6569_s19 }
 0x20d   : > { %5544 = vmatmul.mubr.msk.f32.gmra.mrb[22].mxu1 %vm1368_vm3, %v4940_v53  ;;  %5653 = vmatprep.mubr.msk.f32.mxu0 %vm2076_vm0, %v7311_v1  ;;  %v4943_v53 = vsel %vm1286_vm13, 1.0, %v8445_v19 }
 0x20e   : > { %v1241_v2 = vpop.permute.xlu1 %1240  ;;  %5546 = vmatprep.mubr.msk.f32.mxu1 %vm1368_vm3, %v4941_v63  ;;  %v1250_v0 = vpop.permute.xlu0 %1249  ;;  %3795 = vrot.lane.b32.xlu1 %v7306_v28, %s6569_s19 }
 0x20f   : > { %vm1285_vm14 = vcmp.eq.s32.totalorder %v1241_v2, %v6833_v16  ;;  %vm1288_vm15 = vcmp.eq.s32.totalorder %v1250_v0, %v6833_v16  ;;  %v7343_v2 = vld [vmem:[%s6715_s14 + $0xe0] sm:$0xff]  ;;  %v7354_v0 = vld [vmem:[%s6715_s14 + $0xe8] sm:$0xff] }
 0x210   : > { %v4942_v52 = vsel %vm1285_vm14, 1.0, %v8445_v19  ;;  %5654 = vmatmul.mubr.msk.f32.gmra.mrb[24].mxu0 %vm2076_vm0, %v7322_v22  ;;  %3761 = vrot.lane.b32.xlu0 %v7167_v59, %s6569_s19 }
 0x211   : > { %5547 = vmatmul.mubr.msk.f32.gmra.mrb[24].mxu1 %vm1368_vm3, %v4942_v52  ;;  %5656 = vmatprep.mubr.msk.f32.mxu0 %vm2076_vm0, %v7327_v8  ;;  %v4945_v52 = vsel %vm1288_vm15, 1.0, %v8445_v19 }
 0x212   : > { %v1247_v63 = vpop.permute.xlu1 %1246  ;;  %5549 = vmatprep.mubr.msk.f32.mxu1 %vm1368_vm3, %v4943_v53  ;;  %3763 = vrot.lane.b32.xlu1 %v7178_v23, %s6569_s19 }
 0x213   : > { %vm1287_vm1 = vcmp.eq.s32.totalorder %v1247_v63, %v6833_v16  ;;  %v7358_v63 = vld [vmem:[%s6715_s14 + $0xf0] sm:$0xff] }
 0x214   : > { %v4944_v61 = vsel %vm1287_vm1, 1.0, %v8445_v19  ;;  %5657 = vmatmul.mubr.msk.f32.gmra.mrb[26].mxu0 %vm2076_vm0, %v7338_v14  ;;  %3797 = vrot.lane.b32.xlu0 %v7311_v1, %s6569_s19 }
 0x215   : > { %5550 = vmatmul.mubr.msk.f32.gmra.mrb[26].mxu1 %vm1368_vm3, %v4944_v61  ;;  %5659 = vmatprep.mubr.msk.f32.mxu0 %vm2076_vm0, %v7343_v2  ;;  %v7368_v61 = vld [vmem:[%s6715_s14 + $0xf8] sm:$0xff] }
 0x216   : > { %v1253_v53 = vpop.permute.xlu1 %1252  ;;  %5552 = vmatprep.mubr.msk.f32.mxu1 %vm1368_vm3, %v4945_v52  ;;  %v926_v52 = vld [vmem:[%s6715_s14 + $0x110] sm:$0xff]  ;;  %3799 = vrot.lane.b32.xlu1 %v7322_v22, %s6569_s19 }
 0x217   : > { %vm1289_vm2 = vcmp.eq.s32.totalorder %v1253_v53, %v6833_v16  ;;  %v7378_v16 = vld [vmem:[%s6715_s14 + $0x108] sm:$0xff]  ;;  %v2724_v53 = vld [vmem:[%s8420_s8 + $0x10] sm:$0xff] }
 0x218   : > { %v4946_v43 = vsel %vm1289_vm2, 1.0, %v8445_v19  ;;  %5660 = vmatmul.mubr.msk.f32.gmra.mrb[28].mxu0 %vm2076_vm0, %v7354_v0  ;;  %v2725_v19 = vld [vmem:[%s8420_s8 + $0x18] sm:$0xff]  ;;  %3765 = vrot.lane.b32.xlu0 %v7183_v9, %s6569_s19 }
 0x219   : > { %5553 = vmatmul.mubr.msk.f32.gmra.mrb[28].mxu1 %vm1368_vm3, %v4946_v43  ;;  %5662 = vmatprep.mubr.msk.f32.mxu0 %vm2076_vm0, %v7358_v63  ;;  %v927_v43 = vld [vmem:[%s6715_s14 + $0x118] sm:$0xff]  ;;  %v5825_v40 = vpack.c.bf16 %v2725_v19, %v2724_v53  ;;  %vm2733_vm3 = vcmask 261120  }
 0x21a   : > { %3767 = vrot.lane.b32.xlu1 %v7194_v3, %s6569_s19 }
 0x21b   : > { %5826 = vmatprep.subr.bf16.mxu1 %v5825_v40 }
 0x21c   : > { %5663 = vmatmul.mubr.msk.f32.gmra.mrb[30].mxu0 %vm2076_vm0, %v7368_v61  ;;  %5828 = vmatpush3.bf16.msra.mxu1 %v5825_v40 }
 0x21d   : > { %5665 = vmatprep.mubr.msk.f32.mxu0 %vm2076_vm0, %v7371_v60  ;;  %3801 = vrot.lane.b32.xlu0 %v7327_v8, %s6569_s19 }
 0x21e   : > { %3803 = vrot.lane.b32.xlu1 %v7338_v14, %s6569_s19 }
 0x220   : > { %5666 = vmatmul.mubr.msk.f32.gmra.mrb[32].mxu0 %vm2076_vm0, %v7378_v16 }
 0x221   : > { %5668 = vmatprep.mubr.msk.f32.mxu0 %vm2076_vm0, %v926_v52  ;;  %3769 = vrot.lane.b32.xlu0 %v7199_v45, %s6569_s19 }
 0x222   : > { %3771 = vrot.lane.b32.xlu1 %v7210_v54, %s6569_s19 }
 0x224   : > { %5669 = vmatmul.mubr.msk.f32.gmra.mrb[34].mxu0 %vm2076_vm0, %v927_v43  ;;  %vm6571_vm0 = vmmov 0  }
 0x225   : > { %3805 = vrot.lane.b32.xlu0 %v7343_v2, %s6569_s19 }
 0x226   : > { %3807 = vrot.lane.b32.xlu1 %v7354_v0, %s6569_s19 }
 0x229   : > { %3773 = vrot.lane.b32.xlu0 %v7215_v33, %s6569_s19 }
 0x22a   : > { %3775 = vrot.lane.b32.xlu1 %v7226_v55, %s6569_s19 }
 0x22d   : > { %3809 = vrot.lane.b32.xlu0 %v7358_v63, %s6569_s19 }
 0x22e   : > { %3811 = vrot.lane.b32.xlu1 %v7368_v61, %s6569_s19 }
 0x231   : > { %3777 = vrot.lane.b32.xlu0 %v7231_v27, %s6569_s19 }
 0x232   : > { %3779 = vrot.lane.b32.xlu1 %v7242_v58, %s6569_s19 }
 0x235   : > { %3813 = vrot.lane.b32.xlu0 %v7371_v60, %s6569_s19 }
 0x236   : > { %3815 = vrot.lane.b32.xlu1 %v7378_v16, %s6569_s19 }
 0x2b1   : > { %v5512_v19 = vpop.f32.mrb[0].mxu1 }
 0x2b2   : > { %v1573_v13 = vpop.f32.mrb[1].mxu1 }
 0x2b3   : > { %v7416_v21 = vpop.f32.mrb[0].mxu0 }
 0x2b4   : > { %v5057_v40 = vmul.f32 -1.442695, %v7416_v21  ;;  %v7419_v48 = vpop.f32.mrb[1].mxu0 }
 0x2b5   : > { %v5056_v7 = vmul.f32 -1.442695, %v7419_v48 }
 0x2b6   : > { %6075 = vpow2.f32 %v5057_v40 }
 0x2b7   : > { %6077 = vpow2.f32 %v5056_v7  ;;  %v7426_v10 = vpop.f32.mrb[2].mxu0 }
 0x2b8   : > { %v5059_v4 = vmul.f32 -1.442695, %v7426_v10  ;;  %v7429_v24 = vpop.f32.mrb[3].mxu0  ;;  %v5515_v39 = vpop.f32.mrb[2].mxu1 }
 0x2b9   : > { %v5058_v15 = vmul.f32 -1.442695, %v7429_v24  ;;  %v1583_v37 = vpop.f32.mrb[3].mxu1 }
 0x2ba   : > { %6079 = vpow2.f32 %v5059_v4 }
 0x2bb   : > { %6081 = vpow2.f32 %v5058_v15  ;;  %v7436_v59 = vpop.f32.mrb[4].mxu0 }
 0x2bc   : > { %v5061_v62 = vmul.f32 -1.442695, %v7436_v59  ;;  %v7439_v44 = vpop.f32.mrb[5].mxu0  ;;  %v5518_v36 = vpop.f32.mrb[4].mxu1 }
 0x2bd   : > { %v5060_v1 = vmul.f32 -1.442695, %v7439_v44  ;;  %v1593_v28 = vpop.f32.mrb[5].mxu1 }
 0x2be   : > { %6083 = vpow2.f32 %v5061_v62 }
 0x2bf   : > { %6085 = vpow2.f32 %v5060_v1  ;;  %v5628_v52 = vpop.f32.mrb[6].mxu0 }
 0x2c0   : > { %v6076_v43 = vpop.eup %6075  ;;  %v7446_v53 = vadd.f32 %v5628_v52, %v5512_v19  ;;  %v2285_v40 = vpop.f32.mrb[7].mxu0 }
 0x2c1   : > { %v5521_v7 = vpop.f32.mrb[6].mxu1  ;;  %v6078_v23 = vpop.eup %6077  ;;  %v2579_v4 = vadd.f32 1.0, %v6076_v43  ;;  %v7452_v9 = vadd.f32 %v2285_v40, %v1573_v13 }
 0x2c2   : > { %v1603_v15 = vpop.f32.mrb[7].mxu1  ;;  %v2578_v57 = vadd.f32 1.0, %v6078_v23  ;;  %v5063_v62 = vmul.f32 -1.442695, %v7446_v53 }
 0x2c3   : > { %6087 = vrcp.f32 %v2579_v4  ;;  %v5062_v19 = vmul.f32 -1.442695, %v7452_v9  ;;  %v5631_v1 = vpop.f32.mrb[8].mxu0 }
 0x2c4   : > { %v6080_v52 = vpop.eup %6079  ;;  %6089 = vrcp.f32 %v2578_v57  ;;  %v7456_v32 = vadd.f32 %v5631_v1, %v5515_v39  ;;  %v2295_v22 = vpop.f32.mrb[9].mxu0 }
 0x2c5   : > { %v5524_v56 = vpop.f32.mrb[8].mxu1  ;;  %v6082_v8 = vpop.eup %6081  ;;  %v2581_v13 = vadd.f32 1.0, %v6080_v52  ;;  %6091 = vpow2.f32 %v5063_v62  ;;  %v7462_v43 = vadd.f32 %v2295_v22, %v1583_v37 }
 0x2c6   : > { %v1613_v40 = vpop.f32.mrb[9].mxu1  ;;  %v2580_v23 = vadd.f32 1.0, %v6082_v8  ;;  %6093 = vpow2.f32 %v5062_v19  ;;  %v5065_v57 = vmul.f32 -1.442695, %v7456_v32 }
 0x2c7   : > { %6095 = vrcp.f32 %v2581_v13  ;;  %v5064_v39 = vmul.f32 -1.442695, %v7462_v43  ;;  %v5634_v4 = vpop.f32.mrb[10].mxu0 }
 0x2c8   : > { %v6084_v1 = vpop.eup %6083  ;;  %6097 = vrcp.f32 %v2580_v23  ;;  %v7466_v3 = vadd.f32 %v5634_v4, %v5518_v36  ;;  %v2305_v31 = vpop.f32.mrb[11].mxu0 }
 0x2c9   : > { %v5527_v45 = vpop.f32.mrb[10].mxu1  ;;  %v6086_v37 = vpop.eup %6085  ;;  %v2583_v62 = vadd.f32 1.0, %v6084_v1  ;;  %6099 = vpow2.f32 %v5065_v57  ;;  %v7472_v19 = vadd.f32 %v2305_v31, %v1593_v28 }
 0x2ca   : > { %v1623_v52 = vpop.f32.mrb[11].mxu1  ;;  %v2582_v22 = vadd.f32 1.0, %v6086_v37  ;;  %6101 = vpow2.f32 %v5064_v39  ;;  %v5067_v8 = vmul.f32 -1.442695, %v7466_v3 }
 0x2cb   : > { %6103 = vrcp.f32 %v2583_v62  ;;  %v5066_v36 = vmul.f32 -1.442695, %v7472_v19  ;;  %v5637_v13 = vpop.f32.mrb[12].mxu0 }
 0x2cc   : > { %6105 = vrcp.f32 %v2582_v22  ;;  %v7476_v23 = vadd.f32 %v5637_v13, %v5521_v7  ;;  %v2315_v14 = vpop.f32.mrb[13].mxu0  ;;  %v7478_v4 = vpop.f32.mrb[12].mxu1 }
 0x2cd   : > { %v6088_v31 = vpop.eup %6087  ;;  %6107 = vpow2.f32 %v5067_v8  ;;  %v7484_v2 = vadd.f32 %v2315_v14, %v1603_v15  ;;  %v7486_v28 = vpop.f32.mrb[13].mxu1 }
 0x2ce   : > { %v6090_v57 = vpop.eup %6089  ;;  %6109 = vpow2.f32 %v5066_v36  ;;  %v5069_v7 = vmul.f32 -1.442695, %v7476_v23  ;;  %v2687_v33 = vmul.f32 %v6088_v31, %v7416_v21 }
 0x2cf   : > { %v6092_v39 = vpop.eup %6091  ;;  %v2686_v1 = vmul.f32 %v6090_v57, %v7419_v48  ;;  %v5068_v37 = vmul.f32 -1.442695, %v7484_v2  ;;  %v5640_v54 = vpop.f32.mrb[14].mxu0 }
 0x2d0   : > { %v6094_v62 = vpop.eup %6093  ;;  %v2585_v22 = vadd.f32 1.0, %v6092_v39  ;;  %6111 = vpow2.f32 %v5069_v7  ;;  %v7492_v15 = vadd.f32 %v5640_v54, %v5524_v56  ;;  %v2325_v8 = vpop.f32.mrb[15].mxu0 }
 0x2d1   : > { %v7494_v13 = vpop.f32.mrb[14].mxu1  ;;  %v6096_v48 = vpop.eup %6095  ;;  %v2584_v36 = vadd.f32 1.0, %v6094_v62  ;;  %6113 = vpow2.f32 %v5068_v37  ;;  %v7500_v14 = vadd.f32 %v2325_v8, %v1613_v40  ;;  %5679 = vmatprep.mubr.msk.f32.mxu1 %vm2733_vm3, %v2686_v1 }
 0x2d2   : > { %v7503_v21 = vpop.f32.mrb[15].mxu1  ;;  %v6098_v56 = vpop.eup %6097  ;;  %6115 = vrcp.f32 %v2585_v22  ;;  %v5071_v31 = vmul.f32 -1.442695, %v7492_v15  ;;  %5680 = vmatmul.mubr.msk.f32.vlgmr.msra.gmra.mrb[30].mxu1 %vm2733_vm3, %v2687_v33  ;;  %v2689_v40 = vmul.f32 %v6096_v48, %v7426_v10 }
 0x2d3   : > { %v6100_v57 = vpop.eup %6099  ;;  %v2688_v0 = vmul.f32 %v6098_v56, %v7429_v24  ;;  %6117 = vrcp.f32 %v2584_v36  ;;  %v5070_v63 = vmul.f32 -1.442695, %v7500_v14  ;;  %v5643_v7 = vpop.f32.mrb[16].mxu0 }
 0x2d4   : > { %v6102_v39 = vpop.eup %6101  ;;  %v2587_v37 = vadd.f32 1.0, %v6100_v57  ;;  %6119 = vpow2.f32 %v5071_v31  ;;  %v7510_v1 = vadd.f32 %v5643_v7, %v5527_v45  ;;  %v2335_v54 = vpop.f32.mrb[17].mxu0 }
 0x2d5   : > { %v7512_v62 = vpop.f32.mrb[16].mxu1  ;;  %v6104_v24 = vpop.eup %6103  ;;  %v2586_v33 = vadd.f32 1.0, %v6102_v39  ;;  %6121 = vpow2.f32 %v5070_v63  ;;  %v7518_v22 = vadd.f32 %v2335_v54, %v1623_v52  ;;  %5682 = vmatprep.mubr.msk.f32.mxu1 %vm2733_vm3, %v2688_v0 }
 0x2d6   : > { %v7521_v10 = vpop.f32.mrb[17].mxu1  ;;  %v6106_v45 = vpop.eup %6105  ;;  %6123 = vrcp.f32 %v2587_v37  ;;  %v5073_v8 = vmul.f32 -1.442695, %v7510_v1  ;;  %5683 = vmatmul.mubr.msk.f32.gmra.mrb[32].mxu1 %vm2733_vm3, %v2689_v40  ;;  %v2691_v52 = vmul.f32 %v6104_v24, %v7436_v59 }
 0x2d7   : > { %v6108_v48 = vpop.eup %6107  ;;  %v2690_v55 = vmul.f32 %v6106_v45, %v7439_v44  ;;  %6125 = vrcp.f32 %v2586_v33  ;;  %v5072_v27 = vmul.f32 -1.442695, %v7518_v22  ;;  %v5646_v36 = vpop.f32.mrb[18].mxu0 }
 0x2d8   : > { %v6110_v56 = vpop.eup %6109  ;;  %v2589_v31 = vadd.f32 1.0, %v6108_v48  ;;  %6127 = vpow2.f32 %v5073_v8  ;;  %v7529_v57 = vadd.f32 %v5646_v36, %v7478_v4  ;;  %v2345_v0 = vpop.f32.mrb[19].mxu0 }
 0x2d9   : > { %v7531_v63 = vpop.f32.mrb[18].mxu1  ;;  %v2588_v44 = vadd.f32 1.0, %v6110_v56  ;;  %6129 = vpow2.f32 %v5072_v27  ;;  %v7538_v7 = vadd.f32 %v2345_v0, %v7486_v28  ;;  %5685 = vmatprep.mubr.msk.f32.mxu1 %vm2733_vm3, %v2690_v55 }
 0x2da   : > { %v7541_v59 = vpop.f32.mrb[19].mxu1  ;;  %v6112_v4 = vpop.eup %6111  ;;  %6131 = vrcp.f32 %v2589_v31  ;;  %v5075_v39 = vmul.f32 -1.442695, %v7529_v57  ;;  %5686 = vmatmul.mubr.msk.f32.gmra.mrb[34].mxu1 %vm2733_vm3, %v2691_v52 }
 0x2db   : > { %v6114_v40 = vpop.eup %6113  ;;  %6133 = vrcp.f32 %v2588_v44  ;;  %v2591_v61 = vadd.f32 1.0, %v6112_v4  ;;  %v5074_v60 = vmul.f32 -1.442695, %v7538_v7  ;;  %v5649_v37 = vpop.f32.mrb[20].mxu0 }
 0x2dc   : > { %v6116_v54 = vpop.eup %6115  ;;  %v2590_v24 = vadd.f32 1.0, %v6114_v40  ;;  %6135 = vpow2.f32 %v5075_v39  ;;  %v7547_v28 = vadd.f32 %v5649_v37, %v7494_v13  ;;  %v2355_v33 = vpop.f32.mrb[21].mxu0 }
 0x2dd   : > { %v7549_v45 = vpop.f32.mrb[20].mxu1  ;;  %v6118_v8 = vpop.eup %6117  ;;  %6137 = vrcp.f32 %v2591_v61  ;;  %v7554_v48 = vadd.f32 %v2355_v33, %v7503_v21  ;;  %v2693_v52 = vmul.f32 %v6116_v54, %v7446_v53 }
 0x2de   : > { %v7556_v55 = vpop.f32.mrb[21].mxu1  ;;  %v6120_v27 = vpop.eup %6119  ;;  %v2692_v36 = vmul.f32 %v6118_v8, %v7452_v9  ;;  %6139 = vrcp.f32 %v2590_v24  ;;  %v5077_v13 = vmul.f32 -1.442695, %v7547_v28 }
 0x2df   : > { %v6122_v56 = vpop.eup %6121  ;;  %v2593_v31 = vadd.f32 1.0, %v6120_v27  ;;  %6141 = vpow2.f32 %v5074_v60  ;;  %v5076_v58 = vmul.f32 -1.442695, %v7554_v48  ;;  %v5652_v0 = vpop.f32.mrb[22].mxu0 }
 0x2e0   : > { %v6124_v44 = vpop.eup %6123  ;;  %v2592_v4 = vadd.f32 1.0, %v6122_v56  ;;  %6143 = vpow2.f32 %v5077_v13  ;;  %v7563_v21 = vadd.f32 %v5652_v0, %v7512_v62  ;;  %5688 = vmatprep.mubr.msk.f32.mxu1 %vm2733_vm3, %v2692_v36  ;;  %v2365_v9 = vpop.f32.mrb[23].mxu0 }
 0x2e1   : > { %v7566_v39 = vpop.f32.mrb[22].mxu1  ;;  %v6126_v53 = vpop.eup %6125  ;;  %6145 = vrcp.f32 %v2593_v31  ;;  %v7571_v40 = vadd.f32 %v2365_v9, %v7521_v10  ;;  %5689 = vmatmul.mubr.msk.f32.gmra.mrb[36].mxu1 %vm2733_vm3, %v2693_v52  ;;  %v2695_v24 = vmul.f32 %v6124_v44, %v7456_v32 }
 0x2e2   : > { %v7574_v61 = vpop.f32.mrb[23].mxu1  ;;  %v6128_v60 = vpop.eup %6127  ;;  %v2694_v62 = vmul.f32 %v6126_v53, %v7462_v43  ;;  %6147 = vrcp.f32 %v2592_v4  ;;  %v5079_v37 = vmul.f32 -1.442695, %v7563_v21 }
 0x2e3   : > { %v6130_v54 = vpop.eup %6129  ;;  %v2595_v33 = vadd.f32 1.0, %v6128_v60  ;;  %6149 = vpow2.f32 %v5076_v58  ;;  %v5078_v16 = vmul.f32 -1.442695, %v7571_v40  ;;  %v5655_v8 = vpop.f32.mrb[24].mxu0 }
 0x2e4   : > { %v6132_v10 = vpop.eup %6131  ;;  %v2594_v27 = vadd.f32 1.0, %v6130_v54  ;;  %6151 = vpow2.f32 %v5079_v37  ;;  %v7581_v36 = vadd.f32 %v5655_v8, %v7531_v63  ;;  %5691 = vmatprep.mubr.msk.f32.mxu1 %vm2733_vm3, %v2694_v62  ;;  %v2375_v43 = vpop.f32.mrb[25].mxu0 }
 0x2e5   : > { %v5548_v13 = vpop.f32.mrb[24].mxu1  ;;  %v6134_v56 = vpop.eup %6133  ;;  %6153 = vrcp.f32 %v2595_v33  ;;  %v7585_v52 = vadd.f32 %v2375_v43, %v7541_v59  ;;  %5692 = vmatmul.mubr.msk.f32.gmra.mrb[38].mxu1 %vm2733_vm3, %v2695_v24  ;;  %v2697_v44 = vmul.f32 %v6132_v10, %v7466_v3 }
 0x2e6   : > { %v1693_v32 = vpop.f32.mrb[25].mxu1  ;;  %v6136_v31 = vpop.eup %6135  ;;  %v2696_v58 = vmul.f32 %v6134_v56, %v7472_v19  ;;  %6155 = vrcp.f32 %v2594_v27  ;;  %v5081_v0 = vmul.f32 -1.442695, %v7581_v36 }
 0x2e7   : > { %v6138_v63 = vpop.eup %6137  ;;  %v2597_v4 = vadd.f32 1.0, %v6136_v31  ;;  %6157 = vpow2.f32 %v5078_v16  ;;  %v5080_v9 = vmul.f32 -1.442695, %v7585_v52  ;;  %v5658_v53 = vpop.f32.mrb[26].mxu0 }
 0x2e8   : > { %v6140_v60 = vpop.eup %6139  ;;  %6159 = vpow2.f32 %v5081_v0  ;;  %v7593_v59 = vadd.f32 %v5658_v53, %v7549_v45  ;;  %5694 = vmatprep.mubr.msk.f32.mxu1 %vm2733_vm3, %v2696_v58  ;;  %v2385_v62 = vpop.f32.mrb[27].mxu0  ;;  %v2699_v10 = vmul.f32 %v6138_v63, %v7476_v23 }
 0x2e9   : > { %v5551_v19 = vpop.f32.mrb[26].mxu1  ;;  %v6142_v37 = vpop.eup %6141  ;;  %v2698_v54 = vmul.f32 %v6140_v60, %v7484_v2  ;;  %v7598_v24 = vadd.f32 %v2385_v62, %v7556_v55  ;;  %5695 = vmatmul.mubr.msk.f32.gmra.mrb[40].mxu1 %vm2733_vm3, %v2697_v44  ;;  %6161 = vpow2.f32 %v5080_v9 }
 0x2ea   : > { %v1703_v3 = vpop.f32.mrb[27].mxu1  ;;  %v6144_v33 = vpop.eup %6143  ;;  %v2596_v16 = vadd.f32 1.0, %v6142_v37  ;;  %v5083_v8 = vmul.f32 -1.442695, %v7593_v59  ;;  %6163 = vrcp.f32 %v2597_v4 }
 0x2eb   : > { %v6146_v45 = vpop.eup %6145  ;;  %v2599_v27 = vadd.f32 1.0, %v6144_v33  ;;  %v5082_v43 = vmul.f32 -1.442695, %v7598_v24  ;;  %v5661_v56 = vpop.f32.mrb[28].mxu0  ;;  %5697 = vmatprep.mubr.msk.f32.mxu1 %vm2733_vm3, %v2698_v54 }
 0x2ec   : > { %v6148_v2 = vpop.eup %6147  ;;  %6165 = vrcp.f32 %v2596_v16  ;;  %v7606_v55 = vadd.f32 %v5661_v56, %v7566_v39  ;;  %v2395_v31 = vpop.f32.mrb[29].mxu0  ;;  %v2701_v39 = vmul.f32 %v6146_v45, %v7492_v15 }
 0x2ed   : > { %v5554_v58 = vpop.f32.mrb[28].mxu1  ;;  %v6150_v0 = vpop.eup %6149  ;;  %v2700_v44 = vmul.f32 %v6148_v2, %v7500_v14  ;;  %6167 = vrcp.f32 %v2599_v27  ;;  %v7610_v23 = vadd.f32 %v2395_v31, %v7574_v61  ;;  %5698 = vmatmul.mubr.msk.f32.gmra.mrb[42].mxu1 %vm2733_vm3, %v2699_v10 }
 0x2ee   : > { %v1713_v63 = vpop.f32.mrb[29].mxu1  ;;  %v6152_v4 = vpop.eup %6151  ;;  %v2598_v9 = vadd.f32 1.0, %v6150_v0  ;;  %6169 = vpow2.f32 %v5083_v8  ;;  %v5085_v53 = vmul.f32 -1.442695, %v7606_v55 }
 0x2ef   : > { %v6154_v60 = vpop.eup %6153  ;;  %v2601_v62 = vadd.f32 1.0, %v6152_v4  ;;  %6171 = vpow2.f32 %v5082_v43  ;;  %v5084_v37 = vmul.f32 -1.442695, %v7610_v23  ;;  %v5664_v14 = vpop.f32.mrb[30].mxu0  ;;  %5700 = vmatprep.mubr.msk.f32.mxu1 %vm2733_vm3, %v2700_v44 }
 0x2f0   : > { %v6156_v61 = vpop.eup %6155  ;;  %6173 = vrcp.f32 %v2598_v9  ;;  %v7617_v54 = vadd.f32 %v5664_v14, %v5548_v13  ;;  %v2405_v33 = vpop.f32.mrb[31].mxu0  ;;  %v2703_v43 = vmul.f32 %v6154_v60, %v7510_v1 }
 0x2f1   : > { %v6158_v16 = vpop.eup %6157  ;;  %v2702_v8 = vmul.f32 %v6156_v61, %v7518_v22  ;;  %6175 = vrcp.f32 %v2601_v62  ;;  %v7620_v10 = vadd.f32 %v2405_v33, %v1693_v32  ;;  %5701 = vmatmul.mubr.msk.f32.gmra.mrb[44].mxu1 %vm2733_vm3, %v2701_v39 }
 0x2f2   : > { %v6160_v15 = vpop.eup %6159  ;;  %v2600_v45 = vadd.f32 1.0, %v6158_v16  ;;  %6177 = vpow2.f32 %v5085_v53  ;;  %v5087_v27 = vmul.f32 -1.442695, %v7617_v54 }
 0x2f3   : > { %v2603_v56 = vadd.f32 1.0, %v6160_v15  ;;  %6179 = vpow2.f32 %v5084_v37  ;;  %v5667_v13 = vpop.f32.mrb[32].mxu0  ;;  %5703 = vmatprep.mubr.msk.f32.mxu1 %vm2733_vm3, %v2702_v8  ;;  %v6162_v2 = vpop.eup %6161  ;;  %v5086_v22 = vmul.f32 -1.442695, %v7620_v10 }
 0x2f4   : > { %6181 = vrcp.f32 %v2600_v45  ;;  %v7627_v32 = vadd.f32 %v5667_v13, %v5551_v19  ;;  %v2415_v31 = vpop.f32.mrb[33].mxu0  ;;  %v6164_v0 = vpop.eup %6163  ;;  %v2602_v44 = vadd.f32 1.0, %v6162_v2 }
 0x2f5   : > { %6183 = vrcp.f32 %v2603_v56  ;;  %v7629_v4 = vadd.f32 %v2415_v31, %v1703_v3  ;;  %5704 = vmatmul.mubr.msk.f32.gmra.mrb[46].mxu1 %vm2733_vm3, %v2703_v43  ;;  %v2705_v37 = vmul.f32 %v6164_v0, %v7529_v57 }
 0x2f6   : > { %v6166_v1 = vpop.eup %6165  ;;  %6185 = vpow2.f32 %v5087_v27  ;;  %v5089_v9 = vmul.f32 -1.442695, %v7627_v32 }
 0x2f7   : > { %v6168_v53 = vpop.eup %6167  ;;  %v2704_v60 = vmul.f32 %v6166_v1, %v7538_v7  ;;  %6187 = vrcp.f32 %v2602_v44  ;;  %v5088_v39 = vmul.f32 -1.442695, %v7629_v4  ;;  %v5670_v19 = vpop.f32.mrb[34].mxu0 }
 0x2f8   : > { %v6170_v62 = vpop.eup %6169  ;;  %6189 = vpow2.f32 %v5086_v22  ;;  %v7636_v14 = vadd.f32 %v5670_v19, %v5554_v58  ;;  %v2425_v3 = vpop.f32.mrb[35].mxu0  ;;  %v2707_v43 = vmul.f32 %v6168_v53, %v7547_v28 }
 0x2f9   : > { %v6172_v61 = vpop.eup %6171  ;;  %v2605_v33 = vadd.f32 1.0, %v6170_v62  ;;  %6191 = vpow2.f32 %v5089_v9  ;;  %5706 = vmatprep.mubr.msk.f32.mxu1 %vm2733_vm3, %v2704_v60  ;;  %v7639_v16 = vadd.f32 %v2425_v3, %v1713_v63 }
 0x2fa   : > { %v6174_v8 = vpop.eup %6173  ;;  %v2604_v7 = vadd.f32 1.0, %v6172_v61  ;;  %6193 = vpow2.f32 %v5088_v39  ;;  %v5091_v15 = vmul.f32 -1.442695, %v7636_v14  ;;  %5707 = vmatmul.mubr.msk.f32.gmra.mrb[48].mxu1 %vm2733_vm3, %v2705_v37 }
 0x2fb   : > { %v6176_v45 = vpop.eup %6175  ;;  %v2706_v57 = vmul.f32 %v6174_v8, %v7554_v48  ;;  %6195 = vrcp.f32 %v2605_v33  ;;  %v5090_v58 = vmul.f32 -1.442695, %v7639_v16 }
 0x2fc   : > { %v6178_v27 = vpop.eup %6177  ;;  %6197 = vrcp.f32 %v2604_v7  ;;  %v2709_v0 = vmul.f32 %v6176_v45, %v7563_v21 }
 0x2fd   : > { %v6180_v56 = vpop.eup %6179  ;;  %v2607_v63 = vadd.f32 1.0, %v6178_v27  ;;  %6199 = vpow2.f32 %v5091_v15  ;;  %5709 = vmatprep.mubr.msk.f32.mxu1 %vm2733_vm3, %v2706_v57 }
 0x2fe   : > { %v6182_v13 = vpop.eup %6181  ;;  %v2606_v2 = vadd.f32 1.0, %v6180_v56  ;;  %6201 = vpow2.f32 %v5090_v58  ;;  %5710 = vmatmul.mubr.msk.f32.gmra.mrb[50].mxu1 %vm2733_vm3, %v2707_v43 }
 0x2ff   : > { %v6184_v22 = vpop.eup %6183  ;;  %v2708_v48 = vmul.f32 %v6182_v13, %v7571_v40  ;;  %6203 = vrcp.f32 %v2607_v63 }
 0x300   : > { %v6186_v31 = vpop.eup %6185  ;;  %6205 = vrcp.f32 %v2606_v2  ;;  %v2711_v19 = vmul.f32 %v6184_v22, %v7581_v36 }
 0x301   : > { %v6188_v28 = vpop.eup %6187  ;;  %v2609_v44 = vadd.f32 1.0, %v6186_v31  ;;  %5712 = vmatprep.mubr.msk.f32.mxu1 %vm2733_vm3, %v2708_v48 }
 0x302   : > { %v6190_v1 = vpop.eup %6189  ;;  %v2710_v9 = vmul.f32 %v6188_v28, %v7585_v52  ;;  %5713 = vmatmul.mubr.msk.f32.gmra.mrb[52].mxu1 %vm2733_vm3, %v2709_v0 }
 0x303   : > { %v6192_v53 = vpop.eup %6191  ;;  %v2608_v60 = vadd.f32 1.0, %v6190_v1  ;;  %6207 = vrcp.f32 %v2609_v44 }
 0x304   : > { %v6194_v39 = vpop.eup %6193  ;;  %v2611_v40 = vadd.f32 1.0, %v6192_v53  ;;  %5715 = vmatprep.mubr.msk.f32.mxu1 %vm2733_vm3, %v2710_v9 }
 0x305   : > { %v6196_v21 = vpop.eup %6195  ;;  %6209 = vrcp.f32 %v2608_v60  ;;  %v2610_v62 = vadd.f32 1.0, %v6194_v39 }
 0x306   : > { %v6198_v37 = vpop.eup %6197  ;;  %5716 = vmatmul.mubr.msk.f32.gmra.mrb[54].mxu1 %vm2733_vm3, %v2711_v19  ;;  %v2713_v33 = vmul.f32 %v6196_v21, %v7593_v59 }
 0x307   : > { %v6200_v3 = vpop.eup %6199  ;;  %v2712_v52 = vmul.f32 %v6198_v37, %v7598_v24  ;;  %6211 = vrcp.f32 %v2610_v62 }
 0x308   : > { %v6202_v61 = vpop.eup %6201  ;;  %6213 = vrcp.f32 %v2611_v40  ;;  %v2613_v8 = vadd.f32 1.0, %v6200_v3 }
 0x309   : > { %v6204_v36 = vpop.eup %6203  ;;  %v2612_v7 = vadd.f32 1.0, %v6202_v61  ;;  %5718 = vmatprep.mubr.msk.f32.mxu1 %vm2733_vm3, %v2712_v52 }
 0x30a   : > { %v6206_v15 = vpop.eup %6205  ;;  %5719 = vmatmul.mubr.msk.f32.gmra.mrb[56].mxu1 %vm2733_vm3, %v2713_v33  ;;  %v2715_v57 = vmul.f32 %v6204_v36, %v7606_v55 }
 0x30b   : > { %v2714_v45 = vmul.f32 %v6206_v15, %v7610_v23  ;;  %6215 = vrcp.f32 %v2612_v7 }
 0x30c   : > { %6217 = vrcp.f32 %v2613_v8 }
 0x30d   : > { %5721 = vmatprep.mubr.msk.f32.mxu1 %vm2733_vm3, %v2714_v45  ;;  %v6208_v24 = vpop.eup %6207 }
 0x30e   : > { %5722 = vmatmul.mubr.msk.f32.gmra.mrb[58].mxu1 %vm2733_vm3, %v2715_v57  ;;  %v2717_v43 = vmul.f32 %v6208_v24, %v7617_v54 }
 0x30f   : > { %v6210_v59 = vpop.eup %6209 }
 0x310   : > { %v2716_v58 = vmul.f32 %v6210_v59, %v7620_v10  ;;  %v7679_v10 = vld [vmem:[%s8421_s9] ss:$0 sm:$0xff] }
 0x311   : > { %v6212_v27 = vpop.eup %6211 }
 0x312   : > { %v6214_v56 = vpop.eup %6213  ;;  %v2718_v63 = vmul.f32 %v6212_v27, %v7629_v4  ;;  %5724 = vmatprep.mubr.msk.f32.mxu1 %vm2733_vm3, %v2716_v58 }
 0x313   : > { %5725 = vmatmul.mubr.msk.f32.gmra.mrb[60].mxu1 %vm2733_vm3, %v2717_v43  ;;  %v2719_v23 = vmul.f32 %v6214_v56, %v7627_v32 }
 0x314   : > { %5727 = vmatprep.mubr.msk.f32.mxu1 %vm2733_vm3, %v2718_v63 }
 0x315   : > { %v6216_v55 = vpop.eup %6215 }
 0x316   : > { %v6218_v13 = vpop.eup %6217  ;;  %v2720_v2 = vmul.f32 %v6216_v55, %v7639_v16 }
 0x317   : > { %5728 = vmatmul.mubr.msk.f32.gmra.mrb[62].mxu1 %vm2733_vm3, %v2719_v23  ;;  %v2721_v54 = vmul.f32 %v6218_v13, %v7636_v14 }
 0x318   : > { %5730 = vmatprep.mubr.msk.f32.mxu1 %vm2733_vm3, %v2720_v2 }
 0x31b   : > { %5731 = vmatmul.mubr.msk.f32.gmra.mrb[64].mxu1 %vm2733_vm3, %v2721_v54 }
 0x3a5   : > { %v5681_v4 = vpop.f32.mrb[30].mxu1 }
 0x3a6   : > { %v7682_v22 = vadd.f32 %v5681_v4, %v7679_v10  ;;  %v2908_v32 = vpop.f32.mrb[31].mxu1 }
 0x3a7   : > { %v7685_v16 = vadd.f32 %v7679_v10, %v2908_v32 }
 0x3a8   : > { %v5130_v48 = vmul.f32 -1.442695, %v7682_v22 }
 0x3a9   : > { %v5129_v31 = vmul.f32 -1.442695, %v7685_v16  ;;  %v5684_v14 = vpop.f32.mrb[32].mxu1 }
 0x3aa   : > { %6219 = vpow2.f32 %v5130_v48  ;;  %v7690_v0 = vadd.f32 %v5684_v14, %v7679_v10  ;;  %v2918_v28 = vpop.f32.mrb[33].mxu1 }
 0x3ab   : > { %6221 = vpow2.f32 %v5129_v31  ;;  %v7693_v44 = vadd.f32 %v7679_v10, %v2918_v28 }
 0x3ac   : > { %v5132_v1 = vmul.f32 -1.442695, %v7690_v0 }
 0x3ad   : > { %v5131_v9 = vmul.f32 -1.442695, %v7693_v44  ;;  %v5687_v53 = vpop.f32.mrb[34].mxu1 }
 0x3ae   : > { %6223 = vpow2.f32 %v5132_v1  ;;  %v7698_v60 = vadd.f32 %v5687_v53, %v7679_v10  ;;  %v2928_v39 = vpop.f32.mrb[35].mxu1 }
 0x3af   : > { %6225 = vpow2.f32 %v5131_v9  ;;  %v7701_v19 = vadd.f32 %v7679_v10, %v2928_v39 }
 0x3b0   : > { %v5134_v40 = vmul.f32 -1.442695, %v7698_v60 }
 0x3b1   : > { %v5133_v21 = vmul.f32 -1.442695, %v7701_v19 }
 0x3b2   : > { %6227 = vpow2.f32 %v5134_v40  ;;  %v7735_v40 = vld [vmem:[%s8422_s10] ss:$0 sm:$0xff] }
 0x3b3   : > { %6229 = vpow2.f32 %v5133_v21 }
 0x3b4   : > { %v6220_v62 = vpop.eup %6219  ;;  %v5690_v37 = vpop.f32.mrb[36].mxu1 }
 0x3b5   : > { %v6222_v3 = vpop.eup %6221  ;;  %v3196_v52 = vadd.f32 1.0, %v6220_v62  ;;  %v7706_v61 = vadd.f32 %v5690_v37, %v7679_v10  ;;  %v2938_v33 = vpop.f32.mrb[37].mxu1 }
 0x3b6   : > { %v3195_v8 = vadd.f32 1.0, %v6222_v3  ;;  %v7709_v36 = vadd.f32 %v7679_v10, %v2938_v33 }
 0x3b7   : > { %6231 = vrcp.f32 %v3196_v52  ;;  %v5136_v7 = vmul.f32 -1.442695, %v7706_v61 }
 0x3b8   : > { %v6224_v15 = vpop.eup %6223  ;;  %6233 = vrcp.f32 %v3195_v8  ;;  %v5135_v45 = vmul.f32 -1.442695, %v7709_v36  ;;  %v5693_v57 = vpop.f32.mrb[38].mxu1 }
 0x3b9   : > { %v6226_v24 = vpop.eup %6225  ;;  %v3198_v59 = vadd.f32 1.0, %v6224_v15  ;;  %6235 = vpow2.f32 %v5136_v7  ;;  %v7714_v58 = vadd.f32 %v5693_v57, %v7679_v10  ;;  %v2948_v27 = vpop.f32.mrb[39].mxu1 }
 0x3ba   : > { %v3197_v43 = vadd.f32 1.0, %v6226_v24  ;;  %6237 = vpow2.f32 %v5135_v45  ;;  %v7717_v56 = vadd.f32 %v7679_v10, %v2948_v27 }
 0x3bb   : > { %6239 = vrcp.f32 %v3198_v59  ;;  %v5138_v63 = vmul.f32 -1.442695, %v7714_v58 }
 0x3bc   : > { %v6228_v55 = vpop.eup %6227  ;;  %6241 = vrcp.f32 %v3197_v43  ;;  %v5137_v23 = vmul.f32 -1.442695, %v7717_v56  ;;  %v5696_v13 = vpop.f32.mrb[40].mxu1 }
 0x3bd   : > { %v6230_v2 = vpop.eup %6229  ;;  %v3200_v54 = vadd.f32 1.0, %v6228_v55  ;;  %6243 = vpow2.f32 %v5138_v63  ;;  %v7722_v4 = vadd.f32 %v5696_v13, %v7679_v10  ;;  %v2958_v32 = vpop.f32.mrb[41].mxu1 }
 0x3be   : > { %v3199_v48 = vadd.f32 1.0, %v6230_v2  ;;  %6245 = vpow2.f32 %v5137_v23  ;;  %v7725_v31 = vadd.f32 %v7679_v10, %v2958_v32 }
 0x3bf   : > { %6247 = vrcp.f32 %v3200_v54  ;;  %v5140_v14 = vmul.f32 -1.442695, %v7722_v4 }
 0x3c0   : > { %6249 = vrcp.f32 %v3199_v48  ;;  %v5139_v28 = vmul.f32 -1.442695, %v7725_v31  ;;  %v5699_v1 = vpop.f32.mrb[42].mxu1 }
 0x3c1   : > { %v6232_v9 = vpop.eup %6231  ;;  %6251 = vpow2.f32 %v5140_v14  ;;  %v7730_v53 = vadd.f32 %v5699_v1, %v7679_v10  ;;  %v2968_v39 = vpop.f32.mrb[43].mxu1 }
 0x3c2   : > { %v6234_v21 = vpop.eup %6233  ;;  %v7738_v62 = vmul.f32 %v6232_v9, %v7682_v22  ;;  %6253 = vpow2.f32 %v5139_v28  ;;  %v7741_v37 = vadd.f32 %v7679_v10, %v2968_v39 }
 0x3c3   : > { %v6236_v3 = vpop.eup %6235  ;;  %v7744_v52 = vmul.f32 %v6234_v21, %v7685_v16  ;;  %v5142_v33 = vmul.f32 -1.442695, %v7730_v53 }
 0x3c4   : > { %8541 = vst [vmem:[#allocation41_spill] sm:$0xff] %v7738_v62  ;;  %v6238_v8 = vpop.eup %6237  ;;  %v3202_v7 = vadd.f32 1.0, %v6236_v3  ;;  %v5141_v15 = vmul.f32 -1.442695, %v7741_v37  ;;  %v5702_v45 = vpop.f32.mrb[44].mxu1  ;;  %v3347_v57 = vmul.f32 %v7735_v40, %v7738_v62 }
 0x3c5   : > { %v6240_v22 = vpop.eup %6239  ;;  %v3201_v24 = vadd.f32 1.0, %v6238_v8  ;;  %6255 = vpow2.f32 %v5142_v33  ;;  %v7751_v59 = vadd.f32 %v5702_v45, %v7679_v10  ;;  %v2978_v27 = vpop.f32.mrb[45].mxu1  ;;  %v3346_v16 = vmul.f32 %v7735_v40, %v7744_v52 }
 0x3c6   : > { %v6242_v43 = vpop.eup %6241  ;;  %v7756_v63 = vmul.f32 %v6240_v22, %v7690_v0  ;;  %6257 = vrcp.f32 %v3202_v7  ;;  %v7759_v55 = vadd.f32 %v7679_v10, %v2978_v27  ;;  %v3385_v23 = vsel %vm2733_vm3, %v3347_v57, 0.0 }
 0x3c7   : > { %v6244_v13 = vpop.eup %6243  ;;  %v7763_v2 = vmul.f32 %v6242_v43, %v7693_v44  ;;  %6259 = vrcp.f32 %v3201_v24  ;;  %v5144_v54 = vmul.f32 -1.442695, %v7751_v59  ;;  %3386 = vadd.xlane.f32.xlu0 %v3385_v23  ;;  %v3382_v28 = vsel %vm2733_vm3, %v3346_v16, 0.0 }
 0x3c8   : > { %8542 = vst [vmem:[#allocation42_spill] sm:$0xff] %v7756_v63  ;;  %v6246_v32 = vpop.eup %6245  ;;  %v3204_v48 = vadd.f32 1.0, %v6244_v13  ;;  %6261 = vpow2.f32 %v5141_v15  ;;  %v5143_v0 = vmul.f32 -1.442695, %v7759_v55  ;;  %v5705_v14 = vpop.f32.mrb[46].mxu1  ;;  %v3349_v7 = vmul.f32 %v7735_v40, %v7756_v63 }
 0x3c9   : > { %8543 = vst [vmem:[#allocation43_spill] sm:$0xff] %v7763_v2  ;;  %v6248_v1 = vpop.eup %6247  ;;  %v3203_v9 = vadd.f32 1.0, %v6246_v32  ;;  %6263 = vpow2.f32 %v5144_v54  ;;  %v7769_v39 = vadd.f32 %v5705_v14, %v7679_v10  ;;  %v2988_v44 = vpop.f32.mrb[47].mxu1  ;;  %v3348_v21 = vmul.f32 %v7735_v40, %v7763_v2 }
 0x3ca   : > { %v6250_v3 = vpop.eup %6249  ;;  %v7774_v33 = vmul.f32 %v6248_v1, %v7698_v60  ;;  %6265 = vrcp.f32 %v3204_v48  ;;  %v7777_v8 = vadd.f32 %v7679_v10, %v2988_v44  ;;  %v3391_v54 = vsel %vm2733_vm3, %v3349_v7, 0.0 }
 0x3cb   : > { %v6252_v15 = vpop.eup %6251  ;;  %v7782_v45 = vmul.f32 %v6250_v3, %v7701_v19  ;;  %6267 = vrcp.f32 %v3203_v9  ;;  %v5146_v57 = vmul.f32 -1.442695, %v7769_v39  ;;  %3383 = vadd.xlane.f32.xlu0 %v3382_v28  ;;  %v3388_v22 = vsel %vm2733_vm3, %v3348_v21, 0.0 }
 0x3cc   : > { %8544 = vst [vmem:[#allocation44_spill] sm:$0xff] %v7774_v33  ;;  %v6254_v24 = vpop.eup %6253  ;;  %v3206_v60 = vadd.f32 1.0, %v6252_v15  ;;  %6269 = vpow2.f32 %v5143_v0  ;;  %v5145_v27 = vmul.f32 -1.442695, %v7777_v8  ;;  %3389 = vadd.xlane.f32.xlu1 %v3388_v22  ;;  %v3351_v32 = vmul.f32 %v7735_v40, %v7774_v33 }
 0x3cd   : > { %8545 = vst [vmem:[#allocation45_spill] sm:$0xff] %v7782_v45  ;;  %v3205_v16 = vadd.f32 1.0, %v6254_v24  ;;  %6271 = vpow2.f32 %v5146_v57  ;;  %v5708_v43 = vpop.f32.mrb[48].mxu1  ;;  %v3350_v23 = vmul.f32 %v7735_v40, %v7782_v45 }
 0x3ce   : > { %6273 = vrcp.f32 %v3206_v60  ;;  %v7790_v19 = vadd.f32 %v5708_v43, %v7679_v10  ;;  %v2998_v13 = vpop.f32.mrb[49].mxu1  ;;  %v3397_v60 = vsel %vm2733_vm3, %v3351_v32, 0.0 }
 0x3cf   : > { %v6256_v48 = vpop.eup %6255  ;;  %6275 = vrcp.f32 %v3205_v16  ;;  %v7796_v0 = vadd.f32 %v7679_v10, %v2998_v13  ;;  %3392 = vadd.xlane.f32.xlu0 %v3391_v54  ;;  %v3394_v14 = vsel %vm2733_vm3, %v3350_v23, 0.0 }
 0x3d0   : > { %v6258_v28 = vpop.eup %6257  ;;  %v3208_v1 = vadd.f32 1.0, %v6256_v48  ;;  %6277 = vpow2.f32 %v5145_v27  ;;  %v5148_v9 = vmul.f32 -1.442695, %v7790_v19  ;;  %3395 = vadd.xlane.f32.xlu1 %v3394_v14 }
 0x3d1   : > { %v6260_v44 = vpop.eup %6259  ;;  %v7801_v21 = vmul.f32 %v6258_v28, %v7706_v61  ;;  %v5147_v3 = vmul.f32 -1.442695, %v7796_v0  ;;  %v5711_v7 = vpop.f32.mrb[50].mxu1 }
 0x3d2   : > { %v6262_v15 = vpop.eup %6261  ;;  %v7805_v57 = vmul.f32 %v6260_v44, %v7709_v36  ;;  %6279 = vrcp.f32 %v3208_v1  ;;  %v7808_v22 = vadd.f32 %v5711_v7, %v7679_v10  ;;  %v3008_v24 = vpop.f32.mrb[51].mxu1 }
 0x3d3   : > { %8546 = vst [vmem:[#allocation46_spill] sm:$0xff] %v7801_v21  ;;  %v6264_v27 = vpop.eup %6263  ;;  %v3207_v16 = vadd.f32 1.0, %v6262_v15  ;;  %6281 = vpow2.f32 %v5148_v9  ;;  %v7812_v61 = vadd.f32 %v7679_v10, %v3008_v24  ;;  %3398 = vadd.xlane.f32.xlu0 %v3397_v60  ;;  %v3353_v43 = vmul.f32 %v7735_v40, %v7801_v21 }
 0x3d4   : > { %8547 = vst [vmem:[#allocation47_spill] sm:$0xff] %v7805_v57  ;;  %v6266_v23 = vpop.eup %6265  ;;  %v3210_v36 = vadd.f32 1.0, %v6264_v27  ;;  %6283 = vpow2.f32 %v5147_v3  ;;  %v5150_v13 = vmul.f32 -1.442695, %v7808_v22  ;;  %v3352_v54 = vmul.f32 %v7735_v40, %v7805_v57 }
 0x3d5   : > { %v6268_v48 = vpop.eup %6267  ;;  %v7820_v32 = vmul.f32 %v6266_v23, %v7714_v58  ;;  %6285 = vrcp.f32 %v3207_v16  ;;  %v5149_v14 = vmul.f32 -1.442695, %v7812_v61  ;;  %v5714_v28 = vpop.f32.mrb[52].mxu1  ;;  %v3403_v1 = vsel %vm2733_vm3, %v3353_v43, 0.0 }
 0x3d6   : > { %v6270_v9 = vpop.eup %6269  ;;  %v7825_v44 = vmul.f32 %v6268_v48, %v7717_v56  ;;  %6287 = vrcp.f32 %v3210_v36  ;;  %v7828_v3 = vadd.f32 %v5714_v28, %v7679_v10  ;;  %v3018_v7 = vpop.f32.mrb[53].mxu1  ;;  %v3400_v15 = vsel %vm2733_vm3, %v3352_v54, 0.0 }
 0x3d7   : > { %8548 = vst [vmem:[#allocation48_spill] sm:$0xff] %v7820_v32  ;;  %v6272_v24 = vpop.eup %6271  ;;  %v3209_v58 = vadd.f32 1.0, %v6270_v9  ;;  %6289 = vpow2.f32 %v5150_v13  ;;  %v7832_v60 = vadd.f32 %v7679_v10, %v3018_v7  ;;  %3401 = vadd.xlane.f32.xlu1 %v3400_v15  ;;  %3404 = vadd.xlane.f32.xlu0 %v3403_v1  ;;  %v3355_v27 = vmul.f32 %v7735_v40, %v7820_v32 }
 0x3d8   : > { %8549 = vst [vmem:[#allocation49_spill] sm:$0xff] %v7825_v44  ;;  %v6274_v56 = vpop.eup %6273  ;;  %v3212_v16 = vadd.f32 1.0, %v6272_v24  ;;  %6291 = vpow2.f32 %v5149_v14  ;;  %v5152_v43 = vmul.f32 -1.442695, %v7828_v3  ;;  %v3354_v23 = vmul.f32 %v7735_v40, %v7825_v44  ;;  %v6508_v44 = vld [vmem:[%s6715_s14 + $0x110] sm:$0xff] }
 0x3d9   : > { %v6276_v36 = vpop.eup %6275  ;;  %v7840_v54 = vmul.f32 %v6274_v56, %v7722_v4  ;;  %6293 = vrcp.f32 %v3209_v58  ;;  %v5151_v13 = vmul.f32 -1.442695, %v7832_v60  ;;  %v5717_v48 = vpop.f32.mrb[54].mxu1  ;;  %v3409_v28 = vsel %vm2733_vm3, %v3355_v27, 0.0 }
 0x3da   : > { %v6278_v1 = vpop.eup %6277  ;;  %v7845_v9 = vmul.f32 %v6276_v36, %v7725_v31  ;;  %6295 = vrcp.f32 %v3212_v16  ;;  %v7848_v14 = vadd.f32 %v5717_v48, %v7679_v10  ;;  %v3028_v7 = vpop.f32.mrb[55].mxu1  ;;  %v3406_v15 = vsel %vm2733_vm3, %v3354_v23, 0.0 }
 0x3db   : > { %8550 = vst [vmem:[#allocation50_spill] sm:$0xff] %v7840_v54  ;;  %v3211_v24 = vadd.f32 1.0, %v6278_v1  ;;  %6297 = vpow2.f32 %v5152_v43  ;;  %v7852_v4 = vadd.f32 %v7679_v10, %v3028_v7  ;;  %3407 = vadd.xlane.f32.xlu1 %v3406_v15  ;;  %3410 = vadd.xlane.f32.xlu0 %v3409_v28  ;;  %v3357_v58 = vmul.f32 %v7735_v40, %v7840_v54 }
 0x3dc   : > { %8551 = vst [vmem:[#allocation51_spill] sm:$0xff] %v7845_v9  ;;  %v6280_v27 = vpop.eup %6279  ;;  %6299 = vpow2.f32 %v5151_v13  ;;  %v5154_v31 = vmul.f32 -1.442695, %v7848_v14  ;;  %v3356_v56 = vmul.f32 %v7735_v40, %v7845_v9 }
 0x3dd   : > { %v6282_v16 = vpop.eup %6281  ;;  %v7860_v23 = vmul.f32 %v6280_v27, %v7730_v53  ;;  %6301 = vrcp.f32 %v3211_v24  ;;  %v5153_v43 = vmul.f32 -1.442695, %v7852_v4  ;;  %v5720_v36 = vpop.f32.mrb[56].mxu1  ;;  %v3415_v48 = vsel %vm2733_vm3, %v3357_v58, 0.0 }
 0x3de   : > { %v6284_v28 = vpop.eup %6283  ;;  %v3214_v1 = vadd.f32 1.0, %v6282_v16  ;;  %6303 = vpow2.f32 %v5154_v31  ;;  %v7865_v13 = vadd.f32 %v5720_v36, %v7679_v10  ;;  %v3038_v7 = vpop.f32.mrb[57].mxu1  ;;  %v3412_v15 = vsel %vm2733_vm3, %v3356_v56, 0.0 }
 0x3df   : > { %8552 = vst [vmem:[#allocation52_spill] sm:$0xff] %v7860_v23  ;;  %v6286_v50 = vpop.eup %6285  ;;  %v3213_v26 = vadd.f32 1.0, %v6284_v28  ;;  %6305 = vpow2.f32 %v5153_v43  ;;  %v7869_v53 = vadd.f32 %v7679_v10, %v3038_v7  ;;  %3413 = vadd.xlane.f32.xlu1 %v3412_v15  ;;  %3416 = vadd.xlane.f32.xlu0 %v3415_v48  ;;  %v3359_v24 = vmul.f32 %v7735_v40, %v7860_v23 }
 0x3e0   : > { %v6288_v58 = vpop.eup %6287  ;;  %v7874_v27 = vmul.f32 %v6286_v50, %v7741_v37  ;;  %6307 = vrcp.f32 %v3214_v1  ;;  %v5156_v31 = vmul.f32 -1.442695, %v7865_v13 }
 0x3e1   : > { %v6290_v16 = vpop.eup %6289  ;;  %v7878_v56 = vmul.f32 %v6288_v58, %v7751_v59  ;;  %6309 = vrcp.f32 %v3213_v26  ;;  %v5155_v43 = vmul.f32 -1.442695, %v7869_v53  ;;  %v5723_v36 = vpop.f32.mrb[58].mxu1  ;;  %v3421_v48 = vsel %vm2733_vm3, %v3359_v24, 0.0 }
 0x3e2   : > { %8553 = vst [vmem:[#allocation53_spill] sm:$0xff] %v7874_v27  ;;  %v6292_v28 = vpop.eup %6291  ;;  %v3216_v7 = vadd.f32 1.0, %v6290_v16  ;;  %6311 = vpow2.f32 %v5156_v31  ;;  %v7883_v15 = vadd.f32 %v5723_v36, %v7679_v10  ;;  %v3048_v50 = vpop.f32.mrb[59].mxu1  ;;  %v3358_v37 = vmul.f32 %v7735_v40, %v7874_v27 }
 0x3e3   : > { %v6294_v1 = vpop.eup %6293  ;;  %v3215_v23 = vadd.f32 1.0, %v6292_v28  ;;  %6313 = vpow2.f32 %v5155_v43  ;;  %v7888_v26 = vadd.f32 %v7679_v10, %v3048_v50  ;;  %3422 = vadd.xlane.f32.xlu0 %v3421_v48  ;;  %v3361_v59 = vmul.f32 %v7735_v40, %v7878_v56 }
 0x3e4   : > { %v6296_v24 = vpop.eup %6295  ;;  %v7893_v58 = vmul.f32 %v6294_v1, %v7759_v55  ;;  %6315 = vrcp.f32 %v3216_v7  ;;  %v5158_v31 = vmul.f32 -1.442695, %v7883_v15  ;;  %v3418_v16 = vsel %vm2733_vm3, %v3358_v37, 0.0 }
 0x3e5   : > { %v6298_v36 = vpop.eup %6297  ;;  %v7898_v28 = vmul.f32 %v6296_v24, %v7769_v39  ;;  %6317 = vrcp.f32 %v3215_v23  ;;  %v5157_v43 = vmul.f32 -1.442695, %v7888_v26  ;;  %3419 = vadd.xlane.f32.xlu1 %v3418_v16  ;;  %v3427_v7 = vsel %vm2733_vm3, %v3361_v59, 0.0 }
 0x3e6   : > { %v6300_v48 = vpop.eup %6299  ;;  %v3218_v50 = vadd.f32 1.0, %v6298_v36  ;;  %6319 = vpow2.f32 %v5158_v31  ;;  %v5726_v27 = vpop.f32.mrb[60].mxu1  ;;  %v3360_v55 = vmul.f32 %v7735_v40, %v7893_v58 }
 0x3e7   : > { %v6302_v1 = vpop.eup %6301  ;;  %v3217_v49 = vadd.f32 1.0, %v6300_v48  ;;  %6321 = vpow2.f32 %v5157_v43  ;;  %v7905_v37 = vadd.f32 %v5726_v27, %v7679_v10  ;;  %v7907_v39 = vpop.f32.mrb[61].mxu1  ;;  %3428 = vadd.xlane.f32.xlu0 %v3427_v7  ;;  %v3363_v23 = vmul.f32 %v7735_v40, %v7898_v28 }
 0x3e8   : > { %v6304_v24 = vpop.eup %6303  ;;  %v7912_v31 = vmul.f32 %v6302_v1, %v7777_v8  ;;  %6323 = vrcp.f32 %v3218_v50  ;;  %v3424_v16 = vsel %vm2733_vm3, %v3360_v55, 0.0 }
 0x3e9   : > { %v6306_v59 = vpop.eup %6305  ;;  %6325 = vrcp.f32 %v3217_v49  ;;  %v3220_v36 = vadd.f32 1.0, %v6304_v24  ;;  %v5160_v43 = vmul.f32 -1.442695, %v7905_v37  ;;  %3425 = vadd.xlane.f32.xlu1 %v3424_v16  ;;  %v3433_v7 = vsel %vm2733_vm3, %v3363_v23, 0.0 }
 0x3ea   : > { %v6308_v27 = vpop.eup %6307  ;;  %v3219_v48 = vadd.f32 1.0, %v6306_v59  ;;  %v7916_v25 = vpop.f32.mrb[62].mxu1  ;;  %v3362_v47 = vmul.f32 %v7735_v40, %v7912_v31 }
 0x3eb   : > { %v6310_v8 = vpop.eup %6309  ;;  %v7922_v50 = vmul.f32 %v6308_v27, %v7790_v19  ;;  %6327 = vrcp.f32 %v3220_v36  ;;  %v7924_v55 = vpop.f32.mrb[63].mxu1 }
 0x3ec   : > { %v6312_v49 = vpop.eup %6311  ;;  %v7927_v1 = vmul.f32 %v6310_v8, %v7796_v0  ;;  %6329 = vrcp.f32 %v3219_v48  ;;  %v3430_v24 = vsel %vm2733_vm3, %v3362_v47, 0.0  ;;  %v7939_v47 = vpop.permute.xlu1 %3781 }
 0x3ed   : > { %8554 = vst [vmem:[#allocation54_spill] sm:$0xff] %v7922_v50  ;;  %v6314_v16 = vpop.eup %6313  ;;  %v3222_v59 = vadd.f32 1.0, %v6312_v49  ;;  %6331 = vpow2.f32 %v5160_v43  ;;  %3434 = vadd.xlane.f32.xlu1 %v3433_v7  ;;  %3431 = vadd.xlane.f32.xlu0 %v3430_v24  ;;  %v3365_v23 = vmul.f32 %v7735_v40, %v7922_v50 }
 0x3ee   : > { %8555 = vst [vmem:[#allocation55_spill] sm:$0xff] %v7927_v1  ;;  %v6316_v19 = vpop.eup %6315  ;;  %v3221_v27 = vadd.f32 1.0, %v6314_v16  ;;  %v7932_v36 = vpop.f32.mrb[64].mxu1  ;;  %v3364_v54 = vmul.f32 %v7735_v40, %v7927_v1 }
 0x3ef   : > { %v6318_v0 = vpop.eup %6317  ;;  %v7937_v48 = vmul.f32 %v6316_v19, %v7808_v22  ;;  %6333 = vrcp.f32 %v3222_v59  ;;  %v7941_v43 = vpop.f32.mrb[65].mxu1  ;;  %v3439_v24 = vsel %vm2733_vm3, %v3365_v23, 0.0 }
 0x3f0   : > { %v6320_v7 = vpop.eup %6319  ;;  %v7944_v8 = vmul.f32 %v6318_v0, %v7812_v61  ;;  %6335 = vrcp.f32 %v3221_v27  ;;  %v3436_v49 = vsel %vm2733_vm3, %v3364_v54, 0.0 }
 0x3f1   : > { %8556 = vst [vmem:[#allocation56_spill] sm:$0xff] %v7937_v48  ;;  %v6322_v16 = vpop.eup %6321  ;;  %v3224_v9 = vadd.f32 1.0, %v6320_v7  ;;  %3437 = vadd.xlane.f32.xlu1 %v3436_v49  ;;  %3440 = vadd.xlane.f32.xlu0 %v3439_v24  ;;  %v3367_v22 = vmul.f32 %v7735_v40, %v7937_v48  ;;  %v7960_v7 = vpop.permute.xlu1 %3749 }
 0x3f2   : > { %8557 = vst [vmem:[#allocation57_spill] sm:$0xff] %v7944_v8  ;;  %v6324_v19 = vpop.eup %6323  ;;  %v3223_v59 = vadd.f32 1.0, %v6322_v16  ;;  %v3366_v20 = vmul.f32 %v7735_v40, %v7944_v8 }
 0x3f3   : > { %v6326_v46 = vpop.eup %6325  ;;  %v7953_v61 = vmul.f32 %v6324_v19, %v7828_v3  ;;  %6337 = vrcp.f32 %v3224_v9  ;;  %v3445_v27 = vsel %vm2733_vm3, %v3367_v22, 0.0 }
 0x3f4   : > { %v7956_v54 = vmul.f32 %v6326_v46, %v7832_v60  ;;  %6339 = vrcp.f32 %v3223_v59  ;;  %v3442_v23 = vsel %vm2733_vm3, %v3366_v20, 0.0  ;;  %v7969_v60 = vpop.permute.xlu0 %3783 }
 0x3f5   : > { %8558 = vst [vmem:[#allocation58_spill] sm:$0xff] %v7953_v61  ;;  %v6328_v0 = vpop.eup %6327  ;;  %3443 = vadd.xlane.f32.xlu1 %v3442_v23  ;;  %3446 = vadd.xlane.f32.xlu0 %v3445_v27  ;;  %v3369_v49 = vmul.f32 %v7735_v40, %v7953_v61 }
 0x3f6   : > { %8559 = vst [vmem:[#allocation59_spill] sm:$0xff] %v7956_v54  ;;  %v6330_v24 = vpop.eup %6329  ;;  %v7965_v3 = vmul.f32 %v6328_v0, %v7848_v14  ;;  %v3368_v46 = vmul.f32 %v7735_v40, %v7956_v54 }
 0x3f7   : > { %v6332_v20 = vpop.eup %6331  ;;  %v7972_v9 = vmul.f32 %v6330_v24, %v7852_v4  ;;  %v3451_v19 = vsel %vm2733_vm3, %v3369_v49, 0.0  ;;  %v7986_v24 = vpop.permute.xlu1 %3751 }
 0x3f8   : > { %8560 = vst [vmem:[#allocation60_spill] sm:$0xff] %v7965_v3  ;;  %v3226_v16 = vadd.f32 1.0, %v6332_v20  ;;  %v3448_v22 = vsel %vm2733_vm3, %v3368_v46, 0.0  ;;  %v3371_v59 = vmul.f32 %v7735_v40, %v7965_v3  ;;  %v7990_v20 = vpop.permute.xlu0 %3785 }
 0x3f9   : > { %8561 = vst [vmem:[#allocation61_spill] sm:$0xff] %v7972_v9  ;;  %v6334_v23 = vpop.eup %6333  ;;  %3449 = vadd.xlane.f32.xlu1 %v3448_v22  ;;  %3452 = vadd.xlane.f32.xlu0 %v3451_v19  ;;  %v3370_v14 = vmul.f32 %v7735_v40, %v7972_v9 }
 0x3fa   : > { %v6336_v27 = vpop.eup %6335  ;;  %v7981_v0 = vmul.f32 %v6334_v23, %v7865_v13  ;;  %6341 = vrcp.f32 %v3226_v16  ;;  %v3457_v46 = vsel %vm2733_vm3, %v3371_v59, 0.0 }
 0x3fb   : > { %v7984_v4 = vmul.f32 %v6336_v27, %v7869_v53  ;;  %v3454_v49 = vsel %vm2733_vm3, %v3370_v14, 0.0 }
 0x3fc   : > { %8562 = vst [vmem:[#allocation62_spill] sm:$0xff] %v7981_v0  ;;  %v3373_v22 = vmul.f32 %v7735_v40, %v7981_v0  ;;  %v8006_v0 = vpop.permute.xlu1 %3787 }
 0x3fd   : > { %8563 = vst [vmem:[#allocation63_spill] sm:$0xff] %v7984_v4  ;;  %v6338_v19 = vpop.eup %6337  ;;  %3455 = vadd.xlane.f32.xlu1 %v3454_v49  ;;  %3458 = vadd.xlane.f32.xlu0 %v3457_v46  ;;  %v3372_v13 = vmul.f32 %v7735_v40, %v7984_v4  ;;  %v8010_v46 = vpop.permute.xlu0 %3753  ;;  %v6507_v4 = vld [vmem:[%s6715_s14 + $0x118] sm:$0xff] }
 0x3fe   : > { %v6340_v16 = vpop.eup %6339  ;;  %v7997_v53 = vmul.f32 %v6338_v19, %v7883_v15  ;;  %v3463_v14 = vsel %vm2733_vm3, %v3373_v22, 0.0 }
 0x3ff   : > { %v8000_v23 = vmul.f32 %v6340_v16, %v7888_v26  ;;  %v3460_v59 = vsel %vm2733_vm3, %v3372_v13, 0.0 }
 0x400   : > { %8564 = vst [vmem:[#allocation64_spill] sm:$0xff] %v7997_v53  ;;  %v3375_v27 = vmul.f32 %v7735_v40, %v7997_v53  ;;  %v8017_v22 = vpop.permute.xlu1 %3755 }
 0x401   : > { %8565 = vst [vmem:[#allocation65_spill] sm:$0xff] %v8000_v23  ;;  %3461 = vadd.xlane.f32.xlu1 %v3460_v59  ;;  %3464 = vadd.xlane.f32.xlu0 %v3463_v14  ;;  %v3374_v49 = vmul.f32 %v7735_v40, %v8000_v23  ;;  %v8021_v59 = vpop.permute.xlu0 %3789 }
 0x402   : > { %v3469_v19 = vsel %vm2733_vm3, %v3375_v27, 0.0 }
 0x403   : > { %v3466_v15 = vsel %vm2733_vm3, %v3374_v49, 0.0  ;;  %v3059_v49 = vadd.f32 %v7679_v10, %v7907_v39  ;;  %v3084_v39 = vadd.f32 %v7932_v36, %v7679_v10 }
 0x404   : > { %v6342_v26 = vpop.eup %6341  ;;  %v8026_v27 = vpop.permute.xlu1 %3791 }
 0x405   : > { %v8015_v13 = vmul.f32 %v6342_v26, %v7905_v37  ;;  %3467 = vadd.xlane.f32.xlu1 %v3466_v15  ;;  %3470 = vadd.xlane.f32.xlu0 %v3469_v19  ;;  %v8028_v37 = vpop.permute.xlu0 %3757  ;;  %v5159_v15 = vmul.f32 -1.442695, %v3059_v49  ;;  %v3069_v26 = vadd.f32 %v7679_v10, %v7924_v55  ;;  %v3074_v19 = vadd.f32 %v7916_v25, %v7679_v10 }
 0x406   : > { %v5164_v25 = vmul.f32 -1.442695, %v3084_v39 }
 0x407   : > { %8566 = vst [vmem:[#allocation66_spill] sm:$0xff] %v8015_v13  ;;  %v3377_v16 = vmul.f32 %v7735_v40, %v8015_v13  ;;  %6343 = vpow2.f32 %v5159_v15  ;;  %v5161_v13 = vmul.f32 -1.442695, %v3069_v26  ;;  %v5162_v53 = vmul.f32 -1.442695, %v3074_v19 }
 0x409   : > { %v3475_v14 = vsel %vm2733_vm3, %v3377_v16, 0.0  ;;  %v3079_v16 = vadd.f32 %v7679_v10, %v7941_v43  ;;  %v8040_v23 = vpop.permute.xlu0 %3793  ;;  %6345 = vpow2.f32 %v5161_v13 }
 0x40a   : > { %3476 = vadd.xlane.f32.xlu0 %v3475_v14  ;;  %v8036_v14 = vpop.permute.xlu1 %3759  ;;  %6347 = vpow2.f32 %v5162_v53 }
 0x40b   : > { %v5163_v55 = vmul.f32 -1.442695, %v3079_v16 }
 0x40d   : > { %v8046_v3 = vpop.permute.xlu0 %3761  ;;  %6349 = vpow2.f32 %v5163_v55 }
 0x40e   : > { %v8044_v15 = vpop.permute.xlu1 %3795  ;;  %6351 = vpow2.f32 %v5164_v25 }
 0x411   : > { %v6344_v43 = vpop.eup %6343  ;;  %v8050_v36 = vpop.permute.xlu0 %3797 }
 0x412   : > { %v8048_v32 = vpop.permute.xlu1 %3763  ;;  %v3225_v10 = vadd.f32 1.0, %v6344_v43 }
 0x414   : > { %6353 = vrcp.f32 %v3225_v10 }
 0x415   : > { %v8056_v55 = vpop.permute.xlu0 %3765 }
 0x416   : > { %3819 = vrot.lane.b32.xlu1 %v6507_v4, %s6569_s19  ;;  %v6346_v4 = vpop.eup %6345  ;;  %v8054_v18 = vpop.permute.xlu1 %3799 }
 0x417   : > { %v6348_v13 = vpop.eup %6347  ;;  %v3227_v53 = vadd.f32 1.0, %v6346_v4 }
 0x418   : > { %v6350_v9 = vpop.eup %6349  ;;  %v3228_v61 = vadd.f32 1.0, %v6348_v13 }
 0x419   : > { %v6352_v42 = vpop.eup %6351  ;;  %6355 = vrcp.f32 %v3227_v53  ;;  %v3229_v25 = vadd.f32 1.0, %v6350_v9  ;;  %v8060_v57 = vpop.permute.xlu0 %3801 }
 0x41a   : > { %6357 = vrcp.f32 %v3228_v61  ;;  %v3230_v43 = vadd.f32 1.0, %v6352_v42  ;;  %v8058_v21 = vpop.permute.xlu1 %3767 }
 0x41b   : > { %6359 = vrcp.f32 %v3229_v25 }
 0x41c   : > { %6361 = vrcp.f32 %v3230_v43 }
 0x41d   : > { %v8066_v54 = vpop.permute.xlu0 %3769 }
 0x41e   : > { %v8064_v4 = vpop.permute.xlu1 %3803 }
 0x420   : > { %3817 = vrot.lane.b32.xlu0 %v6508_v44, %s6569_s19  ;;  %v6354_v44 = vpop.eup %6353  ;;  %s8653_s19 = sld [smem:[#allocation75_spill]] (!%p5206_p8) }
 0x421   : > { %v8062_v10 = vmul.f32 %v6354_v44, %v3059_v49  ;;  %v8076_v43 = vpop.permute.xlu0 %3805 }
 0x422   : > { %v8074_v25 = vpop.permute.xlu1 %3771 }
 0x423   : > { %8567 = vst [vmem:[#allocation67_spill] sm:$0xff] %v8062_v10  ;;  %v6356_v13 = vpop.eup %6355  ;;  %v3376_v42 = vmul.f32 %v7735_v40, %v8062_v10 }
 0x424   : > { %v6358_v48 = vpop.eup %6357  ;;  %v8068_v12 = vmul.f32 %v6356_v13, %v3069_v26 }
 0x425   : > { %v6360_v61 = vpop.eup %6359  ;;  %v8072_v9 = vmul.f32 %v6358_v48, %v3074_v19  ;;  %v3472_v44 = vsel %vm2733_vm3, %v3376_v42, 0.0 }
 0x426   : > { %8568 = vst [vmem:[#allocation68_spill] sm:$0xff] %v8068_v12  ;;  %v6362_v53 = vpop.eup %6361  ;;  %v8078_v49 = vmul.f32 %v6360_v61, %v3079_v16  ;;  %v3378_v41 = vmul.f32 %v7735_v40, %v8068_v12  ;;  %v8087_v48 = vpop.permute.xlu1 %3807 }
 0x427   : > { %8569 = vst [vmem:[#allocation69_spill] sm:$0xff] %v8072_v9  ;;  %v8083_v26 = vmul.f32 %v6362_v53, %v3084_v39  ;;  %v3379_v13 = vmul.f32 %v7735_v40, %v8072_v9  ;;  %v8092_v16 = vpop.permute.xlu0 %3773 }
 0x428   : > { %8570 = vst [vmem:[#allocation70_spill] sm:$0xff] %v8078_v49  ;;  %v3478_v19 = vsel %vm2733_vm3, %v3378_v41, 0.0  ;;  %v3380_v10 = vmul.f32 %v7735_v40, %v8078_v49 }
 0x429   : > { %8571 = vst [vmem:[#allocation71_spill] sm:$0xff] %v8083_v26  ;;  %v3481_v42 = vsel %vm2733_vm3, %v3379_v13, 0.0  ;;  %v3381_v39 = vmul.f32 %v7735_v40, %v8083_v26  ;;  %v8111_v40 = vld [vmem:[#allocation5] ss:$0 sm:$0xff] }
 0x42a   : > { %v3484_v61 = vsel %vm2733_vm3, %v3380_v10, 0.0 }
 0x42b   : > { %v3487_v53 = vsel %vm2733_vm3, %v3381_v39, 0.0  ;;  %v8101_v41 = vpop.permute.xlu0 %3809 }
 0x42f   : > { %v8105_v9 = vpop.permute.xlu0 %3777 }
 0x433   : > { %v8109_v13 = vpop.permute.xlu0 %3813 }
 0x43a   : > { %3473 = vadd.xlane.f32.xlu1 %v3472_v44  ;;  %v8099_v44 = vpop.permute.xlu1 %3775 }
 0x43e   : > { %3479 = vadd.xlane.f32.xlu1 %v3478_v19  ;;  %v8103_v49 = vpop.permute.xlu1 %3811 }
 0x43f   : > { %3482 = vadd.xlane.f32.xlu0 %v3481_v42 }
 0x442   : > { %3485 = vadd.xlane.f32.xlu1 %v3484_v61  ;;  %v8107_v19 = vpop.permute.xlu1 %3779 }
 0x443   : > { %3488 = vadd.xlane.f32.xlu0 %v3487_v53 }
 0x446   : > { %v8113_v10 = vpop.permute.xlu1 %3815 }
 0x454   : > { %v3387_v42 = vpop.xlane.xlu0 %3386 }
 0x455   : > { %v3498_v39 = vadd.f32 %v8111_v40, %v3387_v42 }
 0x457   : > { %v5168_v61 = vmul.f32 -1.442695, %v3498_v39 }
 0x458   : > { %v3384_v26 = vpop.xlane.xlu0 %3383 }
 0x459   : > { %6363 = vpow2.f32 %v5168_v61  ;;  %v3497_v53 = vadd.f32 %v8111_v40, %v3384_v26  ;;  %v3390_v12 = vpop.xlane.xlu1 %3389 }
 0x45a   : > { %v3499_v33 = vadd.f32 %v8111_v40, %v3390_v12 }
 0x45b   : > { %v5167_v45 = vmul.f32 -1.442695, %v3497_v53 }
 0x45c   : > { %v5169_v8 = vmul.f32 -1.442695, %v3499_v33  ;;  %v3393_v11 = vpop.xlane.xlu0 %3392 }
 0x45d   : > { %6365 = vpow2.f32 %v5167_v45  ;;  %v3500_v38 = vadd.f32 %v8111_v40, %v3393_v11  ;;  %v3396_v50 = vpop.xlane.xlu1 %3395 }
 0x45e   : > { %6367 = vpow2.f32 %v5169_v8  ;;  %v3501_v63 = vadd.f32 %v8111_v40, %v3396_v50 }
 0x45f   : > { %v5170_v2 = vmul.f32 -1.442695, %v3500_v38 }
 0x460   : > { %v5171_v42 = vmul.f32 -1.442695, %v3501_v63  ;;  %v3399_v39 = vpop.xlane.xlu0 %3398 }
 0x461   : > { %6369 = vpow2.f32 %v5170_v2  ;;  %v3502_v61 = vadd.f32 %v8111_v40, %v3399_v39 }
 0x462   : > { %6371 = vpow2.f32 %v5171_v42 }
 0x463   : > { %v6364_v26 = vpop.eup %6363  ;;  %v5172_v1 = vmul.f32 -1.442695, %v3502_v61 }
 0x464   : > { %v3642_v12 = vadd.f32 1.0, %v6364_v26  ;;  %v3402_v53 = vpop.xlane.xlu1 %3401  ;;  %v3405_v33 = vpop.xlane.xlu0 %3404 }
 0x465   : > { %6373 = vpow2.f32 %v5172_v1  ;;  %v3503_v45 = vadd.f32 %v8111_v40, %v3402_v53  ;;  %v3504_v11 = vadd.f32 %v8111_v40, %v3405_v33 }
 0x466   : > { %6375 = vrcp.f32 %v3642_v12 }
 0x467   : > { %v6366_v8 = vpop.eup %6365  ;;  %v5173_v50 = vmul.f32 -1.442695, %v3503_v45  ;;  %v5174_v62 = vmul.f32 -1.442695, %v3504_v11 }
 0x468   : > { %v6368_v38 = vpop.eup %6367  ;;  %v3641_v63 = vadd.f32 1.0, %v6366_v8  ;;  %v3408_v2 = vpop.xlane.xlu1 %3407 }
 0x469   : > { %v3411_v6 = vpop.xlane.xlu0 %3410  ;;  %v3643_v39 = vadd.f32 1.0, %v6368_v38  ;;  %6377 = vpow2.f32 %v5173_v50  ;;  %v3505_v42 = vadd.f32 %v8111_v40, %v3408_v2 }
 0x46a   : > { %v3506_v61 = vadd.f32 %v8111_v40, %v3411_v6  ;;  %6379 = vrcp.f32 %v3641_v63 }
 0x46b   : > { %v6370_v1 = vpop.eup %6369  ;;  %6381 = vrcp.f32 %v3643_v39  ;;  %v5175_v26 = vmul.f32 -1.442695, %v3505_v42 }
 0x46c   : > { %v6372_v53 = vpop.eup %6371  ;;  %v3644_v33 = vadd.f32 1.0, %v6370_v1  ;;  %6383 = vpow2.f32 %v5174_v62  ;;  %v5176_v12 = vmul.f32 -1.442695, %v3506_v61  ;;  %v3414_v45 = vpop.xlane.xlu1 %3413 }
 0x46d   : > { %v3417_v35 = vpop.xlane.xlu0 %3416  ;;  %v3645_v8 = vadd.f32 1.0, %v6372_v53  ;;  %6385 = vpow2.f32 %v5175_v26  ;;  %v3507_v11 = vadd.f32 %v8111_v40, %v3414_v45 }
 0x46e   : > { %v3508_v50 = vadd.f32 %v8111_v40, %v3417_v35  ;;  %6387 = vrcp.f32 %v3644_v33 }
 0x46f   : > { %v6374_v38 = vpop.eup %6373  ;;  %6389 = vrcp.f32 %v3645_v8  ;;  %v5177_v6 = vmul.f32 -1.442695, %v3507_v11 }
 0x470   : > { %v5178_v63 = vmul.f32 -1.442695, %v3508_v50  ;;  %v6376_v2 = vpop.eup %6375  ;;  %v3646_v39 = vadd.f32 1.0, %v6374_v38  ;;  %6391 = vpow2.f32 %v5176_v12 }
 0x471   : > { %v3423_v42 = vpop.xlane.xlu0 %3422  ;;  %6393 = vpow2.f32 %v5177_v6  ;;  %v3858_v61 = vmul.f32 %v6376_v2, %v7986_v24 }
 0x472   : > { %v3510_v62 = vadd.f32 %v8111_v40, %v3423_v42  ;;  %6395 = vrcp.f32 %v3646_v39  ;;  %v3420_v1 = vpop.xlane.xlu1 %3419 }
 0x473   : > { %v6378_v26 = vpop.eup %6377  ;;  %6397 = vpow2.f32 %v5178_v63  ;;  %v3509_v35 = vadd.f32 %v8111_v40, %v3420_v1  ;;  %3900 = vperm.xlu0 %6026, %v3858_v61  }
 0x474   : > { %v5180_v53 = vmul.f32 -1.442695, %v3510_v62  ;;  %v6380_v33 = vpop.eup %6379  ;;  %v3647_v45 = vadd.f32 1.0, %v6378_v26 }
 0x475   : > { %v3429_v8 = vpop.xlane.xlu0 %3428  ;;  %v6382_v11 = vpop.eup %6381  ;;  %v5179_v50 = vmul.f32 -1.442695, %v3509_v35  ;;  %v3857_v38 = vmul.f32 %v6380_v33, %v7960_v7 }
 0x476   : > { %6399 = vpow2.f32 %v5180_v53  ;;  %v3512_v12 = vadd.f32 %v8111_v40, %v3429_v8  ;;  %v6384_v6 = vpop.eup %6383  ;;  %v3426_v24 = vpop.xlane.xlu1 %3425  ;;  %v3859_v35 = vmul.f32 %v6382_v11, %v8010_v46 }
 0x477   : > { %6401 = vrcp.f32 %v3647_v45  ;;  %v6386_v2 = vpop.eup %6385  ;;  %v3648_v39 = vadd.f32 1.0, %v6384_v6  ;;  %v3511_v63 = vadd.f32 %v8111_v40, %v3426_v24  ;;  %3895 = vperm.xlu1 %6027, %v3857_v38  }
 0x478   : > { %6403 = vpow2.f32 %v5179_v50  ;;  %v6388_v42 = vpop.eup %6387  ;;  %v3649_v62 = vadd.f32 1.0, %v6386_v2  ;;  %v5182_v61 = vmul.f32 -1.442695, %v3512_v12 }
 0x479   : > { %v6390_v1 = vpop.eup %6389  ;;  %6405 = vrcp.f32 %v3648_v39  ;;  %v5181_v26 = vmul.f32 -1.442695, %v3511_v63  ;;  %v3860_v53 = vmul.f32 %v6388_v42, %v8017_v22 }
 0x47a   : > { %v6392_v7 = vpop.eup %6391  ;;  %6407 = vrcp.f32 %v3649_v62  ;;  %v3435_v33 = vpop.xlane.xlu1 %3434  ;;  %v3861_v46 = vmul.f32 %v6390_v1, %v8028_v37 }
 0x47b   : > { %v3432_v45 = vpop.xlane.xlu0 %3431  ;;  %v6394_v8 = vpop.eup %6393  ;;  %v3650_v6 = vadd.f32 1.0, %v6392_v7  ;;  %6409 = vpow2.f32 %v5181_v26  ;;  %v3514_v50 = vadd.f32 %v8111_v40, %v3435_v33  ;;  %3905 = vperm.xlu1 %6027, %v3859_v35   ;;  %3910 = vperm.xlu0 %6026, %v3860_v53  }
 0x47c   : > { %v3513_v38 = vadd.f32 %v8111_v40, %v3432_v45  ;;  %v6396_v12 = vpop.eup %6395  ;;  %v3651_v24 = vadd.f32 1.0, %v6394_v8  ;;  %6411 = vpow2.f32 %v5182_v61 }
 0x47d   : > { %v6398_v11 = vpop.eup %6397  ;;  %6413 = vrcp.f32 %v3650_v6  ;;  %v5184_v22 = vmul.f32 -1.442695, %v3514_v50  ;;  %v3862_v39 = vmul.f32 %v6396_v12, %v8036_v14 }
 0x47e   : > { %v5183_v2 = vmul.f32 -1.442695, %v3513_v38  ;;  %6415 = vrcp.f32 %v3651_v24  ;;  %v3652_v63 = vadd.f32 1.0, %v6398_v11  ;;  %v3438_v42 = vpop.xlane.xlu1 %3437 }
 0x47f   : > { %v3441_v62 = vpop.xlane.xlu0 %3440  ;;  %6417 = vpow2.f32 %v5184_v22  ;;  %v3515_v35 = vadd.f32 %v8111_v40, %v3438_v42  ;;  %3915 = vperm.xlu1 %6027, %v3861_v46   ;;  %3920 = vperm.xlu0 %6026, %v3862_v39  }
 0x480   : > { %v6400_v26 = vpop.eup %6399  ;;  %v3516_v53 = vadd.f32 %v8111_v40, %v3441_v62  ;;  %6419 = vrcp.f32 %v3652_v63 }
 0x481   : > { %v6402_v61 = vpop.eup %6401  ;;  %v3654_v37 = vadd.f32 1.0, %v6400_v26  ;;  %6421 = vpow2.f32 %v5183_v2  ;;  %v5185_v7 = vmul.f32 -1.442695, %v3515_v35 }
 0x482   : > { %v6404_v1 = vpop.eup %6403  ;;  %v5186_v33 = vmul.f32 -1.442695, %v3516_v53  ;;  %v3863_v14 = vmul.f32 %v6402_v61, %v8046_v3  ;;  %v3444_v8 = vpop.xlane.xlu1 %3443 }
 0x483   : > { %v3653_v45 = vadd.f32 1.0, %v6404_v1  ;;  %6423 = vrcp.f32 %v3654_v37  ;;  %v3447_v6 = vpop.xlane.xlu0 %3446  ;;  %v6406_v50 = vpop.eup %6405  ;;  %v3517_v38 = vadd.f32 %v8111_v40, %v3444_v8 }
 0x484   : > { %6425 = vpow2.f32 %v5185_v7  ;;  %v3518_v12 = vadd.f32 %v8111_v40, %v3447_v6  ;;  %3925 = vperm.xlu1 %6027, %v3863_v14   ;;  %v6408_v24 = vpop.eup %6407  ;;  %v3864_v46 = vmul.f32 %v6406_v50, %v8048_v32 }
 0x485   : > { %6427 = vrcp.f32 %v3653_v45  ;;  %v6410_v11 = vpop.eup %6409  ;;  %v5187_v22 = vmul.f32 -1.442695, %v3517_v38  ;;  %v3865_v3 = vmul.f32 %v6408_v24, %v8056_v55 }
 0x486   : > { %6429 = vpow2.f32 %v5186_v33  ;;  %v6412_v2 = vpop.eup %6411  ;;  %v3655_v39 = vadd.f32 1.0, %v6410_v11  ;;  %v5188_v63 = vmul.f32 -1.442695, %v3518_v12  ;;  %v3450_v42 = vpop.xlane.xlu1 %3449  ;;  %3930 = vperm.xlu0 %6026, %v3864_v46  }
 0x487   : > { %v3453_v62 = vpop.xlane.xlu0 %3452  ;;  %v6414_v26 = vpop.eup %6413  ;;  %v3656_v35 = vadd.f32 1.0, %v6412_v2  ;;  %6431 = vpow2.f32 %v5187_v22  ;;  %v3519_v53 = vadd.f32 %v8111_v40, %v3450_v42 }
 0x488   : > { %v3520_v61 = vadd.f32 %v8111_v40, %v3453_v62  ;;  %3935 = vperm.xlu1 %6027, %v3865_v3   ;;  %v6416_v32 = vpop.eup %6415  ;;  %6433 = vrcp.f32 %v3655_v39  ;;  %v3866_v37 = vmul.f32 %v6414_v26, %v8058_v21 }
 0x489   : > { %v6418_v1 = vpop.eup %6417  ;;  %6435 = vrcp.f32 %v3656_v35  ;;  %v5189_v55 = vmul.f32 -1.442695, %v3519_v53  ;;  %v3867_v33 = vmul.f32 %v6416_v32, %v8066_v54 }
 0x48a   : > { %v5190_v7 = vmul.f32 -1.442695, %v3520_v61  ;;  %v6420_v14 = vpop.eup %6419  ;;  %v3658_v45 = vadd.f32 1.0, %v6418_v1  ;;  %6437 = vpow2.f32 %v5188_v63  ;;  %v3456_v8 = vpop.xlane.xlu1 %3455  ;;  %3940 = vperm.xlu0 %6026, %v3866_v37  }
 0x48b   : > { %v3459_v6 = vpop.xlane.xlu0 %3458  ;;  %v6422_v50 = vpop.eup %6421  ;;  %6439 = vpow2.f32 %v5189_v55  ;;  %v3521_v38 = vadd.f32 %v8111_v40, %v3456_v8  ;;  %v3868_v21 = vmul.f32 %v6420_v14, %v8074_v25 }
 0x48c   : > { %v3522_v12 = vadd.f32 %v8111_v40, %v3459_v6  ;;  %3945 = vperm.xlu1 %6027, %v3867_v33   ;;  %6441 = vrcp.f32 %v3658_v45  ;;  %v3657_v46 = vadd.f32 1.0, %v6422_v50 }
 0x48d   : > { %v6424_v24 = vpop.eup %6423  ;;  %6443 = vpow2.f32 %v5190_v7  ;;  %v5191_v54 = vmul.f32 -1.442695, %v3521_v38 }
 0x48e   : > { %v6426_v11 = vpop.eup %6425  ;;  %v5192_v22 = vmul.f32 -1.442695, %v3522_v12  ;;  %6445 = vrcp.f32 %v3657_v46  ;;  %v3462_v39 = vpop.xlane.xlu1 %3461  ;;  %3950 = vperm.xlu0 %6026, %v3868_v21   ;;  %v3870_v42 = vmul.f32 %v6424_v24, %v8099_v44 }
 0x48f   : > { %v6428_v3 = vpop.eup %6427  ;;  %v3659_v2 = vadd.f32 1.0, %v6426_v11  ;;  %v3465_v63 = vpop.xlane.xlu0 %3464  ;;  %6447 = vpow2.f32 %v5191_v54  ;;  %v3523_v26 = vadd.f32 %v8111_v40, %v3462_v39 }
 0x490   : > { %v6430_v62 = vpop.eup %6429  ;;  %v3524_v25 = vadd.f32 %v8111_v40, %v3465_v63  ;;  %v3869_v35 = vmul.f32 %v6428_v3, %v8092_v16 }
 0x491   : > { %6449 = vrcp.f32 %v3659_v2  ;;  %v3660_v53 = vadd.f32 1.0, %v6430_v62  ;;  %v6432_v61 = vpop.eup %6431  ;;  %v5193_v32 = vmul.f32 -1.442695, %v3523_v26 }
 0x492   : > { %6451 = vpow2.f32 %v5192_v22  ;;  %v5194_v37 = vmul.f32 -1.442695, %v3524_v25  ;;  %3955 = vperm.xlu1 %6027, %v3869_v35   ;;  %v6434_v1 = vpop.eup %6433  ;;  %v3661_v55 = vadd.f32 1.0, %v6432_v61  ;;  %v3468_v7 = vpop.xlane.xlu1 %3467  ;;  %3960 = vperm.xlu0 %6026, %v3870_v42  }
 0x493   : > { %6453 = vrcp.f32 %v3660_v53  ;;  %v3471_v44 = vpop.xlane.xlu0 %3470  ;;  %v6436_v33 = vpop.eup %6435  ;;  %v3525_v14 = vadd.f32 %v8111_v40, %v3468_v7  ;;  %v3871_v16 = vmul.f32 %v6434_v1, %v8105_v9 }
 0x494   : > { %6455 = vpow2.f32 %v5193_v32  ;;  %v3526_v45 = vadd.f32 %v8111_v40, %v3471_v44  ;;  %v6438_v8 = vpop.eup %6437  ;;  %v3872_v6 = vmul.f32 %v6436_v33, %v8107_v19 }
 0x495   : > { %6457 = vrcp.f32 %v3661_v55  ;;  %v6440_v50 = vpop.eup %6439  ;;  %v3662_v38 = vadd.f32 1.0, %v6438_v8  ;;  %v5195_v12 = vmul.f32 -1.442695, %v3525_v14 }
 0x496   : > { %6459 = vpow2.f32 %v5194_v37  ;;  %3965 = vperm.xlu1 %6027, %v3871_v16   ;;  %v6442_v21 = vpop.eup %6441  ;;  %v3663_v24 = vadd.f32 1.0, %v6440_v50  ;;  %3970 = vperm.xlu0 %6026, %v3872_v6   ;;  %v5196_v11 = vmul.f32 -1.442695, %v3526_v45 }
 0x497   : > { %v6444_v46 = vpop.eup %6443  ;;  %6461 = vrcp.f32 %v3662_v38  ;;  %v3477_v54 = vpop.xlane.xlu0 %3476  ;;  %v3874_v22 = vmul.f32 %v6442_v21, %v7969_v60 }
 0x498   : > { %v6446_v3 = vpop.eup %6445  ;;  %6463 = vrcp.f32 %v3663_v24  ;;  %v3664_v9 = vadd.f32 1.0, %v6444_v46  ;;  %v3528_v2 = vadd.f32 %v8111_v40, %v3477_v54 }
 0x499   : > { %v6448_v19 = vpop.eup %6447  ;;  %6465 = vpow2.f32 %v5195_v12  ;;  %v3873_v39 = vmul.f32 %v6446_v3, %v7939_v47 }
 0x49a   : > { %3980 = vperm.xlu1 %6027, %v3874_v22   ;;  %6467 = vrcp.f32 %v3664_v9  ;;  %v3665_v42 = vadd.f32 1.0, %v6448_v19  ;;  %v5198_v62 = vmul.f32 -1.442695, %v3528_v2  ;;  %v3820_v9 = vpop.permute.xlu1 %3819 }
 0x49b   : > { %v6450_v63 = vpop.eup %6449  ;;  %6469 = vpow2.f32 %v5196_v11  ;;  %3975 = vperm.xlu0 %6026, %v3873_v39   ;;  %v3818_v2 = vpop.permute.xlu0 %3817 }
 0x49c   : > { %v6452_v26 = vpop.eup %6451  ;;  %v3875_v25 = vmul.f32 %v6450_v63, %v7990_v20  ;;  %6471 = vrcp.f32 %v3665_v42 }
 0x49d   : > { %v6454_v60 = vpop.eup %6453  ;;  %v3666_v35 = vadd.f32 1.0, %v6452_v26  ;;  %6473 = vpow2.f32 %v5198_v62 }
 0x49e   : > { %v6456_v53 = vpop.eup %6455  ;;  %3985 = vperm.xlu1 %6027, %v3875_v25   ;;  %v3876_v61 = vmul.f32 %v6454_v60, %v8006_v0 }
 0x49f   : > { %v6458_v32 = vpop.eup %6457  ;;  %6475 = vrcp.f32 %v3666_v35  ;;  %v3667_v47 = vadd.f32 1.0, %v6456_v53 }
 0x4a0   : > { %v6460_v37 = vpop.eup %6459  ;;  %3990 = vperm.xlu0 %6026, %v3876_v61   ;;  %v3877_v1 = vmul.f32 %v6458_v32, %v8021_v59 }
 0x4a1   : > { %6477 = vrcp.f32 %v3667_v47  ;;  %v3668_v55 = vadd.f32 1.0, %v6460_v37  ;;  %v6462_v7 = vpop.eup %6461 }
 0x4a2   : > { %3995 = vperm.xlu1 %6027, %v3877_v1   ;;  %v6464_v20 = vpop.eup %6463  ;;  %v3878_v44 = vmul.f32 %v6462_v7, %v8026_v27 }
 0x4a3   : > { %6479 = vrcp.f32 %v3668_v55  ;;  %v6466_v33 = vpop.eup %6465  ;;  %v3879_v14 = vmul.f32 %v6464_v20, %v8040_v23 }
 0x4a4   : > { %v6468_v45 = vpop.eup %6467  ;;  %v3669_v0 = vadd.f32 1.0, %v6466_v33  ;;  %4000 = vperm.xlu0 %6026, %v3878_v44  }
 0x4a5   : > { %v6470_v16 = vpop.eup %6469  ;;  %v3880_v8 = vmul.f32 %v6468_v45, %v8044_v15 }
 0x4a6   : > { %4005 = vperm.xlu1 %6027, %v3879_v14   ;;  %v6472_v6 = vpop.eup %6471  ;;  %6481 = vrcp.f32 %v3669_v0  ;;  %v3670_v59 = vadd.f32 1.0, %v6470_v16 }
 0x4a7   : > { %v6474_v50 = vpop.eup %6473  ;;  %v3881_v38 = vmul.f32 %v6472_v6, %v8050_v36 }
 0x4a8   : > { %6483 = vrcp.f32 %v3670_v59  ;;  %v3672_v21 = vadd.f32 1.0, %v6474_v50  ;;  %4010 = vperm.xlu0 %6026, %v3880_v8  }
 0x4a9   : > { %v6476_v12 = vpop.eup %6475 }
 0x4aa   : > { %4015 = vperm.xlu1 %6027, %v3881_v38   ;;  %v3882_v23 = vmul.f32 %v6476_v12, %v8054_v18  ;;  %6485 = vrcp.f32 %v3672_v21 }
 0x4ab   : > { %v6478_v27 = vpop.eup %6477 }
 0x4ac   : > { %v3883_v24 = vmul.f32 %v6478_v27, %v8060_v57  ;;  %4020 = vperm.xlu0 %6026, %v3882_v23  }
 0x4ad   : > { %v6480_v46 = vpop.eup %6479 }
 0x4ae   : > { %4025 = vperm.xlu1 %6027, %v3883_v24   ;;  %v3884_v15 = vmul.f32 %v6480_v46, %v8064_v4 }
 0x4b0   : > { %v6482_v11 = vpop.eup %6481  ;;  %4030 = vperm.xlu0 %6026, %v3884_v15  }
 0x4b1   : > { %v3885_v36 = vmul.f32 %v6482_v11, %v8076_v43 }
 0x4b2   : > { %v6484_v54 = vpop.eup %6483 }
 0x4b3   : > { %4035 = vperm.xlu1 %6027, %v3885_v36   ;;  %v3886_v22 = vmul.f32 %v6484_v54, %v8087_v48 }
 0x4b4   : > { %v6486_v3 = vpop.eup %6485 }
 0x4b5   : > { %4040 = vperm.xlu0 %6026, %v3886_v22   ;;  %v3888_v18 = vmul.f32 %v6486_v3, %v8103_v49 }
 0x4b9   : > { %4050 = vperm.xlu0 %6026, %v3888_v18  }
 0x4c7   : > { %v3474_v57 = vpop.xlane.xlu1 %3473 }
 0x4c8   : > { %v3527_v19 = vadd.f32 %v8111_v40, %v3474_v57 }
 0x4ca   : > { %v5197_v39 = vmul.f32 -1.442695, %v3527_v19 }
 0x4cb   : > { %v3480_v4 = vpop.xlane.xlu1 %3479 }
 0x4cc   : > { %6487 = vpow2.f32 %v5197_v39  ;;  %v3529_v63 = vadd.f32 %v8111_v40, %v3480_v4  ;;  %v3483_v43 = vpop.xlane.xlu0 %3482  ;;  %v8573_v4 = vld [vmem:[#allocation11_spill] sm:$0xff] }
 0x4cd   : > { %v3530_v42 = vadd.f32 %v8111_v40, %v3483_v43  ;;  %v8576_v43 = vld [vmem:[#allocation41_spill] sm:$0xff] }
 0x4ce   : > { %v5199_v62 = vmul.f32 -1.442695, %v3529_v63 }
 0x4cf   : > { %v5200_v48 = vmul.f32 -1.442695, %v3530_v42  ;;  %v3486_v26 = vpop.xlane.xlu1 %3485 }
 0x4d0   : > { %6489 = vpow2.f32 %v5199_v62  ;;  %v3531_v49 = vadd.f32 %v8111_v40, %v3486_v26  ;;  %v3489_v25 = vpop.xlane.xlu0 %3488  ;;  %v8577_v62 = vld [vmem:[#allocation55_spill] sm:$0xff] }
 0x4d1   : > { %6491 = vpow2.f32 %v5200_v48  ;;  %v3532_v60 = vadd.f32 %v8111_v40, %v3489_v25  ;;  %v8579_v25 = vld [vmem:[#allocation42_spill] sm:$0xff] }
 0x4d2   : > { %v5201_v35 = vmul.f32 -1.442695, %v3531_v49  ;;  %v8578_v49 = vld [vmem:[#allocation43_spill] sm:$0xff] }
 0x4d3   : > { %v5202_v53 = vmul.f32 -1.442695, %v3532_v60 }
 0x4d4   : > { %6493 = vpow2.f32 %v5201_v35 }
 0x4d5   : > { %6495 = vpow2.f32 %v5202_v53  ;;  %v8582_v53 = vld [vmem:[#allocation27_spill] sm:$0xff] }
 0x4d6   : > { %v6488_v61 = vpop.eup %6487 }
 0x4d7   : > { %v3671_v32 = vadd.f32 1.0, %v6488_v61 }
 0x4d9   : > { %6497 = vrcp.f32 %v3671_v32 }
 0x4da   : > { %v6490_v47 = vpop.eup %6489 }
 0x4db   : > { %v6492_v37 = vpop.eup %6491  ;;  %v3673_v1 = vadd.f32 1.0, %v6490_v47 }
 0x4dc   : > { %v3674_v55 = vadd.f32 1.0, %v6492_v37 }
 0x4dd   : > { %6499 = vrcp.f32 %v3673_v1  ;;  %v8584_v1 = vld [vmem:[#allocation57_spill] sm:$0xff] }
 0x4de   : > { %v6494_v7 = vpop.eup %6493  ;;  %6501 = vrcp.f32 %v3674_v55 }
 0x4df   : > { %v6496_v20 = vpop.eup %6495  ;;  %v3675_v44 = vadd.f32 1.0, %v6494_v7  ;;  %v8585_v7 = vld [vmem:[#allocation45_spill] sm:$0xff] }
 0x4e0   : > { %v3676_v33 = vadd.f32 1.0, %v6496_v20 }
 0x4e1   : > { %6503 = vrcp.f32 %v3675_v44  ;;  %v8586_v44 = vld [vmem:[#allocation44_spill] sm:$0xff] }
 0x4e2   : > { %6505 = vrcp.f32 %v3676_v33 }
 0x4e3   : > { %v6498_v40 = vpop.eup %6497 }
 0x4e4   : > { %v3887_v14 = vmul.f32 %v6498_v40, %v8101_v41 }
 0x4e6   : > { %4045 = vperm.xlu1 %6027, %v3887_v14   ;;  %v8587_v14 = vld [vmem:[#allocation13_spill] sm:$0xff] }
 0x4e7   : > { %v6500_v45 = vpop.eup %6499 }
 0x4e8   : > { %v6502_v0 = vpop.eup %6501  ;;  %v3889_v16 = vmul.f32 %v6500_v45, %v8109_v13  ;;  %v8588_v45 = vld [vmem:[#allocation28_spill] sm:$0xff] }
 0x4e9   : > { %v3890_v8 = vmul.f32 %v6502_v0, %v8113_v10  ;;  %v8589_v0 = vpack.i.bf16 %v8587_v14, %v8588_v45  ;;  %v8616_v14 = vld [vmem:[#allocation53_spill] sm:$0xff]  ;;  %v8617_v45 = vld [vmem:[#allocation52_spill] sm:$0xff] }
 0x4ea   : > { %4055 = vperm.xlu1 %6027, %v3889_v16   ;;  %v8590_v16 = vld [vmem:[#allocation56_spill] sm:$0xff] }
 0x4eb   : > { %v6504_v6 = vpop.eup %6503  ;;  %4060 = vperm.xlu0 %6026, %v3890_v8  }
 0x4ec   : > { %v6506_v59 = vpop.eup %6505  ;;  %v3891_v50 = vmul.f32 %v6504_v6, %v3818_v2 }
 0x4ed   : > { %v3892_v38 = vmul.f32 %v6506_v59, %v3820_v9 }
 0x4ee   : > { %4065 = vperm.xlu1 %6027, %v3891_v50   ;;  %v8591_v50 = vld [vmem:[#allocation59_spill] sm:$0xff] }
 0x4ef   : > { %4070 = vperm.xlu0 %6026, %v3892_v38  }
 0x4f2   : > { %v3901_v12 = vpop.permute.xlu0 %3900 }
 0x4f6   : > { %v3896_v21 = vpop.permute.xlu1 %3895 }
 0x4fa   : > { %v3906_v23 = vpop.permute.xlu1 %3905  ;;  %v3911_v27 = vpop.permute.xlu0 %3910 }
 0x4fe   : > { %v3916_v41 = vpop.permute.xlu1 %3915  ;;  %v3921_v24 = vpop.permute.xlu0 %3920 }
 0x4ff   : > { %v4077_v20 = vmul.f32 %v3916_v41, %v8585_v7  ;;  %v4078_v33 = vmul.f32 %v3921_v24, %v8586_v44  ;;  %v8594_v24 = vld [vmem:[#allocation14_spill] sm:$0xff] }
 0x503   : > { %v3926_v46 = vpop.permute.xlu1 %3925 }
 0x505   : > { %v3931_v15 = vpop.permute.xlu0 %3930 }
 0x507   : > { %v3936_v11 = vpop.permute.xlu1 %3935 }
 0x509   : > { %v3941_v13 = vpop.permute.xlu0 %3940 }
 0x50b   : > { %v8185_v36 = vpop.permute.xlu1 %3945 }
 0x50d   : > { %4176 = vxpose.xlu0.b32.start [1/4] (short) (narrow) %v7097_v17, 24  ;;  %v8188_v10 = vpop.permute.xlu0 %3950  ;;  %v8572_v17 = vpack.i.bf16 %v6861_v34, %v6970_v5  ;;  %v4074_v34 = vmul.f32 %v3901_v12, %v8576_v43  ;;  %v5839_v12 = vpack.c.bf16 %v4078_v33, %v4077_v20  ;;  %v8612_v20 = vld [vmem:[#allocation65_spill] sm:$0xff] }
 0x50e   : > { %v8613_v33 = vld [vmem:[#allocation17_spill] sm:$0xff] }
 0x511   : > { %v8190_v54 = vpop.permute.xlu1 %3955  ;;  %4177 = vxpose.xlu0.b32.cont [2/4] (short) (narrow) %v7106_v29, 24  ;;  %v8193_v22 = vpop.permute.xlu0 %3960 }
 0x515   : > { %v3966_v3 = vpop.permute.xlu1 %3965  ;;  %4178 = vxpose.xlu0.b32.cont [3/4] (short) (narrow) %v7109_v30, 24  ;;  %v3971_v9 = vpop.permute.xlu0 %3970 }
 0x516   : > { %v8196_v18 = vmul.f32 %v3966_v3, %v7893_v58  ;;  %v8200_v57 = vmul.f32 %v3971_v9, %v7878_v56  ;;  %v4073_v58 = vmul.f32 %v3896_v21, %v7744_v52  ;;  %v8574_v56 = vld [vmem:[#allocation26_spill] sm:$0xff]  ;;  %v8592_v21 = vld [vmem:[#allocation47_spill] sm:$0xff]  ;;  %v8595_v9 = vld [vmem:[#allocation29_spill] sm:$0xff] }
 0x517   : > { %6029 = vxpose.xlu1.b32.start [1/16] (narrow) %v8572_v17, 24  ;;  %v8575_v63 = vpack.i.bf16 %v8573_v4, %v8574_v56  ;;  %v8580_v52 = vld [vmem:[#allocation54_spill] sm:$0xff]  ;;  %v8596_v17 = vpack.i.bf16 %v8594_v24, %v8595_v9  ;;  %v8628_v24 = vld [vmem:[#allocation21_spill] sm:$0xff]  ;;  %v8629_v9 = vld [vmem:[#allocation36_spill] sm:$0xff] }
 0x518   : > { %v5859_v2 = vpack.c.bf16 %v8200_v57, %v8196_v18  ;;  %v5831_v26 = vpack.c.bf16 %v4074_v34, %v4073_v58  ;;  %v8600_v34 = vld [vmem:[#allocation48_spill] sm:$0xff] }
 0x519   : > { %v3981_v29 = vpop.permute.xlu1 %3980  ;;  %4179 = vxpose.xlu0.b32.end [4/4] (short) (narrow) %v7120_v51, 24  ;;  %v4076_v51 = vmul.f32 %v3911_v27, %v8579_v25  ;;  %v8593_v27 = vld [vmem:[#allocation46_spill] sm:$0xff]  ;;  %v8605_v25 = vld [vmem:[#allocation63_spill] sm:$0xff] }
 0x51a   : > { %v4090_v19 = vmul.f32 %v3981_v29, %v7898_v28  ;;  %v3976_v39 = vpop.permute.xlu0 %3975  ;;  %v4075_v28 = vmul.f32 %v3906_v23, %v8578_v49  ;;  %v4079_v23 = vmul.f32 %v3926_v46, %v8592_v21  ;;  %v4080_v41 = vmul.f32 %v3931_v15, %v8593_v27  ;;  %v8597_v29 = vld [vmem:[#allocation58_spill] sm:$0xff]  ;;  %v8601_v15 = vld [vmem:[#allocation15_spill] sm:$0xff] }
 0x51b   : > { %v4089_v30 = vmul.f32 %v3976_v39, %v7912_v31  ;;  %6031 = vxpose.xlu1.b32.cont [2/16] (narrow) %v8575_v63, 24  ;;  %v8581_v31 = vld [vmem:[#allocation12_spill] sm:$0xff]  ;;  %v8599_v63 = vld [vmem:[#allocation49_spill] sm:$0xff]  ;;  %v4082_v46 = vmul.f32 %v3941_v13, %v8600_v34  ;;  %v8623_v27 = vld [vmem:[#allocation34_spill] sm:$0xff] }
 0x51c   : > { %v8583_v61 = vpack.i.bf16 %v8581_v31, %v8582_v53  ;;  %v5835_v37 = vpack.c.bf16 %v4076_v51, %v4075_v28  ;;  %v5843_v56 = vpack.c.bf16 %v4080_v41, %v4079_v23  ;;  %v4081_v43 = vmul.f32 %v3936_v11, %v8599_v63  ;;  %v8607_v11 = vld [vmem:[#allocation50_spill] sm:$0xff]  ;;  %v8608_v53 = vld [vmem:[#allocation16_spill] sm:$0xff]  ;;  %v8622_v23 = vld [vmem:[#allocation19_spill] sm:$0xff] }
 0x51d   : > { %v3986_v5 = vpop.permute.xlu1 %3985  ;;  %v5829_v42 = vpack.c.bf16 %v4090_v19, %v4089_v30  ;;  %v8598_v30 = vld [vmem:[#allocation61_spill] sm:$0xff]  ;;  %v4084_v13 = vmul.f32 %v8188_v10, %v8607_v11  ;;  %v4085_v10 = vmul.f32 %v8190_v54, %v8616_v14  ;;  %v8624_v41 = vpack.i.bf16 %v8622_v23, %v8623_v27  ;;  %v8625_v54 = vld [vmem:[#allocation20_spill] sm:$0xff]  ;;  %v8638_v63 = vld [vmem:[#allocation39_spill] sm:$0xff] }
 0x51e   : > { %v4091_v48 = vmul.f32 %v3986_v5, %v8577_v62  ;;  %v8640_v34 = vld [vmem:[#allocation25_spill] sm:$0xff]  ;;  %v4109_v27 = vld [vmem:[#allocation4] sm:$0xff] }
 0x51f   : > { %v3991_v60 = vpop.permute.xlu0 %3990  ;;  %5830 = vmatprep.subr.bf16.mxu1 %v5829_v42  ;;  %6033 = vxpose.xlu1.b32.cont [3/16] (narrow) %v8583_v61, 24  ;;  %v8602_v42 = vld [vmem:[#allocation30_spill] sm:$0xff]  ;;  %v8609_v61 = vld [vmem:[#allocation31_spill] sm:$0xff] }
 0x520   : > { %v4092_v35 = vmul.f32 %v3991_v60, %v8580_v52  ;;  %5832 = vmatpush3.bf16.msra.mxu1 %v5831_v26  ;;  %v8603_v62 = vpack.i.bf16 %v8601_v15, %v8602_v42  ;;  %v5847_v60 = vpack.c.bf16 %v4082_v46, %v4081_v43  ;;  %v8606_v52 = vld [vmem:[#allocation51_spill] sm:$0xff]  ;;  %v8641_v46 = vld [vmem:[#allocation40_spill] sm:$0xff] }
 0x521   : > { %v3996_v32 = vpop.permute.xlu1 %3995 }
 0x522   : > { %v5833_v47 = vpack.c.bf16 %v4092_v35, %v4091_v48  ;;  %v4093_v55 = vmul.f32 %v3996_v32, %v8584_v1  ;;  %v8604_v48 = vld [vmem:[#allocation60_spill] sm:$0xff]  ;;  %v4083_v35 = vmul.f32 %v8185_v36, %v8606_v52  ;;  %v8610_v32 = vpack.i.bf16 %v8608_v53, %v8609_v61 }
 0x523   : > { %v4001_v40 = vpop.permute.xlu0 %4000  ;;  %6035 = vxpose.xlu1.b32.cont [4/16] (narrow) %v8589_v0, 24  ;;  %v4086_v0 = vmul.f32 %v8193_v22, %v8617_v45 }
 0x524   : > { %5834 = vmatprep.subr.bf16.mxu1 %v5833_v47  ;;  %v4094_v8 = vmul.f32 %v4001_v40, %v8590_v16  ;;  %v8611_v47 = vld [vmem:[#allocation62_spill] sm:$0xff]  ;;  %v5851_v7 = vpack.c.bf16 %v4084_v13, %v4083_v35  ;;  %v8614_v40 = vld [vmem:[#allocation32_spill] sm:$0xff]  ;;  %v8646_v13 = vld [vmem:[#allocation69_spill] sm:$0xff] }
 0x525   : > { %5836 = vmatpush3.bf16.msra.mxu1 %v5835_v37  ;;  %v4006_v6 = vpop.permute.xlu1 %4005  ;;  %v8615_v36 = vpack.i.bf16 %v8613_v33, %v8614_v40  ;;  %v5855_v21 = vpack.c.bf16 %v4086_v0, %v4085_v10  ;;  %v8645_v35 = vld [vmem:[#allocation68_spill] sm:$0xff]  ;;  %v8649_v10 = vmov 0.0  }
 0x526   : > { %v5837_v59 = vpack.c.bf16 %v4094_v8, %v4093_v55  ;;  %v4095_v38 = vmul.f32 %v4006_v6, %v8591_v50  ;;  %v8618_v8 = vld [vmem:[#allocation64_spill] sm:$0xff]  ;;  %v8619_v50 = vld [vmem:[#allocation18_spill] sm:$0xff] }
 0x527   : > { %v4011_v3 = vpop.permute.xlu0 %4010  ;;  %6037 = vxpose.xlu1.b32.cont [5/16] (narrow) %v8596_v17, 24  ;;  %v8630_v17 = vpack.i.bf16 %v8628_v24, %v8629_v9  ;;  %v4110_v24 = vld [vmem:[#allocation4 + $0x8] sm:$0xff] }
 0x528   : > { %v4096_v19 = vmul.f32 %v4011_v3, %v8597_v29  ;;  %5838 = vmatprep.subr.bf16.mxu1 %v5837_v59  ;;  %v8626_v3 = vld [vmem:[#allocation35_spill] sm:$0xff]  ;;  %v8631_v29 = vld [vmem:[#allocation22_spill] sm:$0xff] }
 0x529   : > { %v4016_v58 = vpop.permute.xlu1 %4015  ;;  %5840 = vmatpush3.bf16.msra.mxu1 %v5839_v12  ;;  %v8627_v22 = vpack.i.bf16 %v8625_v54, %v8626_v3 }
 0x52a   : > { %v5841_v39 = vpack.c.bf16 %v4096_v19, %v4095_v38  ;;  %v4097_v4 = vmul.f32 %v4016_v58, %v8598_v30  ;;  %v8620_v38 = vld [vmem:[#allocation33_spill] sm:$0xff]  ;;  %v8635_v30 = vld [vmem:[#allocation38_spill] sm:$0xff] }
 0x52b   : > { %v4021_v5 = vpop.permute.xlu0 %4020  ;;  %6039 = vxpose.xlu1.b32.cont [6/16] (narrow) %v8603_v62, 24  ;;  %v8621_v12 = vpack.i.bf16 %v8619_v50, %v8620_v38  ;;  %v8632_v19 = vld [vmem:[#allocation37_spill] sm:$0xff]  ;;  %v8643_v62 = vld [vmem:[#allocation66_spill] sm:$0xff] }
 0x52c   : > { %v4098_v26 = vmul.f32 %v4021_v5, %v8604_v48  ;;  %5842 = vmatprep.subr.bf16.mxu1 %v5841_v39  ;;  %v8633_v58 = vpack.i.bf16 %v8631_v29, %v8632_v19  ;;  %v8634_v39 = vld [vmem:[#allocation23_spill] sm:$0xff]  ;;  %v8642_v5 = vpack.i.bf16 %v8640_v34, %v8641_v46  ;;  %v6572_v46 = vmov (!%p5206_p8), 0.0|0.0  }
 0x52d   : > { %v4026_v49 = vpop.permute.xlu1 %4025  ;;  %5844 = vmatpush3.bf16.msra.mxu1 %v5843_v56  ;;  %v8637_v56 = vld [vmem:[#allocation24_spill] sm:$0xff]  ;;  %5867 = vmatprep.subr.bf16.mxu0 (!%p5206_p8), %v6572_v46 }
 0x52e   : > { %v5845_v28 = vpack.c.bf16 %v4098_v26, %v4097_v4  ;;  %v4099_v51 = vmul.f32 %v4026_v49, %v8605_v25  ;;  %v8636_v4 = vpack.i.bf16 %v8634_v39, %v8635_v30  ;;  %v8639_v43 = vpack.i.bf16 %v8637_v56, %v8638_v63  ;;  %v8644_v26 = vld [vmem:[#allocation67_spill] sm:$0xff]  ;;  %v4400_v63 = vld [vmem:[%s8425_s13] sm:$0xff] (!%p5206_p8) }
 0x52f   : > { %v4031_v31 = vpop.permute.xlu0 %4030  ;;  %6041 = vxpose.xlu1.b32.cont [7/16] (narrow) %v8610_v32, 24  ;;  %v6570_v25 = vmov 0.0|0.0   ;;  %v4402_v34 = vld [vmem:[%s8425_s13 + $0x10] sm:$0xff] (!%p5206_p8) }
 0x530   : > { %v4100_v37 = vmul.f32 %v4031_v31, %v8611_v47  ;;  %5846 = vmatprep.subr.bf16.mxu1 %v5845_v28 }
 0x531   : > { %5848 = vmatpush3.bf16.msra.mxu1 %v5847_v60 }
 0x532   : > { %v5849_v1 = vpack.c.bf16 %v4100_v37, %v4099_v51  ;;  %v4036_v55 = vpop.permute.xlu1 %4035 }
 0x533   : > { %v4101_v44 = vmul.f32 %v4036_v55, %v8612_v20  ;;  %6043 = vxpose.xlu1.b32.cont [8/16] (narrow) %v8615_v36, 24 }
 0x534   : > { %v4041_v16 = vpop.permute.xlu0 %4040  ;;  %5850 = vmatprep.subr.bf16.mxu1 %v5849_v1  ;;  %v8647_v1 = vld [vmem:[#allocation70_spill] sm:$0xff] }
 0x535   : > { %v4102_v6 = vmul.f32 %v4041_v16, %v8618_v8  ;;  %5852 = vmatpush3.bf16.msra.mxu1 %v5851_v7  ;;  %v8648_v7 = vld [vmem:[#allocation71_spill] sm:$0xff] }
 0x537   : > { %v5853_v59 = vpack.c.bf16 %v4102_v6, %v4101_v44  ;;  %6045 = vxpose.xlu1.b32.cont [9/16] (narrow) %v8621_v12, 24 }
 0x538   : > { %v4051_v15 = vpop.permute.xlu0 %4050 }
 0x539   : > { %5854 = vmatprep.subr.bf16.mxu1 %v5853_v59  ;;  %v4104_v48 = vmul.f32 %v4051_v15, %v8643_v62  ;;  %v4403_v15 = vld [vmem:[%s8425_s13 + $0x18] sm:$0xff] (!%p5206_p8) }
 0x53a   : > { %5856 = vmatpush3.bf16.msra.mxu1 %v5855_v21  ;;  %v5871_v62 = vpack.c.bf16 (!%p5206_p8), %v4403_v15, %v4402_v34  ;;  %v5220_v15 = vld [vmem:[%s8654_s11] ss:$0 sm:$0xff] (!%p5206_p8) }
 0x53b   : > { %6047 = vxpose.xlu1.b32.cont [10/16] (narrow) %v8624_v41, 24 }
 0x53f   : > { %6049 = vxpose.xlu1.b32.cont [11/16] (narrow) %v8627_v22, 24 }
 0x543   : > { %6051 = vxpose.xlu1.b32.cont [12/16] (narrow) %v8630_v17, 24 }
 0x547   : > { %6053 = vxpose.xlu1.b32.cont [13/16] (narrow) %v8633_v58, 24  ;;  %v4111_v58 = vld [vmem:[#allocation4 + $0x10] sm:$0xff] }
 0x54b   : > { %6055 = vxpose.xlu1.b32.cont [14/16] (narrow) %v8636_v4, 24 }
 0x54f   : > { %6057 = vxpose.xlu1.b32.cont [15/16] (narrow) %v8639_v43, 24  ;;  %v4401_v43 = vld [vmem:[%s8425_s13 + $0x8] sm:$0xff] (!%p5206_p8) }
 0x553   : > { %6059 = vxpose.xlu1.b32.end [16/16] (narrow) %v8642_v5, 24  ;;  %v5868_v5 = vpack.c.bf16 (!%p5206_p8), %v4401_v43, %v4400_v63 }
 0x555   : > { %5869 = vmatpush3.bf16.msra.mxu0 (!%p5206_p8), %v5868_v5 }
 0x556   : > { %5870 = vmatprep.subr.bf16.mxu0 (!%p5206_p8), %v6572_v46 }
 0x559   : > { %5872 = vmatpush3.bf16.msra.mxu0 (!%p5206_p8), %v5871_v62 }
 0x55a   : > { %5879 = vmatprep.subr.bf16.mxu0 (!%p5206_p8), %v6572_v46 }
 0x565   : > { %v4046_v42 = vpop.permute.xlu1 %4045 }
 0x566   : > { %v4103_v49 = vmul.f32 %v4046_v42, %v8644_v26  ;;  %v6574_v42 = vmov (!%p5206_p8), 0.0  }
 0x567   : > { %5758 = vmatprep.mubr.msk.f32.mxu0 (!%p5206_p8), %vm6573_vm4, %v6574_v42 }
 0x568   : > { %v5857_v28 = vpack.c.bf16 %v4104_v48, %v4103_v49  ;;  %v4396_v49 = vld [vmem:[%s8650_s25] sm:$0xff] (!%p5206_p8) }
 0x569   : > { %v4056_v51 = vpop.permute.xlu1 %4055 }
 0x56a   : > { %5858 = vmatprep.subr.bf16.mxu1 %v5857_v28  ;;  %v4061_v60 = vpop.permute.xlu0 %4060  ;;  %v4105_v11 = vmul.f32 %v4056_v51, %v8645_v35  ;;  %v4397_v28 = vld [vmem:[%s8650_s25 + $0x8] sm:$0xff] (!%p5206_p8)  ;;  %v4398_v35 = vld [vmem:[%s8650_s25 + $0x10] sm:$0xff] (!%p5206_p8) }
 0x56b   : > { %5860 = vmatpush3.bf16.msra.mxu1 %v5859_v2  ;;  %v4106_v31 = vmul.f32 %v4061_v60, %v8646_v13  ;;  %v5874_v60 = vpack.c.bf16 (!%p5206_p8), %v4397_v28, %v4396_v49 }
 0x56c   : > { %5861 = vmatprep.subr.bf16.mxu1 %v6570_v25 }
 0x56d   : > { %v4066_v52 = vpop.permute.xlu1 %4065  ;;  %v5862_v37 = vpack.c.bf16 %v4106_v31, %v4105_v11  ;;  %v4399_v11 = vld [vmem:[%s8650_s25 + $0x18] sm:$0xff] (!%p5206_p8) }
 0x56e   : > { %v4071_v53 = vpop.permute.xlu0 %4070  ;;  %v4107_v55 = vmul.f32 %v4066_v52, %v8647_v1  ;;  %v5877_v31 = vpack.c.bf16 (!%p5206_p8), %v4399_v11, %v4398_v35 }
 0x56f   : > { %v4108_v20 = vmul.f32 %v4071_v53, %v8648_v7  ;;  %v8340_v53 = vld [vmem:[%s6705_s24] sm:$0xff] (!%p5206_p8)  ;;  %v4616_v7 = vld [vmem:[%s8652_s12 + $0x18] sm:$0xff] (!%p5206_p8) }
 0x571   : > { %v5865_v44 = vpack.c.bf16 %v4108_v20, %v4107_v55  ;;  %v4615_v55 = vld [vmem:[%s8652_s12 + $0x10] sm:$0xff] (!%p5206_p8) }
 0x572   : > { %v5883_v20 = vpack.c.bf16 (!%p5206_p8), %v4616_v7, %v4615_v55 }
 0x58d   : > { %v4192_v14 = vpop.trf.xlu0 }
 0x591   : > { %v4193_v45 = vpop.trf.xlu0 }
 0x595   : > { %v4194_v0 = vpop.trf.xlu0 }
 0x597   : > { %v6060_v61 = vpop.trf.xlu1 }
 0x598   : > { %v6064_v32 = vunpack.i.h.bf16 %v6060_v61  ;;  %v6061_v47 = vunpack.i.l.bf16 %v6060_v61  ;;  %v8349_v61 = vld [vmem:[%s6705_s24 + $0x8] sm:$0xff] (!%p5206_p8) }
 0x59a   : > { %4281 = vmatprep.mubr.f32.mxu1 %v6061_v47  ;;  %v4613_v47 = vld [vmem:[%s8651_s0] sm:$0xff] (!%p5206_p8) }
 0x59b   : > { %v6065_v18 = vpop.trf.xlu1  ;;  %4282 = vmatmul.mubr.f32.vlgmr.msra.gmra.mrb[66].mxu1 %v6064_v32  ;;  %v8356_v32 = vld [vmem:[%s6705_s24 + $0x10] sm:$0xff] (!%p5206_p8) }
 0x59c   : > { %5863 = vmatpush3.bf16.msra.mxu1 %v5862_v37  ;;  %v6066_v57 = vunpack.i.l.bf16 %v6065_v18  ;;  %v6069_v2 = vunpack.i.h.bf16 %v6065_v18  ;;  %v4614_v37 = vld [vmem:[%s8652_s12 + $0x8] sm:$0xff] (!%p5206_p8)  ;;  %v4719_v18 = vld [vmem:[%s6720_s27] sm:$0xff] (!%p5206_p8) }
 0x59d   : > { %5864 = vmatprep.subr.bf16.mxu1 %v6570_v25  ;;  %v5880_v1 = vpack.c.bf16 (!%p5206_p8), %v4614_v37, %v4613_v47 }
 0x59e   : > { %4286 = vmatprep.mubr.f32.mxu1 %v6066_v57  ;;  %v4721_v57 = vld [vmem:[%s6720_s27 + $0x10] sm:$0xff] (!%p5206_p8) }
 0x59f   : > { %v6070_v33 = vpop.trf.xlu1  ;;  %4287 = vmatmul.mubr.f32.gmra.mrb[68].mxu1 %v6069_v2  ;;  %v6575_v2 = vmov (!%p5206_p8), 0  }
 0x5a0   : > { %v6074_v40 = vunpack.i.h.bf16 %v6070_v33  ;;  %v6071_v36 = vunpack.i.l.bf16 %v6070_v33  ;;  %5866 = vmatpush3.bf16.msra.mxu1 %v5865_v44  ;;  %6509 = vset.pattern.permute.xlu0 (!%p5206_p8), %v6575_v2  ;;  %v4720_v44 = vld [vmem:[%s6720_s27 + $0x8] sm:$0xff] (!%p5206_p8) }
 0x5a1   : > { %5961 = vmatprep.subr.bf16.mxu1 (!%p5206_p8), %v6572_v46  ;;  %6510 = vset.pattern.permute.xlu1 (!%p5206_p8), %v6575_v2 }
 0x5a2   : > { %4291 = vmatprep.mubr.f32.mxu1 %v6071_v36  ;;  %4724 = vperm.xlu0 (!%p5206_p8), %6509, %v4719_v18  }
 0x5a3   : > { %4292 = vmatmul.mubr.f32.gmra.mrb[70].mxu1 %v6074_v40  ;;  %4734 = vperm.xlu1 (!%p5206_p8), %6510, %v4721_v57  }
 0x5a4   : > { %5741 = vmatprep.mubr.msk.f32.mxu1 %vm6571_vm0, %v8649_v10 }
 0x5a6   : > { %4729 = vperm.xlu0 (!%p5206_p8), %6509, %v4720_v44  }
 0x5a7   : > { %5742 = vmatmul.mubr.msk.f32.vlgmr.msra.gmra.mrb[72].mxu1 %vm2733_vm3, %v4192_v14 }
 0x5a8   : > { %5744 = vmatprep.mubr.msk.f32.mxu1 %vm6571_vm0, %v8649_v10  ;;  %5963 = vmatpush3.bf16.msra.mxu1 (!%p5206_p8), %v5868_v5 }
 0x5a9   : > { %5962 = vmatprep.subr.bf16.mxu1 (!%p5206_p8), %v6572_v46 }
 0x5ab   : > { %5745 = vmatmul.mubr.msk.f32.gmra.mrb[74].mxu1 %vm2733_vm3, %v4193_v45 }
 0x5ac   : > { %5747 = vmatprep.mubr.msk.f32.mxu1 %vm6571_vm0, %v8649_v10  ;;  %5964 = vmatpush3.bf16.msra.mxu1 (!%p5206_p8), %v5871_v62 }
 0x5ad   : > { %5873 = vmatprep.subr.bf16.mxu1 (!%p5206_p8), %v6572_v46 }
 0x5af   : > { %5748 = vmatmul.mubr.msk.f32.gmra.mrb[76].mxu1 %vm2733_vm3, %v4194_v0 }
 0x5b0   : > { %5764 = vmatprep.mubr.msk.f32.mxu1 (!%p5206_p8), %vm6573_vm4, %v6574_v42 }
 0x621   : > { %v4725_v5 = vpop.permute.xlu0 (!%p5206_p8), %4724 }
 0x66e   : > { %v5424_v16 = vpop.f32.mrb[66].mxu1 }
 0x66f   : > { %v5425_v8 = vpop.f32.mrb[67].mxu1 }
 0x670   : > { %v5426_v6 = vadd.f32 %v5425_v8, %v5424_v16  ;;  %v5213_v16 = vld [vmem:[%s8653_s19] ss:$0 sm:$0xff] (!%p5206_p8) }
 0x672   : > { %v5427_v59 = vpop.f32.mrb[68].mxu1 }
 0x673   : > { %v5428_v50 = vpop.f32.mrb[69].mxu1 }
 0x674   : > { %v5429_v38 = vadd.f32 %v5428_v50, %v5427_v59 }
 0x676   : > { %v5430_v12 = vpop.f32.mrb[70].mxu1 }
 0x677   : > { %v5431_v21 = vpop.f32.mrb[71].mxu1 }
 0x678   : > { %v5432_v23 = vadd.f32 %v5431_v21, %v5430_v12 }
 0x67a   : > { %v4363_v41 = vpop.f32.mrb[72].mxu1 }
 0x67b   : > { %v4364_v54 = vadd.f32 %v5426_v6, %v4363_v41  ;;  %v5743_v3 = vpop.f32.mrb[73].mxu1 }
 0x67d   : > { %v4377_v22 = vadd.f32 %v4364_v54, %v4109_v27 }
 0x67e   : > { %v4368_v9 = vpop.f32.mrb[74].mxu1 }
 0x67f   : > { %4380 = vst.msk [vmem:[#allocation4] sm:$0xff] %vm2733_vm3, %v4377_v22  ;;  %v4369_v17 = vadd.f32 %v5429_v38, %v4368_v9  ;;  %v5746_v29 = vpop.f32.mrb[75].mxu1 }
 0x681   : > { %v4378_v19 = vadd.f32 %v4369_v17, %v4110_v24  ;;  %4386 = sbr.rel (%p5206_p8) target bundleno = 2160 (0x870), region = 96 }
 0x682   : > { %v4373_v39 = vpop.f32.mrb[76].mxu1 }
 0x683   : > { %4381 = vst.msk [vmem:[#allocation4 + $0x8] sm:$0xff] %vm2733_vm3, %v4378_v19  ;;  %v4374_v30 = vadd.f32 %v5432_v23, %v4373_v39  ;;  %v5749_v4 = vpop.f32.mrb[77].mxu1 }
 0x685   : > { %v4379_v56 = vadd.f32 %v4374_v30, %v4111_v58 }
 0x686   : > { %v4387_v26 = vld [vmem:[#allocation4] sm:$0xff] (!%p5206_p8) }
 0x687   : > { %4382 = vst.msk [vmem:[#allocation4 + $0x10] sm:$0xff] %vm2733_vm3, %v4379_v56  ;;  %v4390_v51 = vmul.f32 (!%p5206_p8), 0.01, %v4387_v26 }
 0x689   : > { %5759 = vmatmul.mubr.msk.f32.vlgmr.msra.gmra.mrb[0].mxu0 %vm2733_vm3, %v4390_v51  ;;  %v4730_v51 = vpop.permute.xlu0 %4729 }
 0x68a   : > { %v4388_v52 = vld [vmem:[#allocation4 + $0x8] sm:$0xff]  ;;  %5761 = vmatprep.mubr.msk.f32.mxu0 %vm6573_vm4, %v6574_v42  ;;  %5881 = vmatpush3.bf16.msra.mxu0 %v5880_v1 }
 0x68b   : > { %v4391_v13 = vmul.f32 0.01, %v4388_v52  ;;  %5882 = vmatprep.subr.bf16.mxu0 %v6572_v46 }
 0x68d   : > { %5762 = vmatmul.mubr.msk.f32.gmra.mrb[2].mxu0 %vm2733_vm3, %v4391_v13 }
 0x68e   : > { %v4389_v48 = vld [vmem:[#allocation4 + $0x10] sm:$0xff]  ;;  %5792 = vmatprep.mubr.msk.f32.mxu0 %vm6573_vm4, %v6574_v42  ;;  %5884 = vmatpush3.bf16.msra.mxu0 %v5883_v20 }
 0x68f   : > { %v4392_v25 = vmul.f32 0.01, %v4389_v48 }
 0x691   : > { %5765 = vmatmul.mubr.msk.f32.vlgmr.msra.gmra.mrb[0].mxu1 %vm2733_vm3, %v4392_v25 }
 0x692   : > { %5875 = vmatpush3.bf16.msra.mxu1 %v5874_v60  ;;  %5775 = vmatprep.mubr.msk.f32.mxu1 %vm6573_vm4, %v6574_v42 }
 0x693   : > { %5876 = vmatprep.subr.bf16.mxu1 %v6572_v46 }
 0x696   : > { %5878 = vmatpush3.bf16.msra.mxu1 %v5877_v31  ;;  %v4735_v31 = vpop.permute.xlu1 %4734 }
 0x699   : > { %5776 = vmatmul.mubr.msk.f32.vlgmr.msra.gmra.mrb[2].mxu1 %vm2733_vm3, %v8340_v53 }
 0x69a   : > { %5778 = vmatprep.mubr.msk.f32.mxu1 %vm6573_vm4, %v6574_v42 }
 0x69d   : > { %5779 = vmatmul.mubr.msk.f32.gmra.mrb[4].mxu1 %vm2733_vm3, %v8349_v61 }
 0x69e   : > { %5781 = vmatprep.mubr.msk.f32.mxu1 %vm6573_vm4, %v6574_v42 }
 0x6a1   : > { %5782 = vmatmul.mubr.msk.f32.gmra.mrb[6].mxu1 %vm2733_vm3, %v8356_v32 }
 0x75c   : > { %v4479_v40 = vpop.f32.mrb[0].mxu0 }
 0x75d   : > { %v5760_v14 = vpop.f32.mrb[1].mxu0 }
 0x760   : > { %v4484_v10 = vpop.f32.mrb[2].mxu0 }
 0x761   : > { %v5763_v45 = vpop.f32.mrb[3].mxu0 }
 0x764   : > { %v4489_v33 = vpop.f32.mrb[0].mxu1 }
 0x765   : > { %v5766_v36 = vpop.f32.mrb[1].mxu1 }
 0x76c   : > { %v4568_v0 = vpop.f32.mrb[2].mxu1 }
 0x76d   : > { %v4569_v8 = vadd.f32 %v4568_v0, %v4479_v40  ;;  %v5777_v6 = vpop.f32.mrb[3].mxu1 }
 0x76f   : > { %v4589_v59 = vadd.f32 %v5213_v16, %v4569_v8 }
 0x770   : > { %v4573_v50 = vpop.f32.mrb[4].mxu1 }
 0x771   : > { %v5214_v38 = vmul.f32 -1.442695, %v4589_v59  ;;  %v4574_v12 = vadd.f32 %v4573_v50, %v4484_v10  ;;  %v5780_v21 = vpop.f32.mrb[5].mxu1 }
 0x773   : > { %6511 = vpow2.f32 %v5214_v38  ;;  %v4590_v23 = vadd.f32 %v5213_v16, %v4574_v12 }
 0x774   : > { %v4578_v27 = vpop.f32.mrb[6].mxu1 }
 0x775   : > { %v5215_v41 = vmul.f32 -1.442695, %v4590_v23  ;;  %v4579_v54 = vadd.f32 %v4578_v27, %v4489_v33  ;;  %v5783_v3 = vpop.f32.mrb[7].mxu1 }
 0x777   : > { %6513 = vpow2.f32 %v5215_v41  ;;  %v4591_v22 = vadd.f32 %v5213_v16, %v4579_v54 }
 0x779   : > { %v5216_v24 = vmul.f32 -1.442695, %v4591_v22 }
 0x77b   : > { %6515 = vpow2.f32 %v5216_v24 }
 0x77d   : > { %v6512_v9 = vpop.eup %6511 }
 0x77e   : > { %v4601_v17 = vadd.f32 1.0, %v6512_v9 }
 0x780   : > { %6517 = vrcp.f32 %v4601_v17 }
 0x781   : > { %v6514_v29 = vpop.eup %6513 }
 0x782   : > { %v4602_v19 = vadd.f32 1.0, %v6514_v29 }
 0x784   : > { %6519 = vrcp.f32 %v4602_v19 }
 0x785   : > { %v6516_v58 = vpop.eup %6515 }
 0x786   : > { %v4603_v39 = vadd.f32 1.0, %v6516_v58 }
 0x788   : > { %6521 = vrcp.f32 %v4603_v39 }
 0x78a   : > { %v6518_v30 = vpop.eup %6517 }
 0x78b   : > { %v4610_v4 = vmul.f32 %v6518_v30, %v4589_v59 }
 0x78d   : > { %5793 = vmatmul.mubr.msk.f32.vlgmr.msra.gmra.mrb[4].mxu0 %vm2733_vm3, %v4610_v4 }
 0x78e   : > { %v6520_v56 = vpop.eup %6519  ;;  %5795 = vmatprep.mubr.msk.f32.mxu0 %vm6573_vm4, %v6574_v42 }
 0x78f   : > { %v4611_v63 = vmul.f32 %v6520_v56, %v4590_v23 }
 0x791   : > { %5796 = vmatmul.mubr.msk.f32.gmra.mrb[6].mxu0 %vm2733_vm3, %v4611_v63 }
 0x792   : > { %v6522_v43 = vpop.eup %6521  ;;  %5798 = vmatprep.mubr.msk.f32.mxu0 %vm6573_vm4, %v6574_v42 }
 0x793   : > { %v4612_v34 = vmul.f32 %v6522_v43, %v4591_v22 }
 0x795   : > { %5799 = vmatmul.mubr.msk.f32.gmra.mrb[8].mxu0 %vm2733_vm3, %v4612_v34 }
 0x860   : > { %v4692_v46 = vpop.f32.mrb[4].mxu0 }
 0x861   : > { %v4706_v62 = vadd.f32 %v4692_v46, %v8340_v53  ;;  %v5794_v48 = vpop.f32.mrb[5].mxu0 }
 0x863   : > { %v4716_v26 = vadd.f32 %v5220_v15, %v4706_v62 }
 0x864   : > { %v4697_v49 = vpop.f32.mrb[6].mxu0 }
 0x865   : > { %v4737_v28 = vmul.f32 %v4725_v5, %v4716_v26  ;;  %v4707_v25 = vadd.f32 %v4697_v49, %v8349_v61  ;;  %v5797_v42 = vpop.f32.mrb[7].mxu0 }
 0x867   : > { %4740 = vst.msk [vmem:[%s6725_s20] sm:$0xff] %vm2733_vm3, %v4737_v28  ;;  %v4717_v60 = vadd.f32 %v5220_v15, %v4707_v25 }
 0x868   : > { %v4702_v52 = vpop.f32.mrb[8].mxu0 }
 0x869   : > { %v4738_v35 = vmul.f32 %v4730_v51, %v4717_v60  ;;  %v4708_v11 = vadd.f32 %v4702_v52, %v8356_v32  ;;  %v5800_v13 = vpop.f32.mrb[9].mxu0 }
 0x86b   : > { %4741 = vst.msk [vmem:[%s6725_s20 + $0x8] sm:$0xff] %vm2733_vm3, %v4738_v35  ;;  %v4718_v53 = vadd.f32 %v5220_v15, %v4708_v11 }
 0x86d   : > { %v4739_v47 = vmul.f32 %v4735_v31, %v4718_v53 }
 0x86f   : > { %4742 = vst.msk [vmem:[%s6725_s20 + $0x10] sm:$0xff] %vm2733_vm3, %v4739_v47 }
 0x870 PF: > { %s8655_s28 = sld [smem:[#allocation8_spill]]  ;;  %s8656_s26 = sld [smem:[#allocation6_spill]] }
 0x871   : > { %s8657_s27 = sld [smem:[#allocation7_spill]]  ;;  %s8659_s29 = sld [smem:[#allocation10_spill]] }
 0x876   : > { %s29_s0 = sadd.s32 1, %s8655_s28   ;;  %s8658_s28 = sld [smem:[#allocation9_spill]] }
 0x877   : > { %p26_p9 = scmp.ge.s32.totalorder %s29_s0, 6  }
 0x879   :  { %28 = sbr.rel (!%p26_p9) target bundleno = 7 (0x7), region = 135 }

</bundles_post_ra>
